<compile_context>
chip_gen: v6e
topology: v6e:2x2x1
jax: 0.10.0
libtpu: 0.0.40
codegen_flags: <defaults>
</compile_context>

<pallas_src>
import functools

import jax
import jax.numpy as jnp
import numpy as np
from jax.experimental import pallas as pl
from jax.experimental.pallas import tpu as pltpu

LANE = 128


# --------------------------------------------- constant spatial operators ----

def _nearest_up_op(hs, ws, hd, wd):
    """(hs*ws, hd*wd) 0/1 matrix: (C, M_src) @ U == per-image nearest resize.

    Matches F.interpolate(mode='nearest') floor semantics: src = floor(dst*in/out).
    """
    ih = (np.arange(hd) * hs) // hd
    iw = (np.arange(wd) * ws) // wd
    src = (ih[:, None] * ws + iw[None, :]).reshape(-1)
    u = np.zeros((hs * ws, hd * wd), np.float32)
    u[src, np.arange(hd * wd)] = 1.0
    return u


def _conv3x3_s2_op(h, w):
    """(h*w, 9*ho*wo) 0/1 matrix gathering all 9 taps of a k=3/s=2/p=1 conv at once.

    Column block k = kh*3+kw of (C, M_in) @ S picks x[:, 2*oh-1+kh, 2*ow-1+kw]
    (zero where padded).
    """
    ho = (h - 1) // 2 + 1
    wo = (w - 1) // 2 + 1
    s = np.zeros((h * w, 9 * ho * wo), np.float32)
    oh, ow = np.arange(ho), np.arange(wo)
    dst_hw = oh[:, None] * wo + ow[None, :]
    for kh in range(3):
        ih = 2 * oh - 1 + kh
        vh = (ih >= 0) & (ih < h)
        for kw in range(3):
            iw = 2 * ow - 1 + kw
            vw = (iw >= 0) & (iw < w)
            valid = vh[:, None] & vw[None, :]
            src = (ih[:, None] * w + iw[None, :])[valid]
            dst = (kh * 3 + kw) * (ho * wo) + dst_hw[valid]
            s[src, dst] = 1.0
    return s


# ------------------------------------------------------------- fused kernel --

def _pafpn_kernel(offs, ms,
                  # per-image channel-major inputs (Cin_l, H_l*W_l)
                  c2_ref, c3_ref, c4_ref, c5_ref,
                  # lateral 1x1 conv weights (Cout, Cin) and biases (Cout, 1)
                  w2_ref, b2_ref, w3_ref, b3_ref, w4_ref, b4_ref, w5_ref, b5_ref,
                  # nearest-upsample operators (M_coarse, M_fine), bf16
                  u5_ref, u4_ref, u3_ref,
                  # bottom-up 3x3/s2 convs: im2col weights (Cout, 9*Cout),
                  # biases (Cout, 1), fused 9-tap gather operators (M_in, 9*M_out)
                  wn2_ref, bn2_ref, s2_ref,
                  wn3_ref, bn3_ref, s3_ref,
                  wn4_ref, bn4_ref, s4_ref,
                  # packed lane-dense output slab (Cout, M_slab)
                  out_ref):
    f32 = jnp.float32
    hp = jax.lax.Precision.HIGHEST
    dot = lambda a, b: jnp.dot(a, b, preferred_element_type=f32, precision=hp)
    gather = lambda x, op_ref: dot(x, op_ref[...].astype(f32))   # 0/1 op, exact

    # ---- top-down: lateral 1x1 convs with the nearest-upsample add fused in ----
    p5 = dot(w5_ref[...], c5_ref[...]) + b5_ref[...]
    p4 = dot(w4_ref[...], c4_ref[...]) + b4_ref[...] + gather(p5, u5_ref)
    p3 = dot(w3_ref[...], c3_ref[...]) + b3_ref[...] + gather(p4, u4_ref)
    p2 = dot(w2_ref[...], c2_ref[...]) + b2_ref[...] + gather(p3, u3_ref)

    # ---- bottom-up: one fused 9-tap gather matmul + one K=9*C im2col matmul ----
    def conv3x3_s2(x, s_ref, w_ref, b_ref, res):
        m_out = s_ref.shape[1] // 9
        g = gather(x, s_ref)                                  # (C, 9*m_out)
        patch = jnp.concatenate(                              # (9*C, m_out) im2col
            [g[:, k * m_out:(k + 1) * m_out] for k in range(9)], axis=0)
        return dot(w_ref[...], patch) + b_ref[...] + res

    n3 = conv3x3_s2(p2, s2_ref, wn2_ref, bn2_ref, p3)
    n4 = conv3x3_s2(n3, s3_ref, wn3_ref, bn3_ref, p4)
    n5 = conv3x3_s2(n4, s4_ref, wn4_ref, bn4_ref, p5)

    # ---- pack all 7 levels into one lane-dense slab (single dense output DMA) ----
    out_ref[...] = jnp.zeros(out_ref.shape, out_ref.dtype)
    for piece, off, m in zip((p2, p3, p4, p5, n3, n4, n5), offs, ms):
        out_ref[:, off:off + m] = piece                       # 128-aligned offsets


# -------------------------------------------------------------------- wrapper

def _flat(x):
    n, c, h, w = x.shape
    return x.reshape(n, c, h * w)      # NCHW -> (N, C, H*W): pure metadata reshape


@jax.jit
def pafpn_forward(params, c2, c3, c4, c5):
    """PAFPN(CARF=False, bottom_up=True, s=32).forward; NCHW in, NCHW out."""
    f32 = jnp.float32
    bf16 = jnp.bfloat16
    n = c2.shape[0]
    h2, w2 = c2.shape[2:]
    h3, w3 = c3.shape[2:]
    h4, w4 = c4.shape[2:]
    h5, w5 = c5.shape[2:]
    cout = params["lat2_w"].shape[0]
    m2, m3, m4, m5 = h2 * w2, h3 * w3, h4 * w4, h5 * w5

    # Per-image (NOT batch-block-diagonal) 0/1 spatial operators, stored bf16
    # (lossless) to halve their DMA/VMEM footprint; widened to f32 in-kernel.
    u5 = jnp.asarray(_nearest_up_op(h5, w5, h4, w4), bf16)
    u4 = jnp.asarray(_nearest_up_op(h4, w4, h3, w3), bf16)
    u3 = jnp.asarray(_nearest_up_op(h3, w3, h2, w2), bf16)
    s2 = jnp.asarray(_conv3x3_s2_op(h2, w2), bf16)
    s3 = jnp.asarray(_conv3x3_s2_op(h3, w3), bf16)
    s4 = jnp.asarray(_conv3x3_s2_op(h4, w4), bf16)

    lat = lambda k: params[k].astype(f32)[:, :, 0, 0]                 # (Cout, Cin)
    bias = lambda k: params[k].astype(f32).reshape(cout, 1)           # (Cout, 1)

    def tapw(k):  # (Cout, Cin, 3, 3) -> (Cout, 9*Cin), row-block order (kh, kw, c)
        w = params[k].astype(f32)
        return jnp.transpose(w, (0, 2, 3, 1)).reshape(cout, 9 * w.shape[1])

    # Lane-dense packed output slab: every level starts at a 128-aligned lane offset.
    ms = (m2, m3, m4, m5, m3, m4, m5)
    offs, off = [], 0
    for m in ms:
        offs.append(off)
        off += ((m + LANE - 1) // LANE) * LANE
    offs, m_slab = tuple(offs), off

    operands = (
        _flat(c2).astype(f32), _flat(c3).astype(f32),
        _flat(c4).astype(f32), _flat(c5).astype(f32),
        lat("lat2_w"), bias("lat2_b"), lat("lat3_w"), bias("lat3_b"),
        lat("lat4_w"), bias("lat4_b"), lat("lat5_w"), bias("lat5_b"),
        u5, u4, u3,
        tapw("n2_w"), bias("n2_b"), s2,
        tapw("n3_w"), bias("n3_b"), s3,
        tapw("n4_w"), bias("n4_b"), s4,
    )

    def batched(arr):   # one image per grid step (batch dim squeezed away)
        return pl.BlockSpec((None,) + arr.shape[1:], lambda b: (b, 0, 0))

    def resident(arr):  # whole array, same block every step -> DMA'd once, stays resident
        return pl.BlockSpec(arr.shape, lambda b: (0,) * arr.ndim)

    in_specs = [batched(a) for a in operands[:4]] + [resident(a) for a in operands[4:]]

    out = pl.pallas_call(
        functools.partial(_pafpn_kernel, offs, ms),
        grid=(n,),
        out_shape=jax.ShapeDtypeStruct((n, cout, m_slab), f32),
        in_specs=in_specs,
        out_specs=pl.BlockSpec((None, cout, m_slab), lambda b: (b, 0, 0)),
        compiler_params=pltpu.CompilerParams(dimension_semantics=("parallel",)),
    )(*operands)

    def unpack(i, h, w):
        return out[:, :, offs[i]:offs[i] + ms[i]].reshape(n, cout, h, w)

    return (unpack(0, h2, w2), unpack(1, h3, w3), unpack(2, h4, w4),
            unpack(3, h5, w5), unpack(4, h3, w3), unpack(5, h4, w4),
            unpack(6, h5, w5))


# --------------------------------------------------------------------- params

def init_pafpn_params(key, in_channels_list, out_channels):
    ks = jax.random.split(key, 14)
    scale = 0.1

    def conv_w(k, co, ci, ksz):
        return scale * jax.random.normal(k, (co, ci, ksz, ksz), jnp.float32)

    def conv_b(k, co):
        return scale * jax.random.normal(k, (co,), jnp.float32)

    return {
        "lat2_w": conv_w(ks[0], out_channels, in_channels_list[0], 1),
        "lat2_b": conv_b(ks[1], out_channels),
        "lat3_w": conv_w(ks[2], out_channels, in_channels_list[1], 1),
        "lat3_b": conv_b(ks[3], out_channels),
        "lat4_w": conv_w(ks[4], out_channels, in_channels_list[2], 1),
        "lat4_b": conv_b(ks[5], out_channels),
        "lat5_w": conv_w(ks[6], out_channels, in_channels_list[3], 1),
        "lat5_b": conv_b(ks[7], out_channels),
        "n2_w": conv_w(ks[8], out_channels, out_channels, 3),
        "n2_b": conv_b(ks[9], out_channels),
        "n3_w": conv_w(ks[10], out_channels, out_channels, 3),
        "n3_b": conv_b(ks[11], out_channels),
        "n4_w": conv_w(ks[12], out_channels, out_channels, 3),
        "n4_b": conv_b(ks[13], out_channels),
    }


# ----------------------------------------------------- pure-JAX/XLA reference

@jax.jit
def _ref_forward(params, c2, c3, c4, c5):
    dn = ("NCHW", "OIHW", "NCHW")
    hp = jax.lax.Precision.HIGHEST

    def conv(x, w, b, stride, pad):
        y = jax.lax.conv_general_dilated(x, w, (stride, stride), pad,
                                         dimension_numbers=dn, precision=hp)
        return y + b[None, :, None, None]

    def up(x, size):
        h, w = x.shape[2:]
        ih = (jnp.arange(size[0]) * h) // size[0]
        iw = (jnp.arange(size[1]) * w) // size[1]
        return x[:, :, ih][:, :, :, iw]

    pad1 = ((1, 1), (1, 1))
    p5 = conv(c5, params["lat5_w"], params["lat5_b"], 1, "VALID")
    p4 = conv(c4, params["lat4_w"], params["lat4_b"], 1, "VALID") + up(p5, c4.shape[2:])
    p3 = conv(c3, params["lat3_w"], params["lat3_b"], 1, "VALID") + up(p4, c3.shape[2:])
    p2 = conv(c2, params["lat2_w"], params["lat2_b"], 1, "VALID") + up(p3, c2.shape[2:])
    n3 = conv(p2, params["n2_w"], params["n2_b"], 2, pad1) + p3
    n4 = conv(n3, params["n3_w"], params["n3_b"], 2, pad1) + p4
    n5 = conv(n4, params["n4_w"], params["n4_b"], 2, pad1) + p5
    return (p2, p3, p4, p5, n3, n4, n5)


# ------------------------------------------------------------------------ main

if __name__ == "__main__":
    key = jax.random.PRNGKey(0)
    k_in, k_par = jax.random.split(key)
    k2, k3, k4, k5 = jax.random.split(k_in, 4)

    in_channels_list = [4, 8, 16, 32]
    out_channels = 8
    N = 2

    # NCHW inputs, pyramid spatial sizes 16 / 8 / 4 / 2.
    c2 = jax.random.normal(k2, (N, in_channels_list[0], 16, 16), jnp.float32)
    c3 = jax.random.normal(k3, (N, in_channels_list[1], 8, 8), jnp.float32)
    c4 = jax.random.normal(k4, (N, in_channels_list[2], 4, 4), jnp.float32)
    c5 = jax.random.normal(k5, (N, in_channels_list[3], 2, 2), jnp.float32)

    params = init_pafpn_params(k_par, in_channels_list, out_channels)

    outs = jax.block_until_ready(pafpn_forward(params, c2, c3, c4, c5))

    expected_shapes = [
        (N, out_channels, 16, 16),  # p2
        (N, out_channels, 8, 8),    # p3
        (N, out_channels, 4, 4),    # p4
        (N, out_channels, 2, 2),    # p5
        (N, out_channels, 8, 8),    # n3
        (N, out_channels, 4, 4),    # n4
        (N, out_channels, 2, 2),    # n5
    ]
    assert len(outs) == 7
    for o, s in zip(outs, expected_shapes):
        assert o.shape == s, (o.shape, s)
        assert bool(jnp.all(jnp.isfinite(o)))

    # Numerical check against a pure-JAX/XLA reference of the same module.
    refs = jax.block_until_ready(_ref_forward(params, c2, c3, c4, c5))
    for name, o, r in zip(("p2", "p3", "p4", "p5", "n3", "n4", "n5"), outs, refs):
        err = float(jnp.max(jnp.abs(o - r)))
        assert err < 5e-2, (name, err)

    print("KERNEL_OK")
</pallas_src>

<mosaic_0001>
module attributes {stable_mosaic.version = 11 : i64} {
  func.func @_pafpn_kernel(%arg0: i32, %arg1: memref<1x4x256xf32, #tpu.memory_space<vmem>>, %arg2: memref<1x8x64xf32, #tpu.memory_space<vmem>>, %arg3: memref<1x16x16xf32, #tpu.memory_space<vmem>>, %arg4: memref<1x32x4xf32, #tpu.memory_space<vmem>>, %arg5: memref<8x4xf32, #tpu.memory_space<vmem>>, %arg6: memref<8x1xf32, #tpu.memory_space<vmem>>, %arg7: memref<8x8xf32, #tpu.memory_space<vmem>>, %arg8: memref<8x1xf32, #tpu.memory_space<vmem>>, %arg9: memref<8x16xf32, #tpu.memory_space<vmem>>, %arg10: memref<8x1xf32, #tpu.memory_space<vmem>>, %arg11: memref<8x32xf32, #tpu.memory_space<vmem>>, %arg12: memref<8x1xf32, #tpu.memory_space<vmem>>, %arg13: memref<4x16xbf16, #tpu.memory_space<vmem>>, %arg14: memref<16x64xbf16, #tpu.memory_space<vmem>>, %arg15: memref<64x256xbf16, #tpu.memory_space<vmem>>, %arg16: memref<8x72xf32, #tpu.memory_space<vmem>>, %arg17: memref<8x1xf32, #tpu.memory_space<vmem>>, %arg18: memref<256x576xbf16, #tpu.memory_space<vmem>>, %arg19: memref<8x72xf32, #tpu.memory_space<vmem>>, %arg20: memref<8x1xf32, #tpu.memory_space<vmem>>, %arg21: memref<64x144xbf16, #tpu.memory_space<vmem>>, %arg22: memref<8x72xf32, #tpu.memory_space<vmem>>, %arg23: memref<8x1xf32, #tpu.memory_space<vmem>>, %arg24: memref<16x36xbf16, #tpu.memory_space<vmem>>, %arg25: memref<1x8x1024xf32, #tpu.memory_space<vmem>>) attributes {dimension_semantics = [#tpu.dimension_semantics<parallel>], iteration_bounds = array<i64: 2>, scalar_prefetch = 0 : i64, scratch_operands = 0 : i64, tpu.core_type = #tpu.core_type<tc>, window_params = [{transform_indices = @transform_0, window_bounds = array<i64: 1, 4, 256>}, {transform_indices = @transform_1, window_bounds = array<i64: 1, 8, 64>}, {transform_indices = @transform_2, window_bounds = array<i64: 1, 16, 16>}, {transform_indices = @transform_3, window_bounds = array<i64: 1, 32, 4>}, {pipeline_mode = #tpu.pipeline_mode<synchronous>, transform_indices = @transform_4, window_bounds = array<i64: 8, 4>}, {pipeline_mode = #tpu.pipeline_mode<synchronous>, transform_indices = @transform_5, window_bounds = array<i64: 8, 1>}, {pipeline_mode = #tpu.pipeline_mode<synchronous>, transform_indices = @transform_6, window_bounds = array<i64: 8, 8>}, {pipeline_mode = #tpu.pipeline_mode<synchronous>, transform_indices = @transform_7, window_bounds = array<i64: 8, 1>}, {pipeline_mode = #tpu.pipeline_mode<synchronous>, transform_indices = @transform_8, window_bounds = array<i64: 8, 16>}, {pipeline_mode = #tpu.pipeline_mode<synchronous>, transform_indices = @transform_9, window_bounds = array<i64: 8, 1>}, {pipeline_mode = #tpu.pipeline_mode<synchronous>, transform_indices = @transform_10, window_bounds = array<i64: 8, 32>}, {pipeline_mode = #tpu.pipeline_mode<synchronous>, transform_indices = @transform_11, window_bounds = array<i64: 8, 1>}, {pipeline_mode = #tpu.pipeline_mode<synchronous>, transform_indices = @transform_12, window_bounds = array<i64: 4, 16>}, {pipeline_mode = #tpu.pipeline_mode<synchronous>, transform_indices = @transform_13, window_bounds = array<i64: 16, 64>}, {pipeline_mode = #tpu.pipeline_mode<synchronous>, transform_indices = @transform_14, window_bounds = array<i64: 64, 256>}, {pipeline_mode = #tpu.pipeline_mode<synchronous>, transform_indices = @transform_15, window_bounds = array<i64: 8, 72>}, {pipeline_mode = #tpu.pipeline_mode<synchronous>, transform_indices = @transform_16, window_bounds = array<i64: 8, 1>}, {pipeline_mode = #tpu.pipeline_mode<synchronous>, transform_indices = @transform_17, window_bounds = array<i64: 256, 576>}, {pipeline_mode = #tpu.pipeline_mode<synchronous>, transform_indices = @transform_18, window_bounds = array<i64: 8, 72>}, {pipeline_mode = #tpu.pipeline_mode<synchronous>, transform_indices = @transform_19, window_bounds = array<i64: 8, 1>}, {pipeline_mode = #tpu.pipeline_mode<synchronous>, transform_indices = @transform_20, window_bounds = array<i64: 64, 144>}, {pipeline_mode = #tpu.pipeline_mode<synchronous>, transform_indices = @transform_21, window_bounds = array<i64: 8, 72>}, {pipeline_mode = #tpu.pipeline_mode<synchronous>, transform_indices = @transform_22, window_bounds = array<i64: 8, 1>}, {pipeline_mode = #tpu.pipeline_mode<synchronous>, transform_indices = @transform_23, window_bounds = array<i64: 16, 36>}, {transform_indices = @transform_24, window_bounds = array<i64: 1, 8, 1024>}]} {
    %c0 = arith.constant 0 : index
    %c0_0 = arith.constant 0 : index
    %0 = vector.load %arg11[%c0, %c0_0] : memref<8x32xf32, #tpu.memory_space<vmem>>, vector<8x32xf32>
    %c0_1 = arith.constant 0 : index
    %c0_2 = arith.constant 0 : index
    %c0_3 = arith.constant 0 : index
    %1 = vector.load %arg4[%c0_1, %c0_2, %c0_3] : memref<1x32x4xf32, #tpu.memory_space<vmem>>, vector<1x32x4xf32>
    %2 = vector.shape_cast %1 : vector<1x32x4xf32> to vector<32x4xf32>
    %cst = arith.constant dense<0.000000e+00> : vector<8x4xf32>
    %3 = tpu.matmul %0, %2, %cst {dimension_numbers = #tpu.dot_dimension_numbers<[1], [0], [0], [1], [0, 0, 1, 1], [], []>, precision = #tpu.contract_precision<fp32>} : vector<8x32xf32>, vector<32x4xf32>, vector<8x4xf32> -> vector<8x4xf32>
    %c0_4 = arith.constant 0 : index
    %c0_5 = arith.constant 0 : index
    %4 = vector.load %arg12[%c0_4, %c0_5] : memref<8x1xf32, #tpu.memory_space<vmem>>, vector<8x1xf32>
    %5 = vector.broadcast %4 : vector<8x1xf32> to vector<8x4xf32>
    %6 = arith.addf %3, %5 : vector<8x4xf32>
    %c0_6 = arith.constant 0 : index
    %c0_7 = arith.constant 0 : index
    %7 = vector.load %arg9[%c0_6, %c0_7] : memref<8x16xf32, #tpu.memory_space<vmem>>, vector<8x16xf32>
    %c0_8 = arith.constant 0 : index
    %c0_9 = arith.constant 0 : index
    %c0_10 = arith.constant 0 : index
    %8 = vector.load %arg3[%c0_8, %c0_9, %c0_10] : memref<1x16x16xf32, #tpu.memory_space<vmem>>, vector<1x16x16xf32>
    %9 = vector.shape_cast %8 : vector<1x16x16xf32> to vector<16x16xf32>
    %cst_11 = arith.constant dense<0.000000e+00> : vector<8x16xf32>
    %10 = tpu.matmul %7, %9, %cst_11 {dimension_numbers = #tpu.dot_dimension_numbers<[1], [0], [0], [1], [0, 0, 1, 1], [], []>, precision = #tpu.contract_precision<fp32>} : vector<8x16xf32>, vector<16x16xf32>, vector<8x16xf32> -> vector<8x16xf32>
    %c0_12 = arith.constant 0 : index
    %c0_13 = arith.constant 0 : index
    %11 = vector.load %arg10[%c0_12, %c0_13] : memref<8x1xf32, #tpu.memory_space<vmem>>, vector<8x1xf32>
    %12 = vector.broadcast %11 : vector<8x1xf32> to vector<8x16xf32>
    %13 = arith.addf %10, %12 : vector<8x16xf32>
    %c0_14 = arith.constant 0 : index
    %c0_15 = arith.constant 0 : index
    %14 = vector.load %arg13[%c0_14, %c0_15] : memref<4x16xbf16, #tpu.memory_space<vmem>>, vector<4x16xbf16>
    %15 = arith.extf %14 : vector<4x16xbf16> to vector<4x16xf32>
    %cst_16 = arith.constant dense<0.000000e+00> : vector<8x16xf32>
    %16 = tpu.matmul %6, %15, %cst_16 {dimension_numbers = #tpu.dot_dimension_numbers<[1], [0], [0], [1], [0, 0, 1, 1], [], []>, precision = #tpu.contract_precision<fp32>} : vector<8x4xf32>, vector<4x16xf32>, vector<8x16xf32> -> vector<8x16xf32>
    %17 = arith.addf %13, %16 : vector<8x16xf32>
    %c0_17 = arith.constant 0 : index
    %c0_18 = arith.constant 0 : index
    %18 = vector.load %arg7[%c0_17, %c0_18] : memref<8x8xf32, #tpu.memory_space<vmem>>, vector<8x8xf32>
    %c0_19 = arith.constant 0 : index
    %c0_20 = arith.constant 0 : index
    %c0_21 = arith.constant 0 : index
    %19 = vector.load %arg2[%c0_19, %c0_20, %c0_21] : memref<1x8x64xf32, #tpu.memory_space<vmem>>, vector<1x8x64xf32>
    %20 = vector.shape_cast %19 : vector<1x8x64xf32> to vector<8x64xf32>
    %cst_22 = arith.constant dense<0.000000e+00> : vector<8x64xf32>
    %21 = tpu.matmul %18, %20, %cst_22 {dimension_numbers = #tpu.dot_dimension_numbers<[1], [0], [0], [1], [0, 0, 1, 1], [], []>, precision = #tpu.contract_precision<fp32>} : vector<8x8xf32>, vector<8x64xf32>, vector<8x64xf32> -> vector<8x64xf32>
    %c0_23 = arith.constant 0 : index
    %c0_24 = arith.constant 0 : index
    %22 = vector.load %arg8[%c0_23, %c0_24] : memref<8x1xf32, #tpu.memory_space<vmem>>, vector<8x1xf32>
    %23 = vector.broadcast %22 : vector<8x1xf32> to vector<8x64xf32>
    %24 = arith.addf %21, %23 : vector<8x64xf32>
    %c0_25 = arith.constant 0 : index
    %c0_26 = arith.constant 0 : index
    %25 = vector.load %arg14[%c0_25, %c0_26] : memref<16x64xbf16, #tpu.memory_space<vmem>>, vector<16x64xbf16>
    %26 = arith.extf %25 : vector<16x64xbf16> to vector<16x64xf32>
    %cst_27 = arith.constant dense<0.000000e+00> : vector<8x64xf32>
    %27 = tpu.matmul %17, %26, %cst_27 {dimension_numbers = #tpu.dot_dimension_numbers<[1], [0], [0], [1], [0, 0, 1, 1], [], []>, precision = #tpu.contract_precision<fp32>} : vector<8x16xf32>, vector<16x64xf32>, vector<8x64xf32> -> vector<8x64xf32>
    %28 = arith.addf %24, %27 : vector<8x64xf32>
    %c0_28 = arith.constant 0 : index
    %c0_29 = arith.constant 0 : index
    %29 = vector.load %arg5[%c0_28, %c0_29] : memref<8x4xf32, #tpu.memory_space<vmem>>, vector<8x4xf32>
    %c0_30 = arith.constant 0 : index
    %c0_31 = arith.constant 0 : index
    %c0_32 = arith.constant 0 : index
    %30 = vector.load %arg1[%c0_30, %c0_31, %c0_32] : memref<1x4x256xf32, #tpu.memory_space<vmem>>, vector<1x4x256xf32>
    %31 = vector.shape_cast %30 : vector<1x4x256xf32> to vector<4x256xf32>
    %cst_33 = arith.constant dense<0.000000e+00> : vector<8x256xf32>
    %32 = tpu.matmul %29, %31, %cst_33 {dimension_numbers = #tpu.dot_dimension_numbers<[1], [0], [0], [1], [0, 0, 1, 1], [], []>, precision = #tpu.contract_precision<fp32>} : vector<8x4xf32>, vector<4x256xf32>, vector<8x256xf32> -> vector<8x256xf32>
    %c0_34 = arith.constant 0 : index
    %c0_35 = arith.constant 0 : index
    %33 = vector.load %arg6[%c0_34, %c0_35] : memref<8x1xf32, #tpu.memory_space<vmem>>, vector<8x1xf32>
    %34 = vector.broadcast %33 : vector<8x1xf32> to vector<8x256xf32>
    %35 = arith.addf %32, %34 : vector<8x256xf32>
    %c0_36 = arith.constant 0 : index
    %c0_37 = arith.constant 0 : index
    %36 = vector.load %arg15[%c0_36, %c0_37] : memref<64x256xbf16, #tpu.memory_space<vmem>>, vector<64x256xbf16>
    %37 = arith.extf %36 : vector<64x256xbf16> to vector<64x256xf32>
    %cst_38 = arith.constant dense<0.000000e+00> : vector<8x256xf32>
    %38 = tpu.matmul %28, %37, %cst_38 {dimension_numbers = #tpu.dot_dimension_numbers<[1], [0], [0], [1], [0, 0, 1, 1], [], []>, precision = #tpu.contract_precision<fp32>} : vector<8x64xf32>, vector<64x256xf32>, vector<8x256xf32> -> vector<8x256xf32>
    %39 = arith.addf %35, %38 : vector<8x256xf32>
    %c0_39 = arith.constant 0 : index
    %c0_40 = arith.constant 0 : index
    %40 = vector.load %arg18[%c0_39, %c0_40] : memref<256x576xbf16, #tpu.memory_space<vmem>>, vector<256x576xbf16>
    %41 = arith.extf %40 : vector<256x576xbf16> to vector<256x576xf32>
    %cst_41 = arith.constant dense<0.000000e+00> : vector<8x576xf32>
    %42 = tpu.matmul %39, %41, %cst_41 {dimension_numbers = #tpu.dot_dimension_numbers<[1], [0], [0], [1], [0, 0, 1, 1], [], []>, precision = #tpu.contract_precision<fp32>} : vector<8x256xf32>, vector<256x576xf32>, vector<8x576xf32> -> vector<8x576xf32>
    %43 = vector.extract_strided_slice %42 {offsets = [0, 0], sizes = [8, 64], strides = [1, 1]} : vector<8x576xf32> to vector<8x64xf32>
    %44 = vector.extract_strided_slice %42 {offsets = [0, 64], sizes = [8, 64], strides = [1, 1]} : vector<8x576xf32> to vector<8x64xf32>
    %45 = vector.extract_strided_slice %42 {offsets = [0, 128], sizes = [8, 64], strides = [1, 1]} : vector<8x576xf32> to vector<8x64xf32>
    %46 = vector.extract_strided_slice %42 {offsets = [0, 192], sizes = [8, 64], strides = [1, 1]} : vector<8x576xf32> to vector<8x64xf32>
    %47 = vector.extract_strided_slice %42 {offsets = [0, 256], sizes = [8, 64], strides = [1, 1]} : vector<8x576xf32> to vector<8x64xf32>
    %48 = vector.extract_strided_slice %42 {offsets = [0, 320], sizes = [8, 64], strides = [1, 1]} : vector<8x576xf32> to vector<8x64xf32>
    %49 = vector.extract_strided_slice %42 {offsets = [0, 384], sizes = [8, 64], strides = [1, 1]} : vector<8x576xf32> to vector<8x64xf32>
    %50 = vector.extract_strided_slice %42 {offsets = [0, 448], sizes = [8, 64], strides = [1, 1]} : vector<8x576xf32> to vector<8x64xf32>
    %51 = vector.extract_strided_slice %42 {offsets = [0, 512], sizes = [8, 64], strides = [1, 1]} : vector<8x576xf32> to vector<8x64xf32>
    %52 = tpu.concatenate %43, %44, %45, %46, %47, %48, %49, %50, %51 in 0 : vector<8x64xf32>, vector<8x64xf32>, vector<8x64xf32>, vector<8x64xf32>, vector<8x64xf32>, vector<8x64xf32>, vector<8x64xf32>, vector<8x64xf32>, vector<8x64xf32> -> vector<72x64xf32>
    %c0_42 = arith.constant 0 : index
    %c0_43 = arith.constant 0 : index
    %53 = vector.load %arg16[%c0_42, %c0_43] : memref<8x72xf32, #tpu.memory_space<vmem>>, vector<8x72xf32>
    %cst_44 = arith.constant dense<0.000000e+00> : vector<8x64xf32>
    %54 = tpu.matmul %53, %52, %cst_44 {dimension_numbers = #tpu.dot_dimension_numbers<[1], [0], [0], [1], [0, 0, 1, 1], [], []>, precision = #tpu.contract_precision<fp32>} : vector<8x72xf32>, vector<72x64xf32>, vector<8x64xf32> -> vector<8x64xf32>
    %c0_45 = arith.constant 0 : index
    %c0_46 = arith.constant 0 : index
    %55 = vector.load %arg17[%c0_45, %c0_46] : memref<8x1xf32, #tpu.memory_space<vmem>>, vector<8x1xf32>
    %56 = vector.broadcast %55 : vector<8x1xf32> to vector<8x64xf32>
    %57 = arith.addf %54, %56 : vector<8x64xf32>
    %58 = arith.addf %57, %28 : vector<8x64xf32>
    %c0_47 = arith.constant 0 : index
    %c0_48 = arith.constant 0 : index
    %59 = vector.load %arg21[%c0_47, %c0_48] : memref<64x144xbf16, #tpu.memory_space<vmem>>, vector<64x144xbf16>
    %60 = arith.extf %59 : vector<64x144xbf16> to vector<64x144xf32>
    %cst_49 = arith.constant dense<0.000000e+00> : vector<8x144xf32>
    %61 = tpu.matmul %58, %60, %cst_49 {dimension_numbers = #tpu.dot_dimension_numbers<[1], [0], [0], [1], [0, 0, 1, 1], [], []>, precision = #tpu.contract_precision<fp32>} : vector<8x64xf32>, vector<64x144xf32>, vector<8x144xf32> -> vector<8x144xf32>
    %62 = vector.extract_strided_slice %61 {offsets = [0, 0], sizes = [8, 16], strides = [1, 1]} : vector<8x144xf32> to vector<8x16xf32>
    %63 = vector.extract_strided_slice %61 {offsets = [0, 16], sizes = [8, 16], strides = [1, 1]} : vector<8x144xf32> to vector<8x16xf32>
    %64 = vector.extract_strided_slice %61 {offsets = [0, 32], sizes = [8, 16], strides = [1, 1]} : vector<8x144xf32> to vector<8x16xf32>
    %65 = vector.extract_strided_slice %61 {offsets = [0, 48], sizes = [8, 16], strides = [1, 1]} : vector<8x144xf32> to vector<8x16xf32>
    %66 = vector.extract_strided_slice %61 {offsets = [0, 64], sizes = [8, 16], strides = [1, 1]} : vector<8x144xf32> to vector<8x16xf32>
    %67 = vector.extract_strided_slice %61 {offsets = [0, 80], sizes = [8, 16], strides = [1, 1]} : vector<8x144xf32> to vector<8x16xf32>
    %68 = vector.extract_strided_slice %61 {offsets = [0, 96], sizes = [8, 16], strides = [1, 1]} : vector<8x144xf32> to vector<8x16xf32>
    %69 = vector.extract_strided_slice %61 {offsets = [0, 112], sizes = [8, 16], strides = [1, 1]} : vector<8x144xf32> to vector<8x16xf32>
    %70 = vector.extract_strided_slice %61 {offsets = [0, 128], sizes = [8, 16], strides = [1, 1]} : vector<8x144xf32> to vector<8x16xf32>
    %71 = tpu.concatenate %62, %63, %64, %65, %66, %67, %68, %69, %70 in 0 : vector<8x16xf32>, vector<8x16xf32>, vector<8x16xf32>, vector<8x16xf32>, vector<8x16xf32>, vector<8x16xf32>, vector<8x16xf32>, vector<8x16xf32>, vector<8x16xf32> -> vector<72x16xf32>
    %c0_50 = arith.constant 0 : index
    %c0_51 = arith.constant 0 : index
    %72 = vector.load %arg19[%c0_50, %c0_51] : memref<8x72xf32, #tpu.memory_space<vmem>>, vector<8x72xf32>
    %cst_52 = arith.constant dense<0.000000e+00> : vector<8x16xf32>
    %73 = tpu.matmul %72, %71, %cst_52 {dimension_numbers = #tpu.dot_dimension_numbers<[1], [0], [0], [1], [0, 0, 1, 1], [], []>, precision = #tpu.contract_precision<fp32>} : vector<8x72xf32>, vector<72x16xf32>, vector<8x16xf32> -> vector<8x16xf32>
    %c0_53 = arith.constant 0 : index
    %c0_54 = arith.constant 0 : index
    %74 = vector.load %arg20[%c0_53, %c0_54] : memref<8x1xf32, #tpu.memory_space<vmem>>, vector<8x1xf32>
    %75 = vector.broadcast %74 : vector<8x1xf32> to vector<8x16xf32>
    %76 = arith.addf %73, %75 : vector<8x16xf32>
    %77 = arith.addf %76, %17 : vector<8x16xf32>
    %c0_55 = arith.constant 0 : index
    %c0_56 = arith.constant 0 : index
    %78 = vector.load %arg24[%c0_55, %c0_56] : memref<16x36xbf16, #tpu.memory_space<vmem>>, vector<16x36xbf16>
    %79 = arith.extf %78 : vector<16x36xbf16> to vector<16x36xf32>
    %cst_57 = arith.constant dense<0.000000e+00> : vector<8x36xf32>
    %80 = tpu.matmul %77, %79, %cst_57 {dimension_numbers = #tpu.dot_dimension_numbers<[1], [0], [0], [1], [0, 0, 1, 1], [], []>, precision = #tpu.contract_precision<fp32>} : vector<8x16xf32>, vector<16x36xf32>, vector<8x36xf32> -> vector<8x36xf32>
    %81 = vector.extract_strided_slice %80 {offsets = [0, 0], sizes = [8, 4], strides = [1, 1]} : vector<8x36xf32> to vector<8x4xf32>
    %82 = vector.extract_strided_slice %80 {offsets = [0, 4], sizes = [8, 4], strides = [1, 1]} : vector<8x36xf32> to vector<8x4xf32>
    %83 = vector.extract_strided_slice %80 {offsets = [0, 8], sizes = [8, 4], strides = [1, 1]} : vector<8x36xf32> to vector<8x4xf32>
    %84 = vector.extract_strided_slice %80 {offsets = [0, 12], sizes = [8, 4], strides = [1, 1]} : vector<8x36xf32> to vector<8x4xf32>
    %85 = vector.extract_strided_slice %80 {offsets = [0, 16], sizes = [8, 4], strides = [1, 1]} : vector<8x36xf32> to vector<8x4xf32>
    %86 = vector.extract_strided_slice %80 {offsets = [0, 20], sizes = [8, 4], strides = [1, 1]} : vector<8x36xf32> to vector<8x4xf32>
    %87 = vector.extract_strided_slice %80 {offsets = [0, 24], sizes = [8, 4], strides = [1, 1]} : vector<8x36xf32> to vector<8x4xf32>
    %88 = vector.extract_strided_slice %80 {offsets = [0, 28], sizes = [8, 4], strides = [1, 1]} : vector<8x36xf32> to vector<8x4xf32>
    %89 = vector.extract_strided_slice %80 {offsets = [0, 32], sizes = [8, 4], strides = [1, 1]} : vector<8x36xf32> to vector<8x4xf32>
    %90 = tpu.concatenate %81, %82, %83, %84, %85, %86, %87, %88, %89 in 0 : vector<8x4xf32>, vector<8x4xf32>, vector<8x4xf32>, vector<8x4xf32>, vector<8x4xf32>, vector<8x4xf32>, vector<8x4xf32>, vector<8x4xf32>, vector<8x4xf32> -> vector<72x4xf32>
    %c0_58 = arith.constant 0 : index
    %c0_59 = arith.constant 0 : index
    %91 = vector.load %arg22[%c0_58, %c0_59] : memref<8x72xf32, #tpu.memory_space<vmem>>, vector<8x72xf32>
    %cst_60 = arith.constant dense<0.000000e+00> : vector<8x4xf32>
    %92 = tpu.matmul %91, %90, %cst_60 {dimension_numbers = #tpu.dot_dimension_numbers<[1], [0], [0], [1], [0, 0, 1, 1], [], []>, precision = #tpu.contract_precision<fp32>} : vector<8x72xf32>, vector<72x4xf32>, vector<8x4xf32> -> vector<8x4xf32>
    %c0_61 = arith.constant 0 : index
    %c0_62 = arith.constant 0 : index
    %93 = vector.load %arg23[%c0_61, %c0_62] : memref<8x1xf32, #tpu.memory_space<vmem>>, vector<8x1xf32>
    %94 = vector.broadcast %93 : vector<8x1xf32> to vector<8x4xf32>
    %95 = arith.addf %92, %94 : vector<8x4xf32>
    %96 = arith.addf %95, %6 : vector<8x4xf32>
    %cst_63 = arith.constant 0.000000e+00 : f32
    %97 = vector.broadcast %cst_63 : f32 to vector<8x1024xf32>
    %c0_64 = arith.constant 0 : index
    %c0_65 = arith.constant 0 : index
    %c0_66 = arith.constant 0 : index
    %98 = vector.load %arg25[%c0_64, %c0_65, %c0_66] : memref<1x8x1024xf32, #tpu.memory_space<vmem>>, vector<1x8x1024xf32>
    %99 = vector.shape_cast %98 : vector<1x8x1024xf32> to vector<8x1024xf32>
    %100 = vector.shape_cast %97 : vector<8x1024xf32> to vector<1x8x1024xf32>
    tpu.vector_store %arg25[%c0_64, %c0_65, %c0_66], %100 {strides = array<i32>} : memref<1x8x1024xf32, #tpu.memory_space<vmem>>, vector<1x8x1024xf32>,
    %c0_67 = arith.constant 0 : index
    %c0_68 = arith.constant 0 : index
    %c0_69 = arith.constant 0 : index
    %101 = vector.load %arg25[%c0_67, %c0_68, %c0_69] : memref<1x8x1024xf32, #tpu.memory_space<vmem>>, vector<1x8x256xf32>
    %102 = vector.shape_cast %101 : vector<1x8x256xf32> to vector<8x256xf32>
    %103 = vector.shape_cast %39 : vector<8x256xf32> to vector<1x8x256xf32>
    tpu.vector_store %arg25[%c0_67, %c0_68, %c0_69], %103 {strides = array<i32>} : memref<1x8x1024xf32, #tpu.memory_space<vmem>>, vector<1x8x256xf32>,
    %c0_70 = arith.constant 0 : index
    %c0_71 = arith.constant 0 : index
    %c256 = arith.constant 256 : index
    %104 = vector.load %arg25[%c0_70, %c0_71, %c256] : memref<1x8x1024xf32, #tpu.memory_space<vmem>>, vector<1x8x64xf32>
    %105 = vector.shape_cast %104 : vector<1x8x64xf32> to vector<8x64xf32>
    %106 = vector.shape_cast %28 : vector<8x64xf32> to vector<1x8x64xf32>
    tpu.vector_store %arg25[%c0_70, %c0_71, %c256], %106 {strides = array<i32>} : memref<1x8x1024xf32, #tpu.memory_space<vmem>>, vector<1x8x64xf32>,
    %c0_72 = arith.constant 0 : index
    %c0_73 = arith.constant 0 : index
    %c384 = arith.constant 384 : index
    %107 = vector.load %arg25[%c0_72, %c0_73, %c384] : memref<1x8x1024xf32, #tpu.memory_space<vmem>>, vector<1x8x16xf32>
    %108 = vector.shape_cast %107 : vector<1x8x16xf32> to vector<8x16xf32>
    %109 = vector.shape_cast %17 : vector<8x16xf32> to vector<1x8x16xf32>
    tpu.vector_store %arg25[%c0_72, %c0_73, %c384], %109 {strides = array<i32>} : memref<1x8x1024xf32, #tpu.memory_space<vmem>>, vector<1x8x16xf32>,
    %c0_74 = arith.constant 0 : index
    %c0_75 = arith.constant 0 : index
    %c512 = arith.constant 512 : index
    %110 = vector.load %arg25[%c0_74, %c0_75, %c512] : memref<1x8x1024xf32, #tpu.memory_space<vmem>>, vector<1x8x4xf32>
    %111 = vector.shape_cast %110 : vector<1x8x4xf32> to vector<8x4xf32>
    %112 = vector.shape_cast %6 : vector<8x4xf32> to vector<1x8x4xf32>
    tpu.vector_store %arg25[%c0_74, %c0_75, %c512], %112 {strides = array<i32>} : memref<1x8x1024xf32, #tpu.memory_space<vmem>>, vector<1x8x4xf32>,
    %c0_76 = arith.constant 0 : index
    %c0_77 = arith.constant 0 : index
    %c640 = arith.constant 640 : index
    %113 = vector.load %arg25[%c0_76, %c0_77, %c640] : memref<1x8x1024xf32, #tpu.memory_space<vmem>>, vector<1x8x64xf32>
    %114 = vector.shape_cast %113 : vector<1x8x64xf32> to vector<8x64xf32>
    %115 = vector.shape_cast %58 : vector<8x64xf32> to vector<1x8x64xf32>
    tpu.vector_store %arg25[%c0_76, %c0_77, %c640], %115 {strides = array<i32>} : memref<1x8x1024xf32, #tpu.memory_space<vmem>>, vector<1x8x64xf32>,
    %c0_78 = arith.constant 0 : index
    %c0_79 = arith.constant 0 : index
    %c768 = arith.constant 768 : index
    %116 = vector.load %arg25[%c0_78, %c0_79, %c768] : memref<1x8x1024xf32, #tpu.memory_space<vmem>>, vector<1x8x16xf32>
    %117 = vector.shape_cast %116 : vector<1x8x16xf32> to vector<8x16xf32>
    %118 = vector.shape_cast %77 : vector<8x16xf32> to vector<1x8x16xf32>
    tpu.vector_store %arg25[%c0_78, %c0_79, %c768], %118 {strides = array<i32>} : memref<1x8x1024xf32, #tpu.memory_space<vmem>>, vector<1x8x16xf32>,
    %c0_80 = arith.constant 0 : index
    %c0_81 = arith.constant 0 : index
    %c896 = arith.constant 896 : index
    %119 = vector.load %arg25[%c0_80, %c0_81, %c896] : memref<1x8x1024xf32, #tpu.memory_space<vmem>>, vector<1x8x4xf32>
    %120 = vector.shape_cast %119 : vector<1x8x4xf32> to vector<8x4xf32>
    %121 = vector.shape_cast %96 : vector<8x4xf32> to vector<1x8x4xf32>
    tpu.vector_store %arg25[%c0_80, %c0_81, %c896], %121 {strides = array<i32>} : memref<1x8x1024xf32, #tpu.memory_space<vmem>>, vector<1x8x4xf32>,
    return
  }
  func.func @transform_0(%arg0: i32) -> (i32, i32, i32) {
    %c0_i32 = arith.constant 0 : i32
    %c0_i32_0 = arith.constant 0 : i32
    %c0_i32_1 = arith.constant 0 : i32
    return %arg0, %c0_i32, %c0_i32_0 : i32, i32, i32
  }
  func.func @transform_1(%arg0: i32) -> (i32, i32, i32) {
    %c0_i32 = arith.constant 0 : i32
    %c0_i32_0 = arith.constant 0 : i32
    %c0_i32_1 = arith.constant 0 : i32
    return %arg0, %c0_i32, %c0_i32_0 : i32, i32, i32
  }
  func.func @transform_2(%arg0: i32) -> (i32, i32, i32) {
    %c0_i32 = arith.constant 0 : i32
    %c0_i32_0 = arith.constant 0 : i32
    %c0_i32_1 = arith.constant 0 : i32
    return %arg0, %c0_i32, %c0_i32_0 : i32, i32, i32
  }
  func.func @transform_3(%arg0: i32) -> (i32, i32, i32) {
    %c0_i32 = arith.constant 0 : i32
    %c0_i32_0 = arith.constant 0 : i32
    %c0_i32_1 = arith.constant 0 : i32
    return %arg0, %c0_i32, %c0_i32_0 : i32, i32, i32
  }
  func.func @transform_4(%arg0: i32) -> (i32, i32) {
    %c0_i32 = arith.constant 0 : i32
    %c0_i32_0 = arith.constant 0 : i32
    %c0_i32_1 = arith.constant 0 : i32
    return %c0_i32, %c0_i32_0 : i32, i32
  }
  func.func @transform_5(%arg0: i32) -> (i32, i32) {
    %c0_i32 = arith.constant 0 : i32
    %c0_i32_0 = arith.constant 0 : i32
    %c0_i32_1 = arith.constant 0 : i32
    return %c0_i32, %c0_i32_0 : i32, i32
  }
  func.func @transform_6(%arg0: i32) -> (i32, i32) {
    %c0_i32 = arith.constant 0 : i32
    %c0_i32_0 = arith.constant 0 : i32
    %c0_i32_1 = arith.constant 0 : i32
    return %c0_i32, %c0_i32_0 : i32, i32
  }
  func.func @transform_7(%arg0: i32) -> (i32, i32) {
    %c0_i32 = arith.constant 0 : i32
    %c0_i32_0 = arith.constant 0 : i32
    %c0_i32_1 = arith.constant 0 : i32
    return %c0_i32, %c0_i32_0 : i32, i32
  }
  func.func @transform_8(%arg0: i32) -> (i32, i32) {
    %c0_i32 = arith.constant 0 : i32
    %c0_i32_0 = arith.constant 0 : i32
    %c0_i32_1 = arith.constant 0 : i32
    return %c0_i32, %c0_i32_0 : i32, i32
  }
  func.func @transform_9(%arg0: i32) -> (i32, i32) {
    %c0_i32 = arith.constant 0 : i32
    %c0_i32_0 = arith.constant 0 : i32
    %c0_i32_1 = arith.constant 0 : i32
    return %c0_i32, %c0_i32_0 : i32, i32
  }
  func.func @transform_10(%arg0: i32) -> (i32, i32) {
    %c0_i32 = arith.constant 0 : i32
    %c0_i32_0 = arith.constant 0 : i32
    %c0_i32_1 = arith.constant 0 : i32
    return %c0_i32, %c0_i32_0 : i32, i32
  }
  func.func @transform_11(%arg0: i32) -> (i32, i32) {
    %c0_i32 = arith.constant 0 : i32
    %c0_i32_0 = arith.constant 0 : i32
    %c0_i32_1 = arith.constant 0 : i32
    return %c0_i32, %c0_i32_0 : i32, i32
  }
  func.func @transform_12(%arg0: i32) -> (i32, i32) {
    %c0_i32 = arith.constant 0 : i32
    %c0_i32_0 = arith.constant 0 : i32
    %c0_i32_1 = arith.constant 0 : i32
    return %c0_i32, %c0_i32_0 : i32, i32
  }
  func.func @transform_13(%arg0: i32) -> (i32, i32) {
    %c0_i32 = arith.constant 0 : i32
    %c0_i32_0 = arith.constant 0 : i32
    %c0_i32_1 = arith.constant 0 : i32
    return %c0_i32, %c0_i32_0 : i32, i32
  }
  func.func @transform_14(%arg0: i32) -> (i32, i32) {
    %c0_i32 = arith.constant 0 : i32
    %c0_i32_0 = arith.constant 0 : i32
    %c0_i32_1 = arith.constant 0 : i32
    return %c0_i32, %c0_i32_0 : i32, i32
  }
  func.func @transform_15(%arg0: i32) -> (i32, i32) {
    %c0_i32 = arith.constant 0 : i32
    %c0_i32_0 = arith.constant 0 : i32
    %c0_i32_1 = arith.constant 0 : i32
    return %c0_i32, %c0_i32_0 : i32, i32
  }
  func.func @transform_16(%arg0: i32) -> (i32, i32) {
    %c0_i32 = arith.constant 0 : i32
    %c0_i32_0 = arith.constant 0 : i32
    %c0_i32_1 = arith.constant 0 : i32
    return %c0_i32, %c0_i32_0 : i32, i32
  }
  func.func @transform_17(%arg0: i32) -> (i32, i32) {
    %c0_i32 = arith.constant 0 : i32
    %c0_i32_0 = arith.constant 0 : i32
    %c0_i32_1 = arith.constant 0 : i32
    return %c0_i32, %c0_i32_0 : i32, i32
  }
  func.func @transform_18(%arg0: i32) -> (i32, i32) {
    %c0_i32 = arith.constant 0 : i32
    %c0_i32_0 = arith.constant 0 : i32
    %c0_i32_1 = arith.constant 0 : i32
    return %c0_i32, %c0_i32_0 : i32, i32
  }
  func.func @transform_19(%arg0: i32) -> (i32, i32) {
    %c0_i32 = arith.constant 0 : i32
    %c0_i32_0 = arith.constant 0 : i32
    %c0_i32_1 = arith.constant 0 : i32
    return %c0_i32, %c0_i32_0 : i32, i32
  }
  func.func @transform_20(%arg0: i32) -> (i32, i32) {
    %c0_i32 = arith.constant 0 : i32
    %c0_i32_0 = arith.constant 0 : i32
    %c0_i32_1 = arith.constant 0 : i32
    return %c0_i32, %c0_i32_0 : i32, i32
  }
  func.func @transform_21(%arg0: i32) -> (i32, i32) {
    %c0_i32 = arith.constant 0 : i32
    %c0_i32_0 = arith.constant 0 : i32
    %c0_i32_1 = arith.constant 0 : i32
    return %c0_i32, %c0_i32_0 : i32, i32
  }
  func.func @transform_22(%arg0: i32) -> (i32, i32) {
    %c0_i32 = arith.constant 0 : i32
    %c0_i32_0 = arith.constant 0 : i32
    %c0_i32_1 = arith.constant 0 : i32
    return %c0_i32, %c0_i32_0 : i32, i32
  }
  func.func @transform_23(%arg0: i32) -> (i32, i32) {
    %c0_i32 = arith.constant 0 : i32
    %c0_i32_0 = arith.constant 0 : i32
    %c0_i32_1 = arith.constant 0 : i32
    return %c0_i32, %c0_i32_0 : i32, i32
  }
  func.func @transform_24(%arg0: i32) -> (i32, i32, i32) {
    %c0_i32 = arith.constant 0 : i32
    %c0_i32_0 = arith.constant 0 : i32
    %c0_i32_1 = arith.constant 0 : i32
    return %arg0, %c0_i32, %c0_i32_0 : i32, i32, i32
  }
}

</mosaic_0001>

<bundles_post_ra>
// kernel: pafpn_forward.1
= control target key start
LH: loop header
LB: loop body
LE: loop exit
PB: predicated region body
PF: predicated region fallthrough
CT: control target
= control target key end

     0   :  { %s15988_s0 = inlined_call_operand.vmem [shape: f32[2,4,256], index: 0, kind: input, shape index: {}]   ;;  %s15989_s1 = inlined_call_operand.vmem [shape: f32[2,8,64], index: 1, kind: input, shape index: {}]   ;;  %s15990_s2 = inlined_call_operand.vmem [shape: f32[2,16,16], index: 2, kind: input, shape index: {}]   ;;  %s15991_s3 = inlined_call_operand.vmem [shape: f32[2,32,4], index: 3, kind: input, shape index: {}]   ;;  %s15992_s4 = inlined_call_operand.vmem [shape: f32[8,4], index: 4, kind: input, shape index: {}]   ;;  %s15993_s5 = inlined_call_operand.vmem [shape: f32[8,1], index: 5, kind: input, shape index: {}]   ;;  %s15994_s6 = inlined_call_operand.vmem [shape: f32[8,8], index: 6, kind: input, shape index: {}]   ;;  %s15995_s7 = inlined_call_operand.vmem [shape: f32[8,1], index: 7, kind: input, shape index: {}]   ;;  %s15996_s8 = inlined_call_operand.vmem [shape: f32[8,16], index: 8, kind: input, shape index: {}]   ;;  %s15997_s9 = inlined_call_operand.vmem [shape: f32[8,1], index: 9, kind: input, shape index: {}]   ;;  %s15998_s10 = inlined_call_operand.vmem [shape: f32[8,32], index: 10, kind: input, shape index: {}]   ;;  %s15999_s11 = inlined_call_operand.vmem [shape: f32[8,1], index: 11, kind: input, shape index: {}]   ;;  %s16000_s12 = inlined_call_operand.vmem [shape: bf16[4,16], index: 12, kind: input, shape index: {}]   ;;  %s16001_s13 = inlined_call_operand.vmem [shape: bf16[16,64], index: 13, kind: input, shape index: {}]   ;;  %s16002_s14 = inlined_call_operand.vmem [shape: bf16[64,256], index: 14, kind: input, shape index: {}]   ;;  %s16003_s15 = inlined_call_operand.vmem [shape: f32[8,72], index: 15, kind: input, shape index: {}]   ;;  %s16004_s16 = inlined_call_operand.vmem [shape: f32[8,1], index: 16, kind: input, shape index: {}]   ;;  %s16005_s17 = inlined_call_operand.vmem [shape: bf16[256,576], index: 17, kind: input, shape index: {}]   ;;  %s16006_s18 = inlined_call_operand.vmem [shape: f32[8,72], index: 18, kind: input, shape index: {}]   ;;  %s16007_s19 = inlined_call_operand.vmem [shape: f32[8,1], index: 19, kind: input, shape index: {}]   ;;  %s16008_s20 = inlined_call_operand.vmem [shape: bf16[64,144], index: 20, kind: input, shape index: {}]   ;;  %s16009_s21 = inlined_call_operand.vmem [shape: f32[8,72], index: 21, kind: input, shape index: {}]   ;;  %s16010_s22 = inlined_call_operand.vmem [shape: f32[8,1], index: 22, kind: input, shape index: {}]   ;;  %s16011_s23 = inlined_call_operand.vmem [shape: bf16[16,36], index: 23, kind: input, shape index: {}]   ;;  %s16012_s24 = inlined_call_operand.vmem [shape: f32[2,8,1024], index: 24, kind: output, shape index: {}]  }
   0x1   :  { %16524 = sst [smem:[#allocation120_spill]] %s15988_s0 }
   0x2   :  { %16525 = sst [smem:[#allocation121_spill]] %s15989_s1 }
   0x3   :  { %16526 = sst [smem:[#allocation122_spill]] %s15990_s2 }
   0x4   :  { %16527 = sst [smem:[#allocation123_spill]] %s15991_s3 }
   0x5   :  { %16528 = sst [smem:[#allocation124_spill]] %s15992_s4 }
   0x6   :  { %16529 = sst [smem:[#allocation125_spill]] %s15993_s5  ;;  %s11150_s5 = smov 0  }
   0x7   :  { %16530 = sst [smem:[#allocation126_spill]] %s15994_s6 }
   0x8   :  { %16531 = sst [smem:[#allocation127_spill]] %s15995_s7 }
   0x9   :  { %16532 = sst [smem:[#allocation128_spill]] %s15996_s8 }
   0xa LB: > { %s9812_s26 = sadd.s32 4294967295, %s11007_s5   ;;  %p9816_p0 = scmp.ge.s32.totalorder %s11007_s5, 1  ;;  %s11007_s5 = sphi %s11150_s5, %s34_s5  }
   0xb   : > { %p691_p1 = scmp.lt.s32.totalorder %s11007_s5, 3 }
   0xd   : > { %p692_p2 = pnand %p9816_p0, %p691_p1 }
   0xf   : > { %695 = sbr.rel (%p692_p2) target bundleno = 3090 (0xc12), region = 116 }
  0x14   : > { %p771_p3 = scmp.lt.s32.totalorder %s9812_s26, 1  ;;  %v795_v0 = vld [vmem:[%s15998_s10] sm:$0xff]  ;;  %vm806_vm0 = vcmask 261120   ;;  %v11009_v1 = vmov 0.0   ;;  %vm11010_vm1 = vmmov 0   ;;  %v11011_v5 = vmov 0  }
  0x15   : > { %10341 = vmatprep.subr.mxu0 %v11009_v1  ;;  %10349 = vmatprep.mubr.msk.f32.mxu0 %vm11010_vm1, %v11009_v1  ;;  %v808_v2 = vsel %vm806_vm0, %v795_v0, 0  ;;  %v800_v3 = vld [vmem:[%s15999_s11] sm:$0xff]  ;;  %s16533_s3 = sld [smem:[#allocation123_spill]]  ;;  %vm1304_vm2 = vcmask 130048   ;;  %vm1773_vm3 = vcmask 1043456   ;;  %vm1769_vm4 = vcmask 31744  }
  0x16   : > { %s17419_s26 = smov (!%p771_p3, %s9812_s26), 1  ;;  %10352 = vmatprep.subr.mxu1 %v11009_v1  ;;  %v11170_v4 = vand.u32 4294901760, %v808_v2  ;;  %10360 = vmatprep.mubr.msk.f32.mxu1 %vm11010_vm1, %v11009_v1  ;;  %v1298_v7 = vld [vmem:[%s15997_s9] sm:$0xff]  ;;  %s16537_s2 = sld [smem:[#allocation121_spill]]  ;;  %vm2232_vm5 = vcmask 64512   ;;  %vm3643_vm6 = vcmask 523264  }
  0x17   : > { %10995 = vset.pattern.permute.xlu0 %v11011_v5  ;;  %10996 = vset.pattern.permute.xlu1 %v11011_v5  ;;  %s9833_s29 = sshll.u32 %s17419_s26, 5  ;;  %s9834_s0 = sshll.u32 %s17419_s26, 6  ;;  %v1767_v54 = vld [vmem:[%s16000_s12] sm:$0x3]  ;;  %vm6949_vm7 = vcmask 588800  }
  0x18   : > { %v11177_v6 = vsub.f32 %v808_v2, %v11170_v4  ;;  %803 = vperm.xlu0 %10995, %v800_v3   ;;  %s11185_s1 = scalar_lea.vmem %s16012_s24, %s9834_s0  ;;  %s9832_s0 = sshll.u32 %s17419_s26, 4  ;;  %v1768_v55 = vunpack.c.l.bf16 %v1767_v54 }
  0x19   : > { %9707 = vst [vmem:[%s11185_s1 + $0x10] sm:$0xff] %v11009_v1  ;;  %9708 = vst [vmem:[%s11185_s1 + $0x18] sm:$0xff] %v11009_v1  ;;  %s9831_s27 = sshll.u32 %s17419_s26, 3  ;;  %s16538_s30 = sld [smem:[#allocation126_spill]] }
  0x1a   : > { %9709 = vst [vmem:[%s11185_s1 + $0x20] sm:$0xff] %v11009_v1  ;;  %9710 = vst [vmem:[%s11185_s1 + $0x28] sm:$0xff] %v11009_v1  ;;  %v881_v11 = vand.u32 4294901760, %v11177_v6  ;;  %v1775_v56 = vsel %vm1773_vm3, %v1768_v55, 0  ;;  %s16539_s28 = sld [smem:[#allocation127_spill]]  ;;  %s11012_s7 = smov 64  }
  0x1b   : > { %s789_s25 = scalar_lea.vmem %s16533_s3, %s9833_s29  ;;  %9711 = vst [vmem:[%s11185_s1 + $0x30] sm:$0xff] %v11009_v1  ;;  %9712 = vst [vmem:[%s11185_s1 + $0x38] sm:$0xff] %v11009_v1  ;;  %s16534_s29 = sld [smem:[#allocation128_spill]]  ;;  %v11342_v57 = vsub.f32 %v1775_v56, %v1775_v56 }
  0x1c   : > { %v799_v8 = vld [vmem:[%s789_s25 + $0x18] sm:$0xff]  ;;  %v798_v9 = vld [vmem:[%s789_s25 + $0x10] sm:$0xff]  ;;  %v797_v10 = vld [vmem:[%s789_s25 + $0x8] sm:$0xff]  ;;  %v882_v17 = vsub.f32 %v11177_v6, %v881_v11  ;;  %1301 = vperm.xlu0 %10995, %v1298_v7   ;;  %s16535_s3 = sld [smem:[#allocation122_spill]]  ;;  %s11013_s6 = smov 32  }
  0x1d   : > { %v11203_v12 = vand.u32 4294901760, %v799_v8  ;;  %v11205_v13 = vand.u32 4294901760, %v798_v9  ;;  %v11207_v14 = vand.u32 4294901760, %v797_v10  ;;  %v796_v15 = vld [vmem:[%s789_s25] sm:$0xff]  ;;  %v1886_v58 = vand.u32 4294901760, %v11342_v57  ;;  %s11018_s26 = smov 112  }
  0x1e   : > { %v11209_v16 = vand.u32 4294901760, %v796_v15  ;;  %v883_v25 = vand.u32 4294901760, %v882_v17 }
  0x1f   : > { %10342 = vmatpush3.msra.mxu0 %v11203_v12  ;;  %v915_v18 = vsub.f32 %v799_v8, %v11203_v12  ;;  %v922_v19 = vsub.f32 %v798_v9, %v11205_v13  ;;  %v11218_v20 = vsub.f32 %v797_v10, %v11207_v14  ;;  %v1887_v59 = vsub.f32 %v11342_v57, %v1886_v58 }
  0x20   : > { %10343 = vmatprep.subr.mxu0 %v11009_v1  ;;  %v11222_v21 = vsub.f32 %v796_v15, %v11209_v16 }
  0x21   : > { %10344 = vmatpush3.msra.mxu0 %v11205_v13  ;;  %v916_v22 = vand.u32 4294901760, %v915_v18  ;;  %v923_v23 = vand.u32 4294901760, %v922_v19  ;;  %v930_v24 = vand.u32 4294901760, %v11218_v20  ;;  %v1295_v30 = vld [vmem:[%s16534_s29] sm:$0xff]  ;;  %v1888_v60 = vand.u32 4294901760, %v1887_v59  ;;  %s779_s29 = scalar_lea.vmem %s16537_s2, %s9831_s27  ;;  %s11014_s2 = smov 16  }
  0x22   : > { %10345 = vmatprep.subr.mxu0 %v11009_v1  ;;  %v937_v26 = vand.u32 4294901760, %v11222_v21  ;;  %v1306_v35 = vsel %vm1304_vm2, %v1295_v30, 0  ;;  %s784_s25 = scalar_lea.vmem %s16535_s3, %s9832_s0  ;;  %s11016_s0 = smov 96  }
  0x23   : > { %10346 = vmatpush3.msra.mxu0 %v11207_v14  ;;  %v917_v27 = vsub.f32 %v915_v18, %v916_v22  ;;  %v924_v28 = vsub.f32 %v922_v19, %v923_v23  ;;  %v931_v29 = vsub.f32 %v11218_v20, %v930_v24  ;;  %v11246_v37 = vand.u32 4294901760, %v1306_v35  ;;  %v1297_v38 = vld [vmem:[%s784_s25 + $0x8] sm:$0xff]  ;;  %v1296_v39 = vld [vmem:[%s784_s25] sm:$0xff]  ;;  %s16542_s25 = sld [smem:[#allocation124_spill]] }
  0x24   : > { %10347 = vmatprep.subr.mxu0 %v11009_v1  ;;  %v938_v33 = vsub.f32 %v11222_v21, %v937_v26  ;;  %v11260_v41 = vand.u32 4294901760, %v1297_v38  ;;  %v11265_v42 = vand.u32 4294901760, %v1296_v39 }
  0x25   : > { %10348 = vmatpush3.msra.mxu0 %v11209_v16  ;;  %v918_v31 = vand.u32 4294901760, %v917_v27  ;;  %v925_v32 = vand.u32 4294901760, %v924_v28  ;;  %v932_v34 = vand.u32 4294901760, %v931_v29  ;;  %v11256_v40 = vsub.f32 %v1306_v35, %v11246_v37 }
  0x26   : > { %10363 = vmatprep.subr.mxu0 %v11009_v1  ;;  %10350 = vmatmul.mubr.f32.vlgmr.msra.gmra.mxu0 %v883_v25  ;;  %v939_v36 = vand.u32 4294901760, %v938_v33  ;;  %v1415_v44 = vsub.f32 %v1297_v38, %v11260_v41  ;;  %v1422_v45 = vsub.f32 %v1296_v39, %v11265_v42 }
  0x27   : > { %10353 = vmatpush3.msra.mxu1 %v918_v31  ;;  %10364 = vmatpush3.msra.mxu0 %v915_v18  ;;  %v1377_v43 = vand.u32 4294901760, %v11256_v40 }
  0x28   : > { %10354 = vmatprep.subr.mxu1 %v11009_v1  ;;  %10365 = vmatprep.subr.mxu0 %v11009_v1  ;;  %v1416_v47 = vand.u32 4294901760, %v1415_v44  ;;  %v1423_v48 = vand.u32 4294901760, %v1422_v45 }
  0x29   : > { %10355 = vmatpush3.msra.mxu1 %v925_v32  ;;  %10366 = vmatpush3.msra.mxu0 %v922_v19  ;;  %v1378_v46 = vsub.f32 %v11256_v40, %v1377_v43 }
  0x2a   : > { %10356 = vmatprep.subr.mxu1 %v11009_v1  ;;  %10367 = vmatprep.subr.mxu0 %v11009_v1  ;;  %v1417_v50 = vsub.f32 %v1415_v44, %v1416_v47  ;;  %v1424_v51 = vsub.f32 %v1422_v45, %v1423_v48 }
  0x2b   : > { %10357 = vmatpush3.msra.mxu1 %v932_v34  ;;  %10368 = vmatpush3.msra.mxu0 %v11218_v20  ;;  %v1379_v49 = vand.u32 4294901760, %v1378_v46  ;;  %v2224_v46 = vld [vmem:[%s16538_s30] sm:$0xff]  ;;  %s16541_s30 = sld [smem:[#allocation120_spill]] }
  0x2c   : > { %10358 = vmatprep.subr.mxu1 %v11009_v1  ;;  %10369 = vmatprep.subr.mxu0 %v11009_v1  ;;  %v1418_v52 = vand.u32 4294901760, %v1417_v50  ;;  %v1425_v53 = vand.u32 4294901760, %v1424_v51 }
  0x2d   : > { %10359 = vmatpush3.msra.mxu1 %v939_v36  ;;  %10370 = vmatpush3.msra.mxu0 %v11222_v21 }
  0x2e   : > { %10361 = vmatmul.mubr.f32.vlgmr.msra.gmra.mxu1 %v11170_v4  ;;  %10371 = vmatprep.mubr.msk.f32.mxu0 %vm11010_vm1, %v11009_v1 }
  0x2f   : > { %10374 = vmatprep.subr.mxu1 %v11009_v1  ;;  %10385 = vmatprep.subr.mxu0 %v11009_v1 }
  0x30   : > { %10372 = vmatmul.mubr.f32.vlgmr.msra.gmra.mxu0 %v11177_v6  ;;  %10375 = vmatpush3.msra.mxu1 %v11203_v12 }
  0x31   : > { %10386 = vmatpush3.msra.mxu0 %v916_v22  ;;  %10376 = vmatprep.subr.mxu1 %v11009_v1  ;;  %s775_s3 = scalar_lea.vmem %s16541_s30, %s9831_s27  ;;  %s11017_s30 = smov 80  }
  0x32   : > { %10387 = vmatprep.subr.mxu0 %v11009_v1  ;;  %10377 = vmatpush3.msra.mxu1 %v11205_v13 }
  0x33   : > { %10388 = vmatpush3.msra.mxu0 %v923_v23  ;;  %10378 = vmatprep.subr.mxu1 %v11009_v1 }
  0x34   : > { %10389 = vmatprep.subr.mxu0 %v11009_v1  ;;  %10379 = vmatpush3.msra.mxu1 %v11207_v14 }
  0x35   : > { %10390 = vmatpush3.msra.mxu0 %v930_v24  ;;  %10380 = vmatprep.subr.mxu1 %v11009_v1 }
  0x36   : > { %10391 = vmatprep.subr.mxu0 %v11009_v1  ;;  %10381 = vmatpush3.msra.mxu1 %v11209_v16 }
  0x37   : > { %10382 = vmatprep.mubr.msk.f32.mxu1 %vm11010_vm1, %v11009_v1  ;;  %10392 = vmatpush3.msra.mxu0 %v937_v26 }
  0x38   : > { %10393 = vmatprep.mubr.msk.f32.mxu0 %vm11010_vm1, %v11009_v1  ;;  %10383 = vmatmul.mubr.f32.vlgmr.msra.gmra.mxu1 %v881_v11 }
  0x39   : > { %10394 = vmatmul.mubr.f32.vlgmr.msra.gmra.mxu0 %v11170_v4  ;;  %10396 = vmatprep.subr.mxu1 %v11009_v1 }
  0x3a   : > { %10407 = vmatprep.subr.mxu0 %v11009_v1  ;;  %10397 = vmatpush3.msra.mxu1 %v11203_v12 }
  0x3b   : > { %10408 = vmatpush3.msra.mxu0 %v11260_v41  ;;  %10398 = vmatprep.subr.mxu1 %v11009_v1 }
  0x3c   : > { %10409 = vmatprep.subr.mxu0 %v11009_v1  ;;  %10399 = vmatpush3.msra.mxu1 %v11205_v13 }
  0x3d   : > { %10410 = vmatpush3.msra.mxu0 %v11265_v42  ;;  %10411 = vmatprep.mubr.msk.f32.mxu0 %vm11010_vm1, %v11009_v1 }
  0x3e   : > { %10400 = vmatprep.subr.mxu1 %v11009_v1  ;;  %10412 = vmatmul.mubr.f32.vlgmr.msra.gmra.mxu0 %v1379_v49 }
  0x3f   : > { %10401 = vmatpush3.msra.mxu1 %v11207_v14  ;;  %10404 = vmatprep.mubr.msk.f32.mxu1 %vm11010_vm1, %v11009_v1 }
  0x40   : > { %10402 = vmatprep.subr.mxu1 %v11009_v1  ;;  %10421 = vmatprep.subr.mxu0 %v11009_v1 }
  0x41   : > { %10403 = vmatpush3.msra.mxu1 %v11209_v16  ;;  %10422 = vmatpush3.msra.mxu0 %v1415_v44 }
  0x42   : > { %10405 = vmatmul.mubr.f32.vlgmr.msra.gmra.mxu1 %v11170_v4  ;;  %10414 = vmatprep.subr.mxu1 %v11009_v1 }
  0x43   : > { %10415 = vmatpush3.msra.mxu1 %v1418_v52  ;;  %10418 = vmatprep.mubr.msk.f32.mxu1 %vm11010_vm1, %v11009_v1  ;;  %v9836_v52 = vld [vmem:[%s16001_s13] sm:$0xff]  }
  0x44   : > { %10416 = vmatprep.subr.mxu1 %v11009_v1  ;;  %10423 = vmatprep.subr.mxu0 %v11009_v1  ;;  %v11402_v56 = vunpack.c.l.bf16 %v9836_v52 }
  0x45   : > { %10417 = vmatpush3.msra.mxu1 %v1425_v53  ;;  %10424 = vmatpush3.msra.mxu0 %v1422_v45  ;;  %v11393_v53 = vunpack.c.h.bf16 %v9836_v52 }
  0x46   : > { %10419 = vmatmul.mubr.f32.vlgmr.msra.gmra.mxu1 %v11246_v37  ;;  %10428 = vmatprep.subr.mxu1 %v11009_v1  ;;  %v11408_v59 = vsub.f32 %v11402_v56, %v11402_v56 }
  0x47   : > { %10425 = vmatprep.mubr.msk.f32.mxu0 %vm11010_vm1, %v11009_v1  ;;  %10429 = vmatpush3.msra.mxu1 %v11260_v41 }
  0x48   : > { %10426 = vmatmul.mubr.f32.vlgmr.msra.gmra.mxu0 %v11256_v40  ;;  %10430 = vmatprep.subr.mxu1 %v11009_v1 }
  0x49   : > { %10435 = vmatprep.subr.mxu0 %v11009_v1  ;;  %10431 = vmatpush3.msra.mxu1 %v11265_v42 }
  0x4a   : > { %10432 = vmatprep.mubr.msk.f32.mxu1 %vm11010_vm1, %v11009_v1  ;;  %10436 = vmatpush3.msra.mxu0 %v1416_v47 }
  0x4b   : > { %10433 = vmatmul.mubr.f32.vlgmr.msra.gmra.mxu1 %v1377_v43  ;;  %10437 = vmatprep.subr.mxu0 %v11009_v1 }
  0x4c   : > { %10442 = vmatprep.subr.mxu1 %v11009_v1  ;;  %10438 = vmatpush3.msra.mxu0 %v1423_v48  ;;  %v2234_v48 = vsel %vm2232_vm5, %v2224_v46, 0 }
  0x4d   : > { %10439 = vmatprep.mubr.msk.f32.mxu0 %vm11010_vm1, %v11009_v1  ;;  %10443 = vmatpush3.msra.mxu1 %v11260_v41  ;;  %v2302_v49 = vand.u32 4294901760, %v2234_v48 }
  0x4e   : > { %10440 = vmatmul.mubr.f32.vlgmr.msra.gmra.mxu0 %v11246_v37  ;;  %10444 = vmatprep.subr.mxu1 %v11009_v1 }
  0x4f   : > { %10445 = vmatpush3.msra.mxu1 %v11265_v42  ;;  %10446 = vmatprep.mubr.msk.f32.mxu1 %vm11010_vm1, %v11009_v1  ;;  %v2225_v42 = vld [vmem:[%s779_s29] sm:$0xff]  ;;  %v2303_v51 = vsub.f32 %v2234_v48, %v2302_v49  ;;  %s16540_s29 = sld [smem:[#allocation125_spill]] }
  0x50   : > { %10447 = vmatmul.mubr.f32.vlgmr.msra.gmra.mxu1 %v11246_v37  ;;  %10454 = vmatprep.subr.mxu1 %v11009_v1  ;;  %v2267_v43 = vand.u32 4294901760, %v2225_v42 }
  0x51   : > { %10456 = vmatprep.mubr.msk.f32.mxu1 %vm11010_vm1, %v11009_v1  ;;  %10449 = vmatprep.subr.mxu0 %v11009_v1  ;;  %v2304_v54 = vand.u32 4294901760, %v2303_v51 }
  0x52   : > { %10451 = vmatprep.mubr.msk.f32.mxu0 %vm11010_vm1, %v11009_v1  ;;  %10450 = vmatpush3.msk.msra.mxu0 %vm1773_vm3, %v1768_v55  ;;  %v2344_v44 = vsub.f32 %v2225_v42, %v2267_v43 }
  0x53   : > { %10459 = vmatprep.subr.mxu0 %v11009_v1  ;;  %10455 = vmatpush3.msra.mxu1 %v1888_v60 }
  0x54   : > { %10464 = vmatprep.subr.mxu1 %v11009_v1  ;;  %v2345_v45 = vand.u32 4294901760, %v2344_v44 }
  0x56   : > { %v2346_v47 = vsub.f32 %v2344_v44, %v2345_v45 }
  0x58   : > { %v2347_v50 = vand.u32 4294901760, %v2346_v47 }
  0x93   : > { %v804_v0 = vpop.permute.xlu0 %803 }
  0x97   : > { %v1302_v18 = vpop.permute.xlu0 %1301 }
  0xe6   : > { %v885_v61 = vpop.f32.mrf.mxu0 }
  0xe7   : > { %v886_v5 = vadd.f32 %v885_v61, %v804_v0 }
  0xe8   : > { %v10351_v62 = vpop.f32.mrf.mxu0 }
  0xe9   : > { %v2800_v62 = vand.u32 4294901760, %v11408_v59 }
  0xeb   : > { %v2801_v0 = vsub.f32 %v11408_v59, %v2800_v62 }
  0xee   : > { %v976_v63 = vpop.f32.mrf.mxu1 }
  0xef   : > { %v977_v6 = vadd.f32 %v976_v63, %v886_v5 }
  0xf0   : > { %v10362_v2 = vpop.f32.mrf.mxu1  ;;  %v1056_v3 = vpop.f32.mrf.mxu0 }
  0xf1   : > { %v1057_v10 = vadd.f32 %v1056_v3, %v977_v6  ;;  %v2802_v2 = vand.u32 4294901760, %v2801_v0  ;;  %v2226_v3 = vld [vmem:[%s16539_s28] sm:$0xff]  ;;  %s11019_s28 = smov 100  }
  0xf2   : > { %v10373_v4 = vpop.f32.mrf.mxu0  ;;  %2229 = vperm.xlu1 %10996, %v2226_v3  }
  0xf3   : > { %v3139_v4 = vld [vmem:[%s16540_s29] sm:$0xff]  ;;  %s11015_s29 = smov 48  }
  0xf6   : > { %3142 = vperm.xlu1 %10996, %v3139_v4   ;;  %v3625_v4 = vld [vmem:[%s16002_s14 + $0x30] sm:$0xff] }
  0xf8   : > { %v1133_v7 = vpop.f32.mrf.mxu1 }
  0xf9   : > { %v1216_v8 = vpop.f32.mrf.mxu0  ;;  %v1134_v12 = vadd.f32 %v1133_v7, %v1057_v10 }
  0xfa   : > { %v10384_v9 = vpop.f32.mrf.mxu1 }
  0xfb   : > { %v10395_v11 = vpop.f32.mrf.mxu0  ;;  %v1217_v15 = vadd.f32 %v1216_v8, %v1134_v12  ;;  %v3138_v9 = vld [vmem:[%s775_s3] sm:$0xff] }
  0xfc   : > { %v3146_v12 = vcombine.high %v3138_v9, %v3138_v9 }
  0xfe   : > { %v1381_v13 = vpop.f32.mrf.mxu0 }
  0xff   : > { %v1382_v20 = vadd.f32 %v1381_v13, %v1302_v18 }
 0x100   : > { %v10413_v14 = vpop.f32.mrf.mxu0 }
 0x102   : > { %v1291_v16 = vpop.f32.mrf.mxu1 }
 0x103   : > { %v11350_v17 = vadd.f32 %v1291_v16, %v1217_v15 }
 0x104   : > { %v10406_v19 = vpop.f32.mrf.mxu1 }
 0x105   : > { %16536 = vst [vmem:[#allocation2_spill] sm:$0xff] %v11350_v17  ;;  %v1771_v21 = vsel %vm1769_vm4, %v11350_v17, 0  ;;  %9717 = vst.msk [vmem:[%s11185_s1 + $0x20] sm:$0xff] %vm1769_vm4, %v11350_v17  ;;  %v3152_v19 = vsel %vm1773_vm3, %v3146_v12, 0 }
 0x106   : > { %v1843_v22 = vand.u32 4294901760, %v1771_v21  ;;  %v1462_v23 = vpop.f32.mrf.mxu1 }
 0x107   : > { %v1463_v24 = vadd.f32 %v1462_v23, %v1382_v20 }
 0x108   : > { %v1844_v25 = vsub.f32 %v1771_v21, %v1843_v22  ;;  %v10420_v26 = vpop.f32.mrf.mxu1  ;;  %v1538_v27 = vpop.f32.mrf.mxu0  ;;  %10457 = vmatmul.mubr.f32.vlgmr.msra.gmra.mxu1 %v1843_v22  ;;  %v3150_v21 = vsel %vm1773_vm3, %v3138_v9, 0 }
 0x109   : > { %v1539_v28 = vadd.f32 %v1538_v27, %v1463_v24  ;;  %10465 = vmatpush3.msk.msra.mxu1 %vm1773_vm3, %v1768_v55  ;;  %10466 = vmatprep.mubr.msk.f32.mxu1 %vm11010_vm1, %v11009_v1  ;;  %v11449_v24 = vand.u32 4294901760, %v3152_v19  ;;  %v11451_v26 = vand.u32 4294901760, %v3150_v21 }
 0x10a   : > { %v10427_v29 = vpop.f32.mrf.mxu0  ;;  %v1845_v30 = vand.u32 4294901760, %v1844_v25  ;;  %10474 = vmatprep.subr.mxu1 %v11009_v1 }
 0x10b   : > { %v1613_v31 = vpop.f32.mrf.mxu1  ;;  %v3137_v29 = vld [vmem:[%s16542_s25] sm:$0xff] }
 0x10c   : > { %v1614_v32 = vadd.f32 %v1613_v31, %v1539_v28  ;;  %10467 = vmatmul.mubr.f32.vlgmr.msra.gmra.mxu1 %v1845_v30  ;;  %v1846_v33 = vsub.f32 %v1844_v25, %v1845_v30  ;;  %v3263_v30 = vsub.f32 %v3152_v19, %v11449_v24 }
 0x10d   : > { %v10434_v34 = vpop.f32.mrf.mxu1  ;;  %10475 = vmatpush3.msk.msra.mxu1 %vm1773_vm3, %v1768_v55  ;;  %10476 = vmatprep.mubr.msk.f32.mxu1 %vm11010_vm1, %v11009_v1  ;;  %v11400_v55 = vsub.f32 %v11393_v53, %v11393_v53 }
 0x10e   : > { %v1690_v35 = vpop.f32.mrf.mxu0  ;;  %v1847_v36 = vand.u32 4294901760, %v1846_v33  ;;  %10484 = vmatprep.subr.mxu1 %v11009_v1  ;;  %v3148_v33 = vsel %vm1769_vm4, %v3137_v29, 0 }
 0x10f   : > { %v1691_v37 = vadd.f32 %v1690_v35, %v1614_v32  ;;  %v11461_v32 = vsub.f32 %v3150_v21, %v11451_v26  ;;  %v3623_v21 = vld [vmem:[%s16002_s14 + $0x20] sm:$0xff] }
 0x110   : > { %v1763_v38 = vpop.f32.mrf.mxu1  ;;  %10452 = vmatmul.mubr.f32.vlgmr.msra.gmra.mxu0 %v1847_v36  ;;  %10477 = vmatmul.mubr.f32.vlgmr.msra.gmra.mxu1 %v1843_v22  ;;  %v10441_v39 = vpop.f32.mrf.mxu0  ;;  %v3264_v36 = vand.u32 4294901760, %v3263_v30  ;;  %v11575_v29 = vunpack.c.l.bf16 %v3623_v21 }
 0x111   : > { %v11365_v40 = vadd.f32 %v1763_v38, %v1691_v37  ;;  %10460 = vmatpush3.msra.mxu0 %v11342_v57  ;;  %10461 = vmatprep.mubr.msk.f32.mxu0 %vm11010_vm1, %v11009_v1  ;;  %v2305_v57 = vsub.f32 %v2303_v51, %v2304_v54  ;;  %v3270_v37 = vand.u32 4294901760, %v11461_v32  ;;  %v3221_v38 = vand.u32 4294901760, %v3148_v33 }
 0x112   : > { %10469 = vmatprep.subr.mxu0 %v11009_v1  ;;  %v10448_v41 = vpop.f32.mrf.mxu1  ;;  %10486 = vmatprep.mubr.msk.f32.mxu1 %vm11010_vm1, %v11009_v1 }
 0x113   : > { %10485 = vmatpush3.msra.mxu1 %v2347_v50  ;;  %v2306_v60 = vand.u32 4294901760, %v2305_v57  ;;  %v3265_v41 = vsub.f32 %v3263_v30, %v3264_v36  ;;  %v3271_v42 = vsub.f32 %v11461_v32, %v3270_v37 }
 0x114   : > { %10462 = vmatmul.mubr.f32.vlgmr.msra.gmra.mxu0 %v1844_v25  ;;  %10487 = vmatmul.mubr.f32.vlgmr.msra.gmra.mxu1 %v2302_v49 }
 0x115   : > { %10470 = vmatpush3.msra.mxu0 %v1886_v58  ;;  %10471 = vmatprep.mubr.msk.f32.mxu0 %vm11010_vm1, %v11009_v1  ;;  %v2794_v58 = vand.u32 4294901760, %v11400_v55  ;;  %v3266_v46 = vand.u32 4294901760, %v3265_v41  ;;  %v3272_v47 = vand.u32 4294901760, %v3271_v42 }
 0x116   : > { %10479 = vmatprep.subr.mxu0 %v11009_v1  ;;  %10494 = vmatprep.subr.mxu1 %v11009_v1 }
 0x117   : > { %10495 = vmatpush3.msra.mxu1 %v2267_v43  ;;  %10496 = vmatprep.mubr.msk.f32.mxu1 %vm11010_vm1, %v11009_v1  ;;  %v2795_v61 = vsub.f32 %v11400_v55, %v2794_v58 }
 0x118   : > { %10472 = vmatmul.mubr.f32.vlgmr.msra.gmra.mxu0 %v1843_v22  ;;  %10504 = vmatprep.subr.mxu1 %v11009_v1 }
 0x119   : > { %10481 = vmatprep.mubr.msk.f32.mxu0 %vm11010_vm1, %v11009_v1  ;;  %10480 = vmatpush3.msra.mxu0 %v2267_v43  ;;  %v2796_v63 = vand.u32 4294901760, %v2795_v61 }
 0x11a   : > { %10489 = vmatprep.subr.mxu0 %v11009_v1  ;;  %10497 = vmatmul.mubr.f32.vlgmr.msra.gmra.mxu1 %v2304_v54 }
 0x11b   : > { %10505 = vmatpush3.msra.mxu1 %v2267_v43  ;;  %10506 = vmatprep.mubr.msk.f32.mxu1 %vm11010_vm1, %v11009_v1 }
 0x11c   : > { %10482 = vmatmul.mubr.f32.vlgmr.msra.gmra.mxu0 %v2306_v60  ;;  %10516 = vmatprep.subr.mxu1 %v11009_v1 }
 0x11d   : > { %10490 = vmatpush3.msra.mxu0 %v2344_v44  ;;  %10491 = vmatprep.mubr.msk.f32.mxu0 %vm11010_vm1, %v11009_v1  ;;  %v3222_v44 = vsub.f32 %v3148_v33, %v3221_v38 }
 0x11e   : > { %10507 = vmatmul.mubr.f32.vlgmr.msra.gmra.mxu1 %v2302_v49  ;;  %10499 = vmatprep.subr.mxu0 %v11009_v1 }
 0x11f   : > { %10517 = vmatpush3.msra.mxu1 %v2796_v63  ;;  %10520 = vmatprep.mubr.msk.f32.mxu1 %vm11010_vm1, %v11009_v1  ;;  %v3223_v48 = vand.u32 4294901760, %v3222_v44  ;;  %v3626_v63 = vld [vmem:[%s16002_s14 + $0x38] sm:$0xff] }
 0x120   : > { %10492 = vmatmul.mubr.f32.vlgmr.msra.gmra.mxu0 %v2303_v51  ;;  %10518 = vmatprep.subr.mxu1 %v11009_v1  ;;  %v11515_v3 = vunpack.c.l.bf16 %v3626_v63 }
 0x121   : > { %10519 = vmatpush3.msra.mxu1 %v2802_v2  ;;  %10500 = vmatpush3.msra.mxu0 %v2345_v45  ;;  %v11513_v2 = vunpack.c.h.bf16 %v3626_v63 }
 0x122   : > { %10530 = vmatprep.subr.mxu1 %v11009_v1  ;;  %10501 = vmatprep.mubr.msk.f32.mxu0 %vm11010_vm1, %v11009_v1  ;;  %v11529_v9 = vsub.f32 %v11515_v3, %v11515_v3 }
 0x123   : > { %10509 = vmatprep.subr.mxu0 %v11009_v1 }
 0x124   : > { %10502 = vmatmul.mubr.f32.vlgmr.msra.gmra.mxu0 %v2302_v49  ;;  %v3224_v49 = vsub.f32 %v3222_v44, %v3223_v48 }
 0x125   : > { %10510 = vmatpush3.msra.mxu0 %v11393_v53  ;;  %10513 = vmatprep.mubr.msk.f32.mxu0 %vm11010_vm1, %v11009_v1 }
 0x126   : > { %10511 = vmatprep.subr.mxu0 %v11009_v1  ;;  %v3225_v50 = vand.u32 4294901760, %v3224_v49  ;;  %v3620_v49 = vld [vmem:[%s16002_s14 + $0x8] sm:$0xff] }
 0x127   : > { %10512 = vmatpush3.msra.mxu0 %v11402_v56 }
 0x128   : > { %10523 = vmatprep.subr.mxu0 %v11009_v1 }
 0x16d   : > { %v2230_v54 = vpop.permute.xlu1 %2229 }
 0x1c8   : > { %v1925_v5 = vpop.f32.mrf.mxu1 }
 0x1ca   : > { %v10458_v6 = vpop.f32.mrf.mxu1 }
 0x1cb   : > { %v11522_v6 = vsub.f32 %v11513_v2, %v11513_v2 }
 0x1cc   : > { %v2073_v7 = vpop.f32.mrf.mxu1 }
 0x1ce   : > { %v10468_v8 = vpop.f32.mrf.mxu1 }
 0x1d0   : > { %v1849_v10 = vpop.f32.mrf.mxu0  ;;  %v2219_v11 = vpop.f32.mrf.mxu1 }
 0x1d1   : > { %v1926_v15 = vadd.f32 %v1925_v5, %v1849_v10  ;;  %v11531_v10 = vunpack.c.l.bf16 %v3625_v4 }
 0x1d2   : > { %v10453_v13 = vpop.f32.mrf.mxu0  ;;  %v10478_v14 = vpop.f32.mrf.mxu1 }
 0x1d3   : > { %v3740_v13 = vand.u32 4294901760, %v11522_v6  ;;  %v11548_v19 = vsub.f32 %v11531_v10, %v11531_v10 }
 0x1d4   : > { %v1999_v16 = vpop.f32.mrf.mxu0  ;;  %v2384_v51 = vpop.f32.mrf.mxu1 }
 0x1d5   : > { %v2000_v18 = vadd.f32 %v1999_v16, %v1926_v15 }
 0x1d6   : > { %v10463_v20 = vpop.f32.mrf.mxu0  ;;  %v10488_v52 = vpop.f32.mrf.mxu1 }
 0x1d7   : > { %v2074_v22 = vadd.f32 %v2073_v7, %v2000_v18  ;;  %v11524_v7 = vunpack.c.h.bf16 %v3625_v4  ;;  %v3745_v18 = vand.u32 4294901760, %v11529_v9  ;;  %v11654_v4 = vunpack.c.h.bf16 %v3620_v49 }
 0x1d8   : > { %v2147_v23 = vpop.f32.mrf.mxu0 }
 0x1d9   : > { %v2148_v25 = vadd.f32 %v2147_v23, %v2074_v22  ;;  %v11540_v14 = vsub.f32 %v11524_v7, %v11524_v7  ;;  %v3741_v23 = vsub.f32 %v11522_v6, %v3740_v13 }
 0x1da   : > { %v10473_v27 = vpop.f32.mrf.mxu0 }
 0x1db   : > { %v2220_v28 = vadd.f32 %v2219_v11, %v2148_v25  ;;  %v3624_v11 = vld [vmem:[%s16002_s14 + $0x28] sm:$0xff]  ;;  %v3755_v27 = vand.u32 4294901760, %v11548_v19 }
 0x1dc   : > { %v11542_v15 = vunpack.c.h.bf16 %v3624_v11  ;;  %v11550_v20 = vunpack.c.l.bf16 %v3624_v11 }
 0x1dd   : > { %v11458_v31 = vadd.f32 %v2220_v28, %v11365_v40 }
 0x1de   : > { %v11564_v25 = vsub.f32 %v11542_v15, %v11542_v15  ;;  %v11573_v28 = vsub.f32 %v11550_v20, %v11550_v20 }
 0x1df   : > { %16543 = vst [vmem:[#allocation3_spill] sm:$0xff] %v11458_v31  ;;  %9716 = vst.msk [vmem:[%s11185_s1 + $0x18] sm:$0xff] %vm1304_vm2, %v11458_v31  ;;  %v2687_v34 = vsel %vm1304_vm2, %v11458_v31, 0 }
 0x1e0   : > { %v2754_v35 = vand.u32 4294901760, %v2687_v34 }
 0x1e2   : > { %v2755_v39 = vsub.f32 %v2687_v34, %v2754_v35  ;;  %10521 = vmatmul.mubr.f32.vlgmr.msra.gmra.mxu1 %v2754_v35  ;;  %v3760_v34 = vand.u32 4294901760, %v11564_v25 }
 0x1e3   : > { %10531 = vmatpush3.msra.mxu1 %v11393_v53  ;;  %10534 = vmatprep.mubr.msk.f32.mxu1 %vm11010_vm1, %v11009_v1 }
 0x1e4   : > { %10532 = vmatprep.subr.mxu1 %v11009_v1  ;;  %v2756_v40 = vand.u32 4294901760, %v2755_v39  ;;  %v3761_v42 = vsub.f32 %v11564_v25, %v3760_v34 }
 0x1e5   : > { %10533 = vmatpush3.msra.mxu1 %v11402_v56 }
 0x1e6   : > { %10535 = vmatmul.mubr.f32.vlgmr.msra.gmra.mxu1 %v2756_v40  ;;  %10544 = vmatprep.subr.mxu1 %v11009_v1  ;;  %v2757_v43 = vsub.f32 %v2755_v39, %v2756_v40  ;;  %v3621_v40 = vld [vmem:[%s16002_s14 + $0x10] sm:$0xff] }
 0x1e7   : > { %10545 = vmatpush3.msra.mxu1 %v11393_v53  ;;  %10548 = vmatprep.mubr.msk.f32.mxu1 %vm11010_vm1, %v11009_v1  ;;  %v2532_v53 = vpop.f32.mrf.mxu1 }
 0x1e8   : > { %10546 = vmatprep.subr.mxu1 %v11009_v1  ;;  %v2758_v45 = vand.u32 4294901760, %v2757_v43 }
 0x1e9   : > { %10547 = vmatpush3.msra.mxu1 %v11402_v56  ;;  %v10498_v56 = vpop.f32.mrf.mxu1 }
 0x1ea   : > { %10514 = vmatmul.mubr.f32.vlgmr.msra.gmra.mxu0 %v2758_v45  ;;  %10549 = vmatmul.mubr.f32.vlgmr.msra.gmra.mxu1 %v2754_v35 }
 0x1eb   : > { %10524 = vmatpush3.msra.mxu0 %v11400_v55  ;;  %10527 = vmatprep.mubr.msk.f32.mxu0 %vm11010_vm1, %v11009_v1  ;;  %v2308_v55 = vpop.f32.mrf.mxu0 }
 0x1ec   : > { %10525 = vmatprep.subr.mxu0 %v11009_v1  ;;  %3267 = vmatprep.subr.mxu1 %v3266_v46  ;;  %v2309_v57 = vadd.f32 %v2308_v55, %v2230_v54 }
 0x1ed   : > { %10526 = vmatpush3.msra.mxu0 %v11408_v59  ;;  %3273 = vmatpush1.msra.mxu1 %v3272_v47  ;;  %v2678_v59 = vpop.f32.mrf.mxu1 }
 0x1ee   : > { %10537 = vmatprep.subr.mxu0 %v11009_v1  ;;  %10528 = vmatmul.mubr.f32.vlgmr.msra.gmra.mxu0 %v2755_v39  ;;  %v2385_v60 = vadd.f32 %v2384_v51, %v2309_v57  ;;  %v11593_v39 = vsub.f32 %v11575_v29, %v11575_v29  ;;  %v11632_v57 = vunpack.c.h.bf16 %v3621_v40 }
 0x1ef   : > { %10538 = vmatpush3.msra.mxu0 %v2794_v58  ;;  %10541 = vmatprep.mubr.msk.f32.mxu0 %vm11010_vm1, %v11009_v1  ;;  %v10483_v58 = vpop.f32.mrf.mxu0 }
 0x1f0   : > { %10539 = vmatprep.subr.mxu0 %v11009_v1  ;;  %3306 = vmatprep.mubr.f32.mxu1 %v11009_v1  ;;  %v3775_v47 = vand.u32 4294901760, %v11593_v39 }
 0x1f1   : > { %10540 = vmatpush3.msra.mxu0 %v2800_v62  ;;  %3308 = vmatmul.mubr.f32.vlgmr.msra.gmra.mxu1 %v3221_v38  ;;  %v2458_v61 = vpop.f32.mrf.mxu0  ;;  %v10508_v62 = vpop.f32.mrf.mxu1 }
 0x1f2   : > { %10542 = vmatmul.mubr.f32.vlgmr.msra.gmra.mxu0 %v2754_v35  ;;  %3185 = vmatprep.subr.mxu0 %v11449_v24  ;;  %v2459_v0 = vadd.f32 %v2458_v61, %v2385_v60  ;;  %v11585_v35 = vunpack.c.h.bf16 %v3623_v21  ;;  %v3776_v55 = vsub.f32 %v11593_v39, %v3775_v47  ;;  %v11643_v61 = vunpack.c.l.bf16 %v3620_v49  ;;  %v3619_v62 = vld [vmem:[%s16002_s14] sm:$0xff] }
 0x1f3   : > { %3187 = vmatpush1.msra.mxu0 %v11451_v26  ;;  %3220 = vmatprep.mubr.f32.mxu0 %v11009_v1 }
 0x1f4   : > { %3346 = vmatprep.subr.mxu0 %v3263_v30  ;;  %3422 = vmatprep.subr.mxu1 %v11449_v24  ;;  %v2533_v5 = vadd.f32 %v2532_v53, %v2459_v0  ;;  %v3622_v30 = vld [vmem:[%s16002_s14 + $0x18] sm:$0xff]  ;;  %v11603_v43 = vsub.f32 %v11585_v35, %v11585_v35  ;;  %v11623_v53 = vunpack.c.l.bf16 %v3621_v40  ;;  %v3777_v63 = vand.u32 4294901760, %v3776_v55 }
 0x1f5   : > { %3424 = vmatpush1.msra.mxu1 %v11451_v26  ;;  %3457 = vmatprep.mubr.f32.mxu1 %v11009_v1 }
 0x1f6   : > { %3226 = vmatmul.mubr.f32.vlgmr.msra.gmra.mxu0 %v3225_v50  ;;  %3461 = vmatmul.mubr.f32.vlgmr.msra.gmra.mxu1 %v3223_v48  ;;  %v11612_v48 = vunpack.c.h.bf16 %v3622_v30  ;;  %v3762_v50 = vand.u32 4294901760, %v3761_v42  ;;  %v3770_v51 = vand.u32 4294901760, %v11603_v43  ;;  %v11641_v60 = vsub.f32 %v11623_v53, %v11623_v53 }
 0x1f7   : > { %3349 = vmatpush1.msra.mxu0 %v11461_v32  ;;  %3382 = vmatprep.mubr.f32.mxu0 %v11009_v1  ;;  %v3742_v32 = vand.u32 4294901760, %v3741_v23  ;;  %v11672_v23 = vsub.f32 %v11654_v4, %v11654_v4 }
 0x1f8   : > { %3500 = vmatprep.subr.mxu0 %v3264_v36  ;;  %3576 = vmatprep.subr.mxu1 %v11449_v24  ;;  %v3750_v24 = vand.u32 4294901760, %v11540_v14  ;;  %v11630_v56 = vsub.f32 %v11612_v48, %v11612_v48  ;;  %v3771_v58 = vsub.f32 %v11603_v43, %v3770_v51  ;;  %v3795_v11 = vand.u32 4294901760, %v11641_v60 }
 0x1f9   : > { %3578 = vmatpush1.msra.mxu1 %v11451_v26  ;;  %3611 = vmatprep.mubr.f32.mxu1 %v11009_v1  ;;  %v3746_v26 = vsub.f32 %v11529_v9, %v3745_v18 }
 0x1fa   : > { %3385 = vmatmul.mubr.f32.vlgmr.msra.gmra.mxu0 %v3222_v44  ;;  %3613 = vmatmul.mubr.f32.vlgmr.msra.gmra.mxu1 %v3221_v38  ;;  %v3751_v33 = vsub.f32 %v11540_v14, %v3750_v24  ;;  %v11605_v44 = vunpack.c.l.bf16 %v3622_v30  ;;  %v3780_v0 = vand.u32 4294901760, %v11630_v56 }
 0x1fb   : > { %3504 = vmatpush1.msra.mxu0 %v3270_v37  ;;  %3537 = vmatprep.mubr.f32.mxu0 %v11009_v1  ;;  %v3747_v36 = vand.u32 4294901760, %v3746_v26  ;;  %v3756_v37 = vsub.f32 %v11548_v19, %v3755_v27  ;;  %v11674_v26 = vunpack.c.l.bf16 %v3619_v62 }
 0x1fc   : > { %3851 = vmatprep.mubr.f32.mxu1 %v11009_v1  ;;  %3663 = vmatprep.subr.mxu0 %v11513_v2  ;;  %v3752_v41 = vand.u32 4294901760, %v3751_v33  ;;  %v11621_v52 = vsub.f32 %v11605_v44, %v11605_v44 }
 0x1fd   : > { %3743 = vmatprep.subr.mxu1 %v3742_v32  ;;  %v3757_v45 = vand.u32 4294901760, %v3756_v37  ;;  %v3796_v32 = vsub.f32 %v11641_v60, %v3795_v11  ;;  %v11690_v42 = vsub.f32 %v11674_v26, %v11674_v26 }
 0x1fe   : > { %3539 = vmatmul.mubr.f32.vlgmr.msra.gmra.mxu0 %v3221_v38  ;;  %v3765_v38 = vand.u32 4294901760, %v11573_v28  ;;  %3748 = vmatpush1.msra.mxu1 %v3747_v36  ;;  %v11681_v36 = vunpack.c.h.bf16 %v3619_v62 }
 0x1ff   : > { %3711 = vmatprep.mubr.f32.mxu0 %v11009_v1  ;;  %v10493_v1 = vpop.f32.mrf.mxu0  ;;  %3664 = vmatpush1.msra.mxu0 %v11515_v3  ;;  %v16013_v55 = vand.u32 4294901760, %v11690_v42 }
 0x200   : > { %3665 = vmatprep.subr.mxu0 %v11524_v7  ;;  %v3766_v46 = vsub.f32 %v11573_v28, %v3765_v38  ;;  %3753 = vmatprep.subr.mxu1 %v3752_v41  ;;  %v11652_v1 = vsub.f32 %v11632_v57, %v11632_v57  ;;  %v16015_v41 = vand.u32 4294901760, %v11672_v23  ;;  %v11697_v49 = vsub.f32 %v11681_v36, %v11681_v36 }
 0x201   : > { %v2606_v8 = vpop.f32.mrf.mxu0  ;;  %3666 = vmatpush1.msra.mxu0 %v11531_v10  ;;  %3758 = vmatpush1.msra.mxu1 %v3757_v45  ;;  %v3797_v45 = vand.u32 4294901760, %v3796_v32 }
 0x202   : > { %v2607_v12 = vadd.f32 %v2606_v8, %v2533_v5  ;;  %3667 = vmatprep.subr.mxu0 %v11542_v15  ;;  %v3767_v54 = vand.u32 4294901760, %v3766_v46  ;;  %3763 = vmatprep.subr.mxu1 %v3762_v50  ;;  %v3772_v5 = vand.u32 4294901760, %v3771_v58  ;;  %v3790_v21 = vand.u32 4294901760, %v11652_v1 }
 0x203   : > { %v10503_v16 = vpop.f32.mrf.mxu0  ;;  %3668 = vmatpush1.msra.mxu0 %v11550_v20  ;;  %v16016_v62 = vand.u32 4294901760, %v11697_v49 }
 0x204   : > { %v11556_v22 = vadd.f32 %v2678_v59, %v2607_v12  ;;  %3669 = vmatprep.subr.mxu0 %v11585_v35  ;;  %v3785_v59 = vand.u32 4294901760, %v11621_v52  ;;  %3768 = vmatpush1.msra.mxu1 %v3767_v54  ;;  %v11663_v12 = vsub.f32 %v11643_v61, %v11643_v61  ;;  %v3781_v16 = vsub.f32 %v11630_v56, %v3780_v0 }
 0x205   : > { %3670 = vmatpush1.msra.mxu0 %v11575_v29  ;;  %3773 = vmatprep.subr.mxu1 %v3772_v5  ;;  %v3791_v40 = vsub.f32 %v11652_v1, %v3790_v21  ;;  %v3801_v54 = vsub.f32 %v11672_v23, %v16015_v41  ;;  %v3816_v5 = vsub.f32 %v11690_v42, %v16013_v55 }
 0x206   : > { %3671 = vmatprep.subr.mxu0 %v11612_v48  ;;  %v3786_v8 = vsub.f32 %v11621_v52, %v3785_v59  ;;  %v16014_v33 = vand.u32 4294901760, %v11663_v12  ;;  %3778 = vmatpush1.msra.mxu1 %v3777_v63  ;;  %v3782_v37 = vand.u32 4294901760, %v3781_v16 }
 0x207   : > { %3672 = vmatpush1.msra.mxu0 %v11605_v44  ;;  %v3792_v50 = vand.u32 4294901760, %v3791_v40  ;;  %v3802_v63 = vand.u32 4294901760, %v3801_v54  ;;  %v3817_v16 = vand.u32 4294901760, %v3816_v5 }
 0x208   : > { %3673 = vmatprep.subr.mxu0 %v11632_v57  ;;  %v3787_v30 = vand.u32 4294901760, %v3786_v8  ;;  %v3806_v46 = vsub.f32 %v11663_v12, %v16014_v33  ;;  %3783 = vmatprep.subr.mxu1 %v3782_v37  ;;  %v3811_v8 = vsub.f32 %v11697_v49, %v16016_v62 }
 0x209   : > { %3674 = vmatpush1.msra.mxu0 %v11623_v53 }
 0x20a   : > { %3675 = vmatprep.subr.mxu0 %v11654_v4  ;;  %3788 = vmatpush1.msra.mxu1 %v3787_v30  ;;  %v3807_v58 = vand.u32 4294901760, %v3806_v46  ;;  %v3812_v30 = vand.u32 4294901760, %v3811_v8 }
 0x20b   : > { %3676 = vmatpush1.msra.mxu0 %v11643_v61  ;;  %3793 = vmatprep.subr.mxu1 %v3792_v50 }
 0x20c   : > { %3677 = vmatprep.subr.mxu0 %v11681_v36  ;;  %3798 = vmatpush1.msra.mxu1 %v3797_v45 }
 0x20d   : > { %3678 = vmatpush1.msra.mxu0 %v11674_v26  ;;  %3803 = vmatprep.subr.mxu1 %v3802_v63 }
 0x20e   : > { %3876 = vmatprep.subr.mxu0 %v11522_v6  ;;  %3808 = vmatpush1.msra.mxu1 %v3807_v58 }
 0x20f   : > { %3813 = vmatprep.subr.mxu1 %v3812_v30 }
 0x210   : > { %3818 = vmatpush1.msra.mxu1 %v3817_v16 }
 0x211   : > { %3964 = vmatprep.subr.mxu1 %v11513_v2 }
 0x2a2   : > { %v2839_v32 = vpop.f32.mrf.mxu1 }
 0x2a4   : > { %v10522_v37 = vpop.f32.mrf.mxu1 }
 0x2a6   : > { %v2986_v40 = vpop.f32.mrf.mxu1 }
 0x2a8   : > { %v10536_v46 = vpop.f32.mrf.mxu1 }
 0x2a9   : > { %v4245_v46 = vld [vmem:[%s16005_s17 + $0x12c] sm:$0xff] }
 0x2aa   : > { %v2760_v50 = vpop.f32.mrf.mxu0  ;;  %v3132_v54 = vpop.f32.mrf.mxu1 }
 0x2ab   : > { %v2840_v33 = vadd.f32 %v2839_v32, %v2760_v50  ;;  %v4242_v50 = vld [vmem:[%s16005_s17 + $0x118] sm:$0xff] }
 0x2ac   : > { %v10515_v45 = vpop.f32.mrf.mxu0  ;;  %v10550_v55 = vpop.f32.mrf.mxu1 }
 0x2ad   : > { %v11767_v45 = vunpack.c.l.bf16 %v4245_v46 }
 0x2ae   : > { %v2913_v41 = vpop.f32.mrf.mxu0 }
 0x2af   : > { %v2914_v63 = vadd.f32 %v2913_v41, %v2840_v33  ;;  %v11730_v41 = vld [vmem:[%s11185_s1 + $0x28] sm:$0xff] }
 0x2b0   : > { %v10529_v5 = vpop.f32.mrf.mxu0 }
 0x2b1   : > { %v2987_v58 = vadd.f32 %v2986_v40, %v2914_v63  ;;  %v4239_v63 = vld [vmem:[%s16005_s17 + $0x104] sm:$0xff]  ;;  %v11774_v5 = vunpack.c.h.bf16 %v4242_v50 }
 0x2b2   : > { %v3061_v8 = vpop.f32.mrf.mxu0 }
 0x2b3   : > { %v3062_v30 = vadd.f32 %v3061_v8, %v2987_v58  ;;  %v11778_v58 = vunpack.c.l.bf16 %v4242_v50  ;;  %v11789_v8 = vunpack.c.h.bf16 %v4239_v63 }
 0x2b4   : > { %v10543_v16 = vpop.f32.mrf.mxu0 }
 0x2b5   : > { %v3133_v62 = vadd.f32 %v3132_v54, %v3062_v30  ;;  %v11763_v54 = vunpack.c.h.bf16 %v4245_v46  ;;  %v11797_v30 = vunpack.c.l.bf16 %v4239_v63  ;;  %v11806_v16 = vsub.f32 %v11774_v5, %v11774_v5  ;;  %v4227_v63 = vld [vmem:[%s16005_s17 + $0xb4] sm:$0xff] }
 0x2b7   : > { %v11715_v37 = vadd.f32 %v3133_v62, %v11556_v22  ;;  %16545 = vst [vmem:[#allocation5_spill] sm:$0xff] %v11763_v54  ;;  %v11836_v50 = vsub.f32 %v11797_v30, %v11797_v30  ;;  %v16032_v6 = vand.u32 4294901760, %v11806_v16 }
 0x2b9   : > { %16544 = vst [vmem:[#allocation4_spill] sm:$0xff] %v11715_v37  ;;  %9715 = vst.msk [vmem:[%s11185_s1 + $0x10] sm:$0xff] %vm3643_vm6, %v11715_v37  ;;  %v3645_v55 = vsel %vm3643_vm6, %v11715_v37, 0 }
 0x2ba   : > { %v11722_v32 = vand.u32 4294901760, %v3645_v55 }
 0x2bc   : > { %v11725_v33 = vsub.f32 %v3645_v55, %v11722_v32  ;;  %3853 = vmatmul.mubr.f32.vlgmr.msra.gmra.mxu1 %v11722_v32  ;;  %v11814_v55 = vsub.f32 %v11778_v58, %v11778_v58 }
 0x2bd   : > { %3965 = vmatpush1.msra.mxu1 %v11515_v3  ;;  %4012 = vmatprep.mubr.f32.mxu1 %v11730_v41 }
 0x2be   : > { %3966 = vmatprep.subr.mxu1 %v11524_v7  ;;  %v3714_v22 = vand.u32 4294901760, %v11725_v33 }
 0x2bf   : > { %3967 = vmatpush1.msra.mxu1 %v11531_v10 }
 0x2c0   : > { %3968 = vmatprep.subr.mxu1 %v11542_v15  ;;  %v3715_v62 = vsub.f32 %v11725_v33, %v3714_v22 }
 0x2c1   : > { %3969 = vmatpush1.msra.mxu1 %v11550_v20 }
 0x2c2   : > { %3970 = vmatprep.subr.mxu1 %v11585_v35  ;;  %v3716_v40 = vand.u32 4294901760, %v3715_v62 }
 0x2c3   : > { %3971 = vmatpush1.msra.mxu1 %v11575_v29 }
 0x2c4   : > { %3972 = vmatprep.subr.mxu1 %v11612_v48  ;;  %3717 = vmatmul.mubr.f32.vlgmr.msra.gmra.mxu0 %v3716_v40 }
 0x2c5   : > { %3878 = vmatpush1.msra.mxu0 %v11529_v9  ;;  %3973 = vmatpush1.msra.mxu1 %v11605_v44 }
 0x2c6   : > { %3880 = vmatprep.subr.mxu0 %v11540_v14  ;;  %3974 = vmatprep.subr.mxu1 %v11632_v57 }
 0x2c7   : > { %3882 = vmatpush1.msra.mxu0 %v11548_v19  ;;  %3975 = vmatpush1.msra.mxu1 %v11623_v53 }
 0x2c8   : > { %3884 = vmatprep.subr.mxu0 %v11564_v25  ;;  %3976 = vmatprep.subr.mxu1 %v11654_v4  ;;  %v4549_v25 = vsub.f32 %v11806_v16, %v16032_v6 }
 0x2c9   : > { %3886 = vmatpush1.msra.mxu0 %v11573_v28  ;;  %3977 = vmatpush1.msra.mxu1 %v11643_v61 }
 0x2ca   : > { %3888 = vmatprep.subr.mxu0 %v11603_v43  ;;  %3978 = vmatprep.subr.mxu1 %v11681_v36 }
 0x2cb   : > { %3890 = vmatpush1.msra.mxu0 %v11593_v39  ;;  %3979 = vmatpush1.msra.mxu1 %v11674_v26 }
 0x2cc   : > { %3892 = vmatprep.subr.mxu0 %v11630_v56  ;;  %4016 = vmatmul.mubr.f32.vlgmr.msra.gmra.mxu1 %v3714_v22 }
 0x2cd   : > { %4142 = vmatprep.subr.mxu1 %v11513_v2  ;;  %3894 = vmatpush1.msra.mxu0 %v11621_v52  ;;  %v4236_v2 = vld [vmem:[%s16005_s17 + $0xf0] sm:$0xff] }
 0x2ce   : > { %4143 = vmatpush1.msra.mxu1 %v11515_v3  ;;  %3896 = vmatprep.subr.mxu0 %v11652_v1  ;;  %v11787_v3 = vsub.f32 %v11763_v54, %v11763_v54  ;;  %v11816_v22 = vunpack.c.l.bf16 %v4236_v2 }
 0x2cf   : > { %4144 = vmatprep.subr.mxu1 %v11524_v7  ;;  %3898 = vmatpush1.msra.mxu0 %v11641_v60  ;;  %v11795_v7 = vsub.f32 %v11767_v45, %v11767_v45  ;;  %v16549_v60 = vand.u32 4294901760, %v11663_v12 }
 0x2d0   : > { %4145 = vmatpush1.msra.mxu1 %v11531_v10  ;;  %3900 = vmatprep.subr.mxu0 %v11672_v23  ;;  %16546 = vst [vmem:[#allocation6_spill] sm:$0xff] %v11787_v3  ;;  %v4233_v10 = vld [vmem:[%s16005_s17 + $0xdc] sm:$0xff]  ;;  %v16037_v62 = vand.u32 4294901760, %v11787_v3 }
 0x2d1   : > { %4146 = vmatprep.subr.mxu1 %v11542_v15  ;;  %3902 = vmatpush1.msra.mxu0 %v11663_v12  ;;  %v11808_v15 = vunpack.c.h.bf16 %v4236_v2  ;;  %v11828_v40 = vunpack.c.h.bf16 %v4233_v10  ;;  %v16033_v46 = vand.u32 4294901760, %v11795_v7  ;;  %v16031_v2 = vand.u32 4294901760, %v11814_v55 }
 0x2d2   : > { %4147 = vmatpush1.msra.mxu1 %v11550_v20  ;;  %3904 = vmatprep.subr.mxu0 %v11697_v49  ;;  %v4230_v20 = vld [vmem:[%s16005_s17 + $0xc8] sm:$0xff] }
 0x2d3   : > { %4148 = vmatprep.subr.mxu1 %v11585_v35  ;;  %3906 = vmatpush1.msra.mxu0 %v11690_v42  ;;  %v11826_v35 = vsub.f32 %v11789_v8, %v11789_v8  ;;  %v11861_v9 = vunpack.c.l.bf16 %v4230_v20  ;;  %v4544_v19 = vsub.f32 %v11795_v7, %v16033_v46  ;;  %v4554_v28 = vsub.f32 %v11814_v55, %v16031_v2 }
 0x2d4   : > { %3939 = vmatprep.mubr.f32.mxu0 %v11730_v41  ;;  %4149 = vmatpush1.msra.mxu1 %v11575_v29  ;;  %v11838_v29 = vunpack.c.l.bf16 %v4233_v10  ;;  %v11887_v10 = vunpack.c.l.bf16 %v4227_v63 }
 0x2d5   : > { %3942 = vmatmul.mubr.f32.vlgmr.msra.gmra.mxu0 %v11725_v33  ;;  %4040 = vmatprep.subr.mxu0 %v3740_v13  ;;  %v11849_v13 = vsub.f32 %v11808_v15, %v11808_v15  ;;  %v11851_v33 = vunpack.c.h.bf16 %v4230_v20  ;;  %v16030_v14 = vand.u32 4294901760, %v11826_v35 }
 0x2d6   : > { %4150 = vmatprep.subr.mxu1 %v11612_v48  ;;  %4043 = vmatpush1.msra.mxu0 %v3745_v18  ;;  %v11859_v48 = vsub.f32 %v11816_v22, %v11816_v22  ;;  %v4539_v18 = vsub.f32 %v11787_v3, %v16037_v62 }
 0x2d7   : > { %4151 = vmatpush1.msra.mxu1 %v11605_v44  ;;  %4046 = vmatprep.subr.mxu0 %v3750_v24  ;;  %v11872_v24 = vsub.f32 %v11828_v40, %v11828_v40  ;;  %v11874_v44 = vunpack.c.h.bf16 %v4227_v63  ;;  %v4559_v43 = vsub.f32 %v11826_v35, %v16030_v14  ;;  %v4545_v63 = vand.u32 4294901760, %v4544_v19 }
 0x2d8   : > { %4152 = vmatprep.subr.mxu1 %v11632_v57  ;;  %4049 = vmatpush1.msra.mxu0 %v3755_v27  ;;  %v16017_v27 = vand.u32 4294901760, %v11836_v50  ;;  %v11885_v57 = vsub.f32 %v11838_v29, %v11838_v29  ;;  %v4540_v20 = vand.u32 4294901760, %v4539_v18  ;;  %v4550_v18 = vand.u32 4294901760, %v4549_v25 }
 0x2d9   : > { %4153 = vmatpush1.msra.mxu1 %v11623_v53  ;;  %4052 = vmatprep.subr.mxu0 %v3760_v34  ;;  %v16018_v34 = vand.u32 4294901760, %v11849_v13  ;;  %v11898_v53 = vsub.f32 %v11851_v33, %v11851_v33  ;;  %v4560_v25 = vand.u32 4294901760, %v4559_v43 }
 0x2da   : > { %4154 = vmatprep.subr.mxu1 %v11654_v4  ;;  %4055 = vmatpush1.msra.mxu0 %v3765_v38  ;;  %v16029_v38 = vand.u32 4294901760, %v11859_v48  ;;  %v11909_v4 = vsub.f32 %v11861_v9, %v11861_v9  ;;  %v4564_v39 = vsub.f32 %v11836_v50, %v16017_v27  ;;  %v4555_v27 = vand.u32 4294901760, %v4554_v28 }
 0x2db   : > { %4155 = vmatpush1.msra.mxu1 %v11643_v61  ;;  %4058 = vmatprep.subr.mxu0 %v3770_v51  ;;  %v16027_v51 = vand.u32 4294901760, %v11872_v24  ;;  %v11920_v61 = vsub.f32 %v11874_v44, %v11874_v44  ;;  %v16024_v19 = vand.u32 4294901760, %v11898_v53 }
 0x2dc   : > { %4156 = vmatprep.subr.mxu1 %v11681_v36  ;;  %4061 = vmatpush1.msra.mxu0 %v3775_v47  ;;  %v16025_v47 = vand.u32 4294901760, %v11885_v57  ;;  %v11930_v36 = vsub.f32 %v11887_v10, %v11887_v10  ;;  %v4574_v56 = vsub.f32 %v11859_v48, %v16029_v38 }
 0x2dd   : > { %4157 = vmatpush1.msra.mxu1 %v11674_v26  ;;  %4190 = vmatprep.mubr.f32.mxu1 %v11730_v41  ;;  %v4569_v26 = vsub.f32 %v11849_v13, %v16018_v34  ;;  %v4579_v34 = vsub.f32 %v11872_v24, %v16027_v51  ;;  %v16021_v52 = vand.u32 4294901760, %v11920_v61 }
 0x2de   : > { %16547 = vst [vmem:[#allocation7_spill] sm:$0xff] %v11930_v36  ;;  %4064 = vmatprep.subr.mxu0 %v3780_v0  ;;  %4192 = vmatmul.mubr.f32.vlgmr.msra.gmra.mxu1 %v11722_v32  ;;  %v16023_v0 = vand.u32 4294901760, %v11909_v4  ;;  %v16020_v1 = vand.u32 4294901760, %v11930_v36 }
 0x2df   : > { %4067 = vmatpush1.msra.mxu0 %v3785_v59  ;;  %4118 = vmatprep.mubr.f32.mxu0 %v11730_v41  ;;  %v4565_v59 = vand.u32 4294901760, %v4564_v39  ;;  %v4584_v41 = vsub.f32 %v11885_v57, %v16025_v47  ;;  %v4570_v28 = vand.u32 4294901760, %v4569_v26  ;;  %v4599_v39 = vsub.f32 %v11920_v61, %v16021_v52 }
 0x2e0   : > { %4070 = vmatprep.subr.mxu0 %v3790_v21  ;;  %4541 = vmatprep.subr.mxu1 %v4540_v20  ;;  %v16548_v21 = vand.u32 4294901760, %v11672_v23  ;;  %v4589_v20 = vsub.f32 %v11898_v53, %v16024_v19  ;;  %v4594_v43 = vsub.f32 %v11909_v4, %v16023_v0  ;;  %v4580_v23 = vand.u32 4294901760, %v4579_v34 }
 0x2e1   : > { %4073 = vmatpush1.msra.mxu0 %v3795_v11  ;;  %4546 = vmatpush1.msra.mxu1 %v4545_v63  ;;  %v4575_v11 = vand.u32 4294901760, %v4574_v56  ;;  %v16550_v63 = vand.u32 4294901760, %v11697_v49  ;;  %v4585_v12 = vand.u32 4294901760, %v4584_v41  ;;  %v4600_v26 = vand.u32 4294901760, %v4599_v39 }
 0x2e2   : > { %4076 = vmatprep.subr.mxu0 %v16548_v21  ;;  %4551 = vmatprep.subr.mxu1 %v4550_v18  ;;  %v16551_v18 = vand.u32 4294901760, %v11690_v42  ;;  %v4590_v49 = vand.u32 4294901760, %v4589_v20  ;;  %v4595_v34 = vand.u32 4294901760, %v4594_v43 }
 0x2e3   : > { %4079 = vmatpush1.msra.mxu0 %v16549_v60  ;;  %4556 = vmatpush1.msra.mxu1 %v4555_v27  ;;  %v4604_v27 = vsub.f32 %v11930_v36, %v16020_v1  ;;  %v4218_v60 = vld [vmem:[%s16005_s17 + $0x78] sm:$0xff] }
 0x2e4   : > { %4082 = vmatprep.subr.mxu0 %v16550_v63  ;;  %4561 = vmatprep.subr.mxu1 %v4560_v25  ;;  %v12025_v63 = vunpack.c.h.bf16 %v4218_v60 }
 0x2e5   : > { %4085 = vmatpush1.msra.mxu0 %v16551_v18  ;;  %4566 = vmatpush1.msra.mxu1 %v4565_v59  ;;  %v4605_v42 = vand.u32 4294901760, %v4604_v27  ;;  %v4221_v59 = vld [vmem:[%s16005_s17 + $0x8c] sm:$0xff]  ;;  %v12033_v18 = vunpack.c.l.bf16 %v4218_v60 }
 0x2e6   : > { %4120 = vmatmul.mubr.f32.vlgmr.msra.gmra.mxu0 %v11722_v32  ;;  %4571 = vmatprep.subr.mxu1 %v4570_v28  ;;  %v4224_v32 = vld [vmem:[%s16005_s17 + $0xa0] sm:$0xff]  ;;  %v12007_v21 = vunpack.c.h.bf16 %v4221_v59  ;;  %v12014_v20 = vunpack.c.l.bf16 %v4221_v59 }
 0x2e7   : > { %4576 = vmatpush1.msra.mxu1 %v4575_v11  ;;  %4456 = vmatprep.subr.mxu0 %v11763_v54  ;;  %v11996_v56 = vunpack.c.h.bf16 %v4224_v32  ;;  %v11998_v25 = vunpack.c.l.bf16 %v4224_v32  ;;  %v12056_v59 = vsub.f32 %v12033_v18, %v12033_v18 }
 0x2e8   : > { %4581 = vmatprep.subr.mxu1 %v4580_v23  ;;  %4457 = vmatpush1.msra.mxu0 %v11767_v45  ;;  %v12023_v43 = vsub.f32 %v12007_v21, %v12007_v21  ;;  %v12031_v39 = vsub.f32 %v12014_v20, %v12014_v20 }
 0x2e9   : > { %4586 = vmatpush1.msra.mxu1 %v4585_v12  ;;  %4458 = vmatprep.subr.mxu0 %v11774_v5  ;;  %v12005_v41 = vsub.f32 %v11996_v56, %v11996_v56  ;;  %v12012_v28 = vsub.f32 %v11998_v25, %v11998_v25  ;;  %v4215_v12 = vld [vmem:[%s16005_s17 + $0x64] sm:$0xff]  ;;  %16558 = vst [vmem:[#allocation14_spill] sm:$0xff] %v12056_v59  ;;  %v16035_v47 = vand.u32 4294901760, %v12056_v59 }
 0x2ea   : > { %4591 = vmatprep.subr.mxu1 %v4590_v49  ;;  %4459 = vmatpush1.msra.mxu0 %v11778_v58  ;;  %16554 = vst [vmem:[#allocation10_spill] sm:$0xff] %v12023_v43  ;;  %16555 = vst [vmem:[#allocation11_spill] sm:$0xff] %v12031_v39  ;;  %v16026_v49 = vand.u32 4294901760, %v12023_v43  ;;  %v16028_v32 = vand.u32 4294901760, %v12031_v39  ;;  %v12058_v60 = vunpack.c.l.bf16 %v4215_v12 }
 0x2eb   : > { %4596 = vmatpush1.msra.mxu1 %v4595_v34  ;;  %4460 = vmatprep.subr.mxu0 %v11789_v8  ;;  %16552 = vst [vmem:[#allocation8_spill] sm:$0xff] %v12005_v41  ;;  %16553 = vst [vmem:[#allocation9_spill] sm:$0xff] %v12012_v28  ;;  %v16019_v11 = vand.u32 4294901760, %v12005_v41  ;;  %v16022_v23 = vand.u32 4294901760, %v12012_v28  ;;  %v12045_v34 = vsub.f32 %v12025_v63, %v12025_v63 }
 0x2ec   : > { %4601 = vmatprep.subr.mxu1 %v4600_v26  ;;  %4461 = vmatpush1.msra.mxu0 %v11797_v30  ;;  %v12047_v26 = vunpack.c.h.bf16 %v4215_v12  ;;  %16559 = vst [vmem:[#allocation15_spill] sm:$0xff] %v12058_v60  ;;  %v4619_v52 = vsub.f32 %v12023_v43, %v16026_v49  ;;  %v4624_v19 = vsub.f32 %v12031_v39, %v16028_v32  ;;  %v4209_v49 = vld [vmem:[%s16005_s17 + $0x3c] sm:$0xff] }
 0x2ed   : > { %4606 = vmatpush1.msra.mxu1 %v4605_v42  ;;  %4462 = vmatprep.subr.mxu0 %v11808_v15  ;;  %v4609_v27 = vsub.f32 %v12005_v41, %v16019_v11  ;;  %16556 = vst [vmem:[#allocation12_spill] sm:$0xff] %v12045_v34  ;;  %v4614_v42 = vsub.f32 %v12012_v28, %v16022_v23  ;;  %v4212_v11 = vld [vmem:[%s16005_s17 + $0x50] sm:$0xff]  ;;  %v16034_v23 = vand.u32 4294901760, %v12045_v34 }
 0x2ee   : > { %4463 = vmatpush1.msra.mxu0 %v11816_v22  ;;  %16557 = vst [vmem:[#allocation13_spill] sm:$0xff] %v12047_v26  ;;  %v12070_v0 = vsub.f32 %v12047_v26, %v12047_v26  ;;  %v4620_v51 = vand.u32 4294901760, %v4619_v52  ;;  %v12089_v38 = vunpack.c.l.bf16 %v4212_v11  ;;  %v4625_v14 = vand.u32 4294901760, %v4624_v19  ;;  %v4206_v52 = vld [vmem:[%s16005_s17 + $0x28] sm:$0xff] }
 0x2ef   : > { %4464 = vmatprep.subr.mxu0 %v11828_v40  ;;  %v4610_v1 = vand.u32 4294901760, %v4609_v27  ;;  %v4615_v12 = vand.u32 4294901760, %v4614_v42  ;;  %v12079_v27 = vsub.f32 %v12058_v60, %v12058_v60  ;;  %v4629_v42 = vsub.f32 %v12045_v34, %v16034_v23 }
 0x2f0   : > { %4465 = vmatpush1.msra.mxu0 %v11838_v29  ;;  %16560 = vst [vmem:[#allocation16_spill] sm:$0xff] %v12070_v0  ;;  %v16036_v32 = vand.u32 4294901760, %v12070_v0  ;;  %16562 = vst [vmem:[#allocation18_spill] sm:$0xff] %v12089_v38  ;;  %v4634_v2 = vsub.f32 %v12056_v59, %v16035_v47  ;;  %v12095_v46 = vunpack.c.h.bf16 %v4212_v11  ;;  %v12105_v19 = vsub.f32 %v12089_v38, %v12089_v38 }
 0x2f1   : > { %4466 = vmatprep.subr.mxu0 %v11851_v33  ;;  %16561 = vst [vmem:[#allocation17_spill] sm:$0xff] %v12079_v27  ;;  %4611 = vmatprep.subr.mxu1 %v4610_v1  ;;  %v16038_v6 = vand.u32 4294901760, %v12079_v27  ;;  %v4630_v1 = vand.u32 4294901760, %v4629_v42  ;;  %v12116_v42 = vunpack.c.h.bf16 %v4209_v49 }
 0x2f2   : > { %4467 = vmatpush1.msra.mxu0 %v11861_v9  ;;  %4616 = vmatpush1.msra.mxu1 %v4615_v12  ;;  %16563 = vst [vmem:[#allocation19_spill] sm:$0xff] %v12095_v46  ;;  %v4639_v23 = vsub.f32 %v12070_v0, %v16036_v32  ;;  %16564 = vst [vmem:[#allocation20_spill] sm:$0xff] %v12105_v19  ;;  %v12107_v12 = vunpack.c.l.bf16 %v4209_v49  ;;  %v4635_v47 = vand.u32 4294901760, %v4634_v2  ;;  %v4203_v32 = vld [vmem:[%s16005_s17 + $0x14] sm:$0xff]  ;;  %v16042_v2 = vand.u32 4294901760, %v12105_v19 }
 0x2f3   : > { %4468 = vmatprep.subr.mxu0 %v11874_v44  ;;  %4621 = vmatprep.subr.mxu1 %v4620_v51  ;;  %v4644_v11 = vsub.f32 %v12079_v27, %v16038_v6  ;;  %v12114_v51 = vsub.f32 %v12095_v46, %v12095_v46  ;;  %16567 = vst [vmem:[#allocation23_spill] sm:$0xff] %v12116_v42  ;;  %v12127_v6 = vunpack.c.l.bf16 %v4206_v52  ;;  %v12157_v37 = vunpack.c.h.bf16 %v4203_v32 }
 0x2f4   : > { %4469 = vmatpush1.msra.mxu0 %v11887_v10  ;;  %16565 = vst [vmem:[#allocation21_spill] sm:$0xff] %v12107_v12  ;;  %4626 = vmatpush1.msra.mxu1 %v4625_v14  ;;  %v4640_v62 = vand.u32 4294901760, %v4639_v23  ;;  %v12125_v14 = vsub.f32 %v12107_v12, %v12107_v12  ;;  %v12133_v31 = vsub.f32 %v12116_v42, %v12116_v42 }
 0x2f5   : > { %4470 = vmatprep.subr.mxu0 %v11996_v56  ;;  %16566 = vst [vmem:[#allocation22_spill] sm:$0xff] %v12114_v51  ;;  %4631 = vmatprep.subr.mxu1 %v4630_v1  ;;  %16569 = vst [vmem:[#allocation25_spill] sm:$0xff] %v12127_v6  ;;  %v4645_v49 = vand.u32 4294901760, %v4644_v11  ;;  %v16049_v17 = vand.u32 4294901760, %v12114_v51  ;;  %v12135_v1 = vunpack.c.h.bf16 %v4206_v52  ;;  %v4654_v23 = vsub.f32 %v12105_v19, %v16042_v2  ;;  %v4200_v19 = vld [vmem:[%s16005_s17] sm:$0xff] }
 0x2f6   : > { %4471 = vmatpush1.msra.mxu0 %v11998_v25  ;;  %16568 = vst [vmem:[#allocation24_spill] sm:$0xff] %v12125_v14  ;;  %4636 = vmatpush1.msra.mxu1 %v4635_v47  ;;  %16570 = vst [vmem:[#allocation26_spill] sm:$0xff] %v12133_v31  ;;  %v12144_v47 = vsub.f32 %v12127_v6, %v12127_v6  ;;  %v12146_v11 = vunpack.c.l.bf16 %v4203_v32 }
 0x2f7   : > { %4472 = vmatprep.subr.mxu0 %v12007_v21  ;;  %16571 = vst [vmem:[#allocation27_spill] sm:$0xff] %v12135_v1  ;;  %4641 = vmatprep.subr.mxu1 %v4640_v62  ;;  %v4649_v52 = vsub.f32 %v12114_v51, %v16049_v17  ;;  %v12155_v2 = vsub.f32 %v12135_v1, %v12135_v1  ;;  %16575 = vst [vmem:[#allocation31_spill] sm:$0xff] %v12157_v37  ;;  %v4655_v27 = vand.u32 4294901760, %v4654_v23 }
 0x2f8   : > { %4473 = vmatpush1.msra.mxu0 %v12014_v20  ;;  %16572 = vst [vmem:[#allocation28_spill] sm:$0xff] %v12144_v47  ;;  %16573 = vst [vmem:[#allocation29_spill] sm:$0xff] %v12146_v11  ;;  %4646 = vmatpush1.msra.mxu1 %v4645_v49  ;;  %v16576_v49 = vand.u32 4294901760, %v12125_v14  ;;  %v12169_v62 = vsub.f32 %v12146_v11, %v12146_v11  ;;  %v16578_v51 = vand.u32 4294901760, %v12133_v31 }
 0x2f9   : > { %4474 = vmatprep.subr.mxu0 %v12025_v63  ;;  %16574 = vst [vmem:[#allocation30_spill] sm:$0xff] %v12155_v2  ;;  %v4650_v32 = vand.u32 4294901760, %v4649_v52  ;;  %v12178_v23 = vsub.f32 %v12157_v37, %v12157_v37 }
 0x2fa   : > { %4475 = vmatpush1.msra.mxu0 %v12033_v18  ;;  %v4664_v0 = vsub.f32 %v12125_v14, %v16576_v49  ;;  %16577 = vst [vmem:[#allocation32_spill] sm:$0xff] %v12169_v62  ;;  %v4659_v59 = vsub.f32 %v12133_v31, %v16578_v51  ;;  %v4293_v49 = vld [vmem:[%s16005_s17 + $0x26c] sm:$0xff]  ;;  %v16580_v14 = vand.u32 4294901760, %v12144_v47  ;;  %v12188_v51 = vunpack.c.l.bf16 %v4200_v19 }
 0x2fb   : > { %4476 = vmatprep.subr.mxu0 %v12047_v26  ;;  %16579 = vst [vmem:[#allocation33_spill] sm:$0xff] %v12178_v23  ;;  %4651 = vmatprep.subr.mxu1 %v4650_v32  ;;  %v16582_v31 = vand.u32 4294901760, %v12155_v2  ;;  %v12207_v32 = vunpack.c.l.bf16 %v4293_v49 }
 0x2fc   : > { %4477 = vmatpush1.msra.mxu0 %v12058_v60  ;;  %v4665_v17 = vand.u32 4294901760, %v4664_v0  ;;  %v4674_v52 = vsub.f32 %v12144_v47, %v16580_v14  ;;  %16581 = vst [vmem:[#allocation34_spill] sm:$0xff] %v12188_v51  ;;  %v4290_v0 = vld [vmem:[%s16005_s17 + $0x258] sm:$0xff]  ;;  %4656 = vmatpush1.msra.mxu1 %v4655_v27 }
 0x2fd   : > { %4478 = vmatprep.subr.mxu0 %v12095_v46  ;;  %v4669_v34 = vsub.f32 %v12155_v2, %v16582_v31  ;;  %16585 = vst [vmem:[#allocation37_spill] sm:$0xff] %v12207_v32 }
 0x2fe   : > { %4479 = vmatpush1.msra.mxu0 %v12089_v38  ;;  %v4675_v14 = vand.u32 4294901760, %v4674_v52  ;;  %v12216_v52 = vunpack.c.h.bf16 %v4293_v49 }
 0x2ff   : > { %4480 = vmatprep.subr.mxu0 %v12116_v42  ;;  %v4670_v31 = vand.u32 4294901760, %v4669_v34 }
 0x300   : > { %4481 = vmatpush1.msra.mxu0 %v12107_v12  ;;  %v16073_v12 = vand.u32 4294901760, %v12178_v23  ;;  %16587 = vst [vmem:[#allocation39_spill] sm:$0xff] %v12216_v52  ;;  %v12233_v2 = vsub.f32 %v12216_v52, %v12216_v52 }
 0x301   : > { %4482 = vmatprep.subr.mxu0 %v12135_v1  ;;  %v4660_v1 = vand.u32 4294901760, %v4659_v59  ;;  %v12205_v59 = vsub.f32 %v12188_v51, %v12188_v51 }
 0x302   : > { %4483 = vmatpush1.msra.mxu0 %v12127_v6  ;;  %v16070_v6 = vand.u32 4294901760, %v12169_v62  ;;  %16590 = vst [vmem:[#allocation42_spill] sm:$0xff] %v12233_v2 }
 0x303   : > { %4484 = vmatprep.subr.mxu0 %v12157_v37  ;;  %v12195_v37 = vunpack.c.h.bf16 %v4200_v19  ;;  %16584 = vst [vmem:[#allocation36_spill] sm:$0xff] %v12205_v59  ;;  %4661 = vmatprep.subr.mxu1 %v4660_v1  ;;  %v4679_v19 = vsub.f32 %v12178_v23, %v16073_v12  ;;  %v16080_v34 = vand.u32 4294901760, %v12205_v59  ;;  %v12225_v1 = vsub.f32 %v12207_v32, %v12207_v32 }
 0x304   : > { %4485 = vmatpush1.msra.mxu0 %v12146_v11  ;;  %v4684_v47 = vsub.f32 %v12169_v62, %v16070_v6  ;;  %v4287_v6 = vld [vmem:[%s16005_s17 + $0x244] sm:$0xff]  ;;  %4666 = vmatpush1.msra.mxu1 %v4665_v17  ;;  %v12227_v12 = vunpack.c.l.bf16 %v4290_v0  ;;  %v12235_v17 = vunpack.c.h.bf16 %v4290_v0 }
 0x305   : > { %16583 = vst [vmem:[#allocation35_spill] sm:$0xff] %v12195_v37  ;;  %v12214_v27 = vsub.f32 %v12195_v37, %v12195_v37  ;;  %4486 = vmatprep.subr.mxu0 %v12195_v37  ;;  %16588 = vst [vmem:[#allocation40_spill] sm:$0xff] %v12225_v1  ;;  %4671 = vmatprep.subr.mxu1 %v4670_v31  ;;  %v4680_v49 = vand.u32 4294901760, %v4679_v19  ;;  %v12246_v19 = vunpack.c.l.bf16 %v4287_v6  ;;  %v12257_v37 = vunpack.c.h.bf16 %v4287_v6 }
 0x306   : > { %v4685_v62 = vand.u32 4294901760, %v4684_v47  ;;  %16589 = vst [vmem:[#allocation41_spill] sm:$0xff] %v12227_v12  ;;  %4487 = vmatpush1.msra.mxu0 %v12188_v51  ;;  %16591 = vst [vmem:[#allocation43_spill] sm:$0xff] %v12235_v17  ;;  %4676 = vmatpush1.msra.mxu1 %v4675_v14  ;;  %v4694_v47 = vsub.f32 %v12205_v59, %v16080_v34  ;;  %v12244_v31 = vsub.f32 %v12227_v12, %v12227_v12  ;;  %v4284_v59 = vld [vmem:[%s16005_s17 + $0x230] sm:$0xff] }
 0x307   : > { %16586 = vst [vmem:[#allocation38_spill] sm:$0xff] %v12214_v27  ;;  %v16085_v23 = vand.u32 4294901760, %v12214_v27  ;;  %4488 = vmatprep.subr.mxu0 %v12216_v52  ;;  %16593 = vst [vmem:[#allocation45_spill] sm:$0xff] %v12246_v19  ;;  %4681 = vmatprep.subr.mxu1 %v4680_v49  ;;  %v12255_v34 = vsub.f32 %v12235_v17, %v12235_v17  ;;  %v16598_v52 = vand.u32 4294901760, %v12233_v2 }
 0x308   : > { %16592 = vst [vmem:[#allocation44_spill] sm:$0xff] %v12244_v31  ;;  %4489 = vmatpush2.msra.mxu0 %v12207_v32  ;;  %16595 = vst [vmem:[#allocation47_spill] sm:$0xff] %v12257_v37  ;;  %4686 = vmatpush1.msra.mxu1 %v4685_v62  ;;  %v4695_v49 = vand.u32 4294901760, %v4694_v47  ;;  %v16596_v32 = vand.u32 4294901760, %v12225_v1  ;;  %v12278_v47 = vsub.f32 %v12257_v37, %v12257_v37 }
 0x309   : > { %v4689_v0 = vsub.f32 %v12214_v27, %v16085_v23  ;;  %16594 = vst [vmem:[#allocation46_spill] sm:$0xff] %v12255_v34  ;;  %4490 = vmatprep.subr.mxu0 %v12235_v17  ;;  %v12269_v27 = vsub.f32 %v12246_v19, %v12246_v19  ;;  %v4699_v51 = vsub.f32 %v12233_v2, %v16598_v52  ;;  %v12288_v52 = vunpack.c.l.bf16 %v4284_v59 }
 0x30a   : > { %v4704_v23 = vsub.f32 %v12225_v1, %v16596_v32  ;;  %4491 = vmatpush2.msra.mxu0 %v12227_v12  ;;  %16599 = vst [vmem:[#allocation49_spill] sm:$0xff] %v12278_v47  ;;  %v4281_v32 = vld [vmem:[%s16005_s17 + $0x21c] sm:$0xff]  ;;  %v16600_v1 = vand.u32 4294901760, %v12244_v31  ;;  %v16602_v2 = vand.u32 4294901760, %v12255_v34  ;;  %v16109_v11 = vand.u32 4294901760, %v12278_v47 }
 0x30b   : > { %16597 = vst [vmem:[#allocation48_spill] sm:$0xff] %v12269_v27  ;;  %v4690_v6 = vand.u32 4294901760, %v4689_v0  ;;  %4492 = vmatprep.subr.mxu0 %v12257_v37  ;;  %v16106_v12 = vand.u32 4294901760, %v12269_v27  ;;  %16601 = vst [vmem:[#allocation50_spill] sm:$0xff] %v12288_v52  ;;  %v4700_v62 = vand.u32 4294901760, %v4699_v51  ;;  %v12295_v37 = vunpack.c.h.bf16 %v4284_v59 }
 0x30c   : > { %v4705_v14 = vand.u32 4294901760, %v4704_v23  ;;  %v4714_v0 = vsub.f32 %v12244_v31, %v16600_v1  ;;  %4493 = vmatpush2.msra.mxu0 %v12246_v19  ;;  %v4709_v17 = vsub.f32 %v12255_v34, %v16602_v2  ;;  %v4278_v23 = vld [vmem:[%s16005_s17 + $0x208] sm:$0xff]  ;;  %v12305_v51 = vsub.f32 %v12288_v52, %v12288_v52 }
 0x30d   : > { %4691 = vmatprep.subr.mxu1 %v4690_v6  ;;  %16603 = vst [vmem:[#allocation51_spill] sm:$0xff] %v12295_v37  ;;  %v4724_v31 = vsub.f32 %v12269_v27, %v16106_v12  ;;  %v12307_v6 = vunpack.c.l.bf16 %v4281_v32  ;;  %v4719_v59 = vsub.f32 %v12278_v47, %v16109_v11  ;;  %v4275_v12 = vld [vmem:[%s16005_s17 + $0x1f4] sm:$0xff]  ;;  %4494 = vmatprep.subr.mxu0 %v12295_v37  ;;  %v12327_v11 = vunpack.c.l.bf16 %v4278_v23 }
 0x30e   : > { %4696 = vmatpush1.msra.mxu1 %v4695_v49  ;;  %v4715_v1 = vand.u32 4294901760, %v4714_v0  ;;  %16604 = vst [vmem:[#allocation52_spill] sm:$0xff] %v12305_v51  ;;  %v4710_v2 = vand.u32 4294901760, %v4709_v17  ;;  %v12314_v49 = vsub.f32 %v12295_v37, %v12295_v37  ;;  %v12316_v0 = vunpack.c.h.bf16 %v4281_v32  ;;  %4495 = vmatpush2.msra.mxu0 %v12288_v52 }
 0x30f   : > { %16605 = vst [vmem:[#allocation53_spill] sm:$0xff] %v12307_v6  ;;  %4701 = vmatprep.subr.mxu1 %v4700_v62  ;;  %v4725_v27 = vand.u32 4294901760, %v4724_v31  ;;  %v16116_v17 = vand.u32 4294901760, %v12305_v51  ;;  %v12325_v62 = vsub.f32 %v12307_v6, %v12307_v6  ;;  %16609 = vst [vmem:[#allocation57_spill] sm:$0xff] %v12327_v11  ;;  %v4720_v32 = vand.u32 4294901760, %v4719_v59 }
 0x310   : > { %16606 = vst [vmem:[#allocation54_spill] sm:$0xff] %v12314_v49  ;;  %16607 = vst [vmem:[#allocation55_spill] sm:$0xff] %v12316_v0  ;;  %4706 = vmatpush2.msra.mxu1 %v4705_v14  ;;  %v16121_v47 = vand.u32 4294901760, %v12314_v49  ;;  %v12333_v34 = vsub.f32 %v12316_v0, %v12316_v0  ;;  %v12335_v14 = vunpack.c.h.bf16 %v4278_v23  ;;  %4496 = vmatprep.subr.mxu0 %v12316_v0  ;;  %v12346_v59 = vunpack.c.l.bf16 %v4275_v12 }
 0x311   : > { %16608 = vst [vmem:[#allocation56_spill] sm:$0xff] %v12325_v62  ;;  %4711 = vmatprep.subr.mxu1 %v4710_v2  ;;  %v4734_v31 = vsub.f32 %v12305_v51, %v16116_v17  ;;  %v12344_v2 = vsub.f32 %v12327_v11, %v12327_v11  ;;  %4497 = vmatpush2.msra.mxu0 %v12307_v6  ;;  %v12357_v37 = vunpack.c.h.bf16 %v4275_v12  ;;  %v4272_v51 = vld [vmem:[%s16005_s17 + $0x1e0] sm:$0xff]  ;;  %v16616_v6 = vand.u32 4294901760, %v12325_v62 }
 0x312   : > { %16610 = vst [vmem:[#allocation58_spill] sm:$0xff] %v12333_v34  ;;  %16611 = vst [vmem:[#allocation59_spill] sm:$0xff] %v12335_v14  ;;  %4716 = vmatpush2.msra.mxu1 %v4715_v1  ;;  %v4729_v23 = vsub.f32 %v12314_v49, %v16121_v47  ;;  %v12355_v17 = vsub.f32 %v12335_v14, %v12335_v14  ;;  %4498 = vmatprep.subr.mxu0 %v12335_v14  ;;  %v16618_v0 = vand.u32 4294901760, %v12333_v34 }
 0x313   : > { %16612 = vst [vmem:[#allocation60_spill] sm:$0xff] %v12344_v2  ;;  %16613 = vst [vmem:[#allocation61_spill] sm:$0xff] %v12346_v59  ;;  %4721 = vmatprep.subr.mxu1 %v4720_v32  ;;  %v4735_v32 = vand.u32 4294901760, %v4734_v31  ;;  %v4744_v47 = vsub.f32 %v12325_v62, %v16616_v6  ;;  %v12369_v49 = vsub.f32 %v12346_v59, %v12346_v59  ;;  %4499 = vmatpush2.msra.mxu0 %v12327_v11  ;;  %v4269_v6 = vld [vmem:[%s16005_s17 + $0x1cc] sm:$0xff] }
 0x314   : > { %16614 = vst [vmem:[#allocation62_spill] sm:$0xff] %v12355_v17  ;;  %16615 = vst [vmem:[#allocation63_spill] sm:$0xff] %v12357_v37  ;;  %4726 = vmatpush2.msra.mxu1 %v4725_v27  ;;  %v4730_v12 = vand.u32 4294901760, %v4729_v23  ;;  %v4739_v52 = vsub.f32 %v12333_v34, %v16618_v0  ;;  %v12378_v31 = vsub.f32 %v12357_v37, %v12357_v37  ;;  %4500 = vmatprep.subr.mxu0 %v12357_v37 }
 0x315   : > { %16617 = vst [vmem:[#allocation64_spill] sm:$0xff] %v12369_v49  ;;  %v4745_v1 = vand.u32 4294901760, %v4744_v47  ;;  %v16620_v62 = vand.u32 4294901760, %v12344_v2  ;;  %v16142_v11 = vand.u32 4294901760, %v12369_v49  ;;  %v12388_v0 = vunpack.c.l.bf16 %v4272_v51  ;;  %4501 = vmatpush2.msra.mxu0 %v12346_v59  ;;  %v4266_v47 = vld [vmem:[%s16005_s17 + $0x1b8] sm:$0xff] }
 0x316   : > { %16619 = vst [vmem:[#allocation65_spill] sm:$0xff] %v12378_v31  ;;  %4731 = vmatprep.subr.mxu1 %v4730_v12  ;;  %v4740_v27 = vand.u32 4294901760, %v4739_v52  ;;  %v16622_v34 = vand.u32 4294901760, %v12355_v17  ;;  %v16145_v19 = vand.u32 4294901760, %v12378_v31  ;;  %v12395_v37 = vunpack.c.h.bf16 %v4272_v51 }
 0x317   : > { %v4754_v23 = vsub.f32 %v12344_v2, %v16620_v62  ;;  %16621 = vst [vmem:[#allocation66_spill] sm:$0xff] %v12388_v0  ;;  %4736 = vmatpush2.msra.mxu1 %v4735_v32  ;;  %v4764_v2 = vsub.f32 %v12369_v49, %v16142_v11  ;;  %v12405_v52 = vsub.f32 %v12388_v0, %v12388_v0  ;;  %v12407_v12 = vunpack.c.l.bf16 %v4269_v6  ;;  %v4263_v11 = vld [vmem:[%s16005_s17 + $0x1a4] sm:$0xff] }
 0x318   : > { %v4749_v14 = vsub.f32 %v12355_v17, %v16622_v34  ;;  %16623 = vst [vmem:[#allocation67_spill] sm:$0xff] %v12395_v37  ;;  %4741 = vmatprep.subr.mxu1 %v4740_v27  ;;  %v4759_v51 = vsub.f32 %v12378_v31, %v16145_v19  ;;  %v12414_v32 = vsub.f32 %v12395_v37, %v12395_v37  ;;  %v12427_v19 = vunpack.c.l.bf16 %v4266_v47 }
 0x319   : > { %v4755_v62 = vand.u32 4294901760, %v4754_v23  ;;  %16624 = vst [vmem:[#allocation68_spill] sm:$0xff] %v12405_v52  ;;  %16625 = vst [vmem:[#allocation69_spill] sm:$0xff] %v12407_v12  ;;  %v12416_v23 = vunpack.c.h.bf16 %v4269_v6  ;;  %4502 = vmatprep.subr.mxu0 %v12395_v37  ;;  %4746 = vmatpush2.msra.mxu1 %v4745_v1  ;;  %v4765_v49 = vand.u32 4294901760, %v4764_v2  ;;  %v12425_v27 = vsub.f32 %v12407_v12, %v12407_v12 }
 0x31a   : > { %v4750_v34 = vand.u32 4294901760, %v4749_v14  ;;  %16626 = vst [vmem:[#allocation70_spill] sm:$0xff] %v12414_v32  ;;  %v16152_v14 = vand.u32 4294901760, %v12405_v52  ;;  %16629 = vst [vmem:[#allocation73_spill] sm:$0xff] %v12427_v19  ;;  %4503 = vmatpush2.msra.mxu0 %v12388_v0  ;;  %v4760_v6 = vand.u32 4294901760, %v4759_v51  ;;  %v16157_v31 = vand.u32 4294901760, %v12414_v32 }
 0x31b   : > { %16627 = vst [vmem:[#allocation71_spill] sm:$0xff] %v12416_v23  ;;  %16628 = vst [vmem:[#allocation72_spill] sm:$0xff] %v12425_v27  ;;  %v12433_v17 = vsub.f32 %v12416_v23, %v12416_v23  ;;  %v12435_v1 = vunpack.c.h.bf16 %v4266_v47  ;;  %4504 = vmatprep.subr.mxu0 %v12416_v23  ;;  %v12446_v51 = vunpack.c.l.bf16 %v4263_v11  ;;  %v12457_v37 = vunpack.c.h.bf16 %v4263_v11 }
 0x31c   : > { %4751 = vmatprep.subr.mxu1 %v4750_v34  ;;  %v4774_v2 = vsub.f32 %v12405_v52, %v16152_v14  ;;  %v12444_v34 = vsub.f32 %v12427_v19, %v12427_v19  ;;  %4505 = vmatpush2.msra.mxu0 %v12407_v12  ;;  %v4769_v47 = vsub.f32 %v12414_v32, %v16157_v31  ;;  %v4260_v52 = vld [vmem:[%s16005_s17 + $0x190] sm:$0xff]  ;;  %v16636_v12 = vand.u32 4294901760, %v12425_v27 }
 0x31d   : > { %16630 = vst [vmem:[#allocation74_spill] sm:$0xff] %v12433_v17  ;;  %16631 = vst [vmem:[#allocation75_spill] sm:$0xff] %v12435_v1  ;;  %4756 = vmatpush2.msra.mxu1 %v4755_v62  ;;  %v12455_v14 = vsub.f32 %v12435_v1, %v12435_v1  ;;  %4506 = vmatprep.subr.mxu0 %v12435_v1  ;;  %v12469_v32 = vsub.f32 %v12446_v51, %v12446_v51  ;;  %v16638_v23 = vand.u32 4294901760, %v12433_v17 }
 0x31e   : > { %16632 = vst [vmem:[#allocation76_spill] sm:$0xff] %v12444_v34  ;;  %16633 = vst [vmem:[#allocation77_spill] sm:$0xff] %v12446_v51  ;;  %4761 = vmatprep.subr.mxu1 %v4760_v6  ;;  %v4775_v6 = vand.u32 4294901760, %v4774_v2  ;;  %v4784_v31 = vsub.f32 %v12425_v27, %v16636_v12  ;;  %4507 = vmatpush2.msra.mxu0 %v12427_v19  ;;  %v4770_v11 = vand.u32 4294901760, %v4769_v47  ;;  %v4257_v12 = vld [vmem:[%s16005_s17 + $0x17c] sm:$0xff]  ;;  %v16640_v27 = vand.u32 4294901760, %v12444_v34 }
 0x31f   : > { %16634 = vst [vmem:[#allocation78_spill] sm:$0xff] %v12455_v14  ;;  %16635 = vst [vmem:[#allocation79_spill] sm:$0xff] %v12457_v37  ;;  %4766 = vmatpush2.msra.mxu1 %v4765_v49  ;;  %v4779_v0 = vsub.f32 %v12433_v17, %v16638_v23  ;;  %v12478_v2 = vsub.f32 %v12457_v37, %v12457_v37  ;;  %4508 = vmatprep.subr.mxu0 %v12457_v37  ;;  %v16178_v19 = vand.u32 4294901760, %v12469_v32 }
 0x320   : > { %16637 = vst [vmem:[#allocation80_spill] sm:$0xff] %v12469_v32  ;;  %v4785_v62 = vand.u32 4294901760, %v4784_v31  ;;  %v4794_v47 = vsub.f32 %v12444_v34, %v16640_v27  ;;  %v12488_v23 = vunpack.c.l.bf16 %v4260_v52  ;;  %4509 = vmatpush2.msra.mxu0 %v12446_v51  ;;  %4771 = vmatprep.subr.mxu1 %v4770_v11  ;;  %v16642_v17 = vand.u32 4294901760, %v12455_v14  ;;  %v4254_v31 = vld [vmem:[%s16005_s17 + $0x168] sm:$0xff] }
 0x321   : > { %16639 = vst [vmem:[#allocation81_spill] sm:$0xff] %v12478_v2  ;;  %v4780_v49 = vand.u32 4294901760, %v4779_v0  ;;  %v16181_v59 = vand.u32 4294901760, %v12478_v2  ;;  %v12495_v37 = vunpack.c.h.bf16 %v4260_v52  ;;  %4776 = vmatpush2.msra.mxu1 %v4775_v6  ;;  %v4804_v34 = vsub.f32 %v12469_v32, %v16178_v19  ;;  %v4251_v19 = vld [vmem:[%s16005_s17 + $0x154] sm:$0xff] }
 0x322   : > { %16641 = vst [vmem:[#allocation82_spill] sm:$0xff] %v12488_v23  ;;  %v4789_v1 = vsub.f32 %v12455_v14, %v16642_v17  ;;  %v4795_v27 = vand.u32 4294901760, %v4794_v47  ;;  %v12505_v0 = vsub.f32 %v12488_v23, %v12488_v23  ;;  %v12507_v11 = vunpack.c.l.bf16 %v4257_v12 }
 0x323   : > { %16643 = vst [vmem:[#allocation83_spill] sm:$0xff] %v12495_v37  ;;  %4781 = vmatprep.subr.mxu1 %v4780_v49  ;;  %v4799_v52 = vsub.f32 %v12478_v2, %v16181_v59  ;;  %v12514_v6 = vsub.f32 %v12495_v37, %v12495_v37  ;;  %v12516_v47 = vunpack.c.h.bf16 %v4257_v12  ;;  %4510 = vmatprep.subr.mxu0 %v12495_v37  ;;  %v4805_v32 = vand.u32 4294901760, %v4804_v34 }
 0x324   : > { %16644 = vst [vmem:[#allocation84_spill] sm:$0xff] %v12505_v0  ;;  %16645 = vst [vmem:[#allocation85_spill] sm:$0xff] %v12507_v11  ;;  %v4790_v17 = vand.u32 4294901760, %v4789_v1  ;;  %4786 = vmatpush2.msra.mxu1 %v4785_v62  ;;  %v16188_v1 = vand.u32 4294901760, %v12505_v0  ;;  %v12525_v49 = vsub.f32 %v12507_v11, %v12507_v11  ;;  %v12527_v59 = vunpack.c.l.bf16 %v4254_v31  ;;  %4511 = vmatpush2.msra.mxu0 %v12488_v23 }
 0x325   : > { %16646 = vst [vmem:[#allocation86_spill] sm:$0xff] %v12514_v6  ;;  %16647 = vst [vmem:[#allocation87_spill] sm:$0xff] %v12516_v47  ;;  %v4800_v12 = vand.u32 4294901760, %v4799_v52  ;;  %v16193_v2 = vand.u32 4294901760, %v12514_v6  ;;  %v12533_v14 = vsub.f32 %v12516_v47, %v12516_v47  ;;  %v12535_v62 = vunpack.c.h.bf16 %v4254_v31  ;;  %4512 = vmatprep.subr.mxu0 %v12516_v47 }
 0x326   : > { %16648 = vst [vmem:[#allocation88_spill] sm:$0xff] %v12525_v49  ;;  %16649 = vst [vmem:[#allocation89_spill] sm:$0xff] %v12527_v59  ;;  %4791 = vmatprep.subr.mxu1 %v4790_v17  ;;  %v4814_v34 = vsub.f32 %v12505_v0, %v16188_v1  ;;  %v12544_v17 = vsub.f32 %v12527_v59, %v12527_v59  ;;  %v12546_v52 = vunpack.c.l.bf16 %v4251_v19  ;;  %4513 = vmatpush2.msra.mxu0 %v12507_v11  ;;  %v4248_v0 = vld [vmem:[%s16005_s17 + $0x140] sm:$0xff] }
 0x327   : > { %16650 = vst [vmem:[#allocation90_spill] sm:$0xff] %v12533_v14  ;;  %16651 = vst [vmem:[#allocation91_spill] sm:$0xff] %v12535_v62  ;;  %4796 = vmatpush2.msra.mxu1 %v4795_v27  ;;  %v4809_v31 = vsub.f32 %v12514_v6, %v16193_v2  ;;  %v12555_v1 = vsub.f32 %v12535_v62, %v12535_v62  ;;  %v12557_v37 = vunpack.c.h.bf16 %v4251_v19  ;;  %4514 = vmatprep.subr.mxu0 %v12535_v62 }
 0x328   : > { %16652 = vst [vmem:[#allocation92_spill] sm:$0xff] %v12544_v17  ;;  %16653 = vst [vmem:[#allocation93_spill] sm:$0xff] %v12546_v52  ;;  %4801 = vmatprep.subr.mxu1 %v4800_v12  ;;  %v4815_v12 = vand.u32 4294901760, %v4814_v34  ;;  %v16656_v11 = vand.u32 4294901760, %v12525_v49  ;;  %v16210_v27 = vand.u32 4294901760, %v12544_v17  ;;  %v12569_v6 = vsub.f32 %v12546_v52, %v12546_v52  ;;  %4515 = vmatpush2.msra.mxu0 %v12527_v59 }
 0x329   : > { %16654 = vst [vmem:[#allocation94_spill] sm:$0xff] %v12555_v1  ;;  %16655 = vst [vmem:[#allocation95_spill] sm:$0xff] %v12557_v37  ;;  %4806 = vmatpush2.msra.mxu1 %v4805_v32  ;;  %v4810_v19 = vand.u32 4294901760, %v4809_v31  ;;  %v16658_v47 = vand.u32 4294901760, %v12533_v14  ;;  %v16215_v32 = vand.u32 4294901760, %v12555_v1  ;;  %v12578_v34 = vsub.f32 %v12557_v37, %v12557_v37  ;;  %4516 = vmatprep.subr.mxu0 %v12557_v37 }
 0x32a   : > { %v4824_v2 = vsub.f32 %v12525_v49, %v16656_v11  ;;  %16657 = vst [vmem:[#allocation96_spill] sm:$0xff] %v12569_v6  ;;  %v4834_v49 = vsub.f32 %v12544_v17, %v16210_v27  ;;  %v16213_v59 = vand.u32 4294901760, %v12569_v6  ;;  %v12585_v31 = vunpack.c.l.bf16 %v4248_v0  ;;  %4517 = vmatpush2.msra.mxu0 %v12546_v52 }
 0x32b   : > { %v4819_v23 = vsub.f32 %v12533_v14, %v16658_v47  ;;  %16659 = vst [vmem:[#allocation97_spill] sm:$0xff] %v12578_v34  ;;  %4811 = vmatprep.subr.mxu1 %v4810_v19  ;;  %v4829_v14 = vsub.f32 %v12555_v1, %v16215_v32  ;;  %v16214_v62 = vand.u32 4294901760, %v12578_v34  ;;  %v12592_v37 = vunpack.c.h.bf16 %v4248_v0  ;;  %v3309_v32 = vpop.f32.mrf.mxu1 }
 0x32c   : > { %v4825_v11 = vand.u32 4294901760, %v4824_v2  ;;  %16660 = vst [vmem:[#allocation98_spill] sm:$0xff] %v12585_v31  ;;  %4816 = vmatpush2.msra.mxu1 %v4815_v12  ;;  %v4835_v2 = vand.u32 4294901760, %v4834_v49  ;;  %v4844_v27 = vsub.f32 %v12569_v6, %v16213_v59  ;;  %v12599_v17 = vsub.f32 %v12585_v31, %v12585_v31 }
 0x32d   : > { %v4820_v47 = vand.u32 4294901760, %v4819_v23  ;;  %16661 = vst [vmem:[#allocation99_spill] sm:$0xff] %v12592_v37  ;;  %v4830_v23 = vand.u32 4294901760, %v4829_v14  ;;  %v4839_v19 = vsub.f32 %v12578_v34, %v16214_v62  ;;  %v12606_v0 = vsub.f32 %v12592_v37, %v12592_v37  ;;  %4518 = vmatprep.subr.mxu0 %v12592_v37 }
 0x32e   : > { %16662 = vst [vmem:[#allocation100_spill] sm:$0xff] %v12599_v17  ;;  %v4845_v49 = vand.u32 4294901760, %v4844_v27  ;;  %v16221_v12 = vand.u32 4294901760, %v12599_v17  ;;  %4519 = vmatpush2.msra.mxu0 %v12585_v31 }
 0x32f   : > { %4821 = vmatprep.subr.mxu1 %v4820_v47  ;;  %16663 = vst [vmem:[#allocation101_spill] sm:$0xff] %v12606_v0  ;;  %v4840_v59 = vand.u32 4294901760, %v4839_v19  ;;  %v16228_v14 = vand.u32 4294901760, %v12606_v0  ;;  %4867 = vmatprep.subr.mxu0 %v11787_v3 }
 0x330   : > { %4826 = vmatpush2.msra.mxu1 %v4825_v11  ;;  %v4854_v47 = vsub.f32 %v12599_v17, %v16221_v12  ;;  %v3143_v17 = vpop.permute.xlu1 %3142 }
 0x331   : > { %4831 = vmatprep.subr.mxu1 %v4830_v23  ;;  %v4849_v27 = vsub.f32 %v12606_v0, %v16228_v14  ;;  %v3227_v23 = vpop.f32.mrf.mxu0 }
 0x332   : > { %4836 = vmatpush2.msra.mxu1 %v4835_v2  ;;  %v4855_v11 = vand.u32 4294901760, %v4854_v47  ;;  %v3311_v2 = vpop.f32.mrf.mxu1  ;;  %v3228_v14 = vadd.f32 %v3227_v23, %v3143_v17 }
 0x333   : > { %4841 = vmatprep.subr.mxu1 %v4840_v59  ;;  %v4850_v62 = vand.u32 4294901760, %v4849_v27  ;;  %v3229_v19 = vpop.f32.mrf.mxu0 }
 0x334   : > { %4846 = vmatpush2.msra.mxu1 %v4845_v49  ;;  %v3462_v34 = vpop.f32.mrf.mxu1  ;;  %v3230_v47 = vadd.f32 %v3229_v19, %v3143_v17 }
 0x335   : > { %4851 = vmatprep.subr.mxu1 %v4850_v62  ;;  %v3386_v3 = vpop.f32.mrf.mxu0  ;;  %v3310_v62 = vadd.f32 %v3309_v32, %v3228_v14 }
 0x336   : > { %4856 = vmatpush2.msra.mxu1 %v4855_v11  ;;  %v3464_v12 = vpop.f32.mrf.mxu1 }
 0x337   : > { %5005 = vmatprep.subr.mxu1 %v11763_v54  ;;  %v3388_v6 = vpop.f32.mrf.mxu0  ;;  %v3312_v54 = vadd.f32 %v3311_v2, %v3230_v47  ;;  %v3387_v52 = vadd.f32 %v3386_v3, %v3310_v62 }
 0x338   : > { %v3614_v31 = vpop.f32.mrf.mxu1 }
 0x339   : > { %v3540_v59 = vpop.f32.mrf.mxu0  ;;  %v3389_v39 = vadd.f32 %v3388_v6, %v3312_v54  ;;  %v3463_v28 = vadd.f32 %v3462_v34, %v3387_v52  ;;  %v16672_v34 = vld [vmem:[#allocation13_spill] sm:$0xff] }
 0x33a   : > { %v3616_v27 = vpop.f32.mrf.mxu1 }
 0x33b   : > { %v3542_v1 = vpop.f32.mrf.mxu0  ;;  %v3465_v60 = vadd.f32 %v3464_v12, %v3389_v39  ;;  %v3541_v26 = vadd.f32 %v3540_v59, %v3463_v28  ;;  %v16675_v12 = vld [vmem:[#allocation8_spill] sm:$0xff]  ;;  %v16676_v59 = vld [vmem:[#allocation19_spill] sm:$0xff] }
 0x33d   : > { %v3543_v19 = vadd.f32 %v3542_v1, %v3465_v60  ;;  %v3615_v54 = vadd.f32 %v3614_v31, %v3541_v26  ;;  %v16673_v31 = vld [vmem:[#allocation7_spill] sm:$0xff] }
 0x33f   : > { %v3617_v52 = vadd.f32 %v3616_v27, %v3543_v19  ;;  %v16677_v27 = vld [vmem:[#allocation9_spill] sm:$0xff]  ;;  %v16683_v19 = vld [vmem:[#allocation12_spill] sm:$0xff] }
 0x37c   : > { %v3854_v11 = vpop.f32.mrf.mxu1 }
 0x37e   : > { %v3856_v51 = vpop.f32.mrf.mxu1 }
 0x384   : > { %v3718_v49 = vpop.f32.mrf.mxu0 }
 0x385   : > { %v3855_v42 = vadd.f32 %v3854_v11, %v3718_v49  ;;  %v16678_v11 = vld [vmem:[#allocation18_spill] sm:$0xff] }
 0x386   : > { %v3720_v0 = vpop.f32.mrf.mxu0 }
 0x387   : > { %v3857_v46 = vadd.f32 %v3856_v51, %v3720_v0  ;;  %v16674_v0 = vld [vmem:[#allocation15_spill] sm:$0xff] }
 0x38c   : > { %v4017_v43 = vpop.f32.mrf.mxu1 }
 0x38e   : > { %v4019_v23 = vpop.f32.mrf.mxu1 }
 0x395   : > { %v3943_v37 = vpop.f32.mrf.mxu0 }
 0x396   : > { %v3944_v41 = vadd.f32 %v3943_v37, %v3855_v42 }
 0x397   : > { %v3945_v38 = vpop.f32.mrf.mxu0 }
 0x398   : > { %v3946_v36 = vadd.f32 %v3945_v38, %v3857_v46  ;;  %v4018_v17 = vadd.f32 %v4017_v43, %v3944_v41 }
 0x39a   : > { %v4020_v3 = vadd.f32 %v4019_v23, %v3946_v36  ;;  %v16679_v23 = vld [vmem:[#allocation10_spill] sm:$0xff] }
 0x39e   : > { %v4193_v32 = vpop.f32.mrf.mxu1 }
 0x3a0   : > { %v4195_v62 = vpop.f32.mrf.mxu1 }
 0x3a6   : > { %v4121_v14 = vpop.f32.mrf.mxu0 }
 0x3a7   : > { %v4122_v2 = vadd.f32 %v4121_v14, %v4018_v17  ;;  %v16680_v17 = vld [vmem:[#allocation23_spill] sm:$0xff]  ;;  %v16682_v14 = vld [vmem:[#allocation21_spill] sm:$0xff] }
 0x3a8   : > { %v4123_v47 = vpop.f32.mrf.mxu0 }
 0x3a9   : > { %v4194_v6 = vadd.f32 %v4193_v32, %v4122_v2  ;;  %v4124_v49 = vadd.f32 %v4123_v47, %v4020_v3  ;;  %v16681_v32 = vld [vmem:[#allocation11_spill] sm:$0xff]  ;;  %v16685_v3 = vld [vmem:[#allocation14_spill] sm:$0xff]  ;;  %v16686_v47 = vld [vmem:[#allocation25_spill] sm:$0xff] }
 0x3aa   : > { %v16684_v2 = vld [vmem:[#allocation27_spill] sm:$0xff] }
 0x3ab   : > { %v4198_v51 = vadd.f32 %v4194_v6, %v3615_v54  ;;  %v4196_v37 = vadd.f32 %v4195_v62, %v4124_v49  ;;  %v16687_v54 = vld [vmem:[#allocation16_spill] sm:$0xff]  ;;  %v16688_v6 = vld [vmem:[#allocation31_spill] sm:$0xff]  ;;  %v16689_v49 = vld [vmem:[#allocation17_spill] sm:$0xff] }
 0x3ac   : > { %v16690_v62 = vld [vmem:[#allocation29_spill] sm:$0xff] }
 0x3ad   : > { %v12620_v39 = vand.u32 4294901760, %v4198_v51  ;;  %9713 = vst [vmem:[%s11185_s1] sm:$0xff] %v4198_v51  ;;  %v4199_v46 = vadd.f32 %v4196_v37, %v3617_v52  ;;  %v16691_v52 = vld [vmem:[#allocation22_spill] sm:$0xff]  ;;  %v16693_v37 = vld [vmem:[#allocation20_spill] sm:$0xff] }
 0x3af   : > { %16664 = vst [vmem:[#allocation102_spill] sm:$0xff] %v12620_v39  ;;  %v12624_v38 = vsub.f32 %v4198_v51, %v12620_v39  ;;  %v12626_v41 = vand.u32 4294901760, %v4199_v46  ;;  %9714 = vst [vmem:[%s11185_s1 + $0x8] sm:$0xff] %v4199_v46  ;;  %v16692_v51 = vld [vmem:[#allocation35_spill] sm:$0xff] }
 0x3b1   : > { %16665 = vst [vmem:[#allocation103_spill] sm:$0xff] %v12624_v38  ;;  %16666 = vst [vmem:[#allocation104_spill] sm:$0xff] %v12626_v41  ;;  %v12630_v36 = vsub.f32 %v4199_v46, %v12626_v41  ;;  %4858 = vmatprep.mubr.f32.mxu1 %v12626_v41  ;;  %v12634_v28 = vand.u32 4294901760, %v12624_v38  ;;  %v16694_v46 = vld [vmem:[#allocation34_spill] sm:$0xff] }
 0x3b2   : > { %4860 = vmatmul.mubr.f32.vlgmr.msra.gmra.mxu1 %v12620_v39  ;;  %v16701_v39 = vld [vmem:[#allocation28_spill] sm:$0xff] }
 0x3b3   : > { %16667 = vst [vmem:[#allocation105_spill] sm:$0xff] %v12630_v36  ;;  %16668 = vst [vmem:[#allocation106_spill] sm:$0xff] %v12634_v28  ;;  %5006 = vmatpush1.msra.mxu1 %v11767_v45  ;;  %v12639_v43 = vand.u32 4294901760, %v12630_v36  ;;  %v4529_v26 = vsub.f32 %v12624_v38, %v12634_v28 }
 0x3b4   : > { %5007 = vmatprep.subr.mxu1 %v11774_v5 }
 0x3b5   : > { %16669 = vst [vmem:[#allocation107_spill] sm:$0xff] %v12639_v43  ;;  %5008 = vmatpush1.msra.mxu1 %v11778_v58  ;;  %5072 = vmatprep.mubr.f32.mxu1 %v12639_v43  ;;  %v4523_v60 = vsub.f32 %v12630_v36, %v12639_v43  ;;  %v12653_v1 = vand.u32 4294901760, %v4529_v26  ;;  %v16695_v26 = vld [vmem:[#allocation26_spill] sm:$0xff] }
 0x3b6   : > { %5009 = vmatprep.subr.mxu1 %v11789_v8  ;;  %v16699_v43 = vld [vmem:[#allocation30_spill] sm:$0xff] }
 0x3b7   : > { %5010 = vmatpush1.msra.mxu1 %v11797_v30  ;;  %v12650_v42 = vand.u32 4294901760, %v4523_v60  ;;  %16671 = vst [vmem:[#allocation109_spill] sm:$0xff] %v12653_v1  ;;  %v16696_v60 = vld [vmem:[#allocation39_spill] sm:$0xff] }
 0x3b8   : > { %5011 = vmatprep.subr.mxu1 %v11808_v15 }
 0x3b9   : > { %16670 = vst [vmem:[#allocation108_spill] sm:$0xff] %v12650_v42  ;;  %5012 = vmatpush1.msra.mxu1 %v11816_v22  ;;  %4525 = vmatprep.mubr.f32.mxu0 %v12650_v42  ;;  %v16700_v42 = vld [vmem:[#allocation43_spill] sm:$0xff] }
 0x3ba   : > { %5013 = vmatprep.subr.mxu1 %v11828_v40  ;;  %4531 = vmatmul.mubr.f32.vlgmr.msra.gmra.mxu0 %v12653_v1  ;;  %v16698_v1 = vld [vmem:[#allocation37_spill] sm:$0xff] }
 0x3bb   : > { %4869 = vmatpush1.msra.mxu0 %v11795_v7  ;;  %5014 = vmatpush1.msra.mxu1 %v11838_v29 }
 0x3bc   : > { %4871 = vmatprep.subr.mxu0 %v11806_v16  ;;  %4996 = vmatprep.mubr.f32.mxu0 %v12630_v36  ;;  %v16697_v36 = vld [vmem:[#allocation24_spill] sm:$0xff] }
 0x3bd   : > { %5015 = vmatprep.subr.mxu1 %v11851_v33  ;;  %4873 = vmatpush1.msra.mxu0 %v11814_v55 }
 0x3be   : > { %5016 = vmatpush1.msra.mxu1 %v11861_v9  ;;  %4875 = vmatprep.subr.mxu0 %v11826_v35 }
 0x3bf   : > { %5017 = vmatprep.subr.mxu1 %v11874_v44  ;;  %4877 = vmatpush1.msra.mxu0 %v11836_v50 }
 0x3c0   : > { %5018 = vmatpush1.msra.mxu1 %v11887_v10  ;;  %4879 = vmatprep.subr.mxu0 %v11849_v13 }
 0x3c1   : > { %5019 = vmatprep.subr.mxu1 %v11996_v56  ;;  %4881 = vmatpush1.msra.mxu0 %v11859_v48 }
 0x3c2   : > { %5020 = vmatpush1.msra.mxu1 %v11998_v25  ;;  %4883 = vmatprep.subr.mxu0 %v11872_v24 }
 0x3c3   : > { %5021 = vmatprep.subr.mxu1 %v12007_v21  ;;  %4885 = vmatpush1.msra.mxu0 %v11885_v57 }
 0x3c4   : > { %5022 = vmatpush1.msra.mxu1 %v12014_v20  ;;  %4887 = vmatprep.subr.mxu0 %v11898_v53 }
 0x3c5   : > { %5023 = vmatprep.subr.mxu1 %v12025_v63  ;;  %4889 = vmatpush1.msra.mxu0 %v11909_v4 }
 0x3c6   : > { %5024 = vmatpush1.msra.mxu1 %v12033_v18  ;;  %4891 = vmatprep.subr.mxu0 %v11920_v61 }
 0x3c7   : > { %5025 = vmatprep.subr.mxu1 %v16672_v34  ;;  %4893 = vmatpush1.msra.mxu0 %v16673_v31 }
 0x3c8   : > { %5026 = vmatpush1.msra.mxu1 %v16674_v0  ;;  %4895 = vmatprep.subr.mxu0 %v16675_v12 }
 0x3c9   : > { %5027 = vmatprep.subr.mxu1 %v16676_v59  ;;  %4897 = vmatpush1.msra.mxu0 %v16677_v27 }
 0x3ca   : > { %5028 = vmatpush1.msra.mxu1 %v16678_v11  ;;  %4899 = vmatprep.subr.mxu0 %v16679_v23 }
 0x3cb   : > { %5029 = vmatprep.subr.mxu1 %v16680_v17  ;;  %4901 = vmatpush1.msra.mxu0 %v16681_v32 }
 0x3cc   : > { %5030 = vmatpush1.msra.mxu1 %v16682_v14  ;;  %4903 = vmatprep.subr.mxu0 %v16683_v19 }
 0x3cd   : > { %5031 = vmatprep.subr.mxu1 %v16684_v2  ;;  %4905 = vmatpush1.msra.mxu0 %v16685_v3 }
 0x3ce   : > { %5032 = vmatpush1.msra.mxu1 %v16686_v47  ;;  %4907 = vmatprep.subr.mxu0 %v16687_v54 }
 0x3cf   : > { %5033 = vmatprep.subr.mxu1 %v16688_v6  ;;  %4909 = vmatpush1.msra.mxu0 %v16689_v49 }
 0x3d0   : > { %5034 = vmatpush1.msra.mxu1 %v16690_v62  ;;  %4911 = vmatprep.subr.mxu0 %v16691_v52  ;;  %v16702_v52 = vld [vmem:[#allocation41_spill] sm:$0xff] }
 0x3d1   : > { %5035 = vmatprep.subr.mxu1 %v16692_v51  ;;  %4913 = vmatpush1.msra.mxu0 %v16693_v37  ;;  %v16703_v51 = vld [vmem:[#allocation33_spill] sm:$0xff]  ;;  %v16704_v37 = vld [vmem:[#allocation47_spill] sm:$0xff] }
 0x3d2   : > { %5036 = vmatpush1.msra.mxu1 %v16694_v46  ;;  %4915 = vmatprep.subr.mxu0 %v16695_v26  ;;  %v16705_v46 = vld [vmem:[#allocation32_spill] sm:$0xff]  ;;  %v16706_v26 = vld [vmem:[#allocation45_spill] sm:$0xff] }
 0x3d3   : > { %5037 = vmatprep.subr.mxu1 %v16696_v60  ;;  %4917 = vmatpush1.msra.mxu0 %v16697_v36  ;;  %v16707_v60 = vld [vmem:[#allocation38_spill] sm:$0xff]  ;;  %v16708_v36 = vld [vmem:[#allocation51_spill] sm:$0xff] }
 0x3d4   : > { %5038 = vmatpush2.msra.mxu1 %v16698_v1  ;;  %4919 = vmatprep.subr.mxu0 %v16699_v43  ;;  %v16709_v1 = vld [vmem:[#allocation36_spill] sm:$0xff]  ;;  %v16710_v43 = vld [vmem:[#allocation50_spill] sm:$0xff] }
 0x3d5   : > { %5039 = vmatprep.subr.mxu1 %v16700_v42  ;;  %4921 = vmatpush1.msra.mxu0 %v16701_v39  ;;  %v16711_v42 = vld [vmem:[#allocation42_spill] sm:$0xff]  ;;  %v16712_v39 = vld [vmem:[#allocation55_spill] sm:$0xff] }
 0x3d6   : > { %5040 = vmatpush2.msra.mxu1 %v16702_v52  ;;  %4923 = vmatprep.subr.mxu0 %v16703_v51  ;;  %v16713_v52 = vld [vmem:[#allocation40_spill] sm:$0xff]  ;;  %v16714_v51 = vld [vmem:[#allocation53_spill] sm:$0xff] }
 0x3d7   : > { %5041 = vmatprep.subr.mxu1 %v16704_v37  ;;  %4925 = vmatpush1.msra.mxu0 %v16705_v46  ;;  %v16715_v37 = vld [vmem:[#allocation46_spill] sm:$0xff]  ;;  %v16716_v46 = vld [vmem:[#allocation59_spill] sm:$0xff] }
 0x3d8   : > { %5042 = vmatpush2.msra.mxu1 %v16706_v26  ;;  %4927 = vmatprep.subr.mxu0 %v16707_v60  ;;  %v16717_v26 = vld [vmem:[#allocation44_spill] sm:$0xff]  ;;  %v16718_v60 = vld [vmem:[#allocation57_spill] sm:$0xff] }
 0x3d9   : > { %5043 = vmatprep.subr.mxu1 %v16708_v36  ;;  %4929 = vmatpush1.msra.mxu0 %v16709_v1  ;;  %v16719_v36 = vld [vmem:[#allocation49_spill] sm:$0xff]  ;;  %v16720_v1 = vld [vmem:[#allocation63_spill] sm:$0xff] }
 0x3da   : > { %5044 = vmatpush2.msra.mxu1 %v16710_v43  ;;  %4931 = vmatprep.subr.mxu0 %v16711_v42  ;;  %v16721_v43 = vld [vmem:[#allocation48_spill] sm:$0xff]  ;;  %v16722_v42 = vld [vmem:[#allocation61_spill] sm:$0xff] }
 0x3db   : > { %5045 = vmatprep.subr.mxu1 %v16712_v39  ;;  %4933 = vmatpush2.msra.mxu0 %v16713_v52  ;;  %v16723_v39 = vld [vmem:[#allocation54_spill] sm:$0xff]  ;;  %v16724_v52 = vld [vmem:[#allocation67_spill] sm:$0xff] }
 0x3dc   : > { %5046 = vmatpush2.msra.mxu1 %v16714_v51  ;;  %4935 = vmatprep.subr.mxu0 %v16715_v37  ;;  %v16725_v51 = vld [vmem:[#allocation52_spill] sm:$0xff]  ;;  %v16726_v37 = vld [vmem:[#allocation66_spill] sm:$0xff] }
 0x3dd   : > { %5047 = vmatprep.subr.mxu1 %v16716_v46  ;;  %4937 = vmatpush2.msra.mxu0 %v16717_v26  ;;  %v16727_v46 = vld [vmem:[#allocation58_spill] sm:$0xff]  ;;  %v16728_v26 = vld [vmem:[#allocation71_spill] sm:$0xff] }
 0x3de   : > { %5048 = vmatpush2.msra.mxu1 %v16718_v60  ;;  %4939 = vmatprep.subr.mxu0 %v16719_v36  ;;  %v16729_v60 = vld [vmem:[#allocation56_spill] sm:$0xff]  ;;  %v16730_v36 = vld [vmem:[#allocation69_spill] sm:$0xff] }
 0x3df   : > { %5049 = vmatprep.subr.mxu1 %v16720_v1  ;;  %4941 = vmatpush2.msra.mxu0 %v16721_v43  ;;  %v16731_v1 = vld [vmem:[#allocation62_spill] sm:$0xff]  ;;  %v16732_v43 = vld [vmem:[#allocation75_spill] sm:$0xff] }
 0x3e0   : > { %5050 = vmatpush2.msra.mxu1 %v16722_v42  ;;  %4943 = vmatprep.subr.mxu0 %v16723_v39  ;;  %v16733_v42 = vld [vmem:[#allocation60_spill] sm:$0xff]  ;;  %v16734_v39 = vld [vmem:[#allocation73_spill] sm:$0xff] }
 0x3e1   : > { %5051 = vmatprep.subr.mxu1 %v16724_v52  ;;  %4945 = vmatpush2.msra.mxu0 %v16725_v51  ;;  %v16735_v52 = vld [vmem:[#allocation65_spill] sm:$0xff]  ;;  %v16736_v51 = vld [vmem:[#allocation79_spill] sm:$0xff] }
 0x3e2   : > { %5052 = vmatpush2.msra.mxu1 %v16726_v37  ;;  %4947 = vmatprep.subr.mxu0 %v16727_v46  ;;  %v16737_v37 = vld [vmem:[#allocation64_spill] sm:$0xff]  ;;  %v16738_v46 = vld [vmem:[#allocation77_spill] sm:$0xff] }
 0x3e3   : > { %5053 = vmatprep.subr.mxu1 %v16728_v26  ;;  %4949 = vmatpush2.msra.mxu0 %v16729_v60  ;;  %v16739_v26 = vld [vmem:[#allocation70_spill] sm:$0xff]  ;;  %v16740_v60 = vld [vmem:[#allocation83_spill] sm:$0xff] }
 0x3e4   : > { %5054 = vmatpush2.msra.mxu1 %v16730_v36  ;;  %4951 = vmatprep.subr.mxu0 %v16731_v1  ;;  %v16741_v36 = vld [vmem:[#allocation68_spill] sm:$0xff]  ;;  %v16742_v1 = vld [vmem:[#allocation82_spill] sm:$0xff] }
 0x3e5   : > { %5055 = vmatprep.subr.mxu1 %v16732_v43  ;;  %4953 = vmatpush2.msra.mxu0 %v16733_v42  ;;  %v16743_v43 = vld [vmem:[#allocation74_spill] sm:$0xff]  ;;  %v16744_v42 = vld [vmem:[#allocation87_spill] sm:$0xff] }
 0x3e6   : > { %5056 = vmatpush2.msra.mxu1 %v16734_v39  ;;  %4955 = vmatprep.subr.mxu0 %v16735_v52  ;;  %v16745_v39 = vld [vmem:[#allocation72_spill] sm:$0xff]  ;;  %v16746_v52 = vld [vmem:[#allocation85_spill] sm:$0xff] }
 0x3e7   : > { %5057 = vmatprep.subr.mxu1 %v16736_v51  ;;  %4957 = vmatpush2.msra.mxu0 %v16737_v37  ;;  %v16747_v51 = vld [vmem:[#allocation78_spill] sm:$0xff]  ;;  %v16748_v37 = vld [vmem:[#allocation91_spill] sm:$0xff] }
 0x3e8   : > { %5058 = vmatpush2.msra.mxu1 %v16738_v46  ;;  %4959 = vmatprep.subr.mxu0 %v16739_v26  ;;  %v16749_v46 = vld [vmem:[#allocation76_spill] sm:$0xff]  ;;  %v16750_v26 = vld [vmem:[#allocation89_spill] sm:$0xff] }
 0x3e9   : > { %5059 = vmatprep.subr.mxu1 %v16740_v60  ;;  %4961 = vmatpush2.msra.mxu0 %v16741_v36  ;;  %v16751_v60 = vld [vmem:[#allocation81_spill] sm:$0xff]  ;;  %v16752_v36 = vld [vmem:[#allocation95_spill] sm:$0xff] }
 0x3ea   : > { %5060 = vmatpush2.msra.mxu1 %v16742_v1  ;;  %4963 = vmatprep.subr.mxu0 %v16743_v43  ;;  %v16753_v1 = vld [vmem:[#allocation80_spill] sm:$0xff]  ;;  %v16754_v43 = vld [vmem:[#allocation93_spill] sm:$0xff] }
 0x3eb   : > { %5061 = vmatprep.subr.mxu1 %v16744_v42  ;;  %4965 = vmatpush2.msra.mxu0 %v16745_v39  ;;  %v16755_v42 = vld [vmem:[#allocation86_spill] sm:$0xff]  ;;  %v16756_v39 = vld [vmem:[#allocation99_spill] sm:$0xff] }
 0x3ec   : > { %5062 = vmatpush2.msra.mxu1 %v16746_v52  ;;  %4967 = vmatprep.subr.mxu0 %v16747_v51  ;;  %v16757_v52 = vld [vmem:[#allocation84_spill] sm:$0xff]  ;;  %v16758_v51 = vld [vmem:[#allocation98_spill] sm:$0xff] }
 0x3ed   : > { %5063 = vmatprep.subr.mxu1 %v16748_v37  ;;  %4969 = vmatpush2.msra.mxu0 %v16749_v46  ;;  %v16759_v37 = vld [vmem:[#allocation90_spill] sm:$0xff] }
 0x3ee   : > { %5064 = vmatpush2.msra.mxu1 %v16750_v26  ;;  %4971 = vmatprep.subr.mxu0 %v16751_v60  ;;  %v16760_v26 = vld [vmem:[#allocation5_spill] sm:$0xff]  ;;  %v16761_v60 = vld [vmem:[#allocation88_spill] sm:$0xff] }
 0x3ef   : > { %5065 = vmatprep.subr.mxu1 %v16752_v36  ;;  %4973 = vmatpush2.msra.mxu0 %v16753_v1 }
 0x3f0   : > { %5066 = vmatpush2.msra.mxu1 %v16754_v43  ;;  %4975 = vmatprep.subr.mxu0 %v16755_v42  ;;  %v16762_v43 = vld [vmem:[#allocation94_spill] sm:$0xff] }
 0x3f1   : > { %5067 = vmatprep.subr.mxu1 %v16756_v39  ;;  %4977 = vmatpush2.msra.mxu0 %v16757_v52  ;;  %v16763_v39 = vld [vmem:[#allocation92_spill] sm:$0xff] }
 0x3f2   : > { %5068 = vmatpush2.msra.mxu1 %v16758_v51  ;;  %4979 = vmatprep.subr.mxu0 %v16759_v37  ;;  %v16764_v51 = vld [vmem:[#allocation97_spill] sm:$0xff] }
 0x3f3   : > { %5076 = vmatmul.mubr.f32.vlgmr.msra.gmra.mxu1 %v12634_v28  ;;  %5283 = vmatprep.subr.mxu1 %v16760_v26  ;;  %v16765_v28 = vld [vmem:[#allocation96_spill] sm:$0xff]  ;;  %v16766_v26 = vld [vmem:[#allocation101_spill] sm:$0xff] }
 0x3f4   : > { %4981 = vmatpush2.msra.mxu0 %v16761_v60  ;;  %5284 = vmatpush1.msra.mxu1 %v11767_v45  ;;  %v16767_v45 = vld [vmem:[#allocation100_spill] sm:$0xff] }
 0x3f5   : > { %5348 = vmatprep.mubr.f32.mxu1 %v12626_v41  ;;  %4983 = vmatprep.subr.mxu0 %v16762_v43 }
 0x3f6   : > { %5285 = vmatprep.subr.mxu1 %v11774_v5  ;;  %4985 = vmatpush2.msra.mxu0 %v16763_v39  ;;  %v16768_v5 = vld [vmem:[#allocation6_spill] sm:$0xff] }
 0x3f7   : > { %5286 = vmatpush1.msra.mxu1 %v11778_v58  ;;  %4987 = vmatprep.subr.mxu0 %v16764_v51  ;;  %v16769_v58 = vand.u32 4294901760, %v16768_v5  ;;  %v16812_v5 = vld [vmem:[#allocation32_spill] sm:$0xff] }
 0x3f8   : > { %5287 = vmatprep.subr.mxu1 %v11789_v8  ;;  %4989 = vmatpush2.msra.mxu0 %v16765_v28  ;;  %v16770_v8 = vand.u32 4294901760, %v11795_v7  ;;  %v16774_v7 = vand.u32 4294901760, %v11836_v50  ;;  %v16779_v50 = vand.u32 4294901760, %v11898_v53  ;;  %v16789_v53 = vand.u32 4294901760, %v16687_v54  ;;  %v16809_v54 = vld [vmem:[#allocation33_spill] sm:$0xff] }
 0x3f9   : > { %5288 = vmatpush1.msra.mxu1 %v11797_v30  ;;  %4991 = vmatprep.subr.mxu0 %v16766_v26  ;;  %v16771_v30 = vand.u32 4294901760, %v11806_v16  ;;  %v16775_v16 = vand.u32 4294901760, %v11849_v13  ;;  %v16781_v13 = vand.u32 4294901760, %v11920_v61  ;;  %v16791_v61 = vld [vmem:[#allocation22_spill] sm:$0xff] }
 0x3fa   : > { %5289 = vmatprep.subr.mxu1 %v11808_v15  ;;  %4993 = vmatpush2.msra.mxu0 %v16767_v45  ;;  %v16772_v15 = vand.u32 4294901760, %v11814_v55  ;;  %v16776_v55 = vand.u32 4294901760, %v11859_v48  ;;  %v16783_v48 = vand.u32 4294901760, %v16675_v12  ;;  %v16800_v12 = vld [vmem:[#allocation24_spill] sm:$0xff] }
 0x3fb   : > { %5290 = vmatpush1.msra.mxu1 %v11816_v22  ;;  %4999 = vmatmul.mubr.f32.vlgmr.msra.gmra.mxu0 %v12624_v38  ;;  %v16773_v22 = vand.u32 4294901760, %v11826_v35  ;;  %v16777_v35 = vand.u32 4294901760, %v11872_v24  ;;  %v16785_v24 = vand.u32 4294901760, %v16679_v23 }
 0x3fc   : > { %5084 = vmatprep.subr.mxu0 %v16769_v58  ;;  %5291 = vmatprep.subr.mxu1 %v11828_v40  ;;  %v16778_v40 = vand.u32 4294901760, %v11885_v57  ;;  %v16787_v57 = vand.u32 4294901760, %v16683_v19  ;;  %v16806_v19 = vld [vmem:[#allocation28_spill] sm:$0xff]  ;;  %v16813_v58 = vand.u32 4294901760, %v16812_v5 }
 0x3fd   : > { %5087 = vmatpush1.msra.mxu0 %v16770_v8  ;;  %5275 = vmatprep.mubr.f32.mxu0 %v12626_v41 }
 0x3fe   : > { %5292 = vmatpush1.msra.mxu1 %v11838_v29  ;;  %5090 = vmatprep.subr.mxu0 %v16771_v30  ;;  %v16780_v29 = vand.u32 4294901760, %v11909_v4  ;;  %v16790_v4 = vand.u32 4294901760, %v16689_v49  ;;  %v4240_v49 = vld [vmem:[%s16005_s17 + $0x10c] sm:$0xff]  ;;  %v16814_v30 = vld [vmem:[#allocation45_spill] sm:$0xff] }
 0x3ff   : > { %5293 = vmatprep.subr.mxu1 %v11851_v33  ;;  %5093 = vmatpush1.msra.mxu0 %v16772_v15  ;;  %v16782_v33 = vand.u32 4294901760, %v16673_v31  ;;  %v16815_v15 = vld [vmem:[#allocation38_spill] sm:$0xff] }
 0x400   : > { %5294 = vmatpush1.msra.mxu1 %v11861_v9  ;;  %5096 = vmatprep.subr.mxu0 %v16773_v22  ;;  %v16784_v9 = vand.u32 4294901760, %v16677_v27  ;;  %v16802_v27 = vld [vmem:[#allocation37_spill] sm:$0xff]  ;;  %v16816_v22 = vand.u32 4294901760, %v16815_v15  ;;  %v16850_v15 = vld [vmem:[#allocation54_spill] sm:$0xff] }
 0x401   : > { %5295 = vmatprep.subr.mxu1 %v11874_v44  ;;  %5099 = vmatpush1.msra.mxu0 %v16774_v7  ;;  %v16786_v44 = vand.u32 4294901760, %v16681_v32  ;;  %v4243_v32 = vld [vmem:[%s16005_s17 + $0x120] sm:$0xff] }
 0x402   : > { %5296 = vmatpush1.msra.mxu1 %v11887_v10  ;;  %5102 = vmatprep.subr.mxu0 %v16775_v16  ;;  %v16788_v10 = vand.u32 4294901760, %v16685_v3  ;;  %v12892_v8 = vunpack.c.h.bf16 %v4243_v32  ;;  %v12901_v16 = vunpack.c.l.bf16 %v4243_v32  ;;  %v16840_v32 = vld [vmem:[#allocation49_spill] sm:$0xff] }
 0x403   : > { %5297 = vmatprep.subr.mxu1 %v11996_v56  ;;  %5105 = vmatpush1.msra.mxu0 %v16776_v55  ;;  %v16792_v56 = vand.u32 4294901760, %v16791_v61  ;;  %v4237_v55 = vld [vmem:[%s16005_s17 + $0xf8] sm:$0xff] }
 0x404   : > { %5298 = vmatpush1.msra.mxu1 %v11998_v25  ;;  %5108 = vmatprep.subr.mxu0 %v16777_v35  ;;  %v16793_v25 = vld [vmem:[#allocation35_spill] sm:$0xff]  ;;  %v12930_v61 = vunpack.c.l.bf16 %v4237_v55 }
 0x405   : > { %5299 = vmatprep.subr.mxu1 %v12007_v21  ;;  %5111 = vmatpush1.msra.mxu0 %v16778_v40  ;;  %v16794_v21 = vld [vmem:[#allocation20_spill] sm:$0xff]  ;;  %v16818_v35 = vld [vmem:[#allocation51_spill] sm:$0xff] }
 0x406   : > { %5300 = vmatpush1.msra.mxu1 %v12014_v20  ;;  %5114 = vmatprep.subr.mxu0 %v16779_v50  ;;  %v16795_v20 = vand.u32 4294901760, %v16794_v21  ;;  %v16819_v40 = vld [vmem:[#allocation36_spill] sm:$0xff]  ;;  %16829 = vst [vmem:[#allocation8_spill] sm:$0xff] %v12930_v61  ;;  %v12973_v5 = vsub.f32 %v12930_v61, %v12930_v61 }
 0x407   : > { %5301 = vmatprep.subr.mxu1 %v12025_v63  ;;  %5117 = vmatpush1.msra.mxu0 %v16780_v29  ;;  %v4246_v63 = vld [vmem:[%s16005_s17 + $0x134] sm:$0xff]  ;;  %v16820_v50 = vand.u32 4294901760, %v16819_v40 }
 0x408   : > { %5302 = vmatpush1.msra.mxu1 %v12033_v18  ;;  %5120 = vmatprep.subr.mxu0 %v16781_v13  ;;  %v16796_v18 = vld [vmem:[#allocation34_spill] sm:$0xff]  ;;  %v12881_v3 = vunpack.c.l.bf16 %v4246_v63  ;;  %v12913_v13 = vunpack.c.h.bf16 %v4240_v49  ;;  %16847 = vst [vmem:[#allocation11_spill] sm:$0xff] %v12973_v5 }
 0x409   : > { %5303 = vmatprep.subr.mxu1 %v16672_v34  ;;  %5123 = vmatpush1.msra.mxu0 %v16782_v33  ;;  %v16797_v34 = vld [vmem:[#allocation26_spill] sm:$0xff] }
 0x40a   : > { %5304 = vmatpush1.msra.mxu1 %v16674_v0  ;;  %5126 = vmatprep.subr.mxu0 %v16783_v48  ;;  %v16798_v31 = vand.u32 4294901760, %v16797_v34  ;;  %v16799_v0 = vld [vmem:[#allocation39_spill] sm:$0xff]  ;;  %v12911_v29 = vsub.f32 %v12881_v3, %v12881_v3  ;;  %v16822_v33 = vld [vmem:[#allocation50_spill] sm:$0xff]  ;;  %v4231_v34 = vld [vmem:[%s16005_s17 + $0xd0] sm:$0xff] }
 0x40b   : > { %5305 = vmatprep.subr.mxu1 %v16676_v59  ;;  %5129 = vmatpush1.msra.mxu0 %v16784_v9  ;;  %v16801_v59 = vand.u32 4294901760, %v16800_v12  ;;  %v16823_v48 = vld [vmem:[#allocation42_spill] sm:$0xff] }
 0x40c   : > { %5306 = vmatpush1.msra.mxu1 %v16678_v11  ;;  %5132 = vmatprep.subr.mxu0 %v16785_v24  ;;  %v16803_v11 = vld [vmem:[#allocation30_spill] sm:$0xff]  ;;  %16821 = vst [vmem:[#allocation7_spill] sm:$0xff] %v12911_v29  ;;  %v16824_v9 = vand.u32 4294901760, %v16823_v48  ;;  %v12918_v24 = vunpack.c.l.bf16 %v4240_v49  ;;  %v16854_v48 = vld [vmem:[#allocation67_spill] sm:$0xff] }
 0x40d   : > { %5307 = vmatprep.subr.mxu1 %v16680_v17  ;;  %5135 = vmatpush1.msra.mxu0 %v16786_v44  ;;  %v16804_v23 = vand.u32 4294901760, %v16803_v11  ;;  %v12873_v17 = vunpack.c.h.bf16 %v4246_v63  ;;  %v4234_v44 = vld [vmem:[%s16005_s17 + $0xe4] sm:$0xff]  ;;  %v12938_v63 = vsub.f32 %v12901_v16, %v12901_v16 }
 0x40e   : > { %5308 = vmatpush1.msra.mxu1 %v16682_v14  ;;  %5138 = vmatprep.subr.mxu0 %v16787_v57  ;;  %v16805_v14 = vld [vmem:[#allocation43_spill] sm:$0xff]  ;;  %v12953_v11 = vunpack.c.l.bf16 %v4234_v44 }
 0x40f   : > { %5309 = vmatprep.subr.mxu1 %v16684_v2  ;;  %5141 = vmatpush1.msra.mxu0 %v16788_v10  ;;  %v16807_v2 = vand.u32 4294901760, %v16806_v19  ;;  %v12899_v7 = vsub.f32 %v12873_v17, %v12873_v17  ;;  %v16825_v57 = vld [vmem:[#allocation55_spill] sm:$0xff]  ;;  %v16826_v10 = vld [vmem:[#allocation40_spill] sm:$0xff]  ;;  %16833 = vst [vmem:[#allocation19_spill] sm:$0xff] %v12938_v63  ;;  %v12960_v19 = vsub.f32 %v12918_v24, %v12918_v24 }
 0x410   : > { %5310 = vmatpush1.msra.mxu1 %v16686_v47  ;;  %5144 = vmatprep.subr.mxu0 %v16789_v53  ;;  %v16808_v47 = vld [vmem:[#allocation41_spill] sm:$0xff]  ;;  %v16827_v53 = vand.u32 4294901760, %v16826_v10  ;;  %16838 = vst [vmem:[#allocation18_spill] sm:$0xff] %v12953_v11 }
 0x411   : > { %5311 = vmatprep.subr.mxu1 %v16688_v6  ;;  %5147 = vmatpush1.msra.mxu0 %v16790_v4  ;;  %v16810_v6 = vand.u32 4294901760, %v16809_v54  ;;  %16817 = vst [vmem:[#allocation13_spill] sm:$0xff] %v12899_v7  ;;  %v12928_v4 = vsub.f32 %v12892_v8, %v12892_v8  ;;  %16842 = vst [vmem:[#allocation10_spill] sm:$0xff] %v12960_v19  ;;  %v16844_v54 = vld [vmem:[#allocation63_spill] sm:$0xff] }
 0x412   : > { %5312 = vmatpush1.msra.mxu1 %v16690_v62  ;;  %5150 = vmatprep.subr.mxu0 %v16792_v56  ;;  %v16811_v62 = vld [vmem:[#allocation47_spill] sm:$0xff]  ;;  %v16830_v56 = vld [vmem:[#allocation53_spill] sm:$0xff] }
 0x413   : > { %5313 = vmatprep.subr.mxu1 %v16793_v25  ;;  %5153 = vmatpush1.msra.mxu0 %v16795_v20  ;;  %16828 = vst [vmem:[#allocation15_spill] sm:$0xff] %v12928_v4  ;;  %v16831_v25 = vld [vmem:[#allocation46_spill] sm:$0xff]  ;;  %v16274_v20 = vand.u32 4294901760, %v12899_v7 }
 0x414   : > { %5314 = vmatpush1.msra.mxu1 %v16796_v18  ;;  %5156 = vmatprep.subr.mxu0 %v16798_v31  ;;  %v16832_v21 = vand.u32 4294901760, %v16831_v25  ;;  %v12940_v18 = vunpack.c.h.bf16 %v4237_v55  ;;  %v16834_v31 = vld [vmem:[#allocation59_spill] sm:$0xff]  ;;  %v16859_v25 = vld [vmem:[#allocation66_spill] sm:$0xff] }
 0x415   : > { %5315 = vmatprep.subr.mxu1 %v16799_v0  ;;  %5159 = vmatpush1.msra.mxu0 %v16801_v59  ;;  %v16835_v0 = vld [vmem:[#allocation44_spill] sm:$0xff]  ;;  %v16273_v59 = vand.u32 4294901760, %v12911_v29  ;;  %v12983_v55 = vsub.f32 %v12899_v7, %v16274_v20  ;;  %v16882_v20 = vld [vmem:[#allocation79_spill] sm:$0xff]  ;;  %v16934_v7 = vand.u32 4294901760, %v16759_v37 }
 0x416   : > { %5316 = vmatpush2.msra.mxu1 %v16802_v27  ;;  %5162 = vmatprep.subr.mxu0 %v16804_v23  ;;  %v16836_v12 = vand.u32 4294901760, %v16835_v0  ;;  %v12951_v27 = vsub.f32 %v12913_v13, %v12913_v13  ;;  %v16839_v23 = vld [vmem:[#allocation57_spill] sm:$0xff]  ;;  %v12988_v40 = vsub.f32 %v12940_v18, %v12940_v18 }
 0x417   : > { %5317 = vmatprep.subr.mxu1 %v16805_v14  ;;  %5165 = vmatpush1.msra.mxu0 %v16807_v2  ;;  %v16841_v14 = vand.u32 4294901760, %v16840_v32  ;;  %v12962_v2 = vunpack.c.h.bf16 %v4234_v44  ;;  %v16865_v32 = vld [vmem:[#allocation56_spill] sm:$0xff]  ;;  %v16939_v37 = vand.u32 4294901760, %v12983_v55 }
 0x418   : > { %5318 = vmatpush2.msra.mxu1 %v16808_v47  ;;  %5168 = vmatprep.subr.mxu0 %v16810_v6  ;;  %16837 = vst [vmem:[#allocation9_spill] sm:$0xff] %v12951_v27  ;;  %v4228_v47 = vld [vmem:[%s16005_s17 + $0xbc] sm:$0xff]  ;;  %v16845_v6 = vld [vmem:[#allocation48_spill] sm:$0xff]  ;;  %16852 = vst [vmem:[#allocation12_spill] sm:$0xff] %v12988_v40  ;;  %v16270_v10 = vand.u32 4294901760, %v12951_v27 }
 0x419   : > { %5319 = vmatprep.subr.mxu1 %v16811_v62  ;;  %5171 = vmatpush1.msra.mxu0 %v16813_v58  ;;  %16843 = vst [vmem:[#allocation23_spill] sm:$0xff] %v12962_v2  ;;  %v16846_v49 = vand.u32 4294901760, %v16845_v6  ;;  %v16272_v62 = vand.u32 4294901760, %v12928_v4  ;;  %v12975_v58 = vunpack.c.h.bf16 %v4231_v34  ;;  %v13016_v0 = vsub.f32 %v12962_v2, %v12962_v2 }
 0x41a   : > { %5320 = vmatpush2.msra.mxu1 %v16814_v30  ;;  %5174 = vmatprep.subr.mxu0 %v16816_v22  ;;  %v16849_v30 = vld [vmem:[#allocation61_spill] sm:$0xff]  ;;  %v16851_v22 = vand.u32 4294901760, %v16850_v15  ;;  %v16276_v6 = vand.u32 4294901760, %v12973_v5  ;;  %v16870_v15 = vld [vmem:[#allocation62_spill] sm:$0xff] }
 0x41b   : > { %5321 = vmatprep.subr.mxu1 %v16818_v35  ;;  %5177 = vmatpush1.msra.mxu0 %v16820_v50  ;;  %16848 = vst [vmem:[#allocation21_spill] sm:$0xff] %v12975_v58  ;;  %v16271_v35 = vand.u32 4294901760, %v12938_v63  ;;  %v12990_v50 = vunpack.c.l.bf16 %v4231_v34  ;;  %16862 = vst [vmem:[#allocation16_spill] sm:$0xff] %v13016_v0 }
 0x41c   : > { %5322 = vmatpush2.msra.mxu1 %v16822_v33  ;;  %5180 = vmatprep.subr.mxu0 %v16824_v9  ;;  %v4225_v33 = vld [vmem:[%s16005_s17 + $0xa8] sm:$0xff]  ;;  %v16855_v9 = vld [vmem:[#allocation52_spill] sm:$0xff] }
 0x41d   : > { %5323 = vmatprep.subr.mxu1 %v16825_v57  ;;  %5183 = vmatpush2.msra.mxu0 %v16827_v53  ;;  %16853 = vst [vmem:[#allocation27_spill] sm:$0xff] %v12990_v50  ;;  %v16856_v44 = vand.u32 4294901760, %v16855_v9  ;;  %v13001_v57 = vsub.f32 %v12911_v29, %v16273_v59  ;;  %v13006_v53 = vsub.f32 %v12953_v11, %v12953_v11  ;;  %v13079_v59 = vunpack.c.h.bf16 %v4225_v33  ;;  %v4210_v29 = vld [vmem:[%s16005_s17 + $0x44] sm:$0xff] }
 0x41e   : > { %5324 = vmatpush2.msra.mxu1 %v16830_v56  ;;  %5186 = vmatprep.subr.mxu0 %v16832_v21  ;;  %v13008_v56 = vunpack.c.l.bf16 %v4228_v47  ;;  %v16860_v21 = vld [vmem:[#allocation58_spill] sm:$0xff]  ;;  %v13042_v9 = vsub.f32 %v12938_v63, %v16271_v35 }
 0x41f   : > { %5325 = vmatprep.subr.mxu1 %v16834_v31  ;;  %5189 = vmatpush2.msra.mxu0 %v16836_v12  ;;  %16857 = vst [vmem:[#allocation14_spill] sm:$0xff] %v13006_v53  ;;  %v16861_v34 = vand.u32 4294901760, %v16860_v21  ;;  %v16275_v31 = vand.u32 4294901760, %v12960_v19  ;;  %v13018_v12 = vunpack.c.h.bf16 %v4228_v47  ;;  %v16869_v47 = vld [vmem:[#allocation69_spill] sm:$0xff]  ;;  %v16873_v21 = vld [vmem:[#allocation75_spill] sm:$0xff]  ;;  %16881 = vst [vmem:[#allocation86_spill] sm:$0xff] %v13079_v59 }
 0x420   : > { %5326 = vmatpush2.msra.mxu1 %v16839_v23  ;;  %5192 = vmatprep.subr.mxu0 %v16841_v14  ;;  %16858 = vst [vmem:[#allocation25_spill] sm:$0xff] %v13008_v56  ;;  %v16864_v23 = vld [vmem:[#allocation71_spill] sm:$0xff]  ;;  %v16866_v14 = vand.u32 4294901760, %v16865_v32  ;;  %v16883_v32 = vld [vmem:[#allocation64_spill] sm:$0xff]  ;;  %v16887_v35 = vld [vmem:[#allocation70_spill] sm:$0xff] }
 0x421   : > { %5327 = vmatprep.subr.mxu1 %v16844_v54  ;;  %5195 = vmatpush2.msra.mxu0 %v16846_v49  ;;  %16863 = vst [vmem:[#allocation31_spill] sm:$0xff] %v13018_v12  ;;  %v13026_v54 = vsub.f32 %v12928_v4, %v16272_v62  ;;  %v13031_v49 = vsub.f32 %v12975_v58, %v12975_v58  ;;  %v16917_v4 = vld [vmem:[#allocation81_spill] sm:$0xff] }
 0x422   : > { %5328 = vmatpush2.msra.mxu1 %v16849_v30  ;;  %5198 = vmatprep.subr.mxu0 %v16851_v22  ;;  %v13033_v30 = vunpack.c.l.bf16 %v4225_v33  ;;  %v16871_v22 = vand.u32 4294901760, %v16870_v15  ;;  %v13061_v15 = vsub.f32 %v13008_v56, %v13008_v56  ;;  %v13077_v62 = vsub.f32 %v13018_v12, %v13018_v12  ;;  %v16886_v33 = vld [vmem:[#allocation77_spill] sm:$0xff] }
 0x423   : > { %5329 = vmatprep.subr.mxu1 %v16854_v48  ;;  %5201 = vmatpush2.msra.mxu0 %v16856_v44  ;;  %16867 = vst [vmem:[#allocation17_spill] sm:$0xff] %v13031_v49  ;;  %v16277_v44 = vand.u32 4294901760, %v12988_v40 }
 0x424   : > { %5330 = vmatpush2.msra.mxu1 %v16859_v25  ;;  %5204 = vmatprep.subr.mxu0 %v16861_v34  ;;  %16868 = vst [vmem:[#allocation29_spill] sm:$0xff] %v13033_v30  ;;  %v13047_v25 = vsub.f32 %v12990_v50, %v12990_v50  ;;  %v16874_v34 = vld [vmem:[#allocation60_spill] sm:$0xff]  ;;  %16876 = vst [vmem:[#allocation95_spill] sm:$0xff] %v13061_v15  ;;  %v13093_v48 = vsub.f32 %v13033_v30, %v13033_v30 }
 0x425   : > { %5331 = vmatprep.subr.mxu1 %v16864_v23  ;;  %5207 = vmatpush2.msra.mxu0 %v16866_v14  ;;  %v16875_v23 = vand.u32 4294901760, %v16874_v34  ;;  %v13056_v14 = vsub.f32 %v12951_v27, %v16270_v10  ;;  %v16878_v34 = vld [vmem:[#allocation65_spill] sm:$0xff]  ;;  %v13072_v10 = vsub.f32 %v12960_v19, %v16275_v31  ;;  %16880 = vst [vmem:[#allocation80_spill] sm:$0xff] %v13077_v62  ;;  %v4219_v31 = vld [vmem:[%s16005_s17 + $0x80] sm:$0xff] }
 0x426   : > { %5332 = vmatpush2.msra.mxu1 %v16869_v47  ;;  %5210 = vmatprep.subr.mxu0 %v16871_v22  ;;  %16872 = vst [vmem:[#allocation76_spill] sm:$0xff] %v13047_v25  ;;  %v4222_v22 = vld [vmem:[%s16005_s17 + $0x94] sm:$0xff]  ;;  %16885 = vst [vmem:[#allocation84_spill] sm:$0xff] %v13093_v48  ;;  %v16890_v47 = vld [vmem:[#allocation83_spill] sm:$0xff] }
 0x427   : > { %5333 = vmatprep.subr.mxu1 %v16873_v21  ;;  %5213 = vmatpush2.msra.mxu0 %v16875_v23  ;;  %v16877_v21 = vld [vmem:[#allocation73_spill] sm:$0xff]  ;;  %v16879_v23 = vand.u32 4294901760, %v16878_v34  ;;  %v13105_v34 = vunpack.c.l.bf16 %v4222_v22  ;;  %v13120_v38 = vunpack.c.h.bf16 %v4222_v22  ;;  %v16900_v22 = vld [vmem:[#allocation87_spill] sm:$0xff]  ;;  %v16906_v27 = vld [vmem:[#allocation78_spill] sm:$0xff] }
 0x428   : > { %5334 = vmatpush2.msra.mxu1 %v16877_v21  ;;  %v16884_v21 = vand.u32 4294901760, %v16883_v32  ;;  %v16893_v32 = vand.u32 4294901760, %v13006_v53  ;;  %v16907_v63 = vand.u32 4294901760, %v16906_v27 }
 0x429   : > { %5216 = vmatprep.subr.mxu0 %v16879_v23  ;;  %5335 = vmatprep.subr.mxu1 %v16882_v20  ;;  %v13088_v23 = vsub.f32 %v12973_v5, %v16276_v6  ;;  %v16888_v20 = vand.u32 4294901760, %v16887_v35  ;;  %16889 = vst [vmem:[#allocation90_spill] sm:$0xff] %v13105_v34  ;;  %16894 = vst [vmem:[#allocation5_spill] sm:$0xff] %v13120_v38  ;;  %v16895_v5 = vld [vmem:[#allocation82_spill] sm:$0xff] }
 0x42a   : > { %5219 = vmatpush2.msra.mxu0 %v16884_v21  ;;  %5336 = vmatpush2.msra.mxu1 %v16886_v33  ;;  %v13102_v21 = vsub.f32 %v12988_v40, %v16277_v44  ;;  %v16891_v33 = vld [vmem:[#allocation68_spill] sm:$0xff]  ;;  %v13117_v44 = vsub.f32 %v13006_v53, %v16893_v32  ;;  %v16896_v40 = vld [vmem:[#allocation74_spill] sm:$0xff]  ;;  %v13134_v32 = vsub.f32 %v13079_v59, %v13079_v59  ;;  %v13149_v53 = vunpack.c.h.bf16 %v4219_v31 }
 0x42b   : > { %5222 = vmatprep.subr.mxu0 %v16888_v20  ;;  %5337 = vmatprep.subr.mxu1 %v16890_v47  ;;  %v16892_v35 = vand.u32 4294901760, %v16891_v33  ;;  %v16897_v19 = vand.u32 4294901760, %v16896_v40  ;;  %v16898_v33 = vand.u32 4294901760, %v13016_v0  ;;  %v13164_v47 = vunpack.c.l.bf16 %v4219_v31  ;;  %v16911_v20 = vld [vmem:[#allocation91_spill] sm:$0xff] }
 0x42c   : > { %5338 = vmatpush2.msra.mxu1 %v16895_v5  ;;  %16899 = vst [vmem:[#allocation88_spill] sm:$0xff] %v13134_v32  ;;  %v4216_v5 = vld [vmem:[%s16005_s17 + $0x6c] sm:$0xff]  ;;  %16904 = vst [vmem:[#allocation94_spill] sm:$0xff] %v13149_v53  ;;  %v13180_v31 = vsub.f32 %v13120_v38, %v13120_v38 }
 0x42d   : > { %5225 = vmatpush2.msra.mxu0 %v16892_v35  ;;  %v13129_v35 = vsub.f32 %v13016_v0, %v16898_v33  ;;  %5339 = vmatprep.subr.mxu1 %v16900_v22  ;;  %v16903_v33 = vand.u32 4294901760, %v13031_v49  ;;  %v16905_v0 = vld [vmem:[#allocation85_spill] sm:$0xff]  ;;  %16910 = vst [vmem:[#allocation97_spill] sm:$0xff] %v13164_v47 }
 0x42e   : > { %5228 = vmatprep.subr.mxu0 %v16897_v19  ;;  %v16901_v19 = vld [vmem:[#allocation72_spill] sm:$0xff]  ;;  %5340 = vmatpush2.msra.mxu1 %v16905_v0  ;;  %v4213_v0 = vld [vmem:[%s16005_s17 + $0x58] sm:$0xff]  ;;  %16914 = vst [vmem:[#allocation96_spill] sm:$0xff] %v13180_v31 }
 0x42f   : > { %v16902_v40 = vand.u32 4294901760, %v16901_v19  ;;  %v13146_v6 = vsub.f32 %v13031_v49, %v16903_v33  ;;  %v16908_v19 = vand.u32 4294901760, %v13047_v25  ;;  %v13162_v33 = vsub.f32 %v13105_v34, %v13105_v34  ;;  %5341 = vmatprep.subr.mxu1 %v16911_v20  ;;  %v16916_v49 = vld [vmem:[#allocation89_spill] sm:$0xff] }
 0x430   : > { %5342 = vmatpush2.msra.mxu1 %v16916_v49  ;;  %v16918_v20 = vand.u32 4294901760, %v16917_v4  ;;  %v16921_v4 = vand.u32 4294901760, %v16753_v1  ;;  %v13221_v49 = vsub.f32 %v13164_v47, %v13164_v47 }
 0x431   : > { %5231 = vmatpush2.msra.mxu0 %v16902_v40  ;;  %v13158_v40 = vsub.f32 %v13047_v25, %v16908_v19  ;;  %16909 = vst [vmem:[#allocation92_spill] sm:$0xff] %v13162_v33  ;;  %v16913_v19 = vand.u32 4294901760, %v13061_v15  ;;  %v13182_v25 = vunpack.c.l.bf16 %v4216_v5  ;;  %5343 = vmatprep.subr.mxu1 %v16752_v36  ;;  %v16926_v36 = vand.u32 4294901760, %v16755_v42 }
 0x432   : > { %5234 = vmatprep.subr.mxu0 %v16907_v63  ;;  %v16912_v63 = vand.u32 4294901760, %v16749_v46  ;;  %v13212_v46 = vunpack.c.l.bf16 %v4213_v0  ;;  %16927 = vst [vmem:[#allocation35_spill] sm:$0xff] %v13221_v49  ;;  %v16944_v47 = vand.u32 4294901760, %v13162_v33 }
 0x433   : > { %v13176_v22 = vsub.f32 %v13061_v15, %v16913_v19  ;;  %16915 = vst [vmem:[#allocation101_spill] sm:$0xff] %v13182_v25  ;;  %v13194_v15 = vunpack.c.h.bf16 %v4216_v5  ;;  %v13210_v5 = vsub.f32 %v13149_v53, %v13149_v53  ;;  %v16925_v19 = vld [vmem:[#allocation93_spill] sm:$0xff]  ;;  %v13235_v1 = vsub.f32 %v13182_v25, %v13182_v25  ;;  %v16938_v25 = vld [vmem:[#allocation102_spill] sm:$0xff] }
 0x434   : > { %5237 = vmatpush2.msra.mxu0 %v16912_v63  ;;  %v16919_v63 = vand.u32 4294901760, %v13077_v62  ;;  %16924 = vst [vmem:[#allocation22_spill] sm:$0xff] %v13212_v46  ;;  %5344 = vmatpush2.msra.mxu1 %v16925_v19  ;;  %v16930_v19 = vand.u32 4294901760, %v16757_v52  ;;  %v16935_v52 = vand.u32 4294901760, %v13134_v32  ;;  %v13275_v55 = vsub.f32 %v13162_v33, %v16944_v47 }
 0x435   : > { %5240 = vmatprep.subr.mxu0 %v16918_v20  ;;  %16920 = vst [vmem:[#allocation100_spill] sm:$0xff] %v13194_v15  ;;  %v16922_v20 = vand.u32 4294901760, %v13093_v48  ;;  %16923 = vst [vmem:[#allocation6_spill] sm:$0xff] %v13210_v5  ;;  %v13250_v42 = vsub.f32 %v13194_v15, %v13194_v15  ;;  %v16943_v15 = vand.u32 4294901760, %v13001_v57  ;;  %v16947_v57 = vand.u32 4294901760, %v16762_v43 }
 0x436   : > { %v13191_v27 = vsub.f32 %v13077_v62, %v16919_v63  ;;  %5243 = vmatpush2.msra.mxu0 %v16921_v4  ;;  %v16929_v62 = vld [vmem:[#allocation99_spill] sm:$0xff]  ;;  %16931 = vst [vmem:[#allocation34_spill] sm:$0xff] %v13235_v1  ;;  %v13237_v4 = vunpack.c.l.bf16 %v4210_v29  ;;  %v16951_v33 = vand.u32 4294901760, %v13026_v54  ;;  %v16957_v54 = vand.u32 4294901760, %v13210_v5 }
 0x437   : > { %v13206_v63 = vsub.f32 %v13093_v48, %v16922_v20  ;;  %5246 = vmatprep.subr.mxu0 %v16926_v36  ;;  %v13223_v20 = vunpack.c.h.bf16 %v4213_v0  ;;  %v4207_v48 = vld [vmem:[%s16005_s17 + $0x30] sm:$0xff]  ;;  %5345 = vmatprep.subr.mxu1 %v16929_v62  ;;  %v16933_v0 = vld [vmem:[#allocation98_spill] sm:$0xff]  ;;  %16936 = vst [vmem:[#allocation39_spill] sm:$0xff] %v13250_v42  ;;  %v13252_v36 = vunpack.c.h.bf16 %v4210_v29  ;;  %v13264_v62 = vsub.f32 %v13212_v46, %v13212_v46 }
 0x438   : > { %5249 = vmatpush2.msra.mxu0 %v16930_v19  ;;  %16932 = vst [vmem:[#allocation26_spill] sm:$0xff] %v13237_v4  ;;  %5346 = vmatpush2.msra.mxu1 %v16933_v0  ;;  %v13246_v19 = vsub.f32 %v13134_v32, %v16935_v52  ;;  %v4204_v0 = vld [vmem:[%s16005_s17 + $0x1c] sm:$0xff]  ;;  %v13266_v32 = vunpack.c.h.bf16 %v4207_v48  ;;  %v16942_v29 = vand.u32 4294901760, %v16761_v60  ;;  %v13282_v52 = vunpack.c.l.bf16 %v4207_v48  ;;  %v4201_v60 = vld [vmem:[%s16005_s17 + $0x8] sm:$0xff] }
 0x439   : > { %16928 = vst [vmem:[#allocation20_spill] sm:$0xff] %v13223_v20  ;;  %5252 = vmatprep.subr.mxu0 %v16934_v7  ;;  %16937 = vst [vmem:[#allocation24_spill] sm:$0xff] %v13252_v36  ;;  %5350 = vmatmul.mubr.f32.vlgmr.msra.gmra.mxu1 %v16938_v25  ;;  %v13280_v7 = vsub.f32 %v13223_v20, %v13223_v20  ;;  %v13298_v48 = vsub.f32 %v13237_v4, %v13237_v4  ;;  %v16956_v4 = vand.u32 4294901760, %v16764_v51 }
 0x43a   : > { %5441 = vmatprep.subr.mxu1 %v16939_v37  ;;  %16940 = vst [vmem:[#allocation37_spill] sm:$0xff] %v13264_v62  ;;  %16941 = vst [vmem:[#allocation30_spill] sm:$0xff] %v13266_v32  ;;  %5255 = vmatpush2.msra.mxu0 %v16942_v29  ;;  %v13300_v37 = vunpack.c.l.bf16 %v4204_v0  ;;  %v13312_v29 = vunpack.c.h.bf16 %v4204_v0  ;;  %v13328_v43 = vunpack.c.l.bf16 %v4201_v60  ;;  %v16960_v0 = vand.u32 4294901760, %v13056_v14 }
 0x43b   : > { %5446 = vmatpush1.msra.mxu1 %v16943_v15  ;;  %16945 = vst [vmem:[#allocation43_spill] sm:$0xff] %v13280_v7  ;;  %16946 = vst [vmem:[#allocation28_spill] sm:$0xff] %v13282_v52  ;;  %5758 = vmatprep.mubr.f32.mxu1 %v12626_v41  ;;  %v16948_v15 = vand.u32 4294901760, %v13180_v31  ;;  %v16952_v41 = vand.u32 4294901760, %v16763_v39  ;;  %v13321_v39 = vsub.f32 %v13210_v5, %v16957_v54  ;;  %v16965_v14 = vand.u32 4294901760, %v16766_v26  ;;  %v4282_v5 = vld [vmem:[%s16005_s17 + $0x224] sm:$0xff] }
 0x43c   : > { %5258 = vmatprep.subr.mxu0 %v16947_v57  ;;  %16949 = vst [vmem:[#allocation41_spill] sm:$0xff] %v13298_v48  ;;  %16950 = vst [vmem:[#allocation33_spill] sm:$0xff] %v13300_v37  ;;  %5451 = vmatprep.subr.mxu1 %v16951_v33  ;;  %v13326_v33 = vsub.f32 %v13266_v32, %v13266_v32  ;;  %v16964_v57 = vand.u32 4294901760, %v13072_v10  ;;  %v13358_v51 = vsub.f32 %v13300_v37, %v13300_v37  ;;  %v4294_v10 = vld [vmem:[%s16005_s17 + $0x274] sm:$0xff] }
 0x43d   : > { %v13293_v47 = vsub.f32 %v13180_v31, %v16948_v15  ;;  %5261 = vmatpush2.msra.mxu0 %v16952_v41  ;;  %v13310_v15 = vsub.f32 %v13252_v36, %v13252_v36  ;;  %16954 = vst [vmem:[#allocation32_spill] sm:$0xff] %v13312_v29  ;;  %v16955_v31 = vand.u32 4294901760, %v13042_v9  ;;  %16959 = vst [vmem:[#allocation38_spill] sm:$0xff] %v13328_v43  ;;  %v16961_v9 = vand.u32 4294901760, %v16765_v28 }
 0x43e   : > { %5264 = vmatprep.subr.mxu0 %v16956_v4  ;;  %16958 = vst [vmem:[#allocation45_spill] sm:$0xff] %v13326_v33  ;;  %v13343_v41 = vsub.f32 %v13282_v52, %v13282_v52  ;;  %16967 = vst [vmem:[#allocation36_spill] sm:$0xff] %v13358_v51  ;;  %v16968_v26 = vand.u32 4294901760, %v13102_v21  ;;  %v13377_v54 = vunpack.c.h.bf16 %v4201_v60  ;;  %v16974_v21 = vand.u32 4294901760, %v13264_v62 }
 0x43f   : > { %16953 = vst [vmem:[#allocation47_spill] sm:$0xff] %v13310_v15  ;;  %5456 = vmatpush1.msra.mxu1 %v16955_v31  ;;  %5267 = vmatpush2.msra.mxu0 %v16961_v9  ;;  %v16962_v31 = vand.u32 4294901760, %v13221_v49  ;;  %v16977_v60 = vand.u32 4294901760, %v13280_v7  ;;  %v13403_v28 = vunpack.c.l.bf16 %v4294_v10 }
 0x440   : > { %5461 = vmatprep.subr.mxu1 %v16960_v0  ;;  %16963 = vst [vmem:[#allocation51_spill] sm:$0xff] %v13343_v41  ;;  %5270 = vmatprep.subr.mxu0 %v16965_v14  ;;  %v16966_v0 = vand.u32 4294901760, %v13235_v1  ;;  %v16970_v14 = vand.u32 4294901760, %v13250_v42  ;;  %16972 = vst [vmem:[#allocation42_spill] sm:$0xff] %v13377_v54 }
 0x441   : > { %v13338_v4 = vsub.f32 %v13221_v49, %v16962_v31  ;;  %5466 = vmatpush1.msra.mxu1 %v16964_v57  ;;  %v16969_v57 = vand.u32 4294901760, %v16767_v45  ;;  %v13375_v31 = vsub.f32 %v13312_v29, %v13312_v29  ;;  %v13400_v45 = vsub.f32 %v13280_v7, %v16977_v60  ;;  %16978 = vst [vmem:[#allocation40_spill] sm:$0xff] %v13403_v28 }
 0x442   : > { %v13353_v9 = vsub.f32 %v13235_v1, %v16966_v0  ;;  %5471 = vmatprep.subr.mxu1 %v16968_v26  ;;  %v13370_v0 = vsub.f32 %v13250_v42, %v16970_v14  ;;  %v16973_v1 = vand.u32 4294901760, %v13088_v23  ;;  %v13386_v26 = vsub.f32 %v13264_v62, %v16974_v21  ;;  %v16979_v62 = vld [vmem:[#allocation108_spill] sm:$0xff] }
 0x443   : > { %5273 = vmatpush2.msra.mxu0 %v16969_v57  ;;  %16971 = vst [vmem:[#allocation50_spill] sm:$0xff] %v13375_v31  ;;  %v13391_v14 = vsub.f32 %v13328_v43, %v13328_v43  ;;  %v16976_v23 = vand.u32 4294901760, %v13129_v35  ;;  %v4291_v57 = vld [vmem:[%s16005_s17 + $0x260] sm:$0xff]  ;;  %v13417_v21 = vunpack.c.h.bf16 %v4294_v10  ;;  %v16982_v7 = vand.u32 4294901760, %v13117_v44  ;;  %v4288_v44 = vld [vmem:[%s16005_s17 + $0x24c] sm:$0xff] }
 0x444   : > { %5476 = vmatpush1.msra.mxu1 %v16973_v1  ;;  %5277 = vmatmul.mubr.f32.vlgmr.msra.gmra.mxu0 %v16938_v25  ;;  %v13446_v60 = vunpack.c.h.bf16 %v4291_v57 }
 0x445   : > { %16975 = vst [vmem:[#allocation55_spill] sm:$0xff] %v13391_v14  ;;  %5356 = vmatprep.subr.mxu0 %v12873_v17  ;;  %5481 = vmatprep.subr.mxu1 %v16976_v23  ;;  %v16980_v23 = vand.u32 4294901760, %v13298_v48  ;;  %16981 = vst [vmem:[#allocation53_spill] sm:$0xff] %v13417_v21 }
 0x446   : > { %5357 = vmatpush1.msra.mxu0 %v12881_v3  ;;  %5425 = vmatprep.mubr.f32.mxu0 %v16979_v62  ;;  %v16983_v62 = vand.u32 4294901760, %v13310_v15  ;;  %16987 = vst [vmem:[#allocation59_spill] sm:$0xff] %v13446_v60 }
 0x447   : > { %v13414_v1 = vsub.f32 %v13298_v48, %v16980_v23  ;;  %5486 = vmatpush1.msra.mxu1 %v16982_v7  ;;  %5358 = vmatprep.subr.mxu0 %v12892_v8  ;;  %v13431_v23 = vsub.f32 %v13377_v54, %v13377_v54  ;;  %v16985_v7 = vand.u32 4294901760, %v13146_v6  ;;  %v16988_v48 = vand.u32 4294901760, %v13158_v40  ;;  %v4285_v40 = vld [vmem:[%s16005_s17 + $0x238] sm:$0xff] }
 0x448   : > { %v13426_v35 = vsub.f32 %v13310_v15, %v16983_v62  ;;  %5359 = vmatpush1.msra.mxu0 %v12901_v16  ;;  %v16986_v62 = vand.u32 4294901760, %v13326_v33  ;;  %v16996_v15 = vand.u32 4294901760, %v13176_v22  ;;  %v16999_v22 = vand.u32 4294901760, %v13246_v19 }
 0x449   : > { %16984 = vst [vmem:[#allocation46_spill] sm:$0xff] %v13431_v23  ;;  %5491 = vmatprep.subr.mxu1 %v16985_v7  ;;  %5360 = vmatprep.subr.mxu0 %v12913_v13  ;;  %v16989_v7 = vand.u32 4294901760, %v13343_v41 }
 0x44a   : > { %v13443_v42 = vsub.f32 %v13326_v33, %v16986_v62  ;;  %5496 = vmatpush1.msra.mxu1 %v16988_v48  ;;  %v13459_v62 = vsub.f32 %v13403_v28, %v13403_v28  ;;  %v13461_v33 = vunpack.c.l.bf16 %v4291_v57  ;;  %v16992_v48 = vand.u32 4294901760, %v13191_v27  ;;  %5361 = vmatpush1.msra.mxu0 %v12918_v24 }
 0x44b   : > { %v13455_v10 = vsub.f32 %v13343_v41, %v16989_v7  ;;  %v16993_v7 = vand.u32 4294901760, %v13358_v51  ;;  %v13477_v57 = vsub.f32 %v13417_v21, %v13417_v21  ;;  %v13479_v41 = vunpack.c.l.bf16 %v4288_v44  ;;  %5362 = vmatprep.subr.mxu0 %v12940_v18 }
 0x44c   : > { %16990 = vst [vmem:[#allocation44_spill] sm:$0xff] %v13459_v62  ;;  %16991 = vst [vmem:[#allocation57_spill] sm:$0xff] %v13461_v33  ;;  %5501 = vmatprep.subr.mxu1 %v16992_v48  ;;  %v16997_v48 = vand.u32 4294901760, %v13375_v31  ;;  %5363 = vmatpush1.msra.mxu0 %v12930_v61  ;;  %v17000_v27 = vand.u32 4294901760, %v13391_v14  ;;  %v17006_v61 = vand.u32 4294901760, %v13293_v47 }
 0x44d   : > { %v13473_v49 = vsub.f32 %v13358_v51, %v16993_v7  ;;  %16994 = vst [vmem:[#allocation49_spill] sm:$0xff] %v13477_v57  ;;  %16995 = vst [vmem:[#allocation63_spill] sm:$0xff] %v13479_v41  ;;  %5506 = vmatpush1.msra.mxu1 %v16996_v15  ;;  %v13491_v51 = vunpack.c.h.bf16 %v4288_v44  ;;  %v13507_v44 = vsub.f32 %v13446_v60, %v13446_v60  ;;  %v13509_v7 = vunpack.c.l.bf16 %v4285_v40 }
 0x44e   : > { %v13488_v6 = vsub.f32 %v13375_v31, %v16997_v48  ;;  %5511 = vmatprep.subr.mxu1 %v16999_v22  ;;  %v13503_v48 = vsub.f32 %v13391_v14, %v17000_v27  ;;  %v17003_v31 = vand.u32 4294901760, %v13206_v63  ;;  %5364 = vmatprep.subr.mxu0 %v12962_v2  ;;  %v13518_v15 = vsub.f32 %v13461_v33, %v13461_v33  ;;  %v4279_v14 = vld [vmem:[%s16005_s17 + $0x210] sm:$0xff] }
 0x44f   : > { %16998 = vst [vmem:[#allocation48_spill] sm:$0xff] %v13491_v51  ;;  %17001 = vst [vmem:[#allocation61_spill] sm:$0xff] %v13507_v44  ;;  %v13520_v27 = vunpack.c.h.bf16 %v4285_v40  ;;  %5365 = vmatpush1.msra.mxu0 %v12953_v11  ;;  %v13532_v19 = vsub.f32 %v13479_v41, %v13479_v41  ;;  %v13534_v22 = vunpack.c.l.bf16 %v4282_v5  ;;  %v17009_v40 = vand.u32 4294901760, %v13275_v55  ;;  %v4276_v55 = vld [vmem:[%s16005_s17 + $0x1fc] sm:$0xff] }
 0x450   : > { %17002 = vst [vmem:[#allocation54_spill] sm:$0xff] %v13509_v7  ;;  %5516 = vmatpush1.msra.mxu1 %v17003_v31  ;;  %17004 = vst [vmem:[#allocation67_spill] sm:$0xff] %v13518_v15  ;;  %5366 = vmatprep.subr.mxu0 %v12975_v58  ;;  %v13547_v63 = vsub.f32 %v13491_v51, %v13491_v51  ;;  %v13549_v31 = vunpack.c.h.bf16 %v4282_v5  ;;  %v13563_v58 = vunpack.c.h.bf16 %v4279_v14  ;;  %v17016_v5 = vand.u32 4294901760, %v13338_v4  ;;  %v4273_v4 = vld [vmem:[%s16005_s17 + $0x1e8] sm:$0xff] }
 0x451   : > { %17005 = vst [vmem:[#allocation52_spill] sm:$0xff] %v13520_v27  ;;  %5521 = vmatprep.subr.mxu1 %v17006_v61  ;;  %17007 = vst [vmem:[#allocation66_spill] sm:$0xff] %v13532_v19  ;;  %v17010_v61 = vand.u32 4294901760, %v13431_v23  ;;  %5367 = vmatpush1.msra.mxu0 %v12990_v50  ;;  %v13578_v50 = vunpack.c.l.bf16 %v4279_v14  ;;  %v13594_v14 = vsub.f32 %v13534_v22, %v13534_v22  ;;  %v17024_v2 = vand.u32 4294901760, %v13353_v9 }
 0x452   : > { %17008 = vst [vmem:[#allocation58_spill] sm:$0xff] %v13534_v22  ;;  %5526 = vmatpush1.msra.mxu1 %v17009_v40  ;;  %17011 = vst [vmem:[#allocation71_spill] sm:$0xff] %v13547_v63  ;;  %v17013_v40 = vand.u32 4294901760, %v13321_v39  ;;  %5368 = vmatprep.subr.mxu0 %v13018_v12  ;;  %v17017_v39 = vand.u32 4294901760, %v13459_v62  ;;  %v13596_v12 = vunpack.c.l.bf16 %v4276_v55  ;;  %v13607_v47 = vunpack.c.h.bf16 %v4276_v55 }
 0x453   : > { %v13543_v11 = vsub.f32 %v13431_v23, %v17010_v61  ;;  %17012 = vst [vmem:[#allocation56_spill] sm:$0xff] %v13549_v31  ;;  %v13561_v23 = vsub.f32 %v13509_v7, %v13509_v7  ;;  %17015 = vst [vmem:[#allocation62_spill] sm:$0xff] %v13563_v58  ;;  %v13576_v61 = vsub.f32 %v13520_v27, %v13520_v27  ;;  %5369 = vmatpush1.msra.mxu0 %v13008_v56 }
 0x454   : > { %5531 = vmatprep.subr.mxu1 %v17013_v40  ;;  %v13571_v40 = vsub.f32 %v13459_v62, %v17017_v39  ;;  %17019 = vst [vmem:[#allocation60_spill] sm:$0xff] %v13578_v50  ;;  %v17021_v39 = vand.u32 4294901760, %v13477_v57  ;;  %17022 = vst [vmem:[#allocation73_spill] sm:$0xff] %v13594_v14  ;;  %5370 = vmatprep.subr.mxu0 %v13079_v59  ;;  %v17028_v9 = vand.u32 4294901760, %v13507_v44  ;;  %v13622_v59 = vunpack.c.l.bf16 %v4273_v4 }
 0x455   : > { %17014 = vst [vmem:[#allocation69_spill] sm:$0xff] %v13561_v23  ;;  %5536 = vmatpush1.msra.mxu1 %v17016_v5  ;;  %17018 = vst [vmem:[#allocation75_spill] sm:$0xff] %v13576_v61  ;;  %v17020_v5 = vand.u32 4294901760, %v13370_v0  ;;  %v5590_v0 = vand.u32 4294901760, %v13543_v11  ;;  %5371 = vmatpush1.msra.mxu0 %v13033_v30  ;;  %v17031_v55 = vand.u32 4294901760, %v13386_v26  ;;  %v17034_v30 = vand.u32 4294901760, %v13426_v35 }
 0x456   : > { %v13589_v62 = vsub.f32 %v13477_v57, %v17021_v39  ;;  %17023 = vst [vmem:[#allocation65_spill] sm:$0xff] %v13596_v12  ;;  %v13605_v39 = vsub.f32 %v13549_v31, %v13549_v31  ;;  %17026 = vst [vmem:[#allocation64_spill] sm:$0xff] %v13607_v47  ;;  %v17027_v57 = vand.u32 4294901760, %v13400_v45  ;;  %5372 = vmatprep.subr.mxu0 %v13120_v38  ;;  %v5605_v45 = vand.u32 4294901760, %v13571_v40  ;;  %v4270_v35 = vld [vmem:[%s16005_s17 + $0x1d4] sm:$0xff] }
 0x457   : > { %5541 = vmatprep.subr.mxu1 %v17020_v5  ;;  %v13620_v5 = vsub.f32 %v13563_v58, %v13563_v58  ;;  %17030 = vst [vmem:[#allocation70_spill] sm:$0xff] %v13622_v59  ;;  %5373 = vmatpush1.msra.mxu0 %v13105_v34  ;;  %v17035_v40 = vand.u32 4294901760, %v13532_v19  ;;  %v13650_v11 = vsub.f32 %v13596_v12, %v13596_v12  ;;  %v17041_v34 = vand.u32 4294901760, %v13443_v42  ;;  %v17046_v42 = vld [vmem:[#allocation100_spill] sm:$0xff] }
 0x458   : > { %5546 = vmatpush1.msra.mxu1 %v17024_v2  ;;  %17025 = vst [vmem:[#allocation79_spill] sm:$0xff] %v13605_v39  ;;  %v13615_v2 = vsub.f32 %v13507_v44, %v17028_v9  ;;  %v13636_v44 = vsub.f32 %v13578_v50, %v13578_v50  ;;  %v5600_v26 = vand.u32 4294901760, %v13589_v62  ;;  %5374 = vmatprep.subr.mxu0 %v13149_v53  ;;  %v17038_v62 = vand.u32 4294901760, %v13547_v63 }
 0x459   : > { %5551 = vmatprep.subr.mxu1 %v17027_v57  ;;  %17029 = vst [vmem:[#allocation77_spill] sm:$0xff] %v13620_v5  ;;  %v17032_v57 = vand.u32 4294901760, %v13518_v15  ;;  %17036 = vst [vmem:[#allocation68_spill] sm:$0xff] %v13650_v11  ;;  %v17043_v53 = vand.u32 4294901760, %v13561_v23  ;;  %v17053_v38 = vand.u32 4294901760, %v13473_v49  ;;  %v4264_v49 = vld [vmem:[%s16005_s17 + $0x1ac] sm:$0xff] }
 0x45a   : > { %5556 = vmatpush1.msra.mxu1 %v17031_v55  ;;  %17033 = vst [vmem:[#allocation83_spill] sm:$0xff] %v13636_v44  ;;  %v13645_v55 = vsub.f32 %v13532_v19, %v17035_v40  ;;  %v13661_v40 = vsub.f32 %v13547_v63, %v17038_v62  ;;  %v13666_v19 = vsub.f32 %v13607_v47, %v13607_v47 }
 0x45b   : > { %v13631_v9 = vsub.f32 %v13518_v15, %v17032_v57  ;;  %5561 = vmatprep.subr.mxu1 %v17034_v30  ;;  %v17037_v30 = vand.u32 4294901760, %v13414_v1  ;;  %v13668_v15 = vunpack.c.h.bf16 %v4273_v4  ;;  %v17042_v1 = vld [vmem:[#allocation97_spill] sm:$0xff]  ;;  %v13677_v62 = vsub.f32 %v13561_v23, %v17043_v53  ;;  %v4267_v57 = vld [vmem:[%s16005_s17 + $0x1c0] sm:$0xff] }
 0x45c   : > { %17039 = vst [vmem:[#allocation82_spill] sm:$0xff] %v13666_v19  ;;  %5375 = vmatpush1.msra.mxu0 %v17042_v1  ;;  %v13682_v63 = vsub.f32 %v13622_v59, %v13622_v59  ;;  %v17045_v4 = vand.u32 4294901760, %v13455_v10  ;;  %v13694_v23 = vunpack.c.l.bf16 %v4270_v35  ;;  %v17049_v10 = vand.u32 4294901760, %v13488_v6 }
 0x45d   : > { %5566 = vmatpush1.msra.mxu1 %v17037_v30  ;;  %17040 = vst [vmem:[#allocation74_spill] sm:$0xff] %v13668_v15  ;;  %v5610_v30 = vand.u32 4294901760, %v13615_v2  ;;  %5376 = vmatprep.subr.mxu0 %v17046_v42  ;;  %v17047_v2 = vand.u32 4294901760, %v13576_v61  ;;  %v17051_v42 = vand.u32 4294901760, %v13594_v14  ;;  %v5620_v6 = vand.u32 4294901760, %v13661_v40 }
 0x45e   : > { %5571 = vmatprep.subr.mxu1 %v17041_v34  ;;  %17044 = vst [vmem:[#allocation87_spill] sm:$0xff] %v13682_v63  ;;  %v5615_v34 = vand.u32 4294901760, %v13631_v9  ;;  %17048 = vst [vmem:[#allocation72_spill] sm:$0xff] %v13694_v23  ;;  %v5625_v9 = vand.u32 4294901760, %v13645_v55  ;;  %v17058_v53 = vand.u32 4294901760, %v13503_v48  ;;  %v4261_v48 = vld [vmem:[%s16005_s17 + $0x198] sm:$0xff] }
 0x45f   : > { %5576 = vmatpush1.msra.mxu1 %v17045_v4  ;;  %v13691_v1 = vsub.f32 %v13576_v61, %v17047_v2  ;;  %v17050_v4 = vld [vmem:[#allocation101_spill] sm:$0xff]  ;;  %v13706_v2 = vsub.f32 %v13594_v14, %v17051_v42  ;;  %v13709_v61 = vunpack.c.h.bf16 %v4270_v35  ;;  %v13723_v42 = vsub.f32 %v13668_v15, %v13668_v15 }
 0x460   : > { %5581 = vmatprep.subr.mxu1 %v17049_v10  ;;  %5377 = vmatpush1.msra.mxu0 %v17050_v4  ;;  %v17054_v10 = vand.u32 4294901760, %v13605_v39  ;;  %v17056_v35 = vand.u32 4294901760, %v13620_v5  ;;  %v13736_v4 = vunpack.c.h.bf16 %v4267_v57  ;;  %v17059_v14 = vand.u32 4294901760, %v13636_v44 }
 0x461   : > { %17052 = vst [vmem:[#allocation85_spill] sm:$0xff] %v13709_v61  ;;  %5586 = vmatpush1.msra.mxu1 %v17053_v38  ;;  %5378 = vmatprep.subr.mxu0 %v13223_v20  ;;  %17055 = vst [vmem:[#allocation78_spill] sm:$0xff] %v13723_v42  ;;  %v5635_v38 = vand.u32 4294901760, %v13677_v62 }
 0x462   : > { %v13718_v55 = vsub.f32 %v13605_v39, %v17054_v10  ;;  %5591 = vmatprep.subr.mxu1 %v5590_v0  ;;  %5379 = vmatpush1.msra.mxu0 %v13212_v46  ;;  %v13733_v40 = vsub.f32 %v13620_v5, %v17056_v35  ;;  %17057 = vst [vmem:[#allocation91_spill] sm:$0xff] %v13736_v4  ;;  %v5630_v0 = vand.u32 4294901760, %v13691_v1  ;;  %v13751_v5 = vunpack.c.l.bf16 %v4267_v57 }
 0x463   : > { %5596 = vmatpush1.msra.mxu1 %v17058_v53  ;;  %5380 = vmatprep.subr.mxu0 %v13252_v36  ;;  %v13745_v62 = vsub.f32 %v13636_v44, %v17059_v14  ;;  %v13749_v35 = vsub.f32 %v13694_v23, %v13694_v23  ;;  %v17062_v53 = vld [vmem:[#allocation26_spill] sm:$0xff]  ;;  %v5645_v1 = vand.u32 4294901760, %v13706_v2  ;;  %v17063_v10 = vand.u32 4294901760, %v13650_v11 }
 0x464   : > { %17061 = vst [vmem:[#allocation81_spill] sm:$0xff] %v13751_v5  ;;  %5601 = vmatprep.subr.mxu1 %v5600_v26  ;;  %5381 = vmatpush1.msra.mxu0 %v17062_v53  ;;  %v13765_v44 = vsub.f32 %v13709_v61, %v13709_v61  ;;  %v13767_v57 = vunpack.c.h.bf16 %v4264_v49  ;;  %v5640_v26 = vand.u32 4294901760, %v13718_v55  ;;  %v17066_v39 = vand.u32 4294901760, %v13666_v19 }
 0x465   : > { %17060 = vst [vmem:[#allocation89_spill] sm:$0xff] %v13749_v35  ;;  %v13761_v14 = vsub.f32 %v13650_v11, %v17063_v10  ;;  %5606 = vmatpush2.msra.mxu1 %v5605_v45  ;;  %5382 = vmatprep.subr.mxu0 %v13266_v32  ;;  %v13777_v10 = vunpack.c.l.bf16 %v4264_v49  ;;  %v4258_v11 = vld [vmem:[%s16005_s17 + $0x184] sm:$0xff]  ;;  %v5650_v45 = vand.u32 4294901760, %v13733_v40  ;;  %v17068_v55 = vand.u32 4294901760, %v13682_v63 }
 0x466   : > { %17064 = vst [vmem:[#allocation93_spill] sm:$0xff] %v13765_v44  ;;  %17065 = vst [vmem:[#allocation99_spill] sm:$0xff] %v13767_v57  ;;  %v13774_v2 = vsub.f32 %v13666_v19, %v17066_v39  ;;  %5611 = vmatprep.subr.mxu1 %v5610_v30  ;;  %5383 = vmatpush1.msra.mxu0 %v13282_v52  ;;  %v13791_v39 = vsub.f32 %v13736_v4, %v13736_v4  ;;  %v13793_v49 = vunpack.c.h.bf16 %v4261_v48 }
 0x467   : > { %17067 = vst [vmem:[#allocation98_spill] sm:$0xff] %v13777_v10  ;;  %v13787_v32 = vsub.f32 %v13682_v63, %v17068_v55  ;;  %5616 = vmatpush2.msra.mxu1 %v5615_v34  ;;  %5384 = vmatprep.subr.mxu0 %v13312_v29  ;;  %v5655_v30 = vand.u32 4294901760, %v13745_v62  ;;  %v13800_v40 = vsub.f32 %v13751_v5, %v13751_v5  ;;  %v13802_v19 = vunpack.c.l.bf16 %v4261_v48  ;;  %v4255_v55 = vld [vmem:[%s16005_s17 + $0x170] sm:$0xff] }
 0x468   : > { %17069 = vst [vmem:[#allocation110_spill] sm:$0xff] %v13791_v39  ;;  %17070 = vst [vmem:[#allocation111_spill] sm:$0xff] %v13793_v49  ;;  %5621 = vmatprep.subr.mxu1 %v5620_v6  ;;  %5385 = vmatpush1.msra.mxu0 %v13300_v37  ;;  %v5665_v34 = vand.u32 4294901760, %v13761_v14  ;;  %v13812_v62 = vsub.f32 %v13767_v57, %v13767_v57  ;;  %v13814_v53 = vunpack.c.h.bf16 %v4258_v11  ;;  %v5660_v48 = vand.u32 4294901760, %v13774_v2  ;;  %v4252_v37 = vld [vmem:[%s16005_s17 + $0x15c] sm:$0xff] }
 0x469   : > { %17071 = vst [vmem:[#allocation112_spill] sm:$0xff] %v13800_v40  ;;  %17072 = vst [vmem:[#allocation113_spill] sm:$0xff] %v13802_v19  ;;  %5626 = vmatpush2.msra.mxu1 %v5625_v9  ;;  %5386 = vmatprep.subr.mxu0 %v13377_v54  ;;  %v17075_v29 = vand.u32 4294901760, %v13723_v42  ;;  %v13823_v14 = vsub.f32 %v13777_v10, %v13777_v10  ;;  %v13825_v63 = vunpack.c.l.bf16 %v4258_v11  ;;  %v5675_v9 = vand.u32 4294901760, %v13787_v32 }
 0x46a   : > { %17073 = vst [vmem:[#allocation114_spill] sm:$0xff] %v13812_v62  ;;  %17074 = vst [vmem:[#allocation115_spill] sm:$0xff] %v13814_v53  ;;  %5631 = vmatprep.subr.mxu1 %v5630_v0  ;;  %5387 = vmatpush1.msra.mxu0 %v13328_v43  ;;  %v17079_v11 = vand.u32 4294901760, %v13749_v35  ;;  %v13846_v32 = vsub.f32 %v13802_v19, %v13802_v19  ;;  %v13848_v2 = vunpack.c.l.bf16 %v4255_v55  ;;  %v4249_v43 = vld [vmem:[%s16005_s17 + $0x148] sm:$0xff]  ;;  %v13870_v52 = vunpack.c.l.bf16 %v4252_v37 }
 0x46b   : > { %v5669_v6 = vsub.f32 %v13723_v42, %v17075_v29  ;;  %17076 = vst [vmem:[#allocation116_spill] sm:$0xff] %v13823_v14  ;;  %17077 = vst [vmem:[#allocation117_spill] sm:$0xff] %v13825_v63  ;;  %v13835_v29 = vsub.f32 %v13793_v49, %v13793_v49  ;;  %v13837_v42 = vunpack.c.h.bf16 %v4255_v55  ;;  %5636 = vmatpush2.msra.mxu1 %v5635_v38  ;;  %5388 = vmatprep.subr.mxu0 %v13417_v21 }
 0x46c   : > { %v5684_v54 = vsub.f32 %v13749_v35, %v17079_v11  ;;  %17080 = vst [vmem:[#allocation119_spill] sm:$0xff] %v13846_v32  ;;  %5641 = vmatprep.subr.mxu1 %v5640_v26  ;;  %5389 = vmatpush2.msra.mxu0 %v13403_v28  ;;  %v17081_v38 = vand.u32 4294901760, %v13765_v44  ;;  %v13860_v0 = vsub.f32 %v13814_v53, %v13814_v53  ;;  %v13862_v35 = vunpack.c.h.bf16 %v4252_v37 }
 0x46d   : > { %17078 = vst [vmem:[#allocation118_spill] sm:$0xff] %v13835_v29  ;;  %5646 = vmatpush2.msra.mxu1 %v5645_v1  ;;  %5390 = vmatprep.subr.mxu0 %v13446_v60  ;;  %v5670_v55 = vand.u32 4294901760, %v5669_v6  ;;  %v13868_v28 = vsub.f32 %v13825_v63, %v13825_v63  ;;  %v13879_v6 = vsub.f32 %v13837_v42, %v13837_v42  ;;  %v13881_v26 = vunpack.c.h.bf16 %v4249_v43 }
 0x46e   : > { %v5679_v21 = vsub.f32 %v13765_v44, %v17081_v38  ;;  %5651 = vmatprep.subr.mxu1 %v5650_v45  ;;  %5391 = vmatpush2.msra.mxu0 %v13461_v33  ;;  %v17082_v38 = vand.u32 4294901760, %v13791_v39  ;;  %v17083_v37 = vand.u32 4294901760, %v13800_v40  ;;  %v13892_v1 = vunpack.c.l.bf16 %v4249_v43 }
 0x46f   : > { %5656 = vmatpush2.msra.mxu1 %v5655_v30  ;;  %5392 = vmatprep.subr.mxu0 %v13491_v51  ;;  %v17084_v30 = vand.u32 4294901760, %v13812_v62  ;;  %v5685_v44 = vand.u32 4294901760, %v5684_v54  ;;  %v17085_v43 = vand.u32 4294901760, %v13823_v14  ;;  %v17086_v33 = vand.u32 4294901760, %v13835_v29 }
 0x470   : > { %v5689_v11 = vsub.f32 %v13791_v39, %v17082_v38  ;;  %v5694_v45 = vsub.f32 %v13800_v40, %v17083_v37  ;;  %v13890_v38 = vsub.f32 %v13848_v2, %v13848_v2  ;;  %5661 = vmatprep.subr.mxu1 %v5660_v48  ;;  %5393 = vmatpush2.msra.mxu0 %v13479_v41  ;;  %v5680_v39 = vand.u32 4294901760, %v5679_v21 }
 0x471   : > { %v5699_v51 = vsub.f32 %v13812_v62, %v17084_v30  ;;  %v13901_v37 = vsub.f32 %v13862_v35, %v13862_v35  ;;  %5666 = vmatpush2.msra.mxu1 %v5665_v34  ;;  %5394 = vmatprep.subr.mxu0 %v13520_v27  ;;  %v5704_v48 = vsub.f32 %v13823_v14, %v17085_v43  ;;  %v17087_v21 = vand.u32 4294901760, %v13846_v32 }
 0x472   : > { %v13910_v40 = vsub.f32 %v13870_v52, %v13870_v52  ;;  %5671 = vmatprep.subr.mxu1 %v5670_v55  ;;  %5395 = vmatpush2.msra.mxu0 %v13509_v7  ;;  %v5690_v30 = vand.u32 4294901760, %v5689_v11  ;;  %v5709_v34 = vsub.f32 %v13835_v29, %v17086_v33  ;;  %v13919_v62 = vsub.f32 %v13881_v26, %v13881_v26 }
 0x473   : > { %5676 = vmatpush2.msra.mxu1 %v5675_v9  ;;  %5396 = vmatprep.subr.mxu0 %v13549_v31  ;;  %v5695_v43 = vand.u32 4294901760, %v5694_v45  ;;  %v5714_v55 = vsub.f32 %v13846_v32, %v17087_v21  ;;  %v13928_v14 = vsub.f32 %v13892_v1, %v13892_v1  ;;  %v5700_v33 = vand.u32 4294901760, %v5699_v51 }
 0x474   : > { %5681 = vmatprep.subr.mxu1 %v5680_v39  ;;  %5397 = vmatpush2.msra.mxu0 %v13534_v22  ;;  %v17088_v54 = vand.u32 4294901760, %v13860_v0  ;;  %v5705_v21 = vand.u32 4294901760, %v5704_v48  ;;  %v17089_v11 = vand.u32 4294901760, %v13868_v28  ;;  %v5710_v51 = vand.u32 4294901760, %v5709_v34 }
 0x475   : > { %5686 = vmatpush2.msra.mxu1 %v5685_v44  ;;  %5398 = vmatprep.subr.mxu0 %v13563_v58  ;;  %v17090_v39 = vand.u32 4294901760, %v13879_v6  ;;  %v5715_v44 = vand.u32 4294901760, %v5714_v55  ;;  %v17091_v48 = vand.u32 4294901760, %v13890_v38  ;;  %v16444_v29 = vand.u32 4294901760, %v13928_v14 }
 0x476   : > { %v5719_v9 = vsub.f32 %v13860_v0, %v17088_v54  ;;  %v5724_v32 = vsub.f32 %v13868_v28, %v17089_v11  ;;  %5691 = vmatprep.subr.mxu1 %v5690_v30  ;;  %5399 = vmatpush2.msra.mxu0 %v13578_v50  ;;  %v17092_v34 = vand.u32 4294901760, %v13901_v37  ;;  %v17093_v55 = vand.u32 4294901760, %v13910_v40 }
 0x477   : > { %v5729_v54 = vsub.f32 %v13879_v6, %v17090_v39  ;;  %5696 = vmatpush2.msra.mxu1 %v5695_v43  ;;  %5400 = vmatprep.subr.mxu0 %v13607_v47  ;;  %v5734_v11 = vsub.f32 %v13890_v38, %v17091_v48 }
 0x478   : > { %5701 = vmatprep.subr.mxu1 %v5700_v33  ;;  %5401 = vmatpush2.msra.mxu0 %v13596_v12  ;;  %v5720_v30 = vand.u32 4294901760, %v5719_v9  ;;  %v5739_v39 = vsub.f32 %v13901_v37, %v17092_v34  ;;  %v5725_v43 = vand.u32 4294901760, %v5724_v32  ;;  %v5744_v45 = vsub.f32 %v13910_v40, %v17093_v55  ;;  %v17100_v55 = vld [vmem:[#allocation7_spill] sm:$0xff] }
 0x479   : > { %5706 = vmatpush2.msra.mxu1 %v5705_v21  ;;  %5402 = vmatprep.subr.mxu0 %v13668_v15  ;;  %v5730_v48 = vand.u32 4294901760, %v5729_v54  ;;  %v17094_v33 = vand.u32 4294901760, %v13919_v62  ;;  %v5735_v34 = vand.u32 4294901760, %v5734_v11  ;;  %v5754_v32 = vsub.f32 %v13928_v14, %v16444_v29  ;;  %v17096_v11 = vld [vmem:[#allocation8_spill] sm:$0xff] }
 0x47a   : > { %5711 = vmatprep.subr.mxu1 %v5710_v51  ;;  %5403 = vmatpush2.msra.mxu0 %v13622_v59  ;;  %v5740_v21 = vand.u32 4294901760, %v5739_v39  ;;  %v5745_v51 = vand.u32 4294901760, %v5744_v45  ;;  %v17095_v45 = vld [vmem:[#allocation107_spill] sm:$0xff]  ;;  %v17098_v39 = vld [vmem:[#allocation13_spill] sm:$0xff]  ;;  %v17110_v29 = vld [vmem:[#allocation12_spill] sm:$0xff] }
 0x47b   : > { %v5749_v9 = vsub.f32 %v13919_v62, %v17094_v33  ;;  %5716 = vmatpush2.msra.mxu1 %v5715_v44  ;;  %5404 = vmatprep.subr.mxu0 %v13709_v61  ;;  %v5755_v44 = vand.u32 4294901760, %v5754_v32  ;;  %v17102_v33 = vld [vmem:[#allocation18_spill] sm:$0xff]  ;;  %v17105_v32 = vld [vmem:[#allocation19_spill] sm:$0xff] }
 0x47c   : > { %5721 = vmatprep.subr.mxu1 %v5720_v30  ;;  %5405 = vmatpush2.msra.mxu0 %v13694_v23  ;;  %v17097_v30 = vld [vmem:[#allocation109_spill] sm:$0xff] }
 0x47d   : > { %5726 = vmatpush2.msra.mxu1 %v5725_v43  ;;  %5406 = vmatprep.subr.mxu0 %v13736_v4  ;;  %v5750_v54 = vand.u32 4294901760, %v5749_v9  ;;  %v17099_v43 = vld [vmem:[#allocation23_spill] sm:$0xff] }
 0x47e   : > { %5731 = vmatprep.subr.mxu1 %v5730_v48  ;;  %5407 = vmatpush2.msra.mxu0 %v13751_v5  ;;  %v17101_v48 = vld [vmem:[#allocation105_spill] sm:$0xff]  ;;  %v17103_v9 = vld [vmem:[#allocation15_spill] sm:$0xff] }
 0x47f   : > { %5736 = vmatpush2.msra.mxu1 %v5735_v34  ;;  %5408 = vmatprep.subr.mxu0 %v13767_v57  ;;  %v17104_v34 = vld [vmem:[#allocation21_spill] sm:$0xff] }
 0x480   : > { %5741 = vmatprep.subr.mxu1 %v5740_v21  ;;  %5409 = vmatpush2.msra.mxu0 %v13777_v10  ;;  %v17106_v21 = vld [vmem:[#allocation27_spill] sm:$0xff] }
 0x481   : > { %5746 = vmatpush2.msra.mxu1 %v5745_v51  ;;  %5410 = vmatprep.subr.mxu0 %v13793_v49  ;;  %v17107_v51 = vld [vmem:[#allocation9_spill] sm:$0xff] }
 0x482   : > { %5751 = vmatprep.subr.mxu1 %v5750_v54  ;;  %5411 = vmatpush2.msra.mxu0 %v13802_v19  ;;  %v17108_v54 = vld [vmem:[#allocation31_spill] sm:$0xff] }
 0x483   : > { %5756 = vmatpush2.msra.mxu1 %v5755_v44  ;;  %5412 = vmatprep.subr.mxu0 %v13814_v53  ;;  %v17109_v44 = vld [vmem:[#allocation10_spill] sm:$0xff] }
 0x484   : > { %5760 = vmatmul.mubr.f32.vlgmr.msra.gmra.mxu1 %v16938_v25  ;;  %5905 = vmatprep.subr.mxu1 %v12873_v17  ;;  %v17114_v25 = vld [vmem:[#allocation16_spill] sm:$0xff] }
 0x485   : > { %5413 = vmatpush2.msra.mxu0 %v13825_v63  ;;  %5906 = vmatpush1.msra.mxu1 %v12881_v3 }
 0x486   : > { %5972 = vmatprep.mubr.f32.mxu1 %v17095_v45  ;;  %5414 = vmatprep.subr.mxu0 %v13837_v42  ;;  %v17113_v45 = vld [vmem:[#allocation29_spill] sm:$0xff] }
 0x487   : > { %5907 = vmatprep.subr.mxu1 %v12892_v8  ;;  %5415 = vmatpush2.msra.mxu0 %v13848_v2 }
 0x488   : > { %5908 = vmatpush1.msra.mxu1 %v12901_v16  ;;  %5416 = vmatprep.subr.mxu0 %v13862_v35 }
 0x489   : > { %5909 = vmatprep.subr.mxu1 %v12913_v13  ;;  %5417 = vmatpush2.msra.mxu0 %v13870_v52 }
 0x48a   : > { %5910 = vmatpush1.msra.mxu1 %v12918_v24  ;;  %5418 = vmatprep.subr.mxu0 %v13881_v26 }
 0x48b   : > { %5911 = vmatprep.subr.mxu1 %v12940_v18  ;;  %5419 = vmatpush2.msra.mxu0 %v13892_v1 }
 0x48c   : > { %5912 = vmatpush1.msra.mxu1 %v17096_v11  ;;  %5431 = vmatmul.mubr.f32.vlgmr.msra.gmra.mxu0 %v17097_v30  ;;  %v17112_v30 = vld [vmem:[#allocation11_spill] sm:$0xff] }
 0x48d   : > { %5767 = vmatprep.subr.mxu0 %v17098_v39  ;;  %5913 = vmatprep.subr.mxu1 %v17099_v43 }
 0x48e   : > { %5769 = vmatpush1.msra.mxu0 %v17100_v55  ;;  %5896 = vmatprep.mubr.f32.mxu0 %v17101_v48  ;;  %v17111_v48 = vld [vmem:[#allocation86_spill] sm:$0xff] }
 0x48f   : > { %5914 = vmatpush1.msra.mxu1 %v17102_v33  ;;  %5771 = vmatprep.subr.mxu0 %v17103_v9 }
 0x490   : > { %5915 = vmatprep.subr.mxu1 %v17104_v34  ;;  %5773 = vmatpush1.msra.mxu0 %v17105_v32  ;;  %v17115_v32 = vld [vmem:[#allocation5_spill] sm:$0xff] }
 0x491   : > { %5916 = vmatpush1.msra.mxu1 %v17106_v21  ;;  %5775 = vmatprep.subr.mxu0 %v17107_v51  ;;  %v17116_v21 = vld [vmem:[#allocation14_spill] sm:$0xff] }
 0x492   : > { %5917 = vmatprep.subr.mxu1 %v17108_v54  ;;  %5777 = vmatpush1.msra.mxu0 %v17109_v44  ;;  %v17117_v51 = vld [vmem:[#allocation90_spill] sm:$0xff]  ;;  %v17118_v54 = vld [vmem:[#allocation17_spill] sm:$0xff] }
 0x493   : > { %5918 = vmatpush1.msra.mxu1 %v13008_v56  ;;  %5779 = vmatprep.subr.mxu0 %v17110_v29  ;;  %v17119_v44 = vld [vmem:[#allocation94_spill] sm:$0xff]  ;;  %v17120_v56 = vld [vmem:[#allocation76_spill] sm:$0xff]  ;;  %v17121_v29 = vld [vmem:[#allocation97_spill] sm:$0xff] }
 0x494   : > { %5919 = vmatprep.subr.mxu1 %v17111_v48  ;;  %5781 = vmatpush1.msra.mxu0 %v17112_v30  ;;  %v17122_v48 = vld [vmem:[#allocation80_spill] sm:$0xff] }
 0x495   : > { %5920 = vmatpush1.msra.mxu1 %v17113_v45  ;;  %5783 = vmatprep.subr.mxu0 %v17114_v25  ;;  %v17123_v30 = vld [vmem:[#allocation100_spill] sm:$0xff]  ;;  %v17124_v45 = vld [vmem:[#allocation95_spill] sm:$0xff]  ;;  %v17125_v25 = vld [vmem:[#allocation101_spill] sm:$0xff] }
 0x496   : > { %5921 = vmatprep.subr.mxu1 %v17115_v32  ;;  %5785 = vmatpush1.msra.mxu0 %v17116_v21  ;;  %v17126_v32 = vld [vmem:[#allocation88_spill] sm:$0xff] }
 0x497   : > { %5922 = vmatpush1.msra.mxu1 %v17117_v51  ;;  %5787 = vmatprep.subr.mxu0 %v17118_v54  ;;  %v17127_v51 = vld [vmem:[#allocation84_spill] sm:$0xff] }
 0x498   : > { %5923 = vmatprep.subr.mxu1 %v17119_v44  ;;  %5789 = vmatpush1.msra.mxu0 %v17120_v56  ;;  %v17128_v44 = vld [vmem:[#allocation96_spill] sm:$0xff] }
 0x499   : > { %5924 = vmatpush1.msra.mxu1 %v17121_v29  ;;  %5791 = vmatprep.subr.mxu0 %v17122_v48  ;;  %v17129_v29 = vld [vmem:[#allocation92_spill] sm:$0xff]  ;;  %v17130_v48 = vld [vmem:[#allocation26_spill] sm:$0xff] }
 0x49a   : > { %5925 = vmatprep.subr.mxu1 %v17123_v30  ;;  %5793 = vmatpush1.msra.mxu0 %v17124_v45  ;;  %v17131_v30 = vld [vmem:[#allocation6_spill] sm:$0xff] }
 0x49b   : > { %5926 = vmatpush1.msra.mxu1 %v17125_v25  ;;  %5795 = vmatprep.subr.mxu0 %v17126_v32  ;;  %v17132_v45 = vld [vmem:[#allocation30_spill] sm:$0xff]  ;;  %v17133_v25 = vld [vmem:[#allocation35_spill] sm:$0xff]  ;;  %v17134_v32 = vld [vmem:[#allocation28_spill] sm:$0xff] }
 0x49c   : > { %5927 = vmatprep.subr.mxu1 %v13223_v20  ;;  %5797 = vmatpush1.msra.mxu0 %v17127_v51  ;;  %v17135_v20 = vld [vmem:[#allocation39_spill] sm:$0xff]  ;;  %v17136_v51 = vld [vmem:[#allocation32_spill] sm:$0xff] }
 0x49d   : > { %5928 = vmatpush1.msra.mxu1 %v13212_v46  ;;  %5799 = vmatprep.subr.mxu0 %v17128_v44  ;;  %v17137_v46 = vld [vmem:[#allocation34_spill] sm:$0xff]  ;;  %v17138_v44 = vld [vmem:[#allocation33_spill] sm:$0xff] }
 0x49e   : > { %5929 = vmatprep.subr.mxu1 %v13252_v36  ;;  %5801 = vmatpush1.msra.mxu0 %v17129_v29  ;;  %v17139_v36 = vld [vmem:[#allocation43_spill] sm:$0xff]  ;;  %v17140_v29 = vld [vmem:[#allocation42_spill] sm:$0xff] }
 0x49f   : > { %5930 = vmatpush1.msra.mxu1 %v17130_v48  ;;  %5803 = vmatprep.subr.mxu0 %v17131_v30  ;;  %v17141_v48 = vld [vmem:[#allocation37_spill] sm:$0xff]  ;;  %v17142_v30 = vld [vmem:[#allocation38_spill] sm:$0xff] }
 0x4a0   : > { %5931 = vmatprep.subr.mxu1 %v17132_v45  ;;  %5805 = vmatpush1.msra.mxu0 %v17133_v25  ;;  %v17143_v45 = vld [vmem:[#allocation47_spill] sm:$0xff]  ;;  %v17144_v25 = vld [vmem:[#allocation53_spill] sm:$0xff] }
 0x4a1   : > { %5932 = vmatpush1.msra.mxu1 %v17134_v32  ;;  %5807 = vmatprep.subr.mxu0 %v17135_v20  ;;  %v17145_v32 = vld [vmem:[#allocation41_spill] sm:$0xff]  ;;  %v17146_v20 = vld [vmem:[#allocation40_spill] sm:$0xff] }
 0x4a2   : > { %5933 = vmatprep.subr.mxu1 %v17136_v51  ;;  %5809 = vmatpush1.msra.mxu0 %v17137_v46  ;;  %v17147_v51 = vld [vmem:[#allocation45_spill] sm:$0xff] }
 0x4a3   : > { %5934 = vmatpush1.msra.mxu1 %v17138_v44  ;;  %5811 = vmatprep.subr.mxu0 %v17139_v36  ;;  %v17148_v44 = vld [vmem:[#allocation51_spill] sm:$0xff]  ;;  %v17149_v36 = vld [vmem:[#allocation57_spill] sm:$0xff] }
 0x4a4   : > { %5935 = vmatprep.subr.mxu1 %v17140_v29  ;;  %5813 = vmatpush1.msra.mxu0 %v17141_v48  ;;  %v17150_v29 = vld [vmem:[#allocation50_spill] sm:$0xff]  ;;  %v17151_v48 = vld [vmem:[#allocation48_spill] sm:$0xff] }
 0x4a5   : > { %5936 = vmatpush1.msra.mxu1 %v17142_v30  ;;  %5815 = vmatprep.subr.mxu0 %v17143_v45  ;;  %v17152_v30 = vld [vmem:[#allocation36_spill] sm:$0xff] }
 0x4a6   : > { %5937 = vmatprep.subr.mxu1 %v17144_v25  ;;  %5817 = vmatpush1.msra.mxu0 %v17145_v32  ;;  %v17153_v25 = vld [vmem:[#allocation46_spill] sm:$0xff] }
 0x4a7   : > { %5938 = vmatpush2.msra.mxu1 %v17146_v20  ;;  %5819 = vmatprep.subr.mxu0 %v17147_v51  ;;  %v17154_v20 = vld [vmem:[#allocation55_spill] sm:$0xff] }
 0x4a8   : > { %5939 = vmatprep.subr.mxu1 %v13446_v60  ;;  %5821 = vmatpush1.msra.mxu0 %v17148_v44  ;;  %v17155_v60 = vld [vmem:[#allocation49_spill] sm:$0xff] }
 0x4a9   : > { %5940 = vmatpush2.msra.mxu1 %v17149_v36  ;;  %5823 = vmatprep.subr.mxu0 %v17150_v29  ;;  %v17156_v36 = vld [vmem:[#allocation44_spill] sm:$0xff] }
 0x4aa   : > { %5941 = vmatprep.subr.mxu1 %v17151_v48  ;;  %5825 = vmatpush1.msra.mxu0 %v17152_v30  ;;  %v17157_v48 = vld [vmem:[#allocation61_spill] sm:$0xff] }
 0x4ab   : > { %5942 = vmatpush2.msra.mxu1 %v13479_v41  ;;  %5827 = vmatprep.subr.mxu0 %v17153_v25  ;;  %v17158_v41 = vld [vmem:[#allocation67_spill] sm:$0xff] }
 0x4ac   : > { %5943 = vmatprep.subr.mxu1 %v13520_v27  ;;  %5829 = vmatpush1.msra.mxu0 %v17154_v20  ;;  %v17159_v27 = vld [vmem:[#allocation71_spill] sm:$0xff] }
 0x4ad   : > { %5944 = vmatpush2.msra.mxu1 %v13509_v7  ;;  %5831 = vmatprep.subr.mxu0 %v17155_v60  ;;  %v17160_v7 = vld [vmem:[#allocation66_spill] sm:$0xff] }
 0x4ae   : > { %5945 = vmatprep.subr.mxu1 %v13549_v31  ;;  %5833 = vmatpush2.msra.mxu0 %v17156_v36  ;;  %v17161_v31 = vld [vmem:[#allocation75_spill] sm:$0xff] }
 0x4af   : > { %5946 = vmatpush2.msra.mxu1 %v13534_v22  ;;  %5835 = vmatprep.subr.mxu0 %v17157_v48  ;;  %v17162_v22 = vld [vmem:[#allocation69_spill] sm:$0xff] }
 0x4b0   : > { %5947 = vmatprep.subr.mxu1 %v13563_v58  ;;  %5837 = vmatpush2.msra.mxu0 %v17158_v41  ;;  %v17163_v58 = vld [vmem:[#allocation79_spill] sm:$0xff] }
 0x4b1   : > { %5948 = vmatpush2.msra.mxu1 %v13578_v50  ;;  %5839 = vmatprep.subr.mxu0 %v17159_v27  ;;  %v17164_v50 = vld [vmem:[#allocation73_spill] sm:$0xff] }
 0x4b2   : > { %5949 = vmatprep.subr.mxu1 %v13607_v47  ;;  %5841 = vmatpush2.msra.mxu0 %v17160_v7  ;;  %v17165_v47 = vld [vmem:[#allocation77_spill] sm:$0xff] }
 0x4b3   : > { %5950 = vmatpush2.msra.mxu1 %v13596_v12  ;;  %5843 = vmatprep.subr.mxu0 %v17161_v31  ;;  %v17166_v12 = vld [vmem:[#allocation83_spill] sm:$0xff] }
 0x4b4   : > { %5951 = vmatprep.subr.mxu1 %v13668_v15  ;;  %5845 = vmatpush2.msra.mxu0 %v17162_v22  ;;  %v17167_v15 = vld [vmem:[#allocation82_spill] sm:$0xff] }
 0x4b5   : > { %5952 = vmatpush2.msra.mxu1 %v13622_v59  ;;  %5847 = vmatprep.subr.mxu0 %v17163_v58  ;;  %v17168_v59 = vld [vmem:[#allocation68_spill] sm:$0xff] }
 0x4b6   : > { %5953 = vmatprep.subr.mxu1 %v13709_v61  ;;  %5849 = vmatpush2.msra.mxu0 %v17164_v50  ;;  %v17169_v61 = vld [vmem:[#allocation78_spill] sm:$0xff] }
 0x4b7   : > { %5954 = vmatpush2.msra.mxu1 %v13694_v23  ;;  %5851 = vmatprep.subr.mxu0 %v17165_v47  ;;  %v17170_v23 = vld [vmem:[#allocation87_spill] sm:$0xff] }
 0x4b8   : > { %5955 = vmatprep.subr.mxu1 %v13736_v4  ;;  %5853 = vmatpush2.msra.mxu0 %v17166_v12  ;;  %v17171_v4 = vld [vmem:[#allocation93_spill] sm:$0xff] }
 0x4b9   : > { %5956 = vmatpush2.msra.mxu1 %v13751_v5  ;;  %5855 = vmatprep.subr.mxu0 %v17167_v15  ;;  %v17172_v5 = vld [vmem:[#allocation89_spill] sm:$0xff] }
 0x4ba   : > { %5957 = vmatprep.subr.mxu1 %v13767_v57  ;;  %5857 = vmatpush2.msra.mxu0 %v17168_v59  ;;  %v17173_v57 = vld [vmem:[#allocation110_spill] sm:$0xff] }
 0x4bb   : > { %5958 = vmatpush2.msra.mxu1 %v13777_v10  ;;  %5859 = vmatprep.subr.mxu0 %v17169_v61  ;;  %v17174_v10 = vld [vmem:[#allocation112_spill] sm:$0xff] }
 0x4bc   : > { %5959 = vmatprep.subr.mxu1 %v13793_v49  ;;  %5861 = vmatpush2.msra.mxu0 %v17170_v23  ;;  %v17175_v49 = vld [vmem:[#allocation114_spill] sm:$0xff] }
 0x4bd   : > { %5960 = vmatpush2.msra.mxu1 %v13802_v19  ;;  %5863 = vmatprep.subr.mxu0 %v17171_v4  ;;  %v17176_v19 = vld [vmem:[#allocation116_spill] sm:$0xff] }
 0x4be   : > { %5961 = vmatprep.subr.mxu1 %v13814_v53  ;;  %5865 = vmatpush2.msra.mxu0 %v17172_v5  ;;  %v17177_v53 = vld [vmem:[#allocation118_spill] sm:$0xff] }
 0x4bf   : > { %5962 = vmatpush2.msra.mxu1 %v13825_v63  ;;  %5867 = vmatprep.subr.mxu0 %v17173_v57  ;;  %v17178_v63 = vld [vmem:[#allocation119_spill] sm:$0xff] }
 0x4c0   : > { %5963 = vmatprep.subr.mxu1 %v13837_v42  ;;  %5869 = vmatpush2.msra.mxu0 %v17174_v10  ;;  %v17179_v10 = vld [vmem:[#allocation106_spill] sm:$0xff] }
 0x4c1   : > { %5964 = vmatpush2.msra.mxu1 %v13848_v2  ;;  %5871 = vmatprep.subr.mxu0 %v17175_v49 }
 0x4c2   : > { %5965 = vmatprep.subr.mxu1 %v13862_v35  ;;  %5873 = vmatpush2.msra.mxu0 %v17176_v19  ;;  %v17180_v19 = vld [vmem:[#allocation104_spill] sm:$0xff] }
 0x4c3   : > { %5966 = vmatpush2.msra.mxu1 %v13870_v52  ;;  %5875 = vmatprep.subr.mxu0 %v17177_v53 }
 0x4c4   : > { %5967 = vmatprep.subr.mxu1 %v13881_v26  ;;  %5877 = vmatpush2.msra.mxu0 %v17178_v63 }
 0x4c5   : > { %5968 = vmatpush2.msra.mxu1 %v13892_v1  ;;  %5879 = vmatprep.subr.mxu0 %v13860_v0 }
 0x4c6   : > { %5976 = vmatmul.mubr.f32.vlgmr.msra.gmra.mxu1 %v17179_v10  ;;  %6183 = vmatprep.subr.mxu1 %v12873_v17  ;;  %v17181_v17 = vld [vmem:[#allocation103_spill] sm:$0xff] }
 0x4c7   : > { %5881 = vmatpush2.msra.mxu0 %v13868_v28  ;;  %6184 = vmatpush1.msra.mxu1 %v12881_v3  ;;  %v17182_v3 = vand.u32 4294901760, %v17098_v39 }
 0x4c8   : > { %6248 = vmatprep.mubr.f32.mxu1 %v17180_v19  ;;  %5883 = vmatprep.subr.mxu0 %v13879_v6 }
 0x4c9   : > { %6185 = vmatprep.subr.mxu1 %v12892_v8  ;;  %5885 = vmatpush2.msra.mxu0 %v13890_v38  ;;  %v17183_v8 = vand.u32 4294901760, %v17100_v55  ;;  %v17191_v55 = vld [vmem:[#allocation10_spill] sm:$0xff] }
 0x4ca   : > { %6186 = vmatpush1.msra.mxu1 %v12901_v16  ;;  %5887 = vmatprep.subr.mxu0 %v13901_v37  ;;  %v17184_v16 = vand.u32 4294901760, %v17103_v9 }
 0x4cb   : > { %6187 = vmatprep.subr.mxu1 %v12913_v13  ;;  %5889 = vmatpush2.msra.mxu0 %v13910_v40  ;;  %v17185_v13 = vld [vmem:[#allocation19_spill] sm:$0xff] }
 0x4cc   : > { %6188 = vmatpush1.msra.mxu1 %v12918_v24  ;;  %5891 = vmatprep.subr.mxu0 %v13919_v62  ;;  %v17186_v24 = vand.u32 4294901760, %v17185_v13 }
 0x4cd   : > { %6189 = vmatprep.subr.mxu1 %v12940_v18  ;;  %5893 = vmatpush2.msra.mxu0 %v13928_v14  ;;  %v17187_v18 = vld [vmem:[#allocation27_spill] sm:$0xff] }
 0x4ce   : > { %6190 = vmatpush1.msra.mxu1 %v17096_v11  ;;  %5899 = vmatmul.mubr.f32.vlgmr.msra.gmra.mxu0 %v17181_v17  ;;  %v17188_v11 = vld [vmem:[#allocation9_spill] sm:$0xff]  ;;  %v17316_v17 = vand.u32 4294901760, %v13868_v28 }
 0x4cf   : > { %5984 = vmatprep.subr.mxu0 %v17182_v3  ;;  %6191 = vmatprep.subr.mxu1 %v17099_v43  ;;  %v17189_v39 = vand.u32 4294901760, %v17188_v11  ;;  %v17190_v43 = vld [vmem:[#allocation31_spill] sm:$0xff]  ;;  %v17192_v3 = vand.u32 4294901760, %v17191_v55  ;;  %v17204_v55 = vld [vmem:[#allocation90_spill] sm:$0xff] }
 0x4d0   : > { %5987 = vmatpush1.msra.mxu0 %v17183_v8  ;;  %6175 = vmatprep.mubr.f32.mxu0 %v17180_v19  ;;  %v17193_v8 = vld [vmem:[#allocation25_spill] sm:$0xff] }
 0x4d1   : > { %6192 = vmatpush1.msra.mxu1 %v17102_v33  ;;  %5990 = vmatprep.subr.mxu0 %v17184_v16  ;;  %v17194_v33 = vld [vmem:[#allocation12_spill] sm:$0xff]  ;;  %v17196_v16 = vld [vmem:[#allocation86_spill] sm:$0xff] }
 0x4d2   : > { %6193 = vmatprep.subr.mxu1 %v17104_v34  ;;  %5993 = vmatpush1.msra.mxu0 %v17186_v24  ;;  %v17195_v9 = vand.u32 4294901760, %v17194_v33  ;;  %v17197_v34 = vld [vmem:[#allocation11_spill] sm:$0xff]  ;;  %v17199_v24 = vld [vmem:[#allocation29_spill] sm:$0xff]  ;;  %v17207_v33 = vand.u32 4294901760, %v17120_v56 }
 0x4d3   : > { %6194 = vmatpush1.msra.mxu1 %v17187_v18  ;;  %5996 = vmatprep.subr.mxu0 %v17189_v39  ;;  %v17198_v13 = vand.u32 4294901760, %v17197_v34  ;;  %v17200_v18 = vld [vmem:[#allocation16_spill] sm:$0xff]  ;;  %v17202_v39 = vld [vmem:[#allocation5_spill] sm:$0xff] }
 0x4d4   : > { %6195 = vmatprep.subr.mxu1 %v17190_v43  ;;  %5999 = vmatpush1.msra.mxu0 %v17192_v3  ;;  %v17201_v11 = vand.u32 4294901760, %v17200_v18  ;;  %v17203_v43 = vand.u32 4294901760, %v17116_v21  ;;  %v17205_v3 = vand.u32 4294901760, %v17118_v54  ;;  %v17214_v18 = vld [vmem:[#allocation101_spill] sm:$0xff] }
 0x4d5   : > { %6196 = vmatpush1.msra.mxu1 %v17193_v8  ;;  %6002 = vmatprep.subr.mxu0 %v17195_v9  ;;  %v17206_v8 = vld [vmem:[#allocation94_spill] sm:$0xff]  ;;  %v17208_v9 = vld [vmem:[#allocation97_spill] sm:$0xff] }
 0x4d6   : > { %6197 = vmatprep.subr.mxu1 %v17196_v16  ;;  %6005 = vmatpush1.msra.mxu0 %v17198_v13  ;;  %v17209_v16 = vld [vmem:[#allocation80_spill] sm:$0xff] }
 0x4d7   : > { %6198 = vmatpush1.msra.mxu1 %v17199_v24  ;;  %6008 = vmatprep.subr.mxu0 %v17201_v11  ;;  %v17210_v34 = vand.u32 4294901760, %v17209_v16  ;;  %v17211_v13 = vld [vmem:[#allocation100_spill] sm:$0xff]  ;;  %v17212_v24 = vld [vmem:[#allocation95_spill] sm:$0xff] }
 0x4d8   : > { %6199 = vmatprep.subr.mxu1 %v17202_v39  ;;  %6011 = vmatpush1.msra.mxu0 %v17203_v43  ;;  %v17213_v21 = vand.u32 4294901760, %v17212_v24  ;;  %v17215_v11 = vld [vmem:[#allocation88_spill] sm:$0xff] }
 0x4d9   : > { %6200 = vmatpush1.msra.mxu1 %v17204_v55  ;;  %6014 = vmatprep.subr.mxu0 %v17205_v3  ;;  %v17216_v54 = vand.u32 4294901760, %v17215_v11  ;;  %v17217_v39 = vld [vmem:[#allocation20_spill] sm:$0xff]  ;;  %v17220_v55 = vld [vmem:[#allocation22_spill] sm:$0xff] }
 0x4da   : > { %6201 = vmatprep.subr.mxu1 %v17206_v8  ;;  %6017 = vmatpush1.msra.mxu0 %v17207_v33  ;;  %v17218_v43 = vld [vmem:[#allocation84_spill] sm:$0xff] }
 0x4db   : > { %6202 = vmatpush1.msra.mxu1 %v17208_v9  ;;  %6020 = vmatprep.subr.mxu0 %v17210_v34  ;;  %v17219_v56 = vand.u32 4294901760, %v17218_v43  ;;  %v17221_v3 = vld [vmem:[#allocation96_spill] sm:$0xff]  ;;  %v17226_v34 = vld [vmem:[#allocation26_spill] sm:$0xff] }
 0x4dc   : > { %6203 = vmatprep.subr.mxu1 %v17211_v13  ;;  %6023 = vmatpush1.msra.mxu0 %v17213_v21  ;;  %v17222_v8 = vand.u32 4294901760, %v17221_v3  ;;  %v17223_v33 = vld [vmem:[#allocation24_spill] sm:$0xff]  ;;  %v17227_v13 = vld [vmem:[#allocation6_spill] sm:$0xff]  ;;  %v17237_v3 = vld [vmem:[#allocation33_spill] sm:$0xff] }
 0x4dd   : > { %6204 = vmatpush1.msra.mxu1 %v17214_v18  ;;  %6026 = vmatprep.subr.mxu0 %v17216_v54  ;;  %v17224_v9 = vld [vmem:[#allocation92_spill] sm:$0xff]  ;;  %v17228_v24 = vand.u32 4294901760, %v17227_v13  ;;  %v17229_v21 = vld [vmem:[#allocation30_spill] sm:$0xff]  ;;  %v17230_v18 = vld [vmem:[#allocation35_spill] sm:$0xff] }
 0x4de   : > { %6205 = vmatprep.subr.mxu1 %v17217_v39  ;;  %6029 = vmatpush1.msra.mxu0 %v17219_v56  ;;  %v17225_v16 = vand.u32 4294901760, %v17224_v9  ;;  %v17231_v11 = vand.u32 4294901760, %v17230_v18  ;;  %v17232_v54 = vld [vmem:[#allocation28_spill] sm:$0xff]  ;;  %v17233_v39 = vld [vmem:[#allocation39_spill] sm:$0xff]  ;;  %v17240_v9 = vld [vmem:[#allocation42_spill] sm:$0xff] }
 0x4df   : > { %6206 = vmatpush1.msra.mxu1 %v17220_v55  ;;  %6032 = vmatprep.subr.mxu0 %v17222_v8  ;;  %v17234_v43 = vand.u32 4294901760, %v17233_v39  ;;  %v17235_v56 = vld [vmem:[#allocation32_spill] sm:$0xff]  ;;  %v17236_v55 = vand.u32 4294901760, %v17137_v46  ;;  %v17238_v8 = vld [vmem:[#allocation43_spill] sm:$0xff]  ;;  %v17243_v13 = vld [vmem:[#allocation38_spill] sm:$0xff]  ;;  %v17246_v46 = vand.u32 4294901760, %v17145_v32 }
 0x4e0   : > { %6207 = vmatprep.subr.mxu1 %v17223_v33  ;;  %6035 = vmatpush1.msra.mxu0 %v17225_v16  ;;  %v17239_v33 = vand.u32 4294901760, %v17238_v8  ;;  %v17241_v16 = vld [vmem:[#allocation37_spill] sm:$0xff]  ;;  %v17247_v18 = vld [vmem:[#allocation40_spill] sm:$0xff]  ;;  %v17250_v39 = vand.u32 4294901760, %v17148_v44  ;;  %v17254_v32 = vand.u32 4294901760, %v17152_v30  ;;  %v17258_v44 = vand.u32 4294901760, %v17154_v20 }
 0x4e1   : > { %6208 = vmatpush1.msra.mxu1 %v17226_v34  ;;  %6038 = vmatprep.subr.mxu0 %v17228_v24  ;;  %v17242_v34 = vand.u32 4294901760, %v17241_v16  ;;  %v17244_v24 = vand.u32 4294901760, %v17143_v45  ;;  %v17252_v45 = vand.u32 4294901760, %v17150_v29  ;;  %v17259_v8 = vld [vmem:[#allocation54_spill] sm:$0xff]  ;;  %v17260_v29 = vand.u32 4294901760, %v17155_v60 }
 0x4e2   : > { %6209 = vmatprep.subr.mxu1 %v17229_v21  ;;  %6041 = vmatpush1.msra.mxu0 %v17231_v11  ;;  %v17245_v21 = vld [vmem:[#allocation53_spill] sm:$0xff]  ;;  %v17248_v11 = vand.u32 4294901760, %v17147_v51  ;;  %v17256_v51 = vand.u32 4294901760, %v17153_v25  ;;  %v17263_v20 = vld [vmem:[#allocation58_spill] sm:$0xff]  ;;  %v17264_v16 = vand.u32 4294901760, %v17157_v48  ;;  %v17269_v48 = vld [vmem:[#allocation64_spill] sm:$0xff] }
 0x4e3   : > { %6210 = vmatpush1.msra.mxu1 %v17232_v54  ;;  %6044 = vmatprep.subr.mxu0 %v17234_v43  ;;  %v17249_v54 = vld [vmem:[#allocation59_spill] sm:$0xff]  ;;  %v17251_v43 = vld [vmem:[#allocation57_spill] sm:$0xff]  ;;  %v17265_v60 = vld [vmem:[#allocation62_spill] sm:$0xff] }
 0x4e4   : > { %6211 = vmatprep.subr.mxu1 %v17235_v56  ;;  %6047 = vmatpush1.msra.mxu0 %v17236_v55  ;;  %v17253_v56 = vld [vmem:[#allocation48_spill] sm:$0xff]  ;;  %v17255_v55 = vld [vmem:[#allocation63_spill] sm:$0xff] }
 0x4e5   : > { %6212 = vmatpush1.msra.mxu1 %v17237_v3  ;;  %6050 = vmatprep.subr.mxu0 %v17239_v33  ;;  %v17257_v3 = vld [vmem:[#allocation52_spill] sm:$0xff]  ;;  %v4295_v30 = vld [vmem:[%s16005_s17 + $0x268] ss:$20 sps:$4 sm:$0xff]  }
 0x4e6   : > { %6213 = vmatprep.subr.mxu1 %v17240_v9  ;;  %6053 = vmatpush1.msra.mxu0 %v17242_v34  ;;  %v17261_v33 = vld [vmem:[#allocation56_spill] sm:$0xff]  ;;  %v17262_v9 = vand.u32 4294901760, %v17156_v36  ;;  %v4247_v25 = vld [vmem:[%s16005_s17 + $0x128] ss:$20 sps:$4 sm:$0xff]   ;;  %v17266_v34 = vand.u32 4294901760, %v17158_v41  ;;  %v17268_v36 = vand.u32 4294901760, %v17159_v27  ;;  %v14251_v41 = vunpack.c.l.bf16 %v4295_v30 }
 0x4e7   : > { %6214 = vmatpush1.msra.mxu1 %v17243_v13  ;;  %6056 = vmatprep.subr.mxu0 %v17244_v24  ;;  %v14238_v13 = vunpack.c.h.bf16 %v4295_v30  ;;  %v17267_v24 = vld [vmem:[#allocation60_spill] sm:$0xff]  ;;  %v17272_v27 = vand.u32 4294901760, %v17161_v31 }
 0x4e8   : > { %6215 = vmatprep.subr.mxu1 %v17245_v21  ;;  %6059 = vmatpush1.msra.mxu0 %v17246_v46  ;;  %v14243_v21 = vunpack.c.h.bf16 %v4247_v25  ;;  %v4289_v46 = vld [vmem:[%s16005_s17 + $0x240] ss:$20 sps:$4 sm:$0xff]  }
 0x4e9   : > { %6216 = vmatpush2.msra.mxu1 %v17247_v18  ;;  %6062 = vmatprep.subr.mxu0 %v17248_v11  ;;  %v17270_v18 = vand.u32 4294901760, %v17160_v7  ;;  %v4241_v11 = vld [vmem:[%s16005_s17 + $0x100] ss:$20 sps:$4 sm:$0xff]   ;;  %v14266_v7 = vsub.f32 %v14238_v13, %v14238_v13 }
 0x4ea   : > { %6217 = vmatprep.subr.mxu1 %v17249_v54  ;;  %6065 = vmatpush1.msra.mxu0 %v17250_v39  ;;  %v17271_v54 = vld [vmem:[#allocation65_spill] sm:$0xff]  ;;  %v14259_v39 = vunpack.c.l.bf16 %v4247_v25  ;;  %v14275_v31 = vsub.f32 %v14243_v21, %v14243_v21  ;;  %v17279_v30 = vld [vmem:[#allocation72_spill] sm:$0xff]  ;;  %v17281_v25 = vld [vmem:[#allocation91_spill] sm:$0xff] }
 0x4eb   : > { %6218 = vmatpush2.msra.mxu1 %v17251_v43  ;;  %6068 = vmatprep.subr.mxu0 %v17252_v45  ;;  %v17273_v43 = vld [vmem:[#allocation74_spill] sm:$0xff]  ;;  %v17274_v45 = vand.u32 4294901760, %v17162_v22  ;;  %v4283_v22 = vld [vmem:[%s16005_s17 + $0x218] ss:$20 sps:$4 sm:$0xff]  }
 0x4ec   : > { %6219 = vmatprep.subr.mxu1 %v17253_v56  ;;  %6071 = vmatpush1.msra.mxu0 %v17254_v32  ;;  %v14268_v56 = vunpack.c.h.bf16 %v4289_v46  ;;  %v17275_v32 = vld [vmem:[#allocation70_spill] sm:$0xff] }
 0x4ed   : > { %6220 = vmatpush2.msra.mxu1 %v17255_v55  ;;  %6074 = vmatprep.subr.mxu0 %v17256_v51  ;;  %v17276_v55 = vand.u32 4294901760, %v17163_v58  ;;  %v14277_v51 = vunpack.c.h.bf16 %v4241_v11  ;;  %v14289_v58 = vunpack.c.l.bf16 %v4289_v46 }
 0x4ee   : > { %6221 = vmatprep.subr.mxu1 %v17257_v3  ;;  %6077 = vmatpush1.msra.mxu0 %v17258_v44  ;;  %v17277_v3 = vld [vmem:[#allocation85_spill] sm:$0xff]  ;;  %v17278_v44 = vand.u32 4294901760, %v17164_v50  ;;  %v14301_v50 = vunpack.c.l.bf16 %v4241_v11  ;;  %v17286_v11 = vand.u32 4294901760, %v17168_v59 }
 0x4ef   : > { %6222 = vmatpush2.msra.mxu1 %v17259_v8  ;;  %6080 = vmatprep.subr.mxu0 %v17260_v29  ;;  %v14287_v8 = vsub.f32 %v14251_v41, %v14251_v41  ;;  %v4235_v29 = vld [vmem:[%s16005_s17 + $0xd8] ss:$20 sps:$4 sm:$0xff]   ;;  %v14319_v46 = vsub.f32 %v14277_v51, %v14277_v51 }
 0x4f0   : > { %6223 = vmatprep.subr.mxu1 %v17261_v33  ;;  %6083 = vmatpush2.msra.mxu0 %v17262_v9  ;;  %v17280_v33 = vand.u32 4294901760, %v17165_v47  ;;  %v14299_v9 = vsub.f32 %v14259_v39, %v14259_v39  ;;  %v17283_v47 = vld [vmem:[#allocation81_spill] sm:$0xff] }
 0x4f1   : > { %6224 = vmatpush2.msra.mxu1 %v17263_v20  ;;  %6086 = vmatprep.subr.mxu0 %v17264_v16  ;;  %v17282_v20 = vand.u32 4294901760, %v17166_v12  ;;  %v16477_v16 = vand.u32 4294901760, %v14266_v7  ;;  %v14321_v12 = vunpack.c.h.bf16 %v4235_v29 }
 0x4f2   : > { %6225 = vmatprep.subr.mxu1 %v17265_v60  ;;  %6089 = vmatpush2.msra.mxu0 %v17266_v34  ;;  %v14309_v60 = vsub.f32 %v14268_v56, %v14268_v56  ;;  %v14311_v34 = vunpack.c.h.bf16 %v4283_v22  ;;  %v16473_v59 = vand.u32 4294901760, %v14299_v9 }
 0x4f3   : > { %6226 = vmatpush2.msra.mxu1 %v17267_v24  ;;  %6092 = vmatprep.subr.mxu0 %v17268_v36  ;;  %v17284_v24 = vand.u32 4294901760, %v17167_v15  ;;  %v16474_v36 = vand.u32 4294901760, %v14275_v31  ;;  %v16472_v15 = vand.u32 4294901760, %v14287_v8 }
 0x4f4   : > { %6227 = vmatprep.subr.mxu1 %v17269_v48  ;;  %6095 = vmatpush2.msra.mxu0 %v17270_v18  ;;  %v4277_v48 = vld [vmem:[%s16005_s17 + $0x1f0] ss:$20 sps:$4 sm:$0xff]   ;;  %v17285_v18 = vld [vmem:[#allocation99_spill] sm:$0xff] }
 0x4f5   : > { %6228 = vmatpush2.msra.mxu1 %v17271_v54  ;;  %6098 = vmatprep.subr.mxu0 %v17272_v27  ;;  %v14332_v54 = vsub.f32 %v14289_v58, %v14289_v58  ;;  %v14334_v27 = vunpack.c.l.bf16 %v4283_v22  ;;  %v17291_v22 = vand.u32 4294901760, %v17170_v23  ;;  %v14368_v23 = vsub.f32 %v14275_v31, %v16474_v36 }
 0x4f6   : > { %6229 = vmatprep.subr.mxu1 %v17273_v43  ;;  %6101 = vmatpush2.msra.mxu0 %v17274_v45  ;;  %v4229_v43 = vld [vmem:[%s16005_s17 + $0xb0] ss:$20 sps:$4 sm:$0xff]  }
 0x4f7   : > { %6230 = vmatpush2.msra.mxu1 %v17275_v32  ;;  %6104 = vmatprep.subr.mxu0 %v17276_v55  ;;  %v17287_v45 = vld [vmem:[#allocation98_spill] sm:$0xff]  ;;  %v17288_v32 = vand.u32 4294901760, %v17169_v61  ;;  %v14345_v55 = vsub.f32 %v14301_v50, %v14301_v50  ;;  %v16476_v61 = vand.u32 4294901760, %v14309_v60 }
 0x4f8   : > { %6231 = vmatprep.subr.mxu1 %v17277_v3  ;;  %6107 = vmatpush2.msra.mxu0 %v17278_v44  ;;  %v14347_v3 = vunpack.c.l.bf16 %v4235_v29  ;;  %v17290_v44 = vld [vmem:[#allocation111_spill] sm:$0xff]  ;;  %v17294_v29 = vand.u32 4294901760, %v17171_v4  ;;  %v14383_v4 = vsub.f32 %v14287_v8, %v16472_v15  ;;  %v14405_v15 = vunpack.c.l.bf16 %v4229_v43 }
 0x4f9   : > { %6232 = vmatpush2.msra.mxu1 %v17279_v30  ;;  %6110 = vmatprep.subr.mxu0 %v17280_v33  ;;  %17289 = vst [vmem:[#allocation8_spill] sm:$0xff] %v14345_v55  ;;  %v6435_v30 = vsub.f32 %v14266_v7, %v16477_v16  ;;  %v14358_v33 = vsub.f32 %v14311_v34, %v14311_v34 }
 0x4fa   : > { %6233 = vmatprep.subr.mxu1 %v17281_v25  ;;  %6113 = vmatpush2.msra.mxu0 %v17282_v20  ;;  %v14360_v25 = vunpack.c.h.bf16 %v4277_v48  ;;  %v17293_v20 = vld [vmem:[#allocation113_spill] sm:$0xff] }
 0x4fb   : > { %6234 = vmatpush2.msra.mxu1 %v17283_v47  ;;  %6116 = vmatprep.subr.mxu0 %v17284_v24  ;;  %17292 = vst [vmem:[#allocation13_spill] sm:$0xff] %v14358_v33  ;;  %v16475_v47 = vand.u32 4294901760, %v14319_v46  ;;  %v14373_v24 = vsub.f32 %v14321_v12, %v14321_v12 }
 0x4fc   : > { %6235 = vmatprep.subr.mxu1 %v17285_v18  ;;  %6119 = vmatpush2.msra.mxu0 %v17286_v11  ;;  %v14375_v18 = vunpack.c.h.bf16 %v4229_v43  ;;  %v17296_v11 = vld [vmem:[#allocation115_spill] sm:$0xff]  ;;  %v14418_v36 = vsub.f32 %v14360_v25, %v14360_v25  ;;  %v17305_v43 = vand.u32 4294901760, %v17175_v49  ;;  %v17307_v49 = vld [vmem:[#allocation116_spill] sm:$0xff] }
 0x4fd   : > { %6236 = vmatpush2.msra.mxu1 %v17287_v45  ;;  %6122 = vmatprep.subr.mxu0 %v17288_v32  ;;  %17295 = vst [vmem:[#allocation23_spill] sm:$0xff] %v14373_v24  ;;  %v17297_v45 = vand.u32 4294901760, %v17172_v5  ;;  %v16478_v32 = vand.u32 4294901760, %v14332_v54  ;;  %v14398_v5 = vsub.f32 %v14299_v9, %v16473_v59  ;;  %v16480_v59 = vand.u32 4294901760, %v14358_v33 }
 0x4fe   : > { %6237 = vmatprep.subr.mxu1 %v17290_v44  ;;  %6125 = vmatpush2.msra.mxu0 %v17291_v22  ;;  %v14388_v44 = vsub.f32 %v14334_v27, %v14334_v27  ;;  %v14390_v22 = vunpack.c.l.bf16 %v4277_v48  ;;  %v17302_v48 = vld [vmem:[#allocation112_spill] sm:$0xff]  ;;  %17304 = vst [vmem:[#allocation15_spill] sm:$0xff] %v14418_v36 }
 0x4ff   : > { %6238 = vmatpush2.msra.mxu1 %v17293_v20  ;;  %6128 = vmatprep.subr.mxu0 %v17294_v29  ;;  %v17299_v20 = vld [vmem:[#allocation117_spill] sm:$0xff]  ;;  %v17300_v29 = vand.u32 4294901760, %v17173_v57  ;;  %v6436_v57 = vand.u32 4294901760, %v6435_v30  ;;  %v14427_v30 = vsub.f32 %v14319_v46, %v16475_v47  ;;  %v14444_v47 = vsub.f32 %v14332_v54, %v16478_v32 }
 0x500   : > { %6239 = vmatprep.subr.mxu1 %v17296_v11  ;;  %6131 = vmatpush2.msra.mxu0 %v17297_v45  ;;  %17298 = vst [vmem:[#allocation7_spill] sm:$0xff] %v14388_v44  ;;  %v16479_v11 = vand.u32 4294901760, %v14345_v55  ;;  %v14403_v45 = vsub.f32 %v14347_v3, %v14347_v3  ;;  %v14449_v16 = vsub.f32 %v14390_v22, %v14390_v22  ;;  %v17313_v32 = vand.u32 4294901760, %v13860_v0 }
 0x501   : > { %6240 = vmatpush2.msra.mxu1 %v17299_v20  ;;  %6134 = vmatprep.subr.mxu0 %v17300_v29  ;;  %v17303_v20 = vand.u32 4294901760, %v17302_v48  ;;  %v14413_v29 = vsub.f32 %v14309_v60, %v16476_v61  ;;  %v16481_v48 = vand.u32 4294901760, %v14373_v24  ;;  %v14466_v61 = vsub.f32 %v14405_v15, %v14405_v15 }
 0x502   : > { %17301 = vst [vmem:[#allocation18_spill] sm:$0xff] %v14403_v45  ;;  %6241 = vmatprep.subr.mxu1 %v13837_v42  ;;  %v6340_v42 = vand.u32 4294901760, %v14368_v23  ;;  %v6442_v23 = vand.u32 4294901760, %v14383_v4  ;;  %17309 = vst [vmem:[#allocation14_spill] sm:$0xff] %v14449_v16  ;;  %v6346_v4 = vand.u32 4294901760, %v14398_v5  ;;  %v14475_v5 = vsub.f32 %v14358_v33, %v16480_v59 }
 0x503   : > { %6137 = vmatpush2.msra.mxu0 %v17303_v20  ;;  %6242 = vmatpush2.msra.mxu1 %v13848_v2  ;;  %v14432_v20 = vsub.f32 %v14375_v18, %v14375_v18  ;;  %v4271_v2 = vld [vmem:[%s16005_s17 + $0x1c8] ss:$20 sps:$4 sm:$0xff]   ;;  %17311 = vst [vmem:[#allocation17_spill] sm:$0xff] %v14466_v61  ;;  %v4265_v59 = vld [vmem:[%s16005_s17 + $0x1a0] ss:$20 sps:$4 sm:$0xff]   ;;  %v6454_v0 = vand.u32 4294901760, %v14444_v47 }
 0x504   : > { %6140 = vmatprep.subr.mxu0 %v17305_v43  ;;  %6243 = vmatprep.subr.mxu1 %v13862_v35  ;;  %v17308_v43 = vand.u32 4294901760, %v17307_v49  ;;  %v4223_v35 = vld [vmem:[%s16005_s17 + $0x88] ss:$20 sps:$4 sm:$0xff]   ;;  %v17310_v49 = vand.u32 4294901760, %v17177_v53  ;;  %v6448_v53 = vand.u32 4294901760, %v14413_v29  ;;  %v17317_v47 = vand.u32 4294901760, %v14403_v45 }
 0x505   : > { %17306 = vst [vmem:[#allocation21_spill] sm:$0xff] %v14432_v20  ;;  %6244 = vmatpush2.msra.mxu1 %v13870_v52  ;;  %v17312_v52 = vand.u32 4294901760, %v17178_v63  ;;  %v14487_v63 = vsub.f32 %v14373_v24, %v16481_v48  ;;  %v14503_v48 = vunpack.c.l.bf16 %v4271_v2  ;;  %v4217_v29 = vld [vmem:[%s16005_s17 + $0x60] ss:$20 sps:$4 sm:$0xff]   ;;  %v6460_v28 = vand.u32 4294901760, %v14475_v5 }
 0x506   : > { %6143 = vmatpush2.msra.mxu0 %v17308_v43  ;;  %v14461_v43 = vsub.f32 %v14345_v55, %v16479_v11  ;;  %6245 = vmatprep.subr.mxu1 %v13881_v26  ;;  %v14478_v11 = vunpack.c.h.bf16 %v4271_v2  ;;  %v6352_v26 = vand.u32 4294901760, %v14427_v30  ;;  %v14514_v10 = vsub.f32 %v14403_v45, %v17317_v47 }
 0x507   : > { %6146 = vmatprep.subr.mxu0 %v17310_v49  ;;  %6246 = vmatpush2.msra.mxu1 %v13892_v1  ;;  %v17314_v49 = vld [vmem:[#allocation102_spill] sm:$0xff]  ;;  %v17315_v1 = vand.u32 4294901760, %v14388_v44  ;;  %v14517_v30 = vunpack.c.l.bf16 %v4223_v35  ;;  %v17318_v2 = vand.u32 4294901760, %v13879_v6  ;;  %v14532_v47 = vunpack.c.h.bf16 %v4265_v59 }
 0x508   : > { %6149 = vmatpush2.msra.mxu0 %v17312_v52  ;;  %v14490_v52 = vunpack.c.h.bf16 %v4223_v35  ;;  %6250 = vmatmul.mubr.f32.vlgmr.msra.gmra.mxu1 %v17314_v49  ;;  %v17321_v35 = vand.u32 4294901760, %v13890_v38  ;;  %v6364_v6 = vand.u32 4294901760, %v14487_v63  ;;  %v17324_v38 = vand.u32 4294901760, %v13901_v37 }
 0x509   : > { %6152 = vmatprep.subr.mxu0 %v17313_v32  ;;  %9968 = vmatprep.subr.mxu1 %v6436_v57  ;;  %v14500_v32 = vsub.f32 %v14388_v44, %v17315_v1  ;;  %v6358_v57 = vand.u32 4294901760, %v14461_v43  ;;  %v14530_v43 = vsub.f32 %v14478_v11, %v14478_v11  ;;  %v14546_v1 = vunpack.c.h.bf16 %v4217_v29 }
 0x50a   : > { %6155 = vmatpush2.msra.mxu0 %v17316_v17  ;;  %9969 = vmatpush3.msra.mxu1 %v6340_v42  ;;  %v17319_v17 = vand.u32 4294901760, %v14418_v36  ;;  %v17327_v37 = vand.u32 4294901760, %v13910_v40 }
 0x50b   : > { %6529 = vmatprep.mubr.f32.mxu1 %v17180_v19  ;;  %6158 = vmatprep.subr.mxu0 %v17318_v2  ;;  %17320 = vst [vmem:[#allocation76_spill] sm:$0xff] %v14530_v43  ;;  %v17322_v2 = vand.u32 4294901760, %v14432_v20  ;;  %v6466_v63 = vand.u32 4294901760, %v14500_v32  ;;  %v14561_v19 = vsub.f32 %v14503_v48, %v14503_v48  ;;  %v6370_v32 = vand.u32 4294901760, %v14514_v10 }
 0x50c   : > { %v14526_v42 = vsub.f32 %v14418_v36, %v17319_v17  ;;  %9970 = vmatprep.subr.mxu1 %v6442_v23  ;;  %6161 = vmatpush2.msra.mxu0 %v17321_v35  ;;  %v14544_v17 = vsub.f32 %v14490_v52, %v14490_v52  ;;  %v4259_v23 = vld [vmem:[%s16005_s17 + $0x178] ss:$20 sps:$4 sm:$0xff]   ;;  %v17325_v35 = vand.u32 4294901760, %v14449_v16  ;;  %v17330_v36 = vand.u32 4294901760, %v13919_v62 }
 0x50d   : > { %v14540_v5 = vsub.f32 %v14432_v20, %v17322_v2  ;;  %9971 = vmatpush3.msra.mxu1 %v6346_v4  ;;  %6164 = vmatprep.subr.mxu0 %v17324_v38  ;;  %17326 = vst [vmem:[#allocation47_spill] sm:$0xff] %v14561_v19  ;;  %v14563_v20 = vunpack.c.l.bf16 %v4265_v59  ;;  %v4211_v4 = vld [vmem:[%s16005_s17 + $0x38] ss:$20 sps:$4 sm:$0xff]   ;;  %v17328_v38 = vand.u32 4294901760, %v14466_v61  ;;  %v14580_v59 = vunpack.c.l.bf16 %v4217_v29 }
 0x50e   : > { %17323 = vst [vmem:[#allocation34_spill] sm:$0xff] %v14544_v17  ;;  %v14557_v2 = vsub.f32 %v14449_v16, %v17325_v35  ;;  %9972 = vmatprep.subr.mxu1 %v6448_v53  ;;  %6167 = vmatpush2.msra.mxu0 %v17327_v37  ;;  %v14578_v16 = vsub.f32 %v14517_v30, %v14517_v30  ;;  %v6472_v40 = vand.u32 4294901760, %v14526_v42  ;;  %v14590_v37 = vunpack.c.h.bf16 %v4259_v23  ;;  %v4253_v42 = vld [vmem:[%s16005_s17 + $0x150] ss:$20 sps:$4 sm:$0xff]  }
 0x50f   : > { %v14574_v35 = vsub.f32 %v14466_v61, %v17328_v38  ;;  %9973 = vmatpush3.msra.mxu1 %v6352_v26  ;;  %6170 = vmatprep.subr.mxu0 %v17330_v36  ;;  %v14588_v10 = vsub.f32 %v14532_v47, %v14532_v47  ;;  %v17332_v38 = vand.u32 4294901760, %v13928_v14  ;;  %v6376_v29 = vand.u32 4294901760, %v14540_v5  ;;  %v4205_v26 = vld [vmem:[%s16005_s17 + $0x10] ss:$20 sps:$4 sm:$0xff]  }
 0x510   : > { %17329 = vst [vmem:[#allocation41_spill] sm:$0xff] %v14578_v16  ;;  %9974 = vmatprep.subr.mxu1 %v6454_v0  ;;  %v14598_v62 = vsub.f32 %v14546_v1, %v14546_v1  ;;  %v14600_v36 = vunpack.c.h.bf16 %v4211_v4  ;;  %v6478_v14 = vand.u32 4294901760, %v14557_v2  ;;  %v14610_v5 = vsub.f32 %v14563_v20, %v14563_v20 }
 0x511   : > { %17331 = vst [vmem:[#allocation45_spill] sm:$0xff] %v14588_v10  ;;  %6173 = vmatpush2.msra.mxu0 %v17332_v38  ;;  %9975 = vmatpush3.msra.mxu1 %v6358_v57  ;;  %v14612_v38 = vunpack.c.l.bf16 %v4259_v23  ;;  %v6382_v57 = vand.u32 4294901760, %v14574_v35  ;;  %v14622_v2 = vsub.f32 %v14580_v59, %v14580_v59  ;;  %v14624_v0 = vunpack.c.l.bf16 %v4211_v4  ;;  %v17336_v23 = vld [vmem:[#allocation108_spill] sm:$0xff] }
 0x512   : > { %17333 = vst [vmem:[#allocation51_spill] sm:$0xff] %v14598_v62  ;;  %6177 = vmatmul.mubr.f32.vlgmr.msra.gmra.mxu0 %v17314_v49  ;;  %17334 = vst [vmem:[#allocation50_spill] sm:$0xff] %v14610_v5  ;;  %9933 = vmatprep.subr.mxu0 %v14238_v13  ;;  %v17337_v61 = vand.u32 4294901760, %v14530_v43  ;;  %v14634_v35 = vsub.f32 %v14590_v37, %v14590_v37  ;;  %v14636_v53 = vunpack.c.h.bf16 %v4253_v42  ;;  %v17338_v4 = vand.u32 4294901760, %v14544_v17 }
 0x513   : > { %9976 = vmatprep.subr.mxu1 %v6460_v28  ;;  %17335 = vst [vmem:[#allocation36_spill] sm:$0xff] %v14622_v2  ;;  %9934 = vmatpush3.msra.mxu0 %v14243_v21  ;;  %v14647_v28 = vunpack.c.h.bf16 %v4205_v26  ;;  %v14669_v24 = vunpack.c.l.bf16 %v4205_v26  ;;  %v17342_v26 = vand.u32 4294901760, %v14598_v62  ;;  %v17343_v55 = vand.u32 4294901760, %v14610_v5 }
 0x514   : > { %6325 = vmatprep.mubr.f32.mxu0 %v17336_v23  ;;  %v6483_v45 = vsub.f32 %v14530_v43, %v17337_v61  ;;  %9977 = vmatpush3.msra.mxu1 %v6364_v6  ;;  %v6387_v44 = vsub.f32 %v14544_v17, %v17338_v4  ;;  %v14645_v61 = vsub.f32 %v14600_v36, %v14600_v36  ;;  %v17339_v43 = vand.u32 4294901760, %v14561_v19 }
 0x515   : > { %9935 = vmatprep.subr.mxu0 %v14251_v41  ;;  %9978 = vmatprep.subr.mxu1 %v6466_v63  ;;  %v14656_v4 = vsub.f32 %v14612_v38, %v14612_v38  ;;  %v14658_v23 = vunpack.c.l.bf16 %v4253_v42  ;;  %v17340_v17 = vand.u32 4294901760, %v14578_v16 }
 0x516   : > { %9936 = vmatpush3.msra.mxu0 %v14259_v39  ;;  %v6489_v6 = vsub.f32 %v14561_v19, %v17339_v43  ;;  %9979 = vmatpush3.msra.mxu1 %v6370_v32  ;;  %v14667_v43 = vsub.f32 %v14624_v0, %v14624_v0  ;;  %v6484_v42 = vand.u32 4294901760, %v6483_v45  ;;  %v17341_v32 = vand.u32 4294901760, %v14588_v10 }
 0x517   : > { %9937 = vmatprep.subr.mxu0 %v14268_v56  ;;  %v6393_v63 = vsub.f32 %v14578_v16, %v17340_v17  ;;  %9980 = vmatprep.subr.mxu1 %v6472_v40  ;;  %v14678_v17 = vsub.f32 %v14636_v53, %v14636_v53  ;;  %v6388_v33 = vand.u32 4294901760, %v6387_v44  ;;  %v6399_v40 = vsub.f32 %v14598_v62, %v17342_v26 }
 0x518   : > { %9938 = vmatpush3.msra.mxu0 %v14277_v51  ;;  %v6495_v19 = vsub.f32 %v14588_v10, %v17341_v32  ;;  %9981 = vmatpush3.msra.mxu1 %v6376_v29  ;;  %v14687_v16 = vsub.f32 %v14647_v28, %v14647_v28  ;;  %v6490_v32 = vand.u32 4294901760, %v6489_v6  ;;  %v6501_v29 = vsub.f32 %v14610_v5, %v17343_v55 }
 0x519   : > { %9939 = vmatprep.subr.mxu0 %v14289_v58  ;;  %9982 = vmatprep.subr.mxu1 %v6478_v14  ;;  %v14696_v10 = vsub.f32 %v14658_v23, %v14658_v23  ;;  %v6394_v26 = vand.u32 4294901760, %v6393_v63  ;;  %v17344_v45 = vand.u32 4294901760, %v14622_v2  ;;  %v14705_v62 = vsub.f32 %v14669_v24, %v14669_v24 }
 0x51a   : > { %9940 = vmatpush3.msra.mxu0 %v14301_v50  ;;  %9983 = vmatpush3.msra.mxu1 %v6382_v57  ;;  %v6496_v55 = vand.u32 4294901760, %v6495_v19  ;;  %v17345_v44 = vand.u32 4294901760, %v14634_v35  ;;  %v17346_v6 = vand.u32 4294901760, %v14645_v61  ;;  %v6502_v19 = vand.u32 4294901760, %v6501_v29 }
 0x51b   : > { %9941 = vmatprep.subr.mxu0 %v14311_v34  ;;  %v6405_v14 = vsub.f32 %v14622_v2, %v17344_v45  ;;  %9984 = vmatprep.subr.mxu1 %v6484_v42  ;;  %v6400_v45 = vand.u32 4294901760, %v6399_v40  ;;  %v17347_v42 = vand.u32 4294901760, %v14656_v4  ;;  %v17348_v40 = vand.u32 4294901760, %v14667_v43 }
 0x51c   : > { %9942 = vmatpush3.msra.mxu0 %v14321_v12  ;;  %v6507_v57 = vsub.f32 %v14634_v35, %v17345_v44  ;;  %9985 = vmatpush3.msra.mxu1 %v6388_v33  ;;  %v6411_v2 = vsub.f32 %v14645_v61, %v17346_v6  ;;  %v16517_v5 = vand.u32 4294901760, %v14705_v62  ;;  %v17349_v29 = vand.u32 4294901760, %v14678_v17 }
 0x51d   : > { %9943 = vmatprep.subr.mxu0 %v14334_v27  ;;  %9986 = vmatprep.subr.mxu1 %v6490_v32  ;;  %v6513_v44 = vsub.f32 %v14656_v4, %v17347_v42  ;;  %v6406_v33 = vand.u32 4294901760, %v6405_v14  ;;  %v6417_v6 = vsub.f32 %v14667_v43, %v17348_v40  ;;  %v17350_v14 = vand.u32 4294901760, %v14687_v16 }
 0x51e   : > { %9944 = vmatpush3.msra.mxu0 %v14347_v3  ;;  %9987 = vmatpush3.msra.mxu1 %v6394_v26  ;;  %v6508_v32 = vand.u32 4294901760, %v6507_v57  ;;  %v6519_v42 = vsub.f32 %v14678_v17, %v17349_v29  ;;  %v6412_v26 = vand.u32 4294901760, %v6411_v2  ;;  %v6429_v2 = vsub.f32 %v14705_v62, %v16517_v5  ;;  %v17370_v5 = vld [vmem:[#allocation50_spill] sm:$0xff] }
 0x51f   : > { %9945 = vmatprep.subr.mxu0 %v14360_v25  ;;  %9988 = vmatprep.subr.mxu1 %v6496_v55  ;;  %v6423_v63 = vsub.f32 %v14687_v16, %v17350_v14  ;;  %v6514_v40 = vand.u32 4294901760, %v6513_v44  ;;  %v17351_v55 = vand.u32 4294901760, %v14696_v10  ;;  %v6418_v29 = vand.u32 4294901760, %v6417_v6  ;;  %v17353_v6 = vld [vmem:[#allocation109_spill] sm:$0xff]  ;;  %v17357_v14 = vld [vmem:[#allocation23_spill] sm:$0xff] }
 0x520   : > { %9946 = vmatpush3.msra.mxu0 %v14375_v18  ;;  %9989 = vmatpush3.msra.mxu1 %v6400_v45  ;;  %v6520_v45 = vand.u32 4294901760, %v6519_v42  ;;  %v17355_v42 = vld [vmem:[#allocation8_spill] sm:$0xff] }
 0x521   : > { %9947 = vmatprep.subr.mxu0 %v14390_v22  ;;  %9990 = vmatprep.subr.mxu1 %v6502_v19  ;;  %v6525_v57 = vsub.f32 %v14696_v10, %v17351_v55  ;;  %v6424_v19 = vand.u32 4294901760, %v6423_v63  ;;  %v17352_v63 = vld [vmem:[#allocation107_spill] sm:$0xff]  ;;  %v17359_v55 = vld [vmem:[#allocation18_spill] sm:$0xff] }
 0x522   : > { %9948 = vmatpush3.msra.mxu0 %v14405_v15  ;;  %9991 = vmatpush3.msra.mxu1 %v6406_v33  ;;  %v6430_v33 = vand.u32 4294901760, %v6429_v2  ;;  %v17362_v2 = vld [vmem:[#allocation14_spill] sm:$0xff] }
 0x523   : > { %9949 = vmatprep.subr.mxu0 %v14478_v11  ;;  %9992 = vmatprep.subr.mxu1 %v6508_v32  ;;  %v6526_v44 = vand.u32 4294901760, %v6525_v57  ;;  %v17354_v32 = vld [vmem:[#allocation105_spill] sm:$0xff]  ;;  %v17360_v57 = vld [vmem:[#allocation15_spill] sm:$0xff] }
 0x524   : > { %9950 = vmatpush3.msra.mxu0 %v14490_v52  ;;  %9993 = vmatpush3.msra.mxu1 %v6412_v26  ;;  %v17356_v26 = vld [vmem:[#allocation13_spill] sm:$0xff] }
 0x525   : > { %9951 = vmatprep.subr.mxu0 %v14503_v48  ;;  %9994 = vmatprep.subr.mxu1 %v6514_v40  ;;  %v17358_v40 = vld [vmem:[#allocation7_spill] sm:$0xff] }
 0x526   : > { %9952 = vmatpush3.msra.mxu0 %v14517_v30  ;;  %9995 = vmatpush3.msra.mxu1 %v6418_v29  ;;  %v17361_v29 = vld [vmem:[#allocation21_spill] sm:$0xff] }
 0x527   : > { %9953 = vmatprep.subr.mxu0 %v14532_v47  ;;  %9996 = vmatprep.subr.mxu1 %v6520_v45  ;;  %v17363_v45 = vld [vmem:[#allocation17_spill] sm:$0xff] }
 0x528   : > { %9954 = vmatpush3.msra.mxu0 %v14546_v1  ;;  %9997 = vmatpush3.msra.mxu1 %v6424_v19  ;;  %v17364_v19 = vld [vmem:[#allocation76_spill] sm:$0xff] }
 0x529   : > { %9955 = vmatprep.subr.mxu0 %v14563_v20  ;;  %9998 = vmatprep.subr.mxu1 %v6526_v44  ;;  %v17365_v44 = vld [vmem:[#allocation34_spill] sm:$0xff] }
 0x52a   : > { %9956 = vmatpush3.msra.mxu0 %v14580_v59  ;;  %9999 = vmatpush3.msra.mxu1 %v6430_v33  ;;  %v17366_v33 = vld [vmem:[#allocation47_spill] sm:$0xff] }
 0x52b   : > { %9957 = vmatprep.subr.mxu0 %v14590_v37  ;;  %6531 = vmatmul.mubr.f32.vlgmr.msra.gmra.mxu1 %v17314_v49  ;;  %v17371_v49 = vld [vmem:[#allocation36_spill] sm:$0xff] }
 0x52c   : > { %10038 = vmatprep.subr.mxu1 %v14238_v13  ;;  %9958 = vmatpush3.msra.mxu0 %v14600_v36 }
 0x52d   : > { %10039 = vmatpush3.msra.mxu1 %v14243_v21  ;;  %6709 = vmatprep.mubr.f32.mxu1 %v17352_v63  ;;  %v17367_v63 = vld [vmem:[#allocation41_spill] sm:$0xff] }
 0x52e   : > { %9959 = vmatprep.subr.mxu0 %v14612_v38  ;;  %10040 = vmatprep.subr.mxu1 %v14251_v41 }
 0x52f   : > { %9960 = vmatpush3.msra.mxu0 %v14624_v0  ;;  %10041 = vmatpush3.msra.mxu1 %v14259_v39 }
 0x530   : > { %9961 = vmatprep.subr.mxu0 %v14636_v53  ;;  %10042 = vmatprep.subr.mxu1 %v14268_v56 }
 0x531   : > { %9962 = vmatpush3.msra.mxu0 %v14647_v28  ;;  %10043 = vmatpush3.msra.mxu1 %v14277_v51 }
 0x532   : > { %9963 = vmatprep.subr.mxu0 %v14658_v23  ;;  %10044 = vmatprep.subr.mxu1 %v14289_v58 }
 0x533   : > { %9964 = vmatpush3.msra.mxu0 %v14669_v24  ;;  %10045 = vmatpush3.msra.mxu1 %v14301_v50 }
 0x534   : > { %6331 = vmatmul.mubr.f32.vlgmr.msra.gmra.mxu0 %v17353_v6  ;;  %10003 = vmatprep.subr.mxu0 %v14266_v7  ;;  %v17368_v6 = vld [vmem:[#allocation45_spill] sm:$0xff] }
 0x535   : > { %10046 = vmatprep.subr.mxu1 %v14311_v34  ;;  %10004 = vmatpush3.msra.mxu0 %v14275_v31 }
 0x536   : > { %6634 = vmatprep.mubr.f32.mxu0 %v17354_v32  ;;  %10047 = vmatpush3.msra.mxu1 %v14321_v12  ;;  %v17369_v32 = vld [vmem:[#allocation51_spill] sm:$0xff] }
 0x537   : > { %10005 = vmatprep.subr.mxu0 %v14287_v8  ;;  %10048 = vmatprep.subr.mxu1 %v14334_v27 }
 0x538   : > { %10006 = vmatpush3.msra.mxu0 %v14299_v9  ;;  %10049 = vmatpush3.msra.mxu1 %v14347_v3 }
 0x539   : > { %10007 = vmatprep.subr.mxu0 %v14309_v60  ;;  %10050 = vmatprep.subr.mxu1 %v14360_v25 }
 0x53a   : > { %10008 = vmatpush3.msra.mxu0 %v14319_v46  ;;  %10051 = vmatpush3.msra.mxu1 %v14375_v18 }
 0x53b   : > { %10009 = vmatprep.subr.mxu0 %v14332_v54  ;;  %10052 = vmatprep.subr.mxu1 %v14390_v22 }
 0x53c   : > { %10010 = vmatpush3.msra.mxu0 %v17355_v42  ;;  %10053 = vmatpush3.msra.mxu1 %v14405_v15 }
 0x53d   : > { %10011 = vmatprep.subr.mxu0 %v17356_v26  ;;  %10054 = vmatprep.subr.mxu1 %v14478_v11 }
 0x53e   : > { %10012 = vmatpush3.msra.mxu0 %v17357_v14  ;;  %10055 = vmatpush3.msra.mxu1 %v14490_v52 }
 0x53f   : > { %10013 = vmatprep.subr.mxu0 %v17358_v40  ;;  %10056 = vmatprep.subr.mxu1 %v14503_v48 }
 0x540   : > { %10014 = vmatpush3.msra.mxu0 %v17359_v55  ;;  %10057 = vmatpush3.msra.mxu1 %v14517_v30 }
 0x541   : > { %10015 = vmatprep.subr.mxu0 %v17360_v57  ;;  %10058 = vmatprep.subr.mxu1 %v14532_v47 }
 0x542   : > { %10016 = vmatpush3.msra.mxu0 %v17361_v29  ;;  %10059 = vmatpush3.msra.mxu1 %v14546_v1 }
 0x543   : > { %10017 = vmatprep.subr.mxu0 %v17362_v2  ;;  %10060 = vmatprep.subr.mxu1 %v14563_v20 }
 0x544   : > { %10018 = vmatpush3.msra.mxu0 %v17363_v45  ;;  %10061 = vmatpush3.msra.mxu1 %v14580_v59 }
 0x545   : > { %10019 = vmatprep.subr.mxu0 %v17364_v19  ;;  %10062 = vmatprep.subr.mxu1 %v14590_v37 }
 0x546   : > { %10020 = vmatpush3.msra.mxu0 %v17365_v44  ;;  %10063 = vmatpush3.msra.mxu1 %v14600_v36 }
 0x547   : > { %10021 = vmatprep.subr.mxu0 %v17366_v33  ;;  %10064 = vmatprep.subr.mxu1 %v14612_v38 }
 0x548   : > { %10022 = vmatpush3.msra.mxu0 %v17367_v63  ;;  %10065 = vmatpush3.msra.mxu1 %v14624_v0  ;;  %v17372_v63 = vld [vmem:[#allocation106_spill] sm:$0xff] }
 0x549   : > { %10023 = vmatprep.subr.mxu0 %v17368_v6  ;;  %10066 = vmatprep.subr.mxu1 %v14636_v53 }
 0x54a   : > { %10024 = vmatpush3.msra.mxu0 %v17369_v32  ;;  %10067 = vmatpush3.msra.mxu1 %v14647_v28  ;;  %v17373_v32 = vld [vmem:[#allocation104_spill] sm:$0xff] }
 0x54b   : > { %10025 = vmatprep.subr.mxu0 %v17370_v5  ;;  %10068 = vmatprep.subr.mxu1 %v14658_v23 }
 0x54c   : > { %10026 = vmatpush3.msra.mxu0 %v17371_v49  ;;  %10069 = vmatpush3.msra.mxu1 %v14669_v24 }
 0x54d   : > { %10027 = vmatprep.subr.mxu0 %v14634_v35  ;;  %6713 = vmatmul.mubr.f32.vlgmr.msra.gmra.mxu1 %v17372_v63 }
 0x54e   : > { %10108 = vmatprep.subr.mxu1 %v14238_v13  ;;  %10028 = vmatpush3.msra.mxu0 %v14645_v61  ;;  %v17374_v13 = vld [vmem:[#allocation103_spill] sm:$0xff] }
 0x54f   : > { %10109 = vmatpush3.msra.mxu1 %v14243_v21  ;;  %6919 = vmatprep.mubr.f32.mxu1 %v17373_v32  ;;  %v17375_v21 = vand.u32 4294901760, %v14266_v7  ;;  %v17379_v7 = vand.u32 4294901760, %v14309_v60  ;;  %v17386_v60 = vand.u32 4294901760, %v17359_v55 }
 0x550   : > { %10029 = vmatprep.subr.mxu0 %v14656_v4  ;;  %10110 = vmatprep.subr.mxu1 %v14251_v41  ;;  %v17376_v41 = vand.u32 4294901760, %v14275_v31  ;;  %v17380_v31 = vand.u32 4294901760, %v14319_v46  ;;  %v17388_v46 = vand.u32 4294901760, %v17361_v29 }
 0x551   : > { %10030 = vmatpush3.msra.mxu0 %v14667_v43  ;;  %10111 = vmatpush3.msra.mxu1 %v14259_v39  ;;  %v17377_v39 = vand.u32 4294901760, %v14287_v8  ;;  %v17382_v8 = vand.u32 4294901760, %v17355_v42 }
 0x552   : > { %10031 = vmatprep.subr.mxu0 %v14678_v17  ;;  %10112 = vmatprep.subr.mxu1 %v14268_v56  ;;  %v17378_v56 = vand.u32 4294901760, %v14299_v9  ;;  %v17384_v9 = vand.u32 4294901760, %v17357_v14 }
 0x553   : > { %10032 = vmatpush3.msra.mxu0 %v14687_v16  ;;  %10113 = vmatpush3.msra.mxu1 %v14277_v51  ;;  %v17381_v51 = vand.u32 4294901760, %v14332_v54  ;;  %v17391_v54 = vand.u32 4294901760, %v17364_v19 }
 0x554   : > { %10033 = vmatprep.subr.mxu0 %v14696_v10  ;;  %10114 = vmatprep.subr.mxu1 %v14289_v58  ;;  %v17383_v58 = vand.u32 4294901760, %v17356_v26 }
 0x555   : > { %10034 = vmatpush3.msra.mxu0 %v14705_v62  ;;  %10115 = vmatpush3.msra.mxu1 %v14301_v50  ;;  %v17385_v50 = vand.u32 4294901760, %v17358_v40 }
 0x556   : > { %6637 = vmatmul.mubr.f32.vlgmr.msra.gmra.mxu0 %v17374_v13  ;;  %10073 = vmatprep.subr.mxu0 %v17375_v21 }
 0x557   : > { %10116 = vmatprep.subr.mxu1 %v14311_v34  ;;  %10074 = vmatpush3.msra.mxu0 %v17376_v41  ;;  %v17387_v34 = vand.u32 4294901760, %v17360_v57 }
 0x558   : > { %6847 = vmatprep.mubr.f32.mxu0 %v17373_v32  ;;  %10117 = vmatpush3.msra.mxu1 %v14321_v12  ;;  %v17389_v12 = vand.u32 4294901760, %v17362_v2 }
 0x559   : > { %10075 = vmatprep.subr.mxu0 %v17377_v39  ;;  %10118 = vmatprep.subr.mxu1 %v14334_v27  ;;  %v17392_v27 = vand.u32 4294901760, %v17365_v44 }
 0x55a   : > { %10076 = vmatpush3.msra.mxu0 %v17378_v56  ;;  %10119 = vmatpush3.msra.mxu1 %v14347_v3  ;;  %v17393_v3 = vand.u32 4294901760, %v17366_v33 }
 0x55b   : > { %10077 = vmatprep.subr.mxu0 %v17379_v7  ;;  %10120 = vmatprep.subr.mxu1 %v14360_v25  ;;  %v17394_v25 = vld [vmem:[#allocation41_spill] sm:$0xff] }
 0x55c   : > { %10078 = vmatpush3.msra.mxu0 %v17380_v31  ;;  %10121 = vmatpush3.msra.mxu1 %v14375_v18  ;;  %v17395_v18 = vand.u32 4294901760, %v17394_v25 }
 0x55d   : > { %10079 = vmatprep.subr.mxu0 %v17381_v51  ;;  %10122 = vmatprep.subr.mxu1 %v14390_v22  ;;  %v17396_v22 = vand.u32 4294901760, %v17368_v6 }
 0x55e   : > { %10080 = vmatpush3.msra.mxu0 %v17382_v8  ;;  %10123 = vmatpush3.msra.mxu1 %v14405_v15  ;;  %v17390_v15 = vand.u32 4294901760, %v17363_v45 }
 0x55f   : > { %10081 = vmatprep.subr.mxu0 %v17383_v58  ;;  %10124 = vmatprep.subr.mxu1 %v14478_v11  ;;  %v17397_v11 = vld [vmem:[#allocation51_spill] sm:$0xff] }
 0x560   : > { %10082 = vmatpush3.msra.mxu0 %v17384_v9  ;;  %10125 = vmatpush3.msra.mxu1 %v14490_v52  ;;  %v17400_v52 = vand.u32 4294901760, %v17371_v49  ;;  %v17405_v49 = vand.u32 4294901760, %v14667_v43 }
 0x561   : > { %10083 = vmatprep.subr.mxu0 %v17385_v50  ;;  %10126 = vmatprep.subr.mxu1 %v14503_v48  ;;  %v17398_v48 = vand.u32 4294901760, %v17397_v11 }
 0x562   : > { %10084 = vmatpush3.msra.mxu0 %v17386_v60  ;;  %10127 = vmatpush3.msra.mxu1 %v14517_v30  ;;  %v17401_v30 = vand.u32 4294901760, %v14634_v35 }
 0x563   : > { %10085 = vmatprep.subr.mxu0 %v17387_v34  ;;  %10128 = vmatprep.subr.mxu1 %v14532_v47  ;;  %v17403_v47 = vand.u32 4294901760, %v14645_v61 }
 0x564   : > { %10086 = vmatpush3.msra.mxu0 %v17388_v46  ;;  %10129 = vmatpush3.msra.mxu1 %v14546_v1  ;;  %v17402_v1 = vld [vmem:[#allocation102_spill] sm:$0xff] }
 0x565   : > { %10087 = vmatprep.subr.mxu0 %v17389_v12  ;;  %10130 = vmatprep.subr.mxu1 %v14563_v20  ;;  %v17399_v20 = vand.u32 4294901760, %v17370_v5  ;;  %v4532_v5 = vpop.f32.mrf.mxu0 }
 0x566   : > { %10088 = vmatpush3.msra.mxu0 %v17390_v15  ;;  %10131 = vmatpush3.msra.mxu1 %v14580_v59  ;;  %v17404_v59 = vand.u32 4294901760, %v14656_v4 }
 0x567   : > { %10089 = vmatprep.subr.mxu0 %v17391_v54  ;;  %10132 = vmatprep.subr.mxu1 %v14590_v37  ;;  %v17407_v37 = vand.u32 4294901760, %v14687_v16  ;;  %v6943_v54 = vld [vmem:[%s16004_s16] sm:$0xff] }
 0x568   : > { %10090 = vmatpush3.msra.mxu0 %v17392_v27  ;;  %10133 = vmatpush3.msra.mxu1 %v14600_v36  ;;  %v17408_v36 = vand.u32 4294901760, %v14696_v10 }
 0x569   : > { %10091 = vmatprep.subr.mxu0 %v17393_v3  ;;  %10134 = vmatprep.subr.mxu1 %v14612_v38  ;;  %v4861_v38 = vpop.f32.mrf.mxu1 }
 0x56a   : > { %10092 = vmatpush3.msra.mxu0 %v17395_v18  ;;  %10135 = vmatpush3.msra.mxu1 %v14624_v0  ;;  %v17409_v0 = vand.u32 4294901760, %v14705_v62  ;;  %v4862_v45 = vadd.f32 %v4861_v38, %v4532_v5 }
 0x56b   : > { %10093 = vmatprep.subr.mxu0 %v17396_v22  ;;  %10136 = vmatprep.subr.mxu1 %v14636_v53  ;;  %v14918_v53 = vld [vmem:[%s11185_s1 + $0x28] sm:$0xff] }
 0x56c   : > { %10094 = vmatpush3.msra.mxu0 %v17398_v48  ;;  %10137 = vmatpush3.msra.mxu1 %v14647_v28  ;;  %v4534_v28 = vpop.f32.mrf.mxu0 }
 0x56d   : > { %10095 = vmatprep.subr.mxu0 %v17399_v20  ;;  %10138 = vmatprep.subr.mxu1 %v14658_v23  ;;  %v4863_v23 = vpop.f32.mrf.mxu1 }
 0x56e   : > { %10096 = vmatpush3.msra.mxu0 %v17400_v52  ;;  %10139 = vmatpush3.msra.mxu1 %v14669_v24  ;;  %v17406_v24 = vand.u32 4294901760, %v14678_v17  ;;  %v5000_v35 = vpop.f32.mrf.mxu0  ;;  %v4864_v33 = vadd.f32 %v4863_v23, %v4534_v28 }
 0x56f   : > { %10097 = vmatprep.subr.mxu0 %v17401_v30  ;;  %6921 = vmatmul.mubr.f32.vlgmr.msra.gmra.mxu1 %v17402_v1  ;;  %v5077_v16 = vpop.f32.mrf.mxu1  ;;  %v5001_v63 = vadd.f32 %v5000_v35, %v4862_v45 }
 0x570   : > { %10098 = vmatpush3.msra.mxu0 %v17403_v47  ;;  %10572 = vmatprep.subr.mxu1 %v14918_v53  ;;  %v5002_v61 = vpop.f32.mrf.mxu0 }
 0x571   : > { %10099 = vmatprep.subr.mxu0 %v17404_v59  ;;  %10590 = vmatprep.mubr.msk.f32.mxu1 %vm11010_vm1, %v14918_v53  ;;  %v5079_v10 = vpop.f32.mrf.mxu1  ;;  %v5003_v13 = vadd.f32 %v5002_v61, %v4864_v33  ;;  %v5078_v56 = vadd.f32 %v5077_v16, %v5001_v63 }
 0x572   : > { %10100 = vmatpush3.msra.mxu0 %v17405_v49  ;;  %v5278_v4 = vpop.f32.mrf.mxu0 }
 0x573   : > { %10101 = vmatprep.subr.mxu0 %v17406_v24  ;;  %v5351_v43 = vpop.f32.mrf.mxu1  ;;  %v5279_v8 = vadd.f32 %v5278_v4, %v5078_v56  ;;  %v5080_v58 = vadd.f32 %v5079_v10, %v5003_v13  ;;  %v6942_v4 = vld [vmem:[%s16003_s15] sm:$0xff] }
 0x574   : > { %10102 = vmatpush3.msra.mxu0 %v17407_v37  ;;  %v5280_v17 = vpop.f32.mrf.mxu0 }
 0x575   : > { %10103 = vmatprep.subr.mxu0 %v17408_v36  ;;  %v5353_v42 = vpop.f32.mrf.mxu1  ;;  %v5281_v34 = vadd.f32 %v5280_v17, %v5080_v58  ;;  %v14938_v12 = vadd.f32 %v5351_v43, %v5279_v8 }
 0x576   : > { %10104 = vmatpush3.msra.mxu0 %v17409_v0  ;;  %v5432_v62 = vpop.f32.mrf.mxu0 }
 0x577   : > { %6849 = vmatmul.mubr.f32.vlgmr.msra.gmra.mxu0 %v17402_v1  ;;  %10551 = vmatprep.subr.mxu0 %v14918_v53  ;;  %v5761_v26 = vpop.f32.mrf.mxu1  ;;  %v14941_v15 = vadd.f32 %v5353_v42, %v5281_v34 }
 0x578   : > { %10569 = vmatprep.mubr.msk.f32.mxu0 %vm11010_vm1, %v14918_v53  ;;  %v5434_v14 = vpop.f32.mrf.mxu0  ;;  %v5762_v57 = vadd.f32 %v5761_v26, %v5432_v62  ;;  %v6951_v62 = vsel %vm6949_vm7, %v6942_v4, 0 }
 0x579   : > { %v5763_v55 = vpop.f32.mrf.mxu1 }
 0x57a   : > { %v5764_v19 = vadd.f32 %v5763_v55, %v5434_v14  ;;  %v14967_v14 = vand.u32 4294901760, %v6951_v62 }
 0x57c   : > { %v14986_v33 = vsub.f32 %v6951_v62, %v14967_v14 }
 0x586   : > { %v5977_v29 = vpop.f32.mrf.mxu1 }
 0x588   : > { %v5979_v32 = vpop.f32.mrf.mxu1 }
 0x58e   : > { %v5900_v40 = vpop.f32.mrf.mxu0 }
 0x58f   : > { %v5901_v44 = vadd.f32 %v5900_v40, %v5762_v57 }
 0x590   : > { %v5902_v2 = vpop.f32.mrf.mxu0 }
 0x591   : > { %v5903_v6 = vadd.f32 %v5902_v2, %v5764_v19  ;;  %v5978_v21 = vadd.f32 %v5977_v29, %v5901_v44  ;;  %v14983_v19 = vand.u32 4294901760, %v14941_v15 }
 0x593   : > { %v5980_v31 = vadd.f32 %v5979_v32, %v5903_v6 }
 0x5c8   : > { %v6251_v41 = vpop.f32.mrf.mxu1 }
 0x5ca   : > { %v6253_v60 = vpop.f32.mrf.mxu1 }
 0x5d2   : > { %v6178_v39 = vpop.f32.mrf.mxu0 }
 0x5d3   : > { %v6179_v7 = vadd.f32 %v6178_v39, %v5978_v21 }
 0x5d4   : > { %v6180_v51 = vpop.f32.mrf.mxu0 }
 0x5d5   : > { %v6252_v9 = vadd.f32 %v6251_v41, %v6179_v7  ;;  %v6181_v50 = vadd.f32 %v6180_v51, %v5980_v31  ;;  %v15005_v7 = vand.u32 4294901760, %v14938_v12  ;;  %v15009_v31 = vsub.f32 %v14941_v15, %v14983_v19 }
 0x5d6   : > { %v7029_v51 = vand.u32 4294901760, %v14986_v33 }
 0x5d7   : > { %v6254_v46 = vadd.f32 %v6253_v60, %v6181_v50  ;;  %6935 = vrot.lane.b32.xlu1 %v6252_v9, %s11012_s7  ;;  %v14969_v40 = vand.u32 4294901760, %v6252_v9 }
 0x5d9   : > { %6939 = vrot.lane.b32.xlu0 %v6254_v46, %s11012_s7  ;;  %v14961_v43 = vand.u32 4294901760, %v6254_v46  ;;  %v14989_v63 = vsub.f32 %v6252_v9, %v14969_v40 }
 0x5db   : > { %6927 = vrot.lane.b32.xlu1 %v14938_v12, %s11012_s7  ;;  %v14972_v55 = vsub.f32 %v6254_v46, %v14961_v43  ;;  %v7082_v50 = vand.u32 4294901760, %v14989_v63 }
 0x5dd   : > { %6931 = vrot.lane.b32.xlu0 %v14941_v15, %s11012_s7  ;;  %v7068_v32 = vand.u32 4294901760, %v14972_v55 }
 0x5df   : > { %v7069_v9 = vsub.f32 %v14972_v55, %v7068_v32 }
 0x5e1   : > { %6946 = vperm.xlu0 %10995, %v6943_v54   ;;  %v7030_v54 = vsub.f32 %v14986_v33, %v7029_v51 }
 0x5eb   : > { %v10000_v3 = vpop.f32.mrf.mxu1 }
 0x5ed   : > { %v10001_v22 = vpop.f32.mrf.mxu1 }
 0x5ee   : > { %v10002_v52 = vadd.f32 %v10001_v22, %v10000_v3  ;;  %v7070_v3 = vand.u32 4294901760, %v7069_v9 }
 0x5f4   : > { %v9965_v27 = vpop.f32.mrf.mxu0 }
 0x5f6   : > { %v9966_v25 = vpop.f32.mrf.mxu0 }
 0x5f7   : > { %v9967_v20 = vadd.f32 %v9966_v25, %v9965_v27  ;;  %v15039_v27 = vsub.f32 %v14938_v12, %v15005_v7  ;;  %v7083_v25 = vsub.f32 %v14989_v63, %v7082_v50 }
 0x5f9   : > { %v6533_v47 = vadd.f32 %v10002_v52, %v9967_v20  ;;  %v7084_v20 = vand.u32 4294901760, %v7083_v25 }
 0x60d   : > { %v10070_v11 = vpop.f32.mrf.mxu1 }
 0x60f   : > { %v10071_v1 = vpop.f32.mrf.mxu1 }
 0x610   : > { %v10072_v37 = vadd.f32 %v10071_v1, %v10070_v11 }
 0x616   : > { %v10035_v18 = vpop.f32.mrf.mxu0 }
 0x618   : > { %v10036_v48 = vpop.f32.mrf.mxu0 }
 0x619   : > { %v10037_v30 = vadd.f32 %v10036_v48, %v10035_v18  ;;  %v7096_v18 = vand.u32 4294901760, %v15009_v31  ;;  %v7031_v48 = vand.u32 4294901760, %v7030_v54 }
 0x61b   : > { %v6639_v49 = vadd.f32 %v10037_v30, %v6533_v47  ;;  %v7097_v52 = vsub.f32 %v15009_v31, %v7096_v18  ;;  %v7110_v30 = vand.u32 4294901760, %v15039_v27 }
 0x61d   : > { %v6715_v5 = vadd.f32 %v10072_v37, %v6639_v49  ;;  %v7111_v49 = vsub.f32 %v15039_v27, %v7110_v30 }
 0x61f   : > { %v7112_v37 = vand.u32 4294901760, %v7111_v49 }
 0x62f   : > { %v10140_v59 = vpop.f32.mrf.mxu1 }
 0x631   : > { %v10141_v36 = vpop.f32.mrf.mxu1 }
 0x632   : > { %v10142_v28 = vadd.f32 %v10141_v36, %v10140_v59  ;;  %v7098_v59 = vand.u32 4294901760, %v7097_v52  ;;  %v7511_v36 = vld [vmem:[%s16008_s20 + $0x38] sm:$0xff] }
 0x637   : > { %v10105_v24 = vpop.f32.mrf.mxu0 }
 0x639   : > { %v10106_v0 = vpop.f32.mrf.mxu0 }
 0x63a   : > { %v10107_v38 = vadd.f32 %v10106_v0, %v10105_v24  ;;  %v15173_v0 = vunpack.c.l.bf16 %v7511_v36 }
 0x63c   : > { %v6851_v35 = vadd.f32 %v10107_v38, %v6715_v5  ;;  %v15175_v5 = vunpack.c.h.bf16 %v7511_v36  ;;  %v7510_v38 = vld [vmem:[%s16008_s20 + $0x30] sm:$0xff] }
 0x63e   : > { %v6923_v23 = vadd.f32 %v10142_v28, %v6851_v35  ;;  %v15182_v28 = vsub.f32 %v15175_v5, %v15175_v5  ;;  %v15184_v35 = vunpack.c.h.bf16 %v7510_v38 }
 0x640   : > { %v14950_v16 = vand.u32 4294901760, %v6923_v23  ;;  %v7624_v4 = vand.u32 4294901760, %v15182_v28 }
 0x642   : > { %v14953_v61 = vsub.f32 %v6923_v23, %v14950_v16  ;;  %10552 = vmatpush3.msra.mxu0 %v14950_v16  ;;  %v15189_v23 = vsub.f32 %v15173_v0, %v15173_v0 }
 0x643   : > { %10553 = vmatprep.subr.mxu0 %v14918_v53 }
 0x644   : > { %v7054_v10 = vand.u32 4294901760, %v14953_v61 }
 0x646   : > { %v7055_v17 = vsub.f32 %v14953_v61, %v7054_v10 }
 0x648   : > { %v7056_v42 = vand.u32 4294901760, %v7055_v17  ;;  %v7629_v17 = vand.u32 4294901760, %v15189_v23 }
 0x649   : > { %v6936_v26 = vpop.permute.xlu1 %6935 }
 0x64a   : > { %10573 = vmatpush3.msra.mxu1 %v7056_v42  ;;  %v14974_v57 = vand.u32 4294901760, %v6936_v26 }
 0x64b   : > { %v6940_v29 = vpop.permute.xlu0 %6939  ;;  %10574 = vmatprep.subr.mxu1 %v14918_v53 }
 0x64c   : > { %v14978_v2 = vsub.f32 %v6936_v26, %v14974_v57  ;;  %v14980_v45 = vand.u32 4294901760, %v6940_v29  ;;  %v7508_v26 = vld [vmem:[%s16008_s20 + $0x20] sm:$0xff] }
 0x64d   : > { %v6928_v44 = vpop.permute.xlu1 %6927 }
 0x64e   : > { %v14992_v6 = vsub.f32 %v6940_v29, %v14980_v45  ;;  %10554 = vmatpush3.msra.mxu0 %v14980_v45  ;;  %v7075_v21 = vand.u32 4294901760, %v14978_v2  ;;  %v14999_v39 = vand.u32 4294901760, %v6928_v44  ;;  %v7630_v29 = vsub.f32 %v15189_v23, %v7629_v17 }
 0x64f   : > { %10555 = vmatprep.subr.mxu0 %v14918_v53  ;;  %v6932_v13 = vpop.permute.xlu0 %6931 }
 0x650   : > { %v7061_v41 = vand.u32 4294901760, %v14992_v6  ;;  %v15001_v56 = vand.u32 4294901760, %v6932_v13  ;;  %10556 = vmatpush3.msra.mxu0 %v14961_v43  ;;  %v7076_v60 = vsub.f32 %v14978_v2, %v7075_v21  ;;  %v15029_v46 = vsub.f32 %v6928_v44, %v14999_v39  ;;  %v7507_v44 = vld [vmem:[%s16008_s20 + $0x18] sm:$0xff] }
 0x651   : > { %10557 = vmatprep.subr.mxu0 %v14918_v53 }
 0x652   : > { %v7062_v8 = vsub.f32 %v14992_v6, %v7061_v41  ;;  %v15017_v58 = vsub.f32 %v6932_v13, %v15001_v56  ;;  %10558 = vmatpush3.msra.mxu0 %v14974_v57  ;;  %v7077_v22 = vand.u32 4294901760, %v7076_v60  ;;  %v7103_v11 = vand.u32 4294901760, %v15029_v46 }
 0x653   : > { %10559 = vmatprep.subr.mxu0 %v14918_v53  ;;  %v7631_v13 = vand.u32 4294901760, %v7630_v29  ;;  %v15272_v60 = vunpack.c.h.bf16 %v7507_v44 }
 0x654   : > { %v7063_v34 = vand.u32 4294901760, %v7062_v8  ;;  %v7089_v15 = vand.u32 4294901760, %v15017_v58  ;;  %10560 = vmatpush3.msra.mxu0 %v14969_v40  ;;  %v7104_v1 = vsub.f32 %v15029_v46, %v7103_v11  ;;  %v15266_v8 = vunpack.c.l.bf16 %v7507_v44 }
 0x655   : > { %10561 = vmatprep.subr.mxu0 %v14918_v53 }
 0x656   : > { %10562 = vmatpush3.msra.mxu0 %v15001_v56  ;;  %10575 = vmatpush3.msra.mxu1 %v7063_v34  ;;  %v7090_v12 = vsub.f32 %v15017_v58, %v7089_v15  ;;  %v7105_v24 = vand.u32 4294901760, %v7104_v1  ;;  %v7505_v34 = vld [vmem:[%s16008_s20 + $0x8] sm:$0xff]  ;;  %v15282_v54 = vsub.f32 %v15266_v8, %v15266_v8 }
 0x657   : > { %10563 = vmatprep.subr.mxu0 %v14918_v53  ;;  %10576 = vmatprep.subr.mxu1 %v14918_v53  ;;  %v15304_v52 = vunpack.c.l.bf16 %v7505_v34 }
 0x658   : > { %10564 = vmatpush3.msra.mxu0 %v14983_v19  ;;  %10577 = vmatpush3.msra.mxu1 %v7070_v3  ;;  %v7091_v47 = vand.u32 4294901760, %v7090_v12 }
 0x659   : > { %10565 = vmatprep.subr.mxu0 %v14918_v53  ;;  %10578 = vmatprep.subr.mxu1 %v14918_v53 }
 0x65a   : > { %10566 = vmatpush3.msra.mxu0 %v14999_v39  ;;  %10579 = vmatpush3.msra.mxu1 %v7077_v22 }
 0x65b   : > { %10567 = vmatprep.subr.mxu0 %v14918_v53  ;;  %10580 = vmatprep.subr.mxu1 %v14918_v53 }
 0x65c   : > { %10581 = vmatpush3.msra.mxu1 %v7084_v20  ;;  %10568 = vmatpush3.msra.mxu0 %v15005_v7 }
 0x65d   : > { %10570 = vmatmul.mubr.f32.vlgmr.msra.gmra.mxu0 %v7031_v48  ;;  %10582 = vmatprep.subr.mxu1 %v14918_v53  ;;  %v7669_v48 = vand.u32 4294901760, %v15282_v54 }
 0x65e   : > { %10593 = vmatprep.subr.mxu0 %v14918_v53  ;;  %10583 = vmatpush3.msra.mxu1 %v7091_v47 }
 0x65f   : > { %10594 = vmatpush3.msra.mxu0 %v14953_v61  ;;  %10584 = vmatprep.subr.mxu1 %v14918_v53  ;;  %v7509_v61 = vld [vmem:[%s16008_s20 + $0x28] sm:$0xff]  ;;  %v7670_v49 = vsub.f32 %v15282_v54, %v7669_v48 }
 0x660   : > { %10595 = vmatprep.subr.mxu0 %v14918_v53  ;;  %10585 = vmatpush3.msra.mxu1 %v7098_v59  ;;  %v15210_v42 = vunpack.c.l.bf16 %v7509_v61  ;;  %v15312_v59 = vunpack.c.h.bf16 %v7505_v34 }
 0x661   : > { %10596 = vmatpush3.msra.mxu0 %v14992_v6  ;;  %10586 = vmatprep.subr.mxu1 %v14918_v53  ;;  %v7671_v29 = vand.u32 4294901760, %v7670_v49 }
 0x662   : > { %10597 = vmatprep.subr.mxu0 %v14918_v53  ;;  %10587 = vmatpush3.msra.mxu1 %v7105_v24 }
 0x663   : > { %10598 = vmatpush3.msra.mxu0 %v14972_v55  ;;  %10588 = vmatprep.subr.mxu1 %v14918_v53 }
 0x664   : > { %10599 = vmatprep.subr.mxu0 %v14918_v53  ;;  %10589 = vmatpush3.msra.mxu1 %v7112_v37  ;;  %v15321_v37 = vsub.f32 %v15304_v52, %v15304_v52 }
 0x665   : > { %10600 = vmatpush3.msra.mxu0 %v14978_v2  ;;  %10591 = vmatmul.mubr.f32.vlgmr.msra.gmra.mxu1 %v14967_v14 }
 0x666   : > { %10601 = vmatprep.subr.mxu0 %v14918_v53  ;;  %10614 = vmatprep.subr.mxu1 %v14918_v53 }
 0x667   : > { %10602 = vmatpush3.msra.mxu0 %v14989_v63  ;;  %10615 = vmatpush3.msra.mxu1 %v14950_v16 }
 0x668   : > { %10603 = vmatprep.subr.mxu0 %v14918_v53  ;;  %10616 = vmatprep.subr.mxu1 %v14918_v53 }
 0x669   : > { %10604 = vmatpush3.msra.mxu0 %v15017_v58  ;;  %10617 = vmatpush3.msra.mxu1 %v14980_v45 }
 0x66a   : > { %10605 = vmatprep.subr.mxu0 %v14918_v53  ;;  %10618 = vmatprep.subr.mxu1 %v14918_v53 }
 0x66b   : > { %10606 = vmatpush3.msra.mxu0 %v15009_v31  ;;  %10619 = vmatpush3.msra.mxu1 %v14961_v43 }
 0x66c   : > { %10607 = vmatprep.subr.mxu0 %v14918_v53  ;;  %10620 = vmatprep.subr.mxu1 %v14918_v53 }
 0x66d   : > { %10608 = vmatpush3.msra.mxu0 %v15029_v46  ;;  %10621 = vmatpush3.msra.mxu1 %v14974_v57 }
 0x66e   : > { %10609 = vmatprep.subr.mxu0 %v14918_v53  ;;  %10622 = vmatprep.subr.mxu1 %v14918_v53 }
 0x66f   : > { %10610 = vmatpush3.msra.mxu0 %v15039_v27  ;;  %10611 = vmatprep.mubr.msk.f32.mxu0 %vm11010_vm1, %v14918_v53 }
 0x670   : > { %10623 = vmatpush3.msra.mxu1 %v14969_v40  ;;  %10612 = vmatmul.mubr.f32.vlgmr.msra.gmra.mxu0 %v14986_v33 }
 0x671   : > { %10624 = vmatprep.subr.mxu1 %v14918_v53  ;;  %10635 = vmatprep.subr.mxu0 %v14918_v53 }
 0x672   : > { %10625 = vmatpush3.msra.mxu1 %v15001_v56  ;;  %10636 = vmatpush3.msra.mxu0 %v7054_v10  ;;  %v15200_v10 = vsub.f32 %v15184_v35, %v15184_v35 }
 0x673   : > { %10626 = vmatprep.subr.mxu1 %v14918_v53  ;;  %10637 = vmatprep.subr.mxu0 %v14918_v53 }
 0x674   : > { %10627 = vmatpush3.msra.mxu1 %v14983_v19  ;;  %10638 = vmatpush3.msra.mxu0 %v7061_v41 }
 0x675   : > { %10628 = vmatprep.subr.mxu1 %v14918_v53  ;;  %10639 = vmatprep.subr.mxu0 %v14918_v53 }
 0x676   : > { %10629 = vmatpush3.msra.mxu1 %v14999_v39  ;;  %10640 = vmatpush3.msra.mxu0 %v7068_v32 }
 0x677   : > { %10630 = vmatprep.subr.mxu1 %v14918_v53  ;;  %10641 = vmatprep.subr.mxu0 %v14918_v53 }
 0x678   : > { %10631 = vmatpush3.msra.mxu1 %v15005_v7  ;;  %10632 = vmatprep.mubr.msk.f32.mxu1 %vm11010_vm1, %v14918_v53 }
 0x679   : > { %10642 = vmatpush3.msra.mxu0 %v7075_v21  ;;  %10633 = vmatmul.mubr.f32.vlgmr.msra.gmra.mxu1 %v7029_v51 }
 0x67a   : > { %10643 = vmatprep.subr.mxu0 %v14918_v53  ;;  %10656 = vmatprep.subr.mxu1 %v14918_v53 }
 0x67b   : > { %10644 = vmatpush3.msra.mxu0 %v7082_v50  ;;  %10657 = vmatpush3.msra.mxu1 %v14950_v16  ;;  %v15191_v16 = vunpack.c.l.bf16 %v7510_v38 }
 0x67c   : > { %10645 = vmatprep.subr.mxu0 %v14918_v53  ;;  %10658 = vmatprep.subr.mxu1 %v14918_v53 }
 0x67d   : > { %10646 = vmatpush3.msra.mxu0 %v7089_v15  ;;  %10659 = vmatpush3.msra.mxu1 %v14980_v45  ;;  %v15208_v62 = vsub.f32 %v15191_v16, %v15191_v16  ;;  %v15233_v45 = vsub.f32 %v15210_v42, %v15210_v42 }
 0x67e   : > { %10647 = vmatprep.subr.mxu0 %v14918_v53  ;;  %10660 = vmatprep.subr.mxu1 %v14918_v53 }
 0x67f   : > { %10648 = vmatpush3.msra.mxu0 %v7096_v18  ;;  %10661 = vmatpush3.msra.mxu1 %v14961_v43  ;;  %v15202_v43 = vunpack.c.h.bf16 %v7509_v61  ;;  %v7639_v2 = vand.u32 4294901760, %v15208_v62  ;;  %v7649_v41 = vand.u32 4294901760, %v15233_v45  ;;  %v15291_v18 = vsub.f32 %v15272_v60, %v15272_v60 }
 0x680   : > { %10649 = vmatprep.subr.mxu0 %v14918_v53  ;;  %10662 = vmatprep.subr.mxu1 %v14918_v53 }
 0x681   : > { %10650 = vmatpush3.msra.mxu0 %v7103_v11  ;;  %10663 = vmatpush3.msra.mxu1 %v14974_v57  ;;  %v15222_v55 = vsub.f32 %v15202_v43, %v15202_v43  ;;  %v15224_v57 = vunpack.c.h.bf16 %v7508_v26  ;;  %v7640_v21 = vsub.f32 %v15208_v62, %v7639_v2  ;;  %v7650_v9 = vsub.f32 %v15233_v45, %v7649_v41  ;;  %v7504_v11 = vld [vmem:[%s16008_s20] sm:$0xff] }
 0x682   : > { %10651 = vmatprep.subr.mxu0 %v14918_v53  ;;  %10664 = vmatprep.subr.mxu1 %v14918_v53  ;;  %v7664_v1 = vand.u32 4294901760, %v15291_v18  ;;  %v15323_v36 = vunpack.c.l.bf16 %v7504_v11 }
 0x683   : > { %10652 = vmatpush3.msra.mxu0 %v7110_v30  ;;  %10653 = vmatprep.mubr.msk.f32.mxu0 %vm11010_vm1, %v14918_v53  ;;  %v7644_v6 = vand.u32 4294901760, %v15222_v55  ;;  %v15247_v32 = vsub.f32 %v15224_v57, %v15224_v57  ;;  %v7641_v58 = vand.u32 4294901760, %v7640_v21  ;;  %v7651_v3 = vand.u32 4294901760, %v7650_v9 }
 0x684   : > { %10665 = vmatpush3.msra.mxu1 %v14969_v40  ;;  %10654 = vmatmul.mubr.f32.vlgmr.msra.gmra.mxu0 %v14967_v14  ;;  %v7634_v40 = vand.u32 4294901760, %v15200_v10  ;;  %v7665_v38 = vsub.f32 %v15291_v18, %v7664_v1 }
 0x685   : > { %10666 = vmatprep.subr.mxu1 %v14918_v53  ;;  %10674 = vmatprep.mubr.msk.f32.mxu1 %vm11010_vm1, %v14918_v53  ;;  %v7645_v31 = vsub.f32 %v15222_v55, %v7644_v6  ;;  %v7654_v51 = vand.u32 4294901760, %v15247_v32 }
 0x686   : > { %10667 = vmatpush3.msra.mxu1 %v15001_v56  ;;  %7595 = vmatprep.mubr.f32.mxu0 %v14918_v53  ;;  %v7635_v63 = vsub.f32 %v15200_v10, %v7634_v40  ;;  %v7506_v56 = vld [vmem:[%s16008_s20 + $0x10] sm:$0xff] }
 0x687   : > { %10668 = vmatprep.subr.mxu1 %v14918_v53  ;;  %7547 = vmatprep.subr.mxu0 %v15175_v5  ;;  %v7646_v46 = vand.u32 4294901760, %v7645_v31  ;;  %v7655_v15 = vsub.f32 %v15247_v32, %v7654_v51  ;;  %v15284_v27 = vunpack.c.l.bf16 %v7506_v56  ;;  %v15293_v22 = vunpack.c.h.bf16 %v7506_v56 }
 0x688   : > { %10669 = vmatpush3.msra.mxu1 %v14983_v19  ;;  %7548 = vmatpush1.msra.mxu0 %v15173_v0  ;;  %v15235_v19 = vunpack.c.l.bf16 %v7508_v26  ;;  %v15332_v26 = vsub.f32 %v15312_v59, %v15312_v59 }
 0x689   : > { %10670 = vmatprep.subr.mxu1 %v14918_v53  ;;  %7549 = vmatprep.subr.mxu0 %v15184_v35  ;;  %v7656_v12 = vand.u32 4294901760, %v7655_v15  ;;  %v15302_v20 = vsub.f32 %v15284_v27, %v15284_v27  ;;  %v15310_v47 = vsub.f32 %v15293_v22, %v15293_v22 }
 0x68a   : > { %10671 = vmatpush3.msra.mxu1 %v14999_v39  ;;  %7550 = vmatpush1.msra.mxu0 %v15191_v16  ;;  %v15256_v39 = vsub.f32 %v15235_v19, %v15235_v19  ;;  %v16522_v56 = vand.u32 4294901760, %v15332_v26 }
 0x68b   : > { %10672 = vmatprep.subr.mxu1 %v14918_v53  ;;  %7551 = vmatprep.subr.mxu0 %v15202_v43  ;;  %v16523_v24 = vand.u32 4294901760, %v15302_v20  ;;  %v7674_v61 = vand.u32 4294901760, %v15310_v47 }
 0x68c   : > { %10673 = vmatpush3.msra.mxu1 %v15005_v7  ;;  %7552 = vmatpush1.msra.mxu0 %v15210_v42  ;;  %v7636_v7 = vand.u32 4294901760, %v7635_v63  ;;  %v7659_v50 = vand.u32 4294901760, %v15256_v39  ;;  %v15343_v63 = vsub.f32 %v15323_v36, %v15323_v36 }
 0x68d   : > { %10675 = vmatmul.mubr.f32.vlgmr.msra.gmra.mxu1 %v14967_v14  ;;  %v7625_v14 = vsub.f32 %v15182_v28, %v7624_v4  ;;  %7553 = vmatprep.subr.mxu0 %v15224_v57  ;;  %v7680_v44 = vsub.f32 %v15302_v20, %v16523_v24  ;;  %v7675_v21 = vsub.f32 %v15310_v47, %v7674_v61  ;;  %v17410_v24 = vld [vmem:[#allocation4_spill] sm:$0xff] }
 0x68e   : > { %7735 = vmatprep.mubr.f32.mxu1 %v14918_v53  ;;  %7554 = vmatpush1.msra.mxu0 %v15235_v19  ;;  %v7660_v25 = vsub.f32 %v15256_v39, %v7659_v50  ;;  %v16519_v9 = vand.u32 4294901760, %v15343_v63 }
 0x68f   : > { %v7626_v33 = vand.u32 4294901760, %v7625_v14  ;;  %7555 = vmatprep.subr.mxu0 %v15272_v60  ;;  %v15334_v14 = vunpack.c.h.bf16 %v7504_v11  ;;  %v7681_v31 = vand.u32 4294901760, %v7680_v44  ;;  %v7676_v34 = vand.u32 4294901760, %v7675_v21 }
 0x690   : > { %7556 = vmatpush1.msra.mxu0 %v15266_v8  ;;  %v7661_v30 = vand.u32 4294901760, %v7660_v25  ;;  %v7700_v25 = vsub.f32 %v15343_v63, %v16519_v9  ;;  %v6947_v9 = vpop.permute.xlu0 %6946 }
 0x691   : > { %7627 = vmatprep.subr.mxu1 %v7626_v33  ;;  %7557 = vmatprep.subr.mxu0 %v15293_v22  ;;  %v16521_v33 = vand.u32 4294901760, %v15321_v37 }
 0x692   : > { %7632 = vmatpush1.msra.mxu1 %v7631_v13  ;;  %7558 = vmatpush1.msra.mxu0 %v15284_v27  ;;  %v7666_v13 = vand.u32 4294901760, %v7665_v38 }
 0x693   : > { %7637 = vmatprep.subr.mxu1 %v7636_v7  ;;  %7559 = vmatprep.subr.mxu0 %v15312_v59  ;;  %v15352_v7 = vsub.f32 %v15334_v14, %v15334_v14 }
 0x694   : > { %7642 = vmatpush1.msra.mxu1 %v7641_v58  ;;  %7560 = vmatpush1.msra.mxu0 %v15304_v52  ;;  %v7690_v58 = vsub.f32 %v15321_v37, %v16521_v33 }
 0x695   : > { %7647 = vmatprep.subr.mxu1 %v7646_v46  ;;  %7561 = vmatprep.subr.mxu0 %v15334_v14  ;;  %v7685_v46 = vsub.f32 %v15332_v26, %v16522_v56  ;;  %v16520_v15 = vand.u32 4294901760, %v15352_v7 }
 0x696   : > { %7652 = vmatpush1.msra.mxu1 %v7651_v3  ;;  %7562 = vmatpush1.msra.mxu0 %v15323_v36  ;;  %v7691_v3 = vand.u32 4294901760, %v7690_v58 }
 0x697   : > { %7657 = vmatprep.subr.mxu1 %v7656_v12  ;;  %7760 = vmatprep.subr.mxu0 %v15182_v28  ;;  %v7686_v11 = vand.u32 4294901760, %v7685_v46  ;;  %v7695_v12 = vsub.f32 %v15352_v7, %v16520_v15  ;;  %v17413_v28 = vand.u32 4294901760, %v15321_v37 }
 0x698   : > { %7662 = vmatpush1.msra.mxu1 %v7661_v30  ;;  %v7701_v30 = vand.u32 4294901760, %v7700_v25 }
 0x699   : > { %7667 = vmatprep.subr.mxu1 %v7666_v13  ;;  %v7696_v49 = vand.u32 4294901760, %v7695_v12 }
 0x69a   : > { %7672 = vmatpush1.msra.mxu1 %v7671_v29 }
 0x69b   : > { %7677 = vmatprep.subr.mxu1 %v7676_v34 }
 0x69c   : > { %7682 = vmatpush1.msra.mxu1 %v7681_v31 }
 0x69d   : > { %7687 = vmatprep.subr.mxu1 %v7686_v11 }
 0x69e   : > { %7692 = vmatpush1.msra.mxu1 %v7691_v3 }
 0x69f   : > { %7697 = vmatprep.subr.mxu1 %v7696_v49 }
 0x6a0   : > { %7702 = vmatpush1.msra.mxu1 %v7701_v30 }
 0x6a1   : > { %7848 = vmatprep.subr.mxu1 %v15175_v5 }
 0x71d   : > { %v7033_v38 = vpop.f32.mrf.mxu0 }
 0x71e   : > { %v7034_v15 = vadd.f32 %v7033_v38, %v6947_v9 }
 0x71f   : > { %v10571_v29 = vpop.f32.mrf.mxu0 }
 0x725   : > { %v7149_v44 = vpop.f32.mrf.mxu1 }
 0x726   : > { %v7150_v25 = vadd.f32 %v7149_v44, %v7034_v15 }
 0x727   : > { %v10592_v13 = vpop.f32.mrf.mxu1 }
 0x730   : > { %v7239_v21 = vpop.f32.mrf.mxu0 }
 0x731   : > { %v7240_v12 = vadd.f32 %v7239_v21, %v7150_v25 }
 0x732   : > { %v10613_v58 = vpop.f32.mrf.mxu0 }
 0x739   : > { %v7321_v34 = vpop.f32.mrf.mxu1 }
 0x73a   : > { %v7322_v3 = vadd.f32 %v7321_v34, %v7240_v12 }
 0x73b   : > { %v10634_v46 = vpop.f32.mrf.mxu1 }
 0x744   : > { %v7419_v31 = vpop.f32.mrf.mxu0 }
 0x745   : > { %v7420_v49 = vadd.f32 %v7419_v31, %v7322_v3 }
 0x746   : > { %v10655_v11 = vpop.f32.mrf.mxu0 }
 0x74d   : > { %v7499_v30 = vpop.f32.mrf.mxu1 }
 0x74e   : > { %v7500_v33 = vadd.f32 %v7499_v30, %v7420_v49 }
 0x74f   : > { %v10676_v56 = vpop.f32.mrf.mxu1 }
 0x750   : > { %v7503_v29 = vadd.f32 %v7500_v33, %v17410_v24 }
 0x752   : > { %v7529_v13 = vsel %vm3643_vm6, %v7503_v29, 0  ;;  %9718 = vst.msk [vmem:[%s11185_s1 + $0x28] sm:$0xff] %vm3643_vm6, %v7503_v29 }
 0x753   : > { %v15376_v58 = vand.u32 4294901760, %v7529_v13 }
 0x755   : > { %v7597_v46 = vsub.f32 %v7529_v13, %v15376_v58  ;;  %7737 = vmatmul.mubr.f32.vlgmr.msra.gmra.mxu1 %v15376_v58 }
 0x756   : > { %7849 = vmatpush1.msra.mxu1 %v15173_v0  ;;  %7896 = vmatprep.mubr.f32.mxu1 %v14918_v53 }
 0x757   : > { %7850 = vmatprep.subr.mxu1 %v15184_v35  ;;  %v7598_v9 = vand.u32 4294901760, %v7597_v46 }
 0x758   : > { %7851 = vmatpush1.msra.mxu1 %v15191_v16 }
 0x759   : > { %7852 = vmatprep.subr.mxu1 %v15202_v43  ;;  %v7599_v24 = vsub.f32 %v7597_v46, %v7598_v9 }
 0x75a   : > { %7853 = vmatpush1.msra.mxu1 %v15210_v42 }
 0x75b   : > { %7854 = vmatprep.subr.mxu1 %v15224_v57  ;;  %v7600_v33 = vand.u32 4294901760, %v7599_v24 }
 0x75c   : > { %7855 = vmatpush1.msra.mxu1 %v15235_v19 }
 0x75d   : > { %7856 = vmatprep.subr.mxu1 %v15272_v60  ;;  %7601 = vmatmul.mubr.f32.vlgmr.msra.gmra.mxu0 %v7600_v33 }
 0x75e   : > { %7762 = vmatpush1.msra.mxu0 %v15189_v23  ;;  %7857 = vmatpush1.msra.mxu1 %v15266_v8  ;;  %v17415_v23 = vand.u32 4294901760, %v15343_v63 }
 0x75f   : > { %7764 = vmatprep.subr.mxu0 %v15200_v10  ;;  %7858 = vmatprep.subr.mxu1 %v15293_v22 }
 0x760   : > { %7766 = vmatpush1.msra.mxu0 %v15208_v62  ;;  %7859 = vmatpush1.msra.mxu1 %v15284_v27 }
 0x761   : > { %7768 = vmatprep.subr.mxu0 %v15222_v55  ;;  %7860 = vmatprep.subr.mxu1 %v15312_v59 }
 0x762   : > { %7770 = vmatpush1.msra.mxu0 %v15233_v45  ;;  %7861 = vmatpush1.msra.mxu1 %v15304_v52 }
 0x763   : > { %7772 = vmatprep.subr.mxu0 %v15247_v32  ;;  %7862 = vmatprep.subr.mxu1 %v15334_v14 }
 0x764   : > { %7774 = vmatpush1.msra.mxu0 %v15256_v39  ;;  %7863 = vmatpush1.msra.mxu1 %v15323_v36 }
 0x765   : > { %7776 = vmatprep.subr.mxu0 %v15291_v18  ;;  %7900 = vmatmul.mubr.f32.vlgmr.msra.gmra.mxu1 %v7598_v9 }
 0x766   : > { %8026 = vmatprep.subr.mxu1 %v15175_v5  ;;  %7778 = vmatpush1.msra.mxu0 %v15282_v54  ;;  %v17412_v5 = vand.u32 4294901760, %v15332_v26 }
 0x767   : > { %8027 = vmatpush1.msra.mxu1 %v15173_v0  ;;  %7780 = vmatprep.subr.mxu0 %v15310_v47  ;;  %v17411_v0 = vand.u32 4294901760, %v15302_v20 }
 0x768   : > { %8028 = vmatprep.subr.mxu1 %v15184_v35  ;;  %7782 = vmatpush1.msra.mxu0 %v15302_v20  ;;  %v17414_v35 = vand.u32 4294901760, %v15352_v7  ;;  %v8105_v20 = vld [vmem:[%s16007_s19] sm:$0xff] }
 0x769   : > { %8029 = vmatpush1.msra.mxu1 %v15191_v16  ;;  %7784 = vmatprep.subr.mxu0 %v15332_v26 }
 0x76a   : > { %8030 = vmatprep.subr.mxu1 %v15202_v43  ;;  %7786 = vmatpush1.msra.mxu0 %v15321_v37 }
 0x76b   : > { %8031 = vmatpush1.msra.mxu1 %v15210_v42  ;;  %7788 = vmatprep.subr.mxu0 %v15352_v7 }
 0x76c   : > { %8032 = vmatprep.subr.mxu1 %v15224_v57  ;;  %7790 = vmatpush1.msra.mxu0 %v15343_v63 }
 0x76d   : > { %7823 = vmatprep.mubr.f32.mxu0 %v14918_v53  ;;  %8033 = vmatpush1.msra.mxu1 %v15235_v19 }
 0x76e   : > { %7826 = vmatmul.mubr.f32.vlgmr.msra.gmra.mxu0 %v7597_v46  ;;  %7924 = vmatprep.subr.mxu0 %v7624_v4 }
 0x76f   : > { %8034 = vmatprep.subr.mxu1 %v15272_v60  ;;  %7927 = vmatpush1.msra.mxu0 %v7629_v17 }
 0x770   : > { %8035 = vmatpush1.msra.mxu1 %v15266_v8  ;;  %7930 = vmatprep.subr.mxu0 %v7634_v40 }
 0x771   : > { %8036 = vmatprep.subr.mxu1 %v15293_v22  ;;  %7933 = vmatpush1.msra.mxu0 %v7639_v2  ;;  %v15485_v22 = vld [vmem:[%s11185_s1 + $0x30] sm:$0xff] }
 0x772   : > { %8037 = vmatpush1.msra.mxu1 %v15284_v27  ;;  %7936 = vmatprep.subr.mxu0 %v7644_v6 }
 0x773   : > { %8038 = vmatprep.subr.mxu1 %v15312_v59  ;;  %7939 = vmatpush1.msra.mxu0 %v7649_v41 }
 0x774   : > { %8039 = vmatpush1.msra.mxu1 %v15304_v52  ;;  %7942 = vmatprep.subr.mxu0 %v7654_v51 }
 0x775   : > { %8040 = vmatprep.subr.mxu1 %v15334_v14  ;;  %7945 = vmatpush1.msra.mxu0 %v7659_v50 }
 0x776   : > { %8041 = vmatpush1.msra.mxu1 %v15323_v36  ;;  %8074 = vmatprep.mubr.f32.mxu1 %v14918_v53 }
 0x777   : > { %7948 = vmatprep.subr.mxu0 %v7664_v1  ;;  %8076 = vmatmul.mubr.f32.vlgmr.msra.gmra.mxu1 %v15376_v58  ;;  %v8104_v1 = vld [vmem:[%s16006_s18] sm:$0xff] }
 0x778   : > { %7951 = vmatpush1.msra.mxu0 %v7669_v48  ;;  %8002 = vmatprep.mubr.f32.mxu0 %v14918_v53  ;;  %v8112_v47 = vsel %vm6949_vm7, %v8104_v1, 0 }
 0x779   : > { %7954 = vmatprep.subr.mxu0 %v7674_v61  ;;  %10698 = vmatprep.subr.mxu1 %v14918_v53  ;;  %v15504_v59 = vand.u32 4294901760, %v8112_v47 }
 0x77a   : > { %7957 = vmatpush1.msra.mxu0 %v17411_v0  ;;  %10716 = vmatprep.mubr.msk.f32.mxu1 %vm11010_vm1, %v14918_v53 }
 0x77b   : > { %7960 = vmatprep.subr.mxu0 %v17412_v5  ;;  %v15511_v14 = vsub.f32 %v8112_v47, %v15504_v59 }
 0x77c   : > { %7963 = vmatpush1.msra.mxu0 %v17413_v28 }
 0x77d   : > { %7966 = vmatprep.subr.mxu0 %v17414_v35  ;;  %v8190_v31 = vand.u32 4294901760, %v15511_v14 }
 0x77e   : > { %7969 = vmatpush1.msra.mxu0 %v17415_v23 }
 0x77f   : > { %8004 = vmatmul.mubr.f32.vlgmr.msra.gmra.mxu0 %v15376_v58  ;;  %10677 = vmatprep.subr.mxu0 %v14918_v53  ;;  %v8191_v28 = vsub.f32 %v15511_v14, %v8190_v31 }
 0x780   : > { %10695 = vmatprep.mubr.msk.f32.mxu0 %vm11010_vm1, %v14918_v53 }
 0x815   : > { %v7738_v4 = vpop.f32.mrf.mxu1 }
 0x817   : > { %v7740_v17 = vpop.f32.mrf.mxu1 }
 0x81d   : > { %v7602_v16 = vpop.f32.mrf.mxu0 }
 0x81e   : > { %v7739_v62 = vadd.f32 %v7738_v4, %v7602_v16 }
 0x81f   : > { %v7604_v10 = vpop.f32.mrf.mxu0 }
 0x820   : > { %v7741_v55 = vadd.f32 %v7740_v17, %v7604_v10 }
 0x825   : > { %v7901_v42 = vpop.f32.mrf.mxu1 }
 0x827   : > { %v7903_v45 = vpop.f32.mrf.mxu1 }
 0x82e   : > { %v7827_v43 = vpop.f32.mrf.mxu0 }
 0x82f   : > { %v7828_v57 = vadd.f32 %v7827_v43, %v7739_v62 }
 0x830   : > { %v7829_v40 = vpop.f32.mrf.mxu0 }
 0x831   : > { %v7830_v2 = vadd.f32 %v7829_v40, %v7741_v55  ;;  %v7902_v19 = vadd.f32 %v7901_v42, %v7828_v57  ;;  %v8192_v55 = vand.u32 4294901760, %v8191_v28 }
 0x833   : > { %v7904_v39 = vadd.f32 %v7903_v45, %v7830_v2 }
 0x837   : > { %v8077_v6 = vpop.f32.mrf.mxu1 }
 0x839   : > { %v8079_v50 = vpop.f32.mrf.mxu1 }
 0x83f   : > { %v8005_v32 = vpop.f32.mrf.mxu0 }
 0x840   : > { %v8006_v41 = vadd.f32 %v8005_v32, %v7902_v19 }
 0x841   : > { %v8007_v51 = vpop.f32.mrf.mxu0 }
 0x842   : > { %v15470_v53 = vadd.f32 %v8077_v6, %v8006_v41  ;;  %v8008_v8 = vadd.f32 %v8007_v51, %v7904_v39 }
 0x844   : > { %v8080_v60 = vadd.f32 %v8079_v50, %v8008_v8  ;;  %8098 = vrot.lane.b32.xlu0 %v15470_v53, %s11013_s6  ;;  %8101 = vrot.lane.b32.xlu1 %v15470_v53, %s11014_s2  ;;  %v15545_v29 = vand.u32 4294901760, %v15470_v53  ;;  %v9840_v8 = vld [vmem:[%s16011_s23] sm:$0xff]   ;;  %s11020_s6 = smov 108   ;;  %s11021_s2 = smov 104  }
 0x845   : > { %v9842_v50 = vunpack.c.h.bf16 %v9840_v8 }
 0x846   : > { %v15474_v54 = vand.u32 4294901760, %v8080_v60  ;;  %v15574_v4 = vsub.f32 %v15470_v53, %v15545_v29 }
 0x848   : > { %v15477_v27 = vsub.f32 %v8080_v60, %v15474_v54  ;;  %8092 = vrot.lane.b32.xlu0 %v15470_v53, %s11012_s7  ;;  %8095 = vrot.lane.b32.xlu1 %v15470_v53, %s11015_s29  ;;  %v8271_v45 = vand.u32 4294901760, %v15574_v4  ;;  %v15713_v60 = vsub.f32 %v9842_v50, %v9842_v50  ;;  %s11022_s29 = smov 116   ;;  %s11024_s7 = smov 120  }
 0x849   : > { %10678 = vmatpush3.msra.mxu0 %v15474_v54 }
 0x84a   : > { %v8215_v18 = vand.u32 4294901760, %v15477_v27  ;;  %10679 = vmatprep.subr.mxu0 %v15485_v22  ;;  %v8272_v39 = vsub.f32 %v15574_v4, %v8271_v45 }
 0x84c   : > { %8086 = vrot.lane.b32.xlu0 %v15470_v53, %s11016_s0  ;;  %8089 = vrot.lane.b32.xlu1 %v15470_v53, %s11017_s30  ;;  %v8216_v48 = vsub.f32 %v15477_v27, %v8215_v18  ;;  %s11023_s30 = smov 124  }
 0x84e   : > { %v8217_v52 = vand.u32 4294901760, %v8216_v48 }
 0x850   : > { %8108 = vperm.xlu0 %10995, %v8105_v20   ;;  %8083 = vrot.lane.b32.xlu1 %v15470_v53, %s11018_s26  ;;  %v8273_v53 = vand.u32 4294901760, %v8272_v39 }
 0x851   : > { %10699 = vmatpush3.msra.mxu1 %v8217_v52 }
 0x852   : > { %10700 = vmatprep.subr.mxu1 %v15485_v22 }
 0x8b6   : > { %v8099_v37 = vpop.permute.xlu0 %8098  ;;  %v8102_v36 = vpop.permute.xlu1 %8101 }
 0x8b7   : > { %v15506_v61 = vand.u32 4294901760, %v8099_v37  ;;  %v15508_v26 = vand.u32 4294901760, %v8102_v36 }
 0x8b9   : > { %v15514_v63 = vsub.f32 %v8099_v37, %v15506_v61  ;;  %v15517_v56 = vsub.f32 %v8102_v36, %v15508_v26  ;;  %10680 = vmatpush3.msra.mxu0 %v15508_v26 }
 0x8ba   : > { %v8093_v7 = vpop.permute.xlu0 %8092  ;;  %v8096_v15 = vpop.permute.xlu1 %8095  ;;  %10681 = vmatprep.subr.mxu0 %v15485_v22 }
 0x8bb   : > { %v8229_v38 = vand.u32 4294901760, %v15514_v63  ;;  %v8222_v44 = vand.u32 4294901760, %v15517_v56  ;;  %v15523_v21 = vand.u32 4294901760, %v8093_v7  ;;  %v15525_v34 = vand.u32 4294901760, %v8096_v15  ;;  %10682 = vmatpush3.msra.mxu0 %v15506_v61 }
 0x8bc   : > { %10683 = vmatprep.subr.mxu0 %v15485_v22 }
 0x8bd   : > { %v8230_v25 = vsub.f32 %v15514_v63, %v8229_v38  ;;  %v8223_v11 = vsub.f32 %v15517_v56, %v8222_v44  ;;  %v15537_v12 = vsub.f32 %v8093_v7, %v15523_v21  ;;  %v15540_v3 = vsub.f32 %v8096_v15, %v15525_v34  ;;  %10684 = vmatpush3.msra.mxu0 %v15525_v34 }
 0x8be   : > { %v8087_v49 = vpop.permute.xlu0 %8086  ;;  %v8090_v30 = vpop.permute.xlu1 %8089  ;;  %10685 = vmatprep.subr.mxu0 %v15485_v22 }
 0x8bf   : > { %v8224_v13 = vand.u32 4294901760, %v8223_v11  ;;  %v8243_v58 = vand.u32 4294901760, %v15537_v12  ;;  %v8236_v46 = vand.u32 4294901760, %v15540_v3  ;;  %10686 = vmatpush3.msra.mxu0 %v15523_v21  ;;  %v15550_v9 = vand.u32 4294901760, %v8087_v49 }
 0x8c0   : > { %v15552_v24 = vand.u32 4294901760, %v8090_v30  ;;  %10687 = vmatprep.subr.mxu0 %v15485_v22  ;;  %v8231_v33 = vand.u32 4294901760, %v8230_v25 }
 0x8c1   : > { %v8244_v0 = vsub.f32 %v15537_v12, %v8243_v58  ;;  %v8237_v5 = vsub.f32 %v15540_v3, %v8236_v46  ;;  %10701 = vmatpush3.msra.mxu1 %v8224_v13  ;;  %v15565_v35 = vsub.f32 %v8087_v49, %v15550_v9  ;;  %v17416_v49 = vld [vmem:[#allocation3_spill] sm:$0xff] }
 0x8c2   : > { %v15568_v23 = vsub.f32 %v8090_v30, %v15552_v24  ;;  %10688 = vmatpush3.msra.mxu0 %v15552_v24  ;;  %v8084_v16 = vpop.permute.xlu1 %8083  ;;  %10702 = vmatprep.subr.mxu1 %v15485_v22 }
 0x8c3   : > { %v8238_v10 = vand.u32 4294901760, %v8237_v5  ;;  %v15576_v43 = vand.u32 4294901760, %v8084_v16  ;;  %10689 = vmatprep.subr.mxu0 %v15485_v22  ;;  %10703 = vmatpush3.msra.mxu1 %v8231_v33  ;;  %v8257_v17 = vand.u32 4294901760, %v15565_v35  ;;  %v8245_v42 = vand.u32 4294901760, %v8244_v0 }
 0x8c4   : > { %v8250_v62 = vand.u32 4294901760, %v15568_v23  ;;  %10690 = vmatpush3.msra.mxu0 %v15550_v9  ;;  %10704 = vmatprep.subr.mxu1 %v15485_v22 }
 0x8c5   : > { %v15584_v40 = vsub.f32 %v8084_v16, %v15576_v43  ;;  %10691 = vmatprep.subr.mxu0 %v15485_v22  ;;  %10705 = vmatpush3.msra.mxu1 %v8238_v10  ;;  %v8258_v57 = vsub.f32 %v15565_v35, %v8257_v17 }
 0x8c6   : > { %v8251_v2 = vsub.f32 %v15568_v23, %v8250_v62  ;;  %10692 = vmatpush3.msra.mxu0 %v15576_v43  ;;  %10706 = vmatprep.subr.mxu1 %v15485_v22 }
 0x8c7   : > { %v8264_v19 = vand.u32 4294901760, %v15584_v40  ;;  %10693 = vmatprep.subr.mxu0 %v15485_v22  ;;  %10707 = vmatpush3.msra.mxu1 %v8245_v42  ;;  %v8259_v41 = vand.u32 4294901760, %v8258_v57 }
 0x8c8   : > { %v8252_v6 = vand.u32 4294901760, %v8251_v2  ;;  %10694 = vmatpush3.msra.mxu0 %v15545_v29  ;;  %10708 = vmatprep.subr.mxu1 %v15485_v22 }
 0x8c9   : > { %v8265_v32 = vsub.f32 %v15584_v40, %v8264_v19  ;;  %10696 = vmatmul.mubr.f32.vlgmr.msra.gmra.mxu0 %v8192_v55  ;;  %10719 = vmatprep.subr.mxu0 %v15485_v22 }
 0x8ca   : > { %10709 = vmatpush3.msra.mxu1 %v8252_v6  ;;  %10720 = vmatpush3.msra.mxu0 %v15477_v27  ;;  %v8777_v27 = vand.u32 4294901760, %v15713_v60 }
 0x8cb   : > { %v8266_v51 = vand.u32 4294901760, %v8265_v32  ;;  %10710 = vmatprep.subr.mxu1 %v15485_v22  ;;  %10721 = vmatprep.subr.mxu0 %v15485_v22  ;;  %v8109_v7 = vpop.permute.xlu0 %8108 }
 0x8cc   : > { %10711 = vmatpush3.msra.mxu1 %v8259_v41  ;;  %10722 = vmatpush3.msra.mxu0 %v15517_v56  ;;  %v8778_v48 = vsub.f32 %v15713_v60, %v8777_v27 }
 0x8cd   : > { %10712 = vmatprep.subr.mxu1 %v15485_v22  ;;  %10723 = vmatprep.subr.mxu0 %v15485_v22 }
 0x8ce   : > { %10713 = vmatpush3.msra.mxu1 %v8266_v51  ;;  %10724 = vmatpush3.msra.mxu0 %v15514_v63  ;;  %v8779_v52 = vand.u32 4294901760, %v8778_v48 }
 0x8cf   : > { %10714 = vmatprep.subr.mxu1 %v15485_v22  ;;  %10725 = vmatprep.subr.mxu0 %v15485_v22 }
 0x8d0   : > { %10715 = vmatpush3.msra.mxu1 %v8273_v53  ;;  %10726 = vmatpush3.msra.mxu0 %v15540_v3 }
 0x8d1   : > { %10717 = vmatmul.mubr.f32.vlgmr.msra.gmra.mxu1 %v15504_v59  ;;  %10727 = vmatprep.subr.mxu0 %v15485_v22 }
 0x8d2   : > { %10740 = vmatprep.subr.mxu1 %v15485_v22  ;;  %10728 = vmatpush3.msra.mxu0 %v15537_v12 }
 0x8d3   : > { %10741 = vmatpush3.msra.mxu1 %v15474_v54  ;;  %10729 = vmatprep.subr.mxu0 %v15485_v22 }
 0x8d4   : > { %10742 = vmatprep.subr.mxu1 %v15485_v22  ;;  %10730 = vmatpush3.msra.mxu0 %v15568_v23 }
 0x8d5   : > { %10743 = vmatpush3.msra.mxu1 %v15508_v26  ;;  %10731 = vmatprep.subr.mxu0 %v15485_v22 }
 0x8d6   : > { %10744 = vmatprep.subr.mxu1 %v15485_v22  ;;  %10732 = vmatpush3.msra.mxu0 %v15565_v35 }
 0x8d7   : > { %10745 = vmatpush3.msra.mxu1 %v15506_v61  ;;  %10733 = vmatprep.subr.mxu0 %v15485_v22 }
 0x8d8   : > { %10746 = vmatprep.subr.mxu1 %v15485_v22  ;;  %10734 = vmatpush3.msra.mxu0 %v15584_v40 }
 0x8d9   : > { %10747 = vmatpush3.msra.mxu1 %v15525_v34  ;;  %10735 = vmatprep.subr.mxu0 %v15485_v22 }
 0x8da   : > { %10748 = vmatprep.subr.mxu1 %v15485_v22  ;;  %10736 = vmatpush3.msra.mxu0 %v15574_v4 }
 0x8db   : > { %10737 = vmatprep.mubr.msk.f32.mxu0 %vm11010_vm1, %v15485_v22  ;;  %10749 = vmatpush3.msra.mxu1 %v15523_v21 }
 0x8dc   : > { %10738 = vmatmul.mubr.f32.vlgmr.msra.gmra.mxu0 %v15511_v14  ;;  %10750 = vmatprep.subr.mxu1 %v15485_v22 }
 0x8dd   : > { %10761 = vmatprep.subr.mxu0 %v15485_v22  ;;  %10751 = vmatpush3.msra.mxu1 %v15552_v24 }
 0x8de   : > { %10762 = vmatpush3.msra.mxu0 %v8215_v18  ;;  %10752 = vmatprep.subr.mxu1 %v15485_v22 }
 0x8df   : > { %10763 = vmatprep.subr.mxu0 %v15485_v22  ;;  %10753 = vmatpush3.msra.mxu1 %v15550_v9 }
 0x8e0   : > { %10764 = vmatpush3.msra.mxu0 %v8222_v44  ;;  %10754 = vmatprep.subr.mxu1 %v15485_v22 }
 0x8e1   : > { %10765 = vmatprep.subr.mxu0 %v15485_v22  ;;  %10755 = vmatpush3.msra.mxu1 %v15576_v43 }
 0x8e2   : > { %10766 = vmatpush3.msra.mxu0 %v8229_v38  ;;  %10756 = vmatprep.subr.mxu1 %v15485_v22 }
 0x8e3   : > { %10767 = vmatprep.subr.mxu0 %v15485_v22  ;;  %10757 = vmatpush3.msra.mxu1 %v15545_v29 }
 0x8e4   : > { %10758 = vmatprep.mubr.msk.f32.mxu1 %vm11010_vm1, %v15485_v22  ;;  %10768 = vmatpush3.msra.mxu0 %v8236_v46 }
 0x8e5   : > { %10759 = vmatmul.mubr.f32.vlgmr.msra.gmra.mxu1 %v8190_v31  ;;  %10769 = vmatprep.subr.mxu0 %v15485_v22 }
 0x8e6   : > { %10782 = vmatprep.subr.mxu1 %v15485_v22  ;;  %10770 = vmatpush3.msra.mxu0 %v8243_v58 }
 0x8e7   : > { %10783 = vmatpush3.msra.mxu1 %v15474_v54  ;;  %10771 = vmatprep.subr.mxu0 %v15485_v22  ;;  %v9841_v54 = vunpack.c.l.bf16 %v9840_v8 }
 0x8e8   : > { %10784 = vmatprep.subr.mxu1 %v15485_v22  ;;  %10772 = vmatpush3.msra.mxu0 %v8250_v62 }
 0x8e9   : > { %10785 = vmatpush3.msra.mxu1 %v15508_v26  ;;  %10773 = vmatprep.subr.mxu0 %v15485_v22  ;;  %v15717_v18 = vsub.f32 %v9841_v54, %v9841_v54 }
 0x8ea   : > { %10786 = vmatprep.subr.mxu1 %v15485_v22  ;;  %10774 = vmatpush3.msra.mxu0 %v8257_v17 }
 0x8eb   : > { %10787 = vmatpush3.msra.mxu1 %v15506_v61  ;;  %10775 = vmatprep.subr.mxu0 %v15485_v22  ;;  %v8783_v20 = vand.u32 4294901760, %v15717_v18 }
 0x8ec   : > { %10788 = vmatprep.subr.mxu1 %v15485_v22  ;;  %10776 = vmatpush3.msra.mxu0 %v8264_v19  ;;  %v9144_v19 = vld [vmem:[%s16009_s21] sm:$0xff] }
 0x8ed   : > { %10789 = vmatpush3.msra.mxu1 %v15525_v34  ;;  %10777 = vmatprep.subr.mxu0 %v15485_v22  ;;  %v8784_v1 = vsub.f32 %v15717_v18, %v8783_v20  ;;  %v9152_v6 = vsel %vm6949_vm7, %v9144_v19, 0 }
 0x8ee   : > { %10790 = vmatprep.subr.mxu1 %v15485_v22  ;;  %10778 = vmatpush3.msra.mxu0 %v8271_v45  ;;  %v9145_v45 = vld [vmem:[%s16010_s22] sm:$0xff]  ;;  %v15770_v39 = vand.u32 4294901760, %v9152_v6 }
 0x8ef   : > { %10779 = vmatprep.mubr.msk.f32.mxu0 %vm11010_vm1, %v15485_v22  ;;  %10791 = vmatpush3.msra.mxu1 %v15523_v21  ;;  %v8785_v47 = vand.u32 4294901760, %v8784_v1 }
 0x8f0   : > { %10780 = vmatmul.mubr.f32.vlgmr.msra.gmra.mxu0 %v15504_v59  ;;  %10792 = vmatprep.subr.mxu1 %v15485_v22 }
 0x8f1   : > { %10793 = vmatpush3.msra.mxu1 %v15552_v24  ;;  %10800 = vmatprep.mubr.msk.f32.mxu1 %vm11010_vm1, %v15485_v22 }
 0x8f2   : > { %10794 = vmatprep.subr.mxu1 %v15485_v22  ;;  %10803 = vmatprep.subr.mxu0 %v15485_v22 }
 0x8f3   : > { %10795 = vmatpush3.msra.mxu1 %v15550_v9  ;;  %10807 = vmatprep.mubr.msk.f32.mxu0 %vm11010_vm1, %v15485_v22 }
 0x8f4   : > { %10796 = vmatprep.subr.mxu1 %v15485_v22  ;;  %10804 = vmatpush3.msra.mxu0 %v9842_v50 }
 0x8f5   : > { %10797 = vmatpush3.msra.mxu1 %v15576_v43  ;;  %10805 = vmatprep.subr.mxu0 %v15485_v22 }
 0x8f6   : > { %10798 = vmatprep.subr.mxu1 %v15485_v22  ;;  %10806 = vmatpush3.msra.mxu0 %v9841_v54 }
 0x8f7   : > { %10799 = vmatpush3.msra.mxu1 %v15545_v29  ;;  %10817 = vmatprep.subr.mxu0 %v15485_v22 }
 0x8f8   : > { %10801 = vmatmul.mubr.f32.vlgmr.msra.gmra.mxu1 %v15504_v59  ;;  %10810 = vmatprep.subr.mxu1 %v15485_v22 }
 0x8f9   : > { %10814 = vmatprep.mubr.msk.f32.mxu1 %vm11010_vm1, %v15485_v22  ;;  %10811 = vmatpush3.msra.mxu1 %v8779_v52 }
 0x8fa   : > { %10812 = vmatprep.subr.mxu1 %v15485_v22 }
 0x8fb   : > { %10813 = vmatpush3.msra.mxu1 %v8785_v47 }
 0x8fc   : > { %10824 = vmatprep.subr.mxu1 %v15485_v22 }
 0x989   : > { %v8194_v59 = vpop.f32.mrf.mxu0 }
 0x98a   : > { %v8195_v15 = vadd.f32 %v8194_v59, %v8109_v7 }
 0x98b   : > { %v10697_v37 = vpop.f32.mrf.mxu0 }
 0x991   : > { %v8310_v36 = vpop.f32.mrf.mxu1 }
 0x992   : > { %v8311_v44 = vadd.f32 %v8310_v36, %v8195_v15 }
 0x993   : > { %v10718_v61 = vpop.f32.mrf.mxu1 }
 0x99c   : > { %v8400_v26 = vpop.f32.mrf.mxu0 }
 0x99d   : > { %v8401_v34 = vadd.f32 %v8400_v26, %v8311_v44 }
 0x99e   : > { %v10739_v14 = vpop.f32.mrf.mxu0 }
 0x9a5   : > { %v8482_v63 = vpop.f32.mrf.mxu1 }
 0x9a6   : > { %v8483_v31 = vadd.f32 %v8482_v63, %v8401_v34 }
 0x9a7   : > { %v10760_v56 = vpop.f32.mrf.mxu1 }
 0x9b0   : > { %v8580_v38 = vpop.f32.mrf.mxu0 }
 0x9b1   : > { %v8581_v25 = vadd.f32 %v8580_v38, %v8483_v31 }
 0x9b2   : > { %v10781_v21 = vpop.f32.mrf.mxu0 }
 0x9b8   : > { %v8660_v11 = vpop.f32.mrf.mxu1 }
 0x9b9   : > { %v8661_v12 = vadd.f32 %v8660_v11, %v8581_v25 }
 0x9ba   : > { %v10802_v3 = vpop.f32.mrf.mxu1 }
 0x9bb   : > { %v8664_v30 = vadd.f32 %v8661_v12, %v17416_v49 }
 0x9bd   : > { %v8670_v29 = vsel %vm1304_vm2, %v8664_v30, 0  ;;  %9719 = vst.msk [vmem:[%s11185_s1 + $0x30] sm:$0xff] %vm1304_vm2, %v8664_v30 }
 0x9be   : > { %v8737_v13 = vand.u32 4294901760, %v8670_v29 }
 0x9c0   : > { %v8738_v58 = vsub.f32 %v8670_v29, %v8737_v13  ;;  %10815 = vmatmul.mubr.f32.vlgmr.msra.gmra.mxu1 %v8737_v13 }
 0x9c1   : > { %10825 = vmatpush3.msra.mxu1 %v9842_v50  ;;  %10828 = vmatprep.mubr.msk.f32.mxu1 %vm11010_vm1, %v15485_v22 }
 0x9c2   : > { %10826 = vmatprep.subr.mxu1 %v15485_v22  ;;  %v8739_v46 = vand.u32 4294901760, %v8738_v58 }
 0x9c3   : > { %10827 = vmatpush3.msra.mxu1 %v9841_v54 }
 0x9c4   : > { %10829 = vmatmul.mubr.f32.vlgmr.msra.gmra.mxu1 %v8739_v46  ;;  %10838 = vmatprep.subr.mxu1 %v15485_v22  ;;  %v8740_v9 = vsub.f32 %v8738_v58, %v8739_v46 }
 0x9c5   : > { %10839 = vmatpush3.msra.mxu1 %v9842_v50  ;;  %10842 = vmatprep.mubr.msk.f32.mxu1 %vm11010_vm1, %v15485_v22 }
 0x9c6   : > { %10840 = vmatprep.subr.mxu1 %v15485_v22  ;;  %v8741_v24 = vand.u32 4294901760, %v8740_v9 }
 0x9c7   : > { %10841 = vmatpush3.msra.mxu1 %v9841_v54 }
 0x9c8   : > { %10808 = vmatmul.mubr.f32.vlgmr.msra.gmra.mxu0 %v8741_v24  ;;  %10843 = vmatmul.mubr.f32.vlgmr.msra.gmra.mxu1 %v8737_v13 }
 0x9c9   : > { %10818 = vmatpush3.msra.mxu0 %v15713_v60  ;;  %10821 = vmatprep.mubr.msk.f32.mxu0 %vm11010_vm1, %v15485_v22 }
 0x9ca   : > { %10819 = vmatprep.subr.mxu0 %v15485_v22  ;;  %10866 = vmatprep.subr.mxu1 %v15485_v22 }
 0x9cb   : > { %10820 = vmatpush3.msra.mxu0 %v15717_v18  ;;  %10884 = vmatprep.mubr.msk.f32.mxu1 %vm11010_vm1, %v15485_v22 }
 0x9cc   : > { %10831 = vmatprep.subr.mxu0 %v15485_v22  ;;  %10822 = vmatmul.mubr.f32.vlgmr.msra.gmra.mxu0 %v8738_v58 }
 0x9cd   : > { %10832 = vmatpush3.msra.mxu0 %v8777_v27  ;;  %10835 = vmatprep.mubr.msk.f32.mxu0 %vm11010_vm1, %v15485_v22  ;;  %v15785_v27 = vsub.f32 %v9152_v6, %v15770_v39 }
 0x9ce   : > { %10833 = vmatprep.subr.mxu0 %v15485_v22 }
 0x9cf   : > { %10834 = vmatpush3.msra.mxu0 %v8783_v20  ;;  %v9230_v56 = vand.u32 4294901760, %v15785_v27 }
 0x9d0   : > { %10836 = vmatmul.mubr.f32.vlgmr.msra.gmra.mxu0 %v8737_v13  ;;  %10845 = vmatprep.subr.mxu0 %v15485_v22 }
 0x9d1   : > { %10863 = vmatprep.mubr.msk.f32.mxu0 %vm11010_vm1, %v15485_v22  ;;  %v9231_v29 = vsub.f32 %v15785_v27, %v9230_v56 }
 0xa80   : > { %v8822_v33 = vpop.f32.mrf.mxu1 }
 0xa82   : > { %v10816_v0 = vpop.f32.mrf.mxu1 }
 0xa84   : > { %v8969_v5 = vpop.f32.mrf.mxu1 }
 0xa86   : > { %v10830_v28 = vpop.f32.mrf.mxu1 }
 0xa88   : > { %v8743_v35 = vpop.f32.mrf.mxu0  ;;  %v9115_v23 = vpop.f32.mrf.mxu1 }
 0xa89   : > { %v8823_v10 = vadd.f32 %v8822_v33, %v8743_v35 }
 0xa8a   : > { %v10809_v16 = vpop.f32.mrf.mxu0  ;;  %v10844_v4 = vpop.f32.mrf.mxu1 }
 0xa8c   : > { %v8896_v43 = vpop.f32.mrf.mxu0 }
 0xa8d   : > { %v8897_v17 = vadd.f32 %v8896_v43, %v8823_v10 }
 0xa8e   : > { %v10823_v62 = vpop.f32.mrf.mxu0 }
 0xa8f   : > { %v8970_v42 = vadd.f32 %v8969_v5, %v8897_v17 }
 0xa90   : > { %v9044_v40 = vpop.f32.mrf.mxu0 }
 0xa91   : > { %v9045_v55 = vadd.f32 %v9044_v40, %v8970_v42 }
 0xa92   : > { %v10837_v57 = vpop.f32.mrf.mxu0 }
 0xa93   : > { %v15751_v2 = vadd.f32 %v9115_v23, %v9045_v55  ;;  %v9232_v23 = vand.u32 4294901760, %v9231_v29 }
 0xa95   : > { %9138 = vrot.lane.b32.xlu0 %v15751_v2, %s11019_s28  ;;  %9141 = vrot.lane.b32.xlu1 %v15751_v2, %s11016_s0  ;;  %v15819_v38 = vand.u32 4294901760, %v15751_v2 }
 0xa97   : > { %v15849_v46 = vsub.f32 %v15751_v2, %v15819_v38 }
 0xa99   : > { %9132 = vrot.lane.b32.xlu0 %v15751_v2, %s11020_s6  ;;  %9135 = vrot.lane.b32.xlu1 %v15751_v2, %s11021_s2  ;;  %v9311_v4 = vand.u32 4294901760, %v15849_v46 }
 0xa9b   : > { %v9312_v42 = vsub.f32 %v15849_v46, %v9311_v4 }
 0xa9d   : > { %9126 = vrot.lane.b32.xlu0 %v15751_v2, %s11022_s29  ;;  %9129 = vrot.lane.b32.xlu1 %v15751_v2, %s11018_s26  ;;  %v9313_v55 = vand.u32 4294901760, %v9312_v42 }
 0xaa1   : > { %9120 = vrot.lane.b32.xlu0 %v15751_v2, %s11023_s30  ;;  %9123 = vrot.lane.b32.xlu1 %v15751_v2, %s11024_s7 }
 0xaa5   : > { %9148 = vperm.xlu1 %10996, %v9145_v45  }
 0xb07   : > { %v9139_v32 = vpop.permute.xlu0 %9138  ;;  %v9142_v41 = vpop.permute.xlu1 %9141 }
 0xb08   : > { %v15772_v51 = vand.u32 4294901760, %v9139_v32  ;;  %v15774_v53 = vand.u32 4294901760, %v9142_v41 }
 0xb0a   : > { %v15777_v8 = vsub.f32 %v9139_v32, %v15772_v51  ;;  %v15780_v50 = vsub.f32 %v9142_v41, %v15774_v53  ;;  %10846 = vmatpush3.msra.mxu0 %v15774_v53 }
 0xb0b   : > { %v9133_v60 = vpop.permute.xlu0 %9132  ;;  %10847 = vmatprep.subr.mxu0 %v15485_v22  ;;  %v9136_v54 = vpop.permute.xlu1 %9135 }
 0xb0c   : > { %v9262_v18 = vand.u32 4294901760, %v15777_v8  ;;  %v9255_v48 = vand.u32 4294901760, %v15780_v50  ;;  %v15789_v20 = vand.u32 4294901760, %v9133_v60  ;;  %v15791_v52 = vand.u32 4294901760, %v9136_v54  ;;  %10848 = vmatpush3.msra.mxu0 %v15772_v51 }
 0xb0d   : > { %10849 = vmatprep.subr.mxu0 %v15485_v22 }
 0xb0e   : > { %v9263_v1 = vsub.f32 %v15777_v8, %v9262_v18  ;;  %v9256_v47 = vsub.f32 %v15780_v50, %v9255_v48  ;;  %v15802_v59 = vsub.f32 %v9133_v60, %v15789_v20  ;;  %v15805_v37 = vsub.f32 %v9136_v54, %v15791_v52  ;;  %10850 = vmatpush3.msra.mxu0 %v15791_v52 }
 0xb0f   : > { %v9127_v36 = vpop.permute.xlu0 %9126  ;;  %10851 = vmatprep.subr.mxu0 %v15485_v22  ;;  %v9130_v61 = vpop.permute.xlu1 %9129 }
 0xb10   : > { %v9257_v26 = vand.u32 4294901760, %v9256_v47  ;;  %v9276_v14 = vand.u32 4294901760, %v15802_v59  ;;  %v9269_v63 = vand.u32 4294901760, %v15805_v37  ;;  %10852 = vmatpush3.msra.mxu0 %v15789_v20  ;;  %v15813_v7 = vand.u32 4294901760, %v9127_v36 }
 0xb11   : > { %v15815_v15 = vand.u32 4294901760, %v9130_v61  ;;  %10853 = vmatprep.subr.mxu0 %v15485_v22  ;;  %v9264_v44 = vand.u32 4294901760, %v9263_v1 }
 0xb12   : > { %v9277_v21 = vsub.f32 %v15802_v59, %v9276_v14  ;;  %v9270_v34 = vsub.f32 %v15805_v37, %v9269_v63  ;;  %10867 = vmatpush3.msra.mxu1 %v9257_v26  ;;  %v15828_v31 = vsub.f32 %v9127_v36, %v15813_v7 }
 0xb13   : > { %v15831_v25 = vsub.f32 %v9130_v61, %v15815_v15  ;;  %10854 = vmatpush3.msra.mxu0 %v15815_v15  ;;  %v9121_v11 = vpop.permute.xlu0 %9120  ;;  %10868 = vmatprep.subr.mxu1 %v15485_v22  ;;  %v9124_v12 = vpop.permute.xlu1 %9123 }
 0xb14   : > { %v9271_v3 = vand.u32 4294901760, %v9270_v34  ;;  %v15835_v49 = vand.u32 4294901760, %v9121_v11  ;;  %10855 = vmatprep.subr.mxu0 %v15485_v22  ;;  %v15838_v30 = vand.u32 4294901760, %v9124_v12  ;;  %10869 = vmatpush3.msra.mxu1 %v9264_v44  ;;  %v9290_v13 = vand.u32 4294901760, %v15828_v31 }
 0xb15   : > { %v9283_v58 = vand.u32 4294901760, %v15831_v25  ;;  %10856 = vmatpush3.msra.mxu0 %v15813_v7  ;;  %10870 = vmatprep.subr.mxu1 %v15485_v22  ;;  %v9278_v9 = vand.u32 4294901760, %v9277_v21 }
 0xb16   : > { %v15852_v24 = vsub.f32 %v9121_v11, %v15835_v49  ;;  %v15855_v33 = vsub.f32 %v9124_v12, %v15838_v30  ;;  %10857 = vmatprep.subr.mxu0 %v15485_v22  ;;  %10871 = vmatpush3.msra.mxu1 %v9271_v3  ;;  %v9291_v0 = vsub.f32 %v15828_v31, %v9290_v13 }
 0xb17   : > { %v9284_v5 = vsub.f32 %v15831_v25, %v9283_v58  ;;  %10858 = vmatpush3.msra.mxu0 %v15838_v30  ;;  %10872 = vmatprep.subr.mxu1 %v15485_v22 }
 0xb18   : > { %v9304_v28 = vand.u32 4294901760, %v15852_v24  ;;  %v9297_v35 = vand.u32 4294901760, %v15855_v33  ;;  %10859 = vmatprep.subr.mxu0 %v15485_v22  ;;  %10873 = vmatpush3.msra.mxu1 %v9278_v9  ;;  %v9292_v43 = vand.u32 4294901760, %v9291_v0 }
 0xb19   : > { %v9285_v16 = vand.u32 4294901760, %v9284_v5  ;;  %10860 = vmatpush3.msra.mxu0 %v15835_v49  ;;  %10874 = vmatprep.subr.mxu1 %v15485_v22 }
 0xb1a   : > { %v9298_v10 = vsub.f32 %v15855_v33, %v9297_v35  ;;  %10861 = vmatprep.subr.mxu0 %v15485_v22  ;;  %v9305_v17 = vsub.f32 %v15852_v24, %v9304_v28 }
 0xb1b   : > { %10862 = vmatpush3.msra.mxu0 %v15819_v38  ;;  %10875 = vmatpush3.msra.mxu1 %v9285_v16 }
 0xb1c   : > { %v9299_v62 = vand.u32 4294901760, %v9298_v10  ;;  %10864 = vmatmul.mubr.f32.vlgmr.msra.gmra.mxu0 %v9232_v23  ;;  %10876 = vmatprep.subr.mxu1 %v15485_v22  ;;  %v9306_v40 = vand.u32 4294901760, %v9305_v17 }
 0xb1d   : > { %10887 = vmatprep.subr.mxu0 %v15485_v22  ;;  %10877 = vmatpush3.msra.mxu1 %v9292_v43 }
 0xb1e   : > { %10888 = vmatpush3.msra.mxu0 %v15780_v50  ;;  %10878 = vmatprep.subr.mxu1 %v15485_v22 }
 0xb1f   : > { %10889 = vmatprep.subr.mxu0 %v15485_v22  ;;  %10879 = vmatpush3.msra.mxu1 %v9299_v62 }
 0xb20   : > { %10890 = vmatpush3.msra.mxu0 %v15777_v8  ;;  %10880 = vmatprep.subr.mxu1 %v15485_v22 }
 0xb21   : > { %10891 = vmatprep.subr.mxu0 %v15485_v22  ;;  %10881 = vmatpush3.msra.mxu1 %v9306_v40 }
 0xb22   : > { %10892 = vmatpush3.msra.mxu0 %v15805_v37  ;;  %10882 = vmatprep.subr.mxu1 %v15485_v22 }
 0xb23   : > { %10893 = vmatprep.subr.mxu0 %v15485_v22  ;;  %10883 = vmatpush3.msra.mxu1 %v9313_v55 }
 0xb24   : > { %10894 = vmatpush3.msra.mxu0 %v15802_v59  ;;  %10885 = vmatmul.mubr.f32.vlgmr.msra.gmra.mxu1 %v15770_v39 }
 0xb25   : > { %10895 = vmatprep.subr.mxu0 %v15485_v22  ;;  %10908 = vmatprep.subr.mxu1 %v15485_v22 }
 0xb26   : > { %10896 = vmatpush3.msra.mxu0 %v15831_v25  ;;  %10909 = vmatpush3.msra.mxu1 %v15774_v53 }
 0xb27   : > { %10897 = vmatprep.subr.mxu0 %v15485_v22  ;;  %10910 = vmatprep.subr.mxu1 %v15485_v22 }
 0xb28   : > { %10898 = vmatpush3.msra.mxu0 %v15828_v31  ;;  %10911 = vmatpush3.msra.mxu1 %v15772_v51 }
 0xb29   : > { %10899 = vmatprep.subr.mxu0 %v15485_v22  ;;  %10912 = vmatprep.subr.mxu1 %v15485_v22 }
 0xb2a   : > { %10900 = vmatpush3.msra.mxu0 %v15855_v33  ;;  %10913 = vmatpush3.msra.mxu1 %v15791_v52 }
 0xb2b   : > { %10901 = vmatprep.subr.mxu0 %v15485_v22  ;;  %10914 = vmatprep.subr.mxu1 %v15485_v22 }
 0xb2c   : > { %10902 = vmatpush3.msra.mxu0 %v15852_v24  ;;  %10915 = vmatpush3.msra.mxu1 %v15789_v20 }
 0xb2d   : > { %10903 = vmatprep.subr.mxu0 %v15485_v22  ;;  %10916 = vmatprep.subr.mxu1 %v15485_v22 }
 0xb2e   : > { %10904 = vmatpush3.msra.mxu0 %v15849_v46  ;;  %10905 = vmatprep.mubr.msk.f32.mxu0 %vm11010_vm1, %v15485_v22 }
 0xb2f   : > { %10917 = vmatpush3.msra.mxu1 %v15815_v15  ;;  %10906 = vmatmul.mubr.f32.vlgmr.msra.gmra.mxu0 %v15785_v27 }
 0xb30   : > { %10918 = vmatprep.subr.mxu1 %v15485_v22  ;;  %10929 = vmatprep.subr.mxu0 %v15485_v22 }
 0xb31   : > { %10919 = vmatpush3.msra.mxu1 %v15813_v7  ;;  %10930 = vmatpush3.msra.mxu0 %v9255_v48 }
 0xb32   : > { %10920 = vmatprep.subr.mxu1 %v15485_v22  ;;  %10931 = vmatprep.subr.mxu0 %v15485_v22 }
 0xb33   : > { %10921 = vmatpush3.msra.mxu1 %v15838_v30  ;;  %10932 = vmatpush3.msra.mxu0 %v9262_v18 }
 0xb34   : > { %10922 = vmatprep.subr.mxu1 %v15485_v22  ;;  %10933 = vmatprep.subr.mxu0 %v15485_v22 }
 0xb35   : > { %10923 = vmatpush3.msra.mxu1 %v15835_v49  ;;  %10934 = vmatpush3.msra.mxu0 %v9269_v63 }
 0xb36   : > { %10924 = vmatprep.subr.mxu1 %v15485_v22  ;;  %10935 = vmatprep.subr.mxu0 %v15485_v22 }
 0xb37   : > { %10925 = vmatpush3.msra.mxu1 %v15819_v38  ;;  %10926 = vmatprep.mubr.msk.f32.mxu1 %vm11010_vm1, %v15485_v22 }
 0xb38   : > { %10936 = vmatpush3.msra.mxu0 %v9276_v14  ;;  %10927 = vmatmul.mubr.f32.vlgmr.msra.gmra.mxu1 %v9230_v56 }
 0xb39   : > { %10937 = vmatprep.subr.mxu0 %v15485_v22  ;;  %10950 = vmatprep.subr.mxu1 %v15485_v22 }
 0xb3a   : > { %10938 = vmatpush3.msra.mxu0 %v9283_v58  ;;  %10951 = vmatpush3.msra.mxu1 %v15774_v53  ;;  %v9149_v53 = vpop.permute.xlu1 %9148 }
 0xb3b   : > { %10939 = vmatprep.subr.mxu0 %v15485_v22  ;;  %10952 = vmatprep.subr.mxu1 %v15485_v22 }
 0xb3c   : > { %10940 = vmatpush3.msra.mxu0 %v9290_v13  ;;  %10953 = vmatpush3.msra.mxu1 %v15772_v51 }
 0xb3d   : > { %10941 = vmatprep.subr.mxu0 %v15485_v22  ;;  %10954 = vmatprep.subr.mxu1 %v15485_v22 }
 0xb3e   : > { %10942 = vmatpush3.msra.mxu0 %v9297_v35  ;;  %10955 = vmatpush3.msra.mxu1 %v15791_v52  ;;  %v17417_v52 = vld [vmem:[#allocation2_spill] sm:$0xff] }
 0xb3f   : > { %10943 = vmatprep.subr.mxu0 %v15485_v22  ;;  %10956 = vmatprep.subr.mxu1 %v15485_v22 }
 0xb40   : > { %10944 = vmatpush3.msra.mxu0 %v9304_v28  ;;  %10957 = vmatpush3.msra.mxu1 %v15789_v20 }
 0xb41   : > { %10945 = vmatprep.subr.mxu0 %v15485_v22  ;;  %10958 = vmatprep.subr.mxu1 %v15485_v22 }
 0xb42   : > { %10946 = vmatpush3.msra.mxu0 %v9311_v4  ;;  %10947 = vmatprep.mubr.msk.f32.mxu0 %vm11010_vm1, %v15485_v22 }
 0xb43   : > { %10959 = vmatpush3.msra.mxu1 %v15815_v15  ;;  %10948 = vmatmul.mubr.f32.vlgmr.msra.gmra.mxu0 %v15770_v39 }
 0xb44   : > { %10960 = vmatprep.subr.mxu1 %v15485_v22  ;;  %10968 = vmatprep.mubr.msk.f32.mxu1 %vm11010_vm1, %v15485_v22 }
 0xb45   : > { %10961 = vmatpush3.msra.mxu1 %v15813_v7 }
 0xb46   : > { %10962 = vmatprep.subr.mxu1 %v15485_v22 }
 0xb47   : > { %10963 = vmatpush3.msra.mxu1 %v15838_v30 }
 0xb48   : > { %10964 = vmatprep.subr.mxu1 %v15485_v22 }
 0xb49   : > { %10965 = vmatpush3.msra.mxu1 %v15835_v49 }
 0xb4a   : > { %10966 = vmatprep.subr.mxu1 %v15485_v22 }
 0xb4b   : > { %10967 = vmatpush3.msra.mxu1 %v15819_v38 }
 0xb4c   : > { %10969 = vmatmul.mubr.f32.vlgmr.msra.gmra.mxu1 %v15770_v39 }
 0xbdc   : > { %v9234_v57 = vpop.f32.mrf.mxu0 }
 0xbdd   : > { %v9235_v8 = vadd.f32 %v9234_v57, %v9149_v53 }
 0xbde   : > { %v10865_v2 = vpop.f32.mrf.mxu0 }
 0xbe4   : > { %v9350_v45 = vpop.f32.mrf.mxu1 }
 0xbe5   : > { %v9351_v60 = vadd.f32 %v9350_v45, %v9235_v8 }
 0xbe6   : > { %v10886_v19 = vpop.f32.mrf.mxu1 }
 0xbef   : > { %v9440_v6 = vpop.f32.mrf.mxu0 }
 0xbf0   : > { %v9441_v27 = vadd.f32 %v9440_v6, %v9351_v60 }
 0xbf1   : > { %v10907_v32 = vpop.f32.mrf.mxu0 }
 0xbf8   : > { %v9522_v41 = vpop.f32.mrf.mxu1 }
 0xbf9   : > { %v9523_v22 = vadd.f32 %v9522_v41, %v9441_v27 }
 0xbfa   : > { %v10928_v51 = vpop.f32.mrf.mxu1 }
 0xc03   : > { %v9620_v50 = vpop.f32.mrf.mxu0 }
 0xc04   : > { %v9621_v18 = vadd.f32 %v9620_v50, %v9523_v22 }
 0xc05   : > { %v10949_v54 = vpop.f32.mrf.mxu0 }
 0xc0c   : > { %v9700_v48 = vpop.f32.mrf.mxu1 }
 0xc0d   : > { %v9701_v20 = vadd.f32 %v9700_v48, %v9621_v18 }
 0xc0e   : > { %v10970_v39 = vpop.f32.mrf.mxu1 }
 0xc0f   : > { %v9704_v1 = vadd.f32 %v9701_v20, %v17417_v52 }
 0xc11   : > { %9720 = vst.msk [vmem:[%s11185_s1 + $0x38] sm:$0xff] %vm1769_vm4, %v9704_v1 }
 0xc12 PF: > { %s34_s5 = sadd.s32 1, %s11007_s5  }
 0xc13   : > { %p31_p4 = scmp.ge.s32.totalorder %s34_s5, 4  }
 0xc15   :  { %33 = sbr.rel (!%p31_p4) target bundleno = 10 (0xa), region = 155 }

</bundles_post_ra>
